<compile_context>
chip_gen: v7x
topology: tpu7x:2x2x1
jax: 0.10.0
libtpu: 0.0.40
codegen_flags: <defaults>
</compile_context>

<pallas_src>
import functools

import jax
import jax.numpy as jnp
from jax.experimental import pallas as pl
from jax.experimental.pallas import tpu as pltpu


def _round_up(x, m):
    return ((x + m - 1) // m) * m


def _full_spec(shape):
    nd = len(shape)
    return pl.BlockSpec(shape, lambda i: (0,) * nd)


# ----------------------------------------------------------------------------
# Pallas kernel: full RowDecoder forward step.
# ----------------------------------------------------------------------------
def row_decoder_kernel(
    # ---- VMEM inputs (BlockSpec-loaded) -----------------------------------
    tokh_ref,        # (B, K)      [input_token | hidden_state], bf16
    h_ref,           # (B, H)      hidden_state, f32
    c_ref,           # (B, H)      cell_state, f32
    enc_ref,         # (B*HW, F)   encoded image, features last, bf16
    whT_ref,         # (H, H)      W_h^T, bf16
    bh_ref,          # (1, H)      f32
    wfT_ref,         # (F, H)      W_F^T, bf16
    bf_ref,          # (1, H)      f32
    bg_ref,          # (1, 4H)     b_ih + b_hh, f32
    bout_ref,        # (1, Opad)   zero-padded, f32
    # ---- HBM inputs (manual DMA, overlapped with the attention phase) -----
    w_tokh_hbm,      # (K, 4H)     [W_ih_tok ; W_hh]^T fused, bf16
    w_ctx_hbm,       # (F, 4H)     W_ih_ctx^T, bf16
    woutT_hbm,       # (H, Opad)   W_out^T zero-padded, bf16
    # ---- outputs -----------------------------------------------------------
    probs_ref,       # (B, Opad)
    h_out_ref,       # (B, H)
    c_out_ref,       # (B, H)
    logits_ref,      # (B, Opad)
    # ---- scratch -----------------------------------------------------------
    w_tokh_buf,      # VMEM (K, 4H)  bf16
    w_ctx_buf,       # VMEM (F, 4H)  bf16
    wout_buf,        # VMEM (H, Opad) bf16
    dma_sems,        # DMA semaphores (3,)
    *,
    num_classes,     # true number of classes O (static)
):
    # Kick off the gate / output-head weight DMAs immediately: they are only
    # needed after the attention phase, so their HBM traffic is hidden behind
    # the f_t matmul + tanh + softmax + context reduction.
    cp_tokh = pltpu.make_async_copy(w_tokh_hbm, w_tokh_buf, dma_sems.at[0])
    cp_ctx = pltpu.make_async_copy(w_ctx_hbm, w_ctx_buf, dma_sems.at[1])
    cp_out = pltpu.make_async_copy(woutT_hbm, wout_buf, dma_sems.at[2])
    cp_tokh.start()
    cp_ctx.start()
    cp_out.start()

    h = h_ref[...]                                   # (B, H) f32
    c = c_ref[...]                                   # (B, H) f32
    enc = enc_ref[...]                               # (B*HW, F) bf16
    B, hidden = h.shape
    BHW, F = enc.shape
    HW = BHW // B

    # h_t_transformed = W_h(hidden_state)
    h_t = jnp.dot(h.astype(jnp.bfloat16), whT_ref[...],
                  preferred_element_type=jnp.float32) + bh_ref[...]       # (B, H)

    # W_F F'_{u,v} for every position via a single flat (B*HW, F) matmul.
    f_t = jnp.dot(enc, wfT_ref[...], preferred_element_type=jnp.float32)  # (B*HW, H)
    f_t = f_t.reshape(B, HW, hidden) + bf_ref[...][None]                  # (B, HW, H)

    # score_i = tanh(h_t + W_F F'_i), stacked over positions.
    scores = jnp.tanh(h_t[:, None, :] + f_t)                              # (B, HW, H)

    # attention = softmax(mean over hidden / 0.1, over positions)
    # (mean and /0.1 folded into one scale; approx reciprocal -> EUP slot).
    s = jnp.sum(scores, axis=-1) * (1.0 / (hidden * 0.1))                 # (B, HW)
    m = jnp.max(s, axis=1, keepdims=True)
    e = jnp.exp(s - m)
    attn = e * pl.reciprocal(jnp.sum(e, axis=1, keepdims=True), approx=True)

    # context vector = sum_i attn_i * F'_i ; bf16 enc upcasts per-vreg in the
    # multiply, no explicit f32 copy is materialized.
    ctx = jnp.sum(attn[:, :, None] * enc.reshape(B, HW, F), axis=1)       # (B, F) f32

    # LSTMCell gates on cat([input_token, context]):
    #   [tok|h] @ [W_ih_tok ; W_hh]  +  ctx @ W_ih_ctx  +  (b_ih + b_hh)
    cp_tokh.wait()
    cp_ctx.wait()
    gates = (
        jnp.dot(tokh_ref[...], w_tokh_buf[...], preferred_element_type=jnp.float32)
        + jnp.dot(ctx.astype(jnp.bfloat16), w_ctx_buf[...],
                  preferred_element_type=jnp.float32)
        + bg_ref[...]
    )                                                                     # (B, 4H)
    i_g = jax.nn.sigmoid(gates[:, 0 * hidden:1 * hidden])
    f_g = jax.nn.sigmoid(gates[:, 1 * hidden:2 * hidden])
    g_g = jnp.tanh(gates[:, 2 * hidden:3 * hidden])
    o_g = jax.nn.sigmoid(gates[:, 3 * hidden:4 * hidden])
    c_new = f_g * c + i_g * g_g
    h_new = o_g * jnp.tanh(c_new)

    # Output head (lane-dense padded O) + softmax masked to the real classes.
    cp_out.wait()
    logits = jnp.dot(h_new.astype(jnp.bfloat16), wout_buf[...],
                     preferred_element_type=jnp.float32) + bout_ref[...]  # (B, Opad)
    opad = logits.shape[-1]
    col = jax.lax.broadcasted_iota(jnp.int32, (1, opad), 1)
    ml = jnp.where(col < num_classes, logits, -1e30)   # padded cols -> exp -> 0
    lm = jnp.max(ml, axis=1, keepdims=True)
    le = jnp.exp(ml - lm)
    # Exact divide for the class softmax so probability rows sum to 1 to f32
    # accuracy (the approx reciprocal is only used for the attention softmax).
    probs = le / jnp.sum(le, axis=1, keepdims=True)

    probs_ref[...] = probs
    h_out_ref[...] = h_new
    c_out_ref[...] = c_new
    logits_ref[...] = logits


# ----------------------------------------------------------------------------
# One-time weight packing (model-load time, NOT per step).
# ----------------------------------------------------------------------------
def pack_row_decoder_params(params, embedding_dim):
    E = embedding_dim
    O = params["b_out"].shape[-1]
    Opad = _round_up(O, 128)
    w_ih = params["w_ih"]                               # (4H, E + F)
    # Fuse the token and hidden gate matmuls: operand [tok | h] against
    # [W_ih_tok ; W_hh]^T, no K padding (true K = E + H is a multiple of 8).
    w_tokh = jnp.concatenate([w_ih[:, :E].T, params["w_hh"].T], axis=0)   # (E+H, 4H)
    packed = dict(
        whT=params["w_h"].T.astype(jnp.bfloat16),                         # (H, H)
        bh=params["b_h"][None, :].astype(jnp.float32),                    # (1, H)
        wfT=params["w_f"].T.astype(jnp.bfloat16),                         # (F, H)
        bf=params["b_f"][None, :].astype(jnp.float32),                    # (1, H)
        w_tokh=w_tokh.astype(jnp.bfloat16),                               # (E+H, 4H)
        w_ctx=w_ih[:, E:].T.astype(jnp.bfloat16),                         # (F, 4H)
        bg=(params["b_ih"] + params["b_hh"])[None, :].astype(jnp.float32),
        woutT=jnp.pad(params["w_out"].T,
                      ((0, 0), (0, Opad - O))).astype(jnp.bfloat16),      # (H, Opad)
        bout=jnp.pad(params["b_out"], (0, Opad - O))[None, :].astype(jnp.float32),
    )
    return packed, O


# ----------------------------------------------------------------------------
# Per-step wrapper: activation plumbing + pallas_call.
# ----------------------------------------------------------------------------
@functools.partial(jax.jit, static_argnames=("num_classes",))
def row_decoder_forward(input_token, hidden_state, cell_state, encoded_image,
                        packed, num_classes):
    B, F, Hh, Ww = encoded_image.shape
    HW = Hh * Ww
    Hd = hidden_state.shape[-1]
    O = num_classes
    Opad = packed["bout"].shape[-1]
    K = input_token.shape[-1] + Hd

    # NCHW -> (B*HW, F), position order i = h*W + w (same as torch reshape).
    enc = jnp.transpose(encoded_image.reshape(B, F, HW), (0, 2, 1))
    enc_flat = enc.reshape(B * HW, F).astype(jnp.bfloat16)

    # Fused [token | hidden] operand for the gate matmul (true K, no padding).
    tokh = jnp.concatenate([input_token, hidden_state], axis=-1).astype(jnp.bfloat16)

    vmem_args = (tokh, hidden_state, cell_state, enc_flat,
                 packed["whT"], packed["bh"], packed["wfT"], packed["bf"],
                 packed["bg"], packed["bout"])
    hbm_args = (packed["w_tokh"], packed["w_ctx"], packed["woutT"])

    out_shapes = (
        jax.ShapeDtypeStruct((B, Opad), jnp.float32),   # output_probs (padded)
        jax.ShapeDtypeStruct((B, Hd), jnp.float32),     # hidden_state
        jax.ShapeDtypeStruct((B, Hd), jnp.float32),     # cell_state
        jax.ShapeDtypeStruct((B, Opad), jnp.float32),   # logits (padded)
    )

    in_specs = ([_full_spec(a.shape) for a in vmem_args]
                + [pl.BlockSpec(memory_space=pl.ANY) for _ in hbm_args])

    scratch_shapes = [
        pltpu.VMEM((K, 4 * Hd), jnp.bfloat16),          # w_tokh buffer
        pltpu.VMEM((F, 4 * Hd), jnp.bfloat16),          # w_ctx buffer
        pltpu.VMEM((Hd, Opad), jnp.bfloat16),           # w_out buffer
        pltpu.SemaphoreType.DMA((3,)),
    ]

    probs_p, h_new, c_new, logits_p = pl.pallas_call(
        functools.partial(row_decoder_kernel, num_classes=O),
        out_shape=out_shapes,
        grid=(1,),
        in_specs=in_specs,
        out_specs=tuple(_full_spec(s.shape) for s in out_shapes),
        scratch_shapes=scratch_shapes,
        compiler_params=pltpu.CompilerParams(
            dimension_semantics=("arbitrary",),
            # ~2.4 MiB double-buffered VMEM inputs + ~4.5 MiB manual-DMA
            # scratch + ~1.5 MiB intermediates; 24 MiB leaves ample headroom
            # on every generation (v7x physical VMEM is 64 MiB).
            vmem_limit_bytes=24 * 1024 * 1024,
        ),
    )(*vmem_args, *hbm_args)

    return probs_p[:, :O], h_new, c_new, logits_p[:, :O]


# ----------------------------------------------------------------------------
# Pure-JAX reference (mirrors the PyTorch forward exactly, all f32)
# ----------------------------------------------------------------------------
def row_decoder_reference(input_token, hidden_state, cell_state, encoded_image, params):
    B, F, Hh, Ww = encoded_image.shape
    Hd = hidden_state.shape[-1]
    enc_flat = encoded_image.reshape(B, F, Hh * Ww)                 # (B, F, HW)
    h_t = hidden_state @ params["w_h"].T + params["b_h"]
    f_t = jnp.einsum("bfi,hf->bih", enc_flat, params["w_f"]) + params["b_f"]
    scores = jnp.tanh(h_t[:, None, :] + f_t)                        # (B, HW, H)
    attn = jax.nn.softmax(scores.mean(-1) / 0.1, axis=1)            # (B, HW)
    ctx = jnp.sum(attn[:, :, None] * jnp.transpose(enc_flat, (0, 2, 1)), axis=1)
    lstm_in = jnp.concatenate([input_token, ctx], axis=-1)
    gates = (lstm_in @ params["w_ih"].T + params["b_ih"]
             + hidden_state @ params["w_hh"].T + params["b_hh"])
    i_g = jax.nn.sigmoid(gates[:, 0 * Hd:1 * Hd])
    f_g = jax.nn.sigmoid(gates[:, 1 * Hd:2 * Hd])
    g_g = jnp.tanh(gates[:, 2 * Hd:3 * Hd])
    o_g = jax.nn.sigmoid(gates[:, 3 * Hd:4 * Hd])
    c_new = f_g * cell_state + i_g * g_g
    h_new = o_g * jnp.tanh(c_new)
    logits = h_new @ params["w_out"].T + params["b_out"]
    probs = jax.nn.softmax(logits, axis=1)
    return probs, h_new, c_new, logits


# ----------------------------------------------------------------------------
# Deterministic parameter init (PyTorch-style uniform(-1/sqrt(fan_in), ..))
# ----------------------------------------------------------------------------
def init_params(key, hidden_size, output_size, embedding_dim, feature_size=512):
    def lin(k, out_f, in_f):
        bound = 1.0 / jnp.sqrt(in_f)
        kw, kb = jax.random.split(k)
        w = jax.random.uniform(kw, (out_f, in_f), jnp.float32, -bound, bound)
        b = jax.random.uniform(kb, (out_f,), jnp.float32, -bound, bound)
        return w, b

    ks = jax.random.split(key, 6)
    w_h, b_h = lin(ks[0], hidden_size, hidden_size)
    w_f, b_f = lin(ks[1], hidden_size, feature_size)
    lstm_in = embedding_dim + hidden_size    # forward feeds emb + 512 == emb + hidden
    w_ih, b_ih = lin(ks[2], 4 * hidden_size, lstm_in)
    w_hh, b_hh = lin(ks[3], 4 * hidden_size, hidden_size)
    w_out, b_out = lin(ks[4], output_size, hidden_size)
    return dict(w_h=w_h, b_h=b_h, w_f=w_f, b_f=b_f,
                w_ih=w_ih, b_ih=b_ih, w_hh=w_hh, b_hh=b_hh,
                w_out=w_out, b_out=b_out)


if __name__ == "__main__":
    # Shapes implied by the forward pass: feature_size must be 512 (W_F is
    # Linear(512, H)) and hidden_size must equal 512 so that the LSTMCell
    # input (embedding_dim + 512 == embedding_dim + hidden_size) matches.
    B, E, Hd, O = 8, 32, 512, 64
    Hh = Ww = 4
    F = 512

    key = jax.random.PRNGKey(0)
    k_tok, k_h, k_c, k_img, k_par = jax.random.split(key, 5)
    input_token = jax.random.normal(k_tok, (B, E), jnp.float32)
    hidden_state = jax.random.normal(k_h, (B, Hd), jnp.float32)
    cell_state = jax.random.normal(k_c, (B, Hd), jnp.float32)
    encoded_image = jax.random.normal(k_img, (B, F, Hh, Ww), jnp.float32)
    params = init_params(k_par, Hd, O, E, F)

    # Weight packing runs once (model-load time), outside the per-step jit.
    packed, num_classes = pack_row_decoder_params(params, E)

    outs = row_decoder_forward(input_token, hidden_state, cell_state,
                               encoded_image, packed, num_classes=num_classes)
    outs = jax.block_until_ready(outs)
    refs = row_decoder_reference(input_token, hidden_state, cell_state,
                                 encoded_image, params)

    # Tolerance rationale: weights / encoder features are intentionally bf16
    # (halves the HBM weight traffic of this memory-bound op) while the
    # reference is pure f32.  Expected error: RMS ~1e-3..1e-2, max-abs up to a
    # few 1e-2 through the /0.1 attention temperature and the LSTM cell update.
    # Real bugs (wrong transpose, gate order, missing bias) produce O(0.3-1).
    names = ("output_probs", "hidden_state", "cell_state", "logits")
    for name, o, r in zip(names, outs, refs):
        assert o.shape == r.shape and o.dtype == r.dtype, name
        max_err = float(jnp.max(jnp.abs(o - r)))
        rms_err = float(jnp.sqrt(jnp.mean((o - r) ** 2)))
        assert max_err < 7.5e-2, (name, max_err)
        assert rms_err < 1.5e-2, (name, rms_err)
    # Class softmax uses an exact divide, so rows sum to 1 to f32 accuracy.
    row_sum_err = float(jnp.max(jnp.abs(jnp.sum(outs[0], axis=1) - 1.0)))
    assert row_sum_err < 1e-3, row_sum_err

    print("KERNEL_OK")
</pallas_src>

<mosaic_0001>
module attributes {stable_mosaic.version = 11 : i64} {
  func.func @row_decoder_kernel(%arg0: i32, %arg1: memref<8x544xbf16, #tpu.memory_space<vmem>>, %arg2: memref<8x512xf32, #tpu.memory_space<vmem>>, %arg3: memref<8x512xf32, #tpu.memory_space<vmem>>, %arg4: memref<128x512xbf16, #tpu.memory_space<vmem>>, %arg5: memref<512x512xbf16, #tpu.memory_space<vmem>>, %arg6: memref<1x512xf32, #tpu.memory_space<vmem>>, %arg7: memref<512x512xbf16, #tpu.memory_space<vmem>>, %arg8: memref<1x512xf32, #tpu.memory_space<vmem>>, %arg9: memref<1x2048xf32, #tpu.memory_space<vmem>>, %arg10: memref<1x128xf32, #tpu.memory_space<vmem>>, %arg11: memref<544x2048xbf16, #tpu.memory_space<any>>, %arg12: memref<512x2048xbf16, #tpu.memory_space<any>>, %arg13: memref<512x128xbf16, #tpu.memory_space<any>>, %arg14: memref<8x128xf32, #tpu.memory_space<vmem>>, %arg15: memref<8x512xf32, #tpu.memory_space<vmem>>, %arg16: memref<8x512xf32, #tpu.memory_space<vmem>>, %arg17: memref<8x128xf32, #tpu.memory_space<vmem>>, %arg18: memref<544x2048xbf16, #tpu.memory_space<vmem>>, %arg19: memref<512x2048xbf16, #tpu.memory_space<vmem>>, %arg20: memref<512x128xbf16, #tpu.memory_space<vmem>>, %arg21: memref<3x!tpu.dma_semaphore, #tpu.memory_space<semaphore_mem>>) attributes {dimension_semantics = [#tpu.dimension_semantics<arbitrary>], iteration_bounds = array<i64: 1>, scalar_prefetch = 0 : i64, scratch_operands = 4 : i64, tpu.core_type = #tpu.core_type<tc>, window_params = [{pipeline_mode = #tpu.pipeline_mode<synchronous>, transform_indices = @transform_0, window_bounds = array<i64: 8, 544>}, {pipeline_mode = #tpu.pipeline_mode<synchronous>, transform_indices = @transform_1, window_bounds = array<i64: 8, 512>}, {pipeline_mode = #tpu.pipeline_mode<synchronous>, transform_indices = @transform_2, window_bounds = array<i64: 8, 512>}, {pipeline_mode = #tpu.pipeline_mode<synchronous>, transform_indices = @transform_3, window_bounds = array<i64: 128, 512>}, {pipeline_mode = #tpu.pipeline_mode<synchronous>, transform_indices = @transform_4, window_bounds = array<i64: 512, 512>}, {pipeline_mode = #tpu.pipeline_mode<synchronous>, transform_indices = @transform_5, window_bounds = array<i64: 1, 512>}, {pipeline_mode = #tpu.pipeline_mode<synchronous>, transform_indices = @transform_6, window_bounds = array<i64: 512, 512>}, {pipeline_mode = #tpu.pipeline_mode<synchronous>, transform_indices = @transform_7, window_bounds = array<i64: 1, 512>}, {pipeline_mode = #tpu.pipeline_mode<synchronous>, transform_indices = @transform_8, window_bounds = array<i64: 1, 2048>}, {pipeline_mode = #tpu.pipeline_mode<synchronous>, transform_indices = @transform_9, window_bounds = array<i64: 1, 128>}, {}, {}, {}, {pipeline_mode = #tpu.pipeline_mode<synchronous>, transform_indices = @transform_13, window_bounds = array<i64: 8, 128>}, {pipeline_mode = #tpu.pipeline_mode<synchronous>, transform_indices = @transform_14, window_bounds = array<i64: 8, 512>}, {pipeline_mode = #tpu.pipeline_mode<synchronous>, transform_indices = @transform_15, window_bounds = array<i64: 8, 512>}, {pipeline_mode = #tpu.pipeline_mode<synchronous>, transform_indices = @transform_16, window_bounds = array<i64: 8, 128>}]} {
    %c0_i32 = arith.constant 0 : i32
    %0 = tpu.memref_slice %arg21[%c0_i32] : memref<3x!tpu.dma_semaphore, #tpu.memory_space<semaphore_mem>> -> memref<1x!tpu.dma_semaphore, #tpu.memory_space<semaphore_mem>>
    %1 = tpu.memref_squeeze %0 : memref<1x!tpu.dma_semaphore, #tpu.memory_space<semaphore_mem>> -> memref<!tpu.dma_semaphore, #tpu.memory_space<semaphore_mem>>
    tpu.enqueue_dma source(%arg11 : memref<544x2048xbf16, #tpu.memory_space<any>>) target(%arg18 : memref<544x2048xbf16, #tpu.memory_space<vmem>>) target_semaphore(%1 : memref<!tpu.dma_semaphore, #tpu.memory_space<semaphore_mem>>)
    %c1_i32 = arith.constant 1 : i32
    %2 = tpu.memref_slice %arg21[%c1_i32] : memref<3x!tpu.dma_semaphore, #tpu.memory_space<semaphore_mem>> -> memref<1x!tpu.dma_semaphore, #tpu.memory_space<semaphore_mem>>
    %3 = tpu.memref_squeeze %2 : memref<1x!tpu.dma_semaphore, #tpu.memory_space<semaphore_mem>> -> memref<!tpu.dma_semaphore, #tpu.memory_space<semaphore_mem>>
    tpu.enqueue_dma source(%arg12 : memref<512x2048xbf16, #tpu.memory_space<any>>) target(%arg19 : memref<512x2048xbf16, #tpu.memory_space<vmem>>) target_semaphore(%3 : memref<!tpu.dma_semaphore, #tpu.memory_space<semaphore_mem>>)
    %c2_i32 = arith.constant 2 : i32
    %4 = tpu.memref_slice %arg21[%c2_i32] : memref<3x!tpu.dma_semaphore, #tpu.memory_space<semaphore_mem>> -> memref<1x!tpu.dma_semaphore, #tpu.memory_space<semaphore_mem>>
    %5 = tpu.memref_squeeze %4 : memref<1x!tpu.dma_semaphore, #tpu.memory_space<semaphore_mem>> -> memref<!tpu.dma_semaphore, #tpu.memory_space<semaphore_mem>>
    tpu.enqueue_dma source(%arg13 : memref<512x128xbf16, #tpu.memory_space<any>>) target(%arg20 : memref<512x128xbf16, #tpu.memory_space<vmem>>) target_semaphore(%5 : memref<!tpu.dma_semaphore, #tpu.memory_space<semaphore_mem>>)
    %c0 = arith.constant 0 : index
    %c0_0 = arith.constant 0 : index
    %6 = vector.load %arg2[%c0, %c0_0] : memref<8x512xf32, #tpu.memory_space<vmem>>, vector<8x512xf32>
    %c0_1 = arith.constant 0 : index
    %c0_2 = arith.constant 0 : index
    %7 = vector.load %arg3[%c0_1, %c0_2] : memref<8x512xf32, #tpu.memory_space<vmem>>, vector<8x512xf32>
    %c0_3 = arith.constant 0 : index
    %c0_4 = arith.constant 0 : index
    %8 = vector.load %arg4[%c0_3, %c0_4] : memref<128x512xbf16, #tpu.memory_space<vmem>>, vector<128x512xbf16>
    %9 = arith.truncf %6 : vector<8x512xf32> to vector<8x512xbf16>
    %c0_5 = arith.constant 0 : index
    %c0_6 = arith.constant 0 : index
    %10 = vector.load %arg5[%c0_5, %c0_6] : memref<512x512xbf16, #tpu.memory_space<vmem>>, vector<512x512xbf16>
    %cst = arith.constant dense<0.000000e+00> : vector<8x512xf32>
    %11 = tpu.matmul %9, %10, %cst {dimension_numbers = #tpu.dot_dimension_numbers<[1], [0], [0], [1], [0, 0, 1, 1], [], []>} : vector<8x512xbf16>, vector<512x512xbf16>, vector<8x512xf32> -> vector<8x512xf32>
    %c0_7 = arith.constant 0 : index
    %c0_8 = arith.constant 0 : index
    %12 = vector.load %arg6[%c0_7, %c0_8] : memref<1x512xf32, #tpu.memory_space<vmem>>, vector<1x512xf32>
    %13 = vector.broadcast %12 : vector<1x512xf32> to vector<8x512xf32>
    %14 = arith.addf %11, %13 : vector<8x512xf32>
    %c0_9 = arith.constant 0 : index
    %c0_10 = arith.constant 0 : index
    %15 = vector.load %arg7[%c0_9, %c0_10] : memref<512x512xbf16, #tpu.memory_space<vmem>>, vector<512x512xbf16>
    %cst_11 = arith.constant dense<0.000000e+00> : vector<128x512xf32>
    %16 = tpu.matmul %8, %15, %cst_11 {dimension_numbers = #tpu.dot_dimension_numbers<[1], [0], [0], [1], [0, 0, 1, 1], [], []>} : vector<128x512xbf16>, vector<512x512xbf16>, vector<128x512xf32> -> vector<128x512xf32>
    %17 = vector.shape_cast %16 : vector<128x512xf32> to vector<8x16x512xf32>
    %c0_12 = arith.constant 0 : index
    %c0_13 = arith.constant 0 : index
    %18 = vector.load %arg8[%c0_12, %c0_13] : memref<1x512xf32, #tpu.memory_space<vmem>>, vector<1x512xf32>
    %19 = vector.shape_cast %18 : vector<1x512xf32> to vector<1x1x512xf32>
    %20 = vector.broadcast %19 : vector<1x1x512xf32> to vector<8x16x512xf32>
    %21 = arith.addf %17, %20 : vector<8x16x512xf32>
    %22 = vector.shape_cast %14 : vector<8x512xf32> to vector<8x1x512xf32>
    %23 = vector.broadcast %22 : vector<8x1x512xf32> to vector<8x16x512xf32>
    %24 = arith.addf %23, %21 : vector<8x16x512xf32>
    %25 = math.tanh %24 : vector<8x16x512xf32>
    %cst_14 = arith.constant dense<0.000000e+00> : vector<8x16xf32>
    %26 = vector.multi_reduction <add>, %25, %cst_14 [2] : vector<8x16x512xf32> to vector<8x16xf32>
    %cst_15 = arith.constant 0.01953125 : f32
    %27 = vector.broadcast %cst_15 : f32 to vector<8x16xf32>
    %28 = arith.mulf %26, %27 : vector<8x16xf32>
    %cst_16 = arith.constant dense<0xFF800000> : vector<8xf32>
    %29 = vector.multi_reduction <maximumf>, %28, %cst_16 [1] : vector<8x16xf32> to vector<8xf32>
    %30 = vector.shape_cast %29 : vector<8xf32> to vector<8x1xf32>
    %31 = vector.broadcast %30 : vector<8x1xf32> to vector<8x16xf32>
    %32 = arith.subf %28, %31 : vector<8x16xf32>
    %33 = math.exp %32 : vector<8x16xf32>
    %cst_17 = arith.constant dense<0.000000e+00> : vector<8xf32>
    %34 = vector.multi_reduction <add>, %33, %cst_17 [1] : vector<8x16xf32> to vector<8xf32>
    %35 = vector.shape_cast %34 : vector<8xf32> to vector<8x1xf32>
    %36 = tpu.reciprocal %35 {approx = true} : vector<8x1xf32> -> vector<8x1xf32>
    %37 = vector.broadcast %36 : vector<8x1xf32> to vector<8x16xf32>
    %38 = arith.mulf %33, %37 : vector<8x16xf32>
    %39 = vector.shape_cast %38 : vector<8x16xf32> to vector<8x16x1xf32>
    %40 = vector.shape_cast %8 : vector<128x512xbf16> to vector<8x16x512xbf16>
    %41 = arith.extf %40 : vector<8x16x512xbf16> to vector<8x16x512xf32>
    %42 = vector.broadcast %39 : vector<8x16x1xf32> to vector<8x16x512xf32>
    %43 = arith.mulf %42, %41 : vector<8x16x512xf32>
    %cst_18 = arith.constant dense<0.000000e+00> : vector<8x512xf32>
    %44 = vector.multi_reduction <add>, %43, %cst_18 [1] : vector<8x16x512xf32> to vector<8x512xf32>
    %c0_i32_19 = arith.constant 0 : i32
    %45 = tpu.memref_slice %arg21[%c0_i32_19] : memref<3x!tpu.dma_semaphore, #tpu.memory_space<semaphore_mem>> -> memref<1x!tpu.dma_semaphore, #tpu.memory_space<semaphore_mem>>
    %46 = tpu.memref_squeeze %45 : memref<1x!tpu.dma_semaphore, #tpu.memory_space<semaphore_mem>> -> memref<!tpu.dma_semaphore, #tpu.memory_space<semaphore_mem>>
    tpu.wait_dma2 semaphore(%46 : memref<!tpu.dma_semaphore, #tpu.memory_space<semaphore_mem>>) src(%arg11 : memref<544x2048xbf16, #tpu.memory_space<any>>) dst(%arg18 : memref<544x2048xbf16, #tpu.memory_space<vmem>>)
    %c1_i32_20 = arith.constant 1 : i32
    %47 = tpu.memref_slice %arg21[%c1_i32_20] : memref<3x!tpu.dma_semaphore, #tpu.memory_space<semaphore_mem>> -> memref<1x!tpu.dma_semaphore, #tpu.memory_space<semaphore_mem>>
    %48 = tpu.memref_squeeze %47 : memref<1x!tpu.dma_semaphore, #tpu.memory_space<semaphore_mem>> -> memref<!tpu.dma_semaphore, #tpu.memory_space<semaphore_mem>>
    tpu.wait_dma2 semaphore(%48 : memref<!tpu.dma_semaphore, #tpu.memory_space<semaphore_mem>>) src(%arg12 : memref<512x2048xbf16, #tpu.memory_space<any>>) dst(%arg19 : memref<512x2048xbf16, #tpu.memory_space<vmem>>)
    %c0_21 = arith.constant 0 : index
    %c0_22 = arith.constant 0 : index
    %49 = vector.load %arg1[%c0_21, %c0_22] : memref<8x544xbf16, #tpu.memory_space<vmem>>, vector<8x544xbf16>
    %c0_23 = arith.constant 0 : index
    %c0_24 = arith.constant 0 : index
    %50 = vector.load %arg18[%c0_23, %c0_24] : memref<544x2048xbf16, #tpu.memory_space<vmem>>, vector<544x2048xbf16>
    %cst_25 = arith.constant dense<0.000000e+00> : vector<8x2048xf32>
    %51 = tpu.matmul %49, %50, %cst_25 {dimension_numbers = #tpu.dot_dimension_numbers<[1], [0], [0], [1], [0, 0, 1, 1], [], []>} : vector<8x544xbf16>, vector<544x2048xbf16>, vector<8x2048xf32> -> vector<8x2048xf32>
    %52 = arith.truncf %44 : vector<8x512xf32> to vector<8x512xbf16>
    %c0_26 = arith.constant 0 : index
    %c0_27 = arith.constant 0 : index
    %53 = vector.load %arg19[%c0_26, %c0_27] : memref<512x2048xbf16, #tpu.memory_space<vmem>>, vector<512x2048xbf16>
    %cst_28 = arith.constant dense<0.000000e+00> : vector<8x2048xf32>
    %54 = tpu.matmul %52, %53, %cst_28 {dimension_numbers = #tpu.dot_dimension_numbers<[1], [0], [0], [1], [0, 0, 1, 1], [], []>} : vector<8x512xbf16>, vector<512x2048xbf16>, vector<8x2048xf32> -> vector<8x2048xf32>
    %55 = arith.addf %51, %54 : vector<8x2048xf32>
    %c0_29 = arith.constant 0 : index
    %c0_30 = arith.constant 0 : index
    %56 = vector.load %arg9[%c0_29, %c0_30] : memref<1x2048xf32, #tpu.memory_space<vmem>>, vector<1x2048xf32>
    %57 = vector.broadcast %56 : vector<1x2048xf32> to vector<8x2048xf32>
    %58 = arith.addf %55, %57 : vector<8x2048xf32>
    %59 = vector.extract_strided_slice %58 {offsets = [0, 0], sizes = [8, 512], strides = [1, 1]} : vector<8x2048xf32> to vector<8x512xf32>
    %60 = arith.negf %59 : vector<8x512xf32>
    %61 = math.exp %60 : vector<8x512xf32>
    %cst_31 = arith.constant 1.000000e+00 : f32
    %62 = vector.broadcast %cst_31 : f32 to vector<8x512xf32>
    %63 = arith.addf %62, %61 : vector<8x512xf32>
    %64 = arith.divf %62, %63 : vector<8x512xf32>
    %65 = vector.extract_strided_slice %58 {offsets = [0, 512], sizes = [8, 512], strides = [1, 1]} : vector<8x2048xf32> to vector<8x512xf32>
    %66 = arith.negf %65 : vector<8x512xf32>
    %67 = math.exp %66 : vector<8x512xf32>
    %cst_32 = arith.constant 1.000000e+00 : f32
    %68 = vector.broadcast %cst_32 : f32 to vector<8x512xf32>
    %69 = arith.addf %68, %67 : vector<8x512xf32>
    %70 = arith.divf %68, %69 : vector<8x512xf32>
    %71 = vector.extract_strided_slice %58 {offsets = [0, 1024], sizes = [8, 512], strides = [1, 1]} : vector<8x2048xf32> to vector<8x512xf32>
    %72 = math.tanh %71 : vector<8x512xf32>
    %73 = vector.extract_strided_slice %58 {offsets = [0, 1536], sizes = [8, 512], strides = [1, 1]} : vector<8x2048xf32> to vector<8x512xf32>
    %74 = arith.negf %73 : vector<8x512xf32>
    %75 = math.exp %74 : vector<8x512xf32>
    %cst_33 = arith.constant 1.000000e+00 : f32
    %76 = vector.broadcast %cst_33 : f32 to vector<8x512xf32>
    %77 = arith.addf %76, %75 : vector<8x512xf32>
    %78 = arith.divf %76, %77 : vector<8x512xf32>
    %79 = arith.mulf %70, %7 : vector<8x512xf32>
    %80 = arith.mulf %64, %72 : vector<8x512xf32>
    %81 = arith.addf %79, %80 : vector<8x512xf32>
    %82 = math.tanh %81 : vector<8x512xf32>
    %83 = arith.mulf %78, %82 : vector<8x512xf32>
    %c2_i32_34 = arith.constant 2 : i32
    %84 = tpu.memref_slice %arg21[%c2_i32_34] : memref<3x!tpu.dma_semaphore, #tpu.memory_space<semaphore_mem>> -> memref<1x!tpu.dma_semaphore, #tpu.memory_space<semaphore_mem>>
    %85 = tpu.memref_squeeze %84 : memref<1x!tpu.dma_semaphore, #tpu.memory_space<semaphore_mem>> -> memref<!tpu.dma_semaphore, #tpu.memory_space<semaphore_mem>>
    tpu.wait_dma2 semaphore(%85 : memref<!tpu.dma_semaphore, #tpu.memory_space<semaphore_mem>>) src(%arg13 : memref<512x128xbf16, #tpu.memory_space<any>>) dst(%arg20 : memref<512x128xbf16, #tpu.memory_space<vmem>>)
    %86 = arith.truncf %83 : vector<8x512xf32> to vector<8x512xbf16>
    %c0_35 = arith.constant 0 : index
    %c0_36 = arith.constant 0 : index
    %87 = vector.load %arg20[%c0_35, %c0_36] : memref<512x128xbf16, #tpu.memory_space<vmem>>, vector<512x128xbf16>
    %cst_37 = arith.constant dense<0.000000e+00> : vector<8x128xf32>
    %88 = tpu.matmul %86, %87, %cst_37 {dimension_numbers = #tpu.dot_dimension_numbers<[1], [0], [0], [1], [0, 0, 1, 1], [], []>} : vector<8x512xbf16>, vector<512x128xbf16>, vector<8x128xf32> -> vector<8x128xf32>
    %c0_38 = arith.constant 0 : index
    %c0_39 = arith.constant 0 : index
    %89 = vector.load %arg10[%c0_38, %c0_39] : memref<1x128xf32, #tpu.memory_space<vmem>>, vector<1x128xf32>
    %90 = vector.broadcast %89 : vector<1x128xf32> to vector<8x128xf32>
    %91 = arith.addf %88, %90 : vector<8x128xf32>
    %92 = tpu.iota {dimensions = array<i32: 1>} : vector<1x128xi32>
    %c64_i32 = arith.constant 64 : i32
    %93 = vector.broadcast %c64_i32 : i32 to vector<1x128xi32>
    %94 = arith.cmpi slt, %92, %93 : vector<1x128xi32>
    %cst_40 = arith.constant -1.000000e+30 : f32
    %95 = vector.shape_cast %94 : vector<1x128xi1> to vector<1x128xi1>
    %96 = vector.broadcast %95 : vector<1x128xi1> to vector<8x128xi1>
    %97 = vector.broadcast %cst_40 : f32 to vector<8x128xf32>
    %98 = arith.select %96, %91, %97 : vector<8x128xi1>, vector<8x128xf32>
    %cst_41 = arith.constant dense<0xFF800000> : vector<8xf32>
    %99 = vector.multi_reduction <maximumf>, %98, %cst_41 [1] : vector<8x128xf32> to vector<8xf32>
    %100 = vector.shape_cast %99 : vector<8xf32> to vector<8x1xf32>
    %101 = vector.broadcast %100 : vector<8x1xf32> to vector<8x128xf32>
    %102 = arith.subf %98, %101 : vector<8x128xf32>
    %103 = math.exp %102 : vector<8x128xf32>
    %cst_42 = arith.constant dense<0.000000e+00> : vector<8xf32>
    %104 = vector.multi_reduction <add>, %103, %cst_42 [1] : vector<8x128xf32> to vector<8xf32>
    %105 = vector.shape_cast %104 : vector<8xf32> to vector<8x1xf32>
    %106 = vector.broadcast %105 : vector<8x1xf32> to vector<8x128xf32>
    %107 = arith.divf %103, %106 : vector<8x128xf32>
    %c0_43 = arith.constant 0 : index
    %c0_44 = arith.constant 0 : index
    %108 = vector.load %arg14[%c0_43, %c0_44] : memref<8x128xf32, #tpu.memory_space<vmem>>, vector<8x128xf32>
    tpu.vector_store %arg14[%c0_43, %c0_44], %107 {strides = array<i32>} : memref<8x128xf32, #tpu.memory_space<vmem>>, vector<8x128xf32>,
    %c0_45 = arith.constant 0 : index
    %c0_46 = arith.constant 0 : index
    %109 = vector.load %arg15[%c0_45, %c0_46] : memref<8x512xf32, #tpu.memory_space<vmem>>, vector<8x512xf32>
    tpu.vector_store %arg15[%c0_45, %c0_46], %83 {strides = array<i32>} : memref<8x512xf32, #tpu.memory_space<vmem>>, vector<8x512xf32>,
    %c0_47 = arith.constant 0 : index
    %c0_48 = arith.constant 0 : index
    %110 = vector.load %arg16[%c0_47, %c0_48] : memref<8x512xf32, #tpu.memory_space<vmem>>, vector<8x512xf32>
    tpu.vector_store %arg16[%c0_47, %c0_48], %81 {strides = array<i32>} : memref<8x512xf32, #tpu.memory_space<vmem>>, vector<8x512xf32>,
    %c0_49 = arith.constant 0 : index
    %c0_50 = arith.constant 0 : index
    %111 = vector.load %arg17[%c0_49, %c0_50] : memref<8x128xf32, #tpu.memory_space<vmem>>, vector<8x128xf32>
    tpu.vector_store %arg17[%c0_49, %c0_50], %91 {strides = array<i32>} : memref<8x128xf32, #tpu.memory_space<vmem>>, vector<8x128xf32>,
    return
  }
  func.func @transform_0(%arg0: i32) -> (i32, i32) {
    %c0_i32 = arith.constant 0 : i32
    %c0_i32_0 = arith.constant 0 : i32
    %c0_i32_1 = arith.constant 0 : i32
    return %c0_i32, %c0_i32_0 : i32, i32
  }
  func.func @transform_1(%arg0: i32) -> (i32, i32) {
    %c0_i32 = arith.constant 0 : i32
    %c0_i32_0 = arith.constant 0 : i32
    %c0_i32_1 = arith.constant 0 : i32
    return %c0_i32, %c0_i32_0 : i32, i32
  }
  func.func @transform_2(%arg0: i32) -> (i32, i32) {
    %c0_i32 = arith.constant 0 : i32
    %c0_i32_0 = arith.constant 0 : i32
    %c0_i32_1 = arith.constant 0 : i32
    return %c0_i32, %c0_i32_0 : i32, i32
  }
  func.func @transform_3(%arg0: i32) -> (i32, i32) {
    %c0_i32 = arith.constant 0 : i32
    %c0_i32_0 = arith.constant 0 : i32
    %c0_i32_1 = arith.constant 0 : i32
    return %c0_i32, %c0_i32_0 : i32, i32
  }
  func.func @transform_4(%arg0: i32) -> (i32, i32) {
    %c0_i32 = arith.constant 0 : i32
    %c0_i32_0 = arith.constant 0 : i32
    %c0_i32_1 = arith.constant 0 : i32
    return %c0_i32, %c0_i32_0 : i32, i32
  }
  func.func @transform_5(%arg0: i32) -> (i32, i32) {
    %c0_i32 = arith.constant 0 : i32
    %c0_i32_0 = arith.constant 0 : i32
    %c0_i32_1 = arith.constant 0 : i32
    return %c0_i32, %c0_i32_0 : i32, i32
  }
  func.func @transform_6(%arg0: i32) -> (i32, i32) {
    %c0_i32 = arith.constant 0 : i32
    %c0_i32_0 = arith.constant 0 : i32
    %c0_i32_1 = arith.constant 0 : i32
    return %c0_i32, %c0_i32_0 : i32, i32
  }
  func.func @transform_7(%arg0: i32) -> (i32, i32) {
    %c0_i32 = arith.constant 0 : i32
    %c0_i32_0 = arith.constant 0 : i32
    %c0_i32_1 = arith.constant 0 : i32
    return %c0_i32, %c0_i32_0 : i32, i32
  }
  func.func @transform_8(%arg0: i32) -> (i32, i32) {
    %c0_i32 = arith.constant 0 : i32
    %c0_i32_0 = arith.constant 0 : i32
    %c0_i32_1 = arith.constant 0 : i32
    return %c0_i32, %c0_i32_0 : i32, i32
  }
  func.func @transform_9(%arg0: i32) -> (i32, i32) {
    %c0_i32 = arith.constant 0 : i32
    %c0_i32_0 = arith.constant 0 : i32
    %c0_i32_1 = arith.constant 0 : i32
    return %c0_i32, %c0_i32_0 : i32, i32
  }
  func.func @transform_13(%arg0: i32) -> (i32, i32) {
    %c0_i32 = arith.constant 0 : i32
    %c0_i32_0 = arith.constant 0 : i32
    %c0_i32_1 = arith.constant 0 : i32
    return %c0_i32, %c0_i32_0 : i32, i32
  }
  func.func @transform_14(%arg0: i32) -> (i32, i32) {
    %c0_i32 = arith.constant 0 : i32
    %c0_i32_0 = arith.constant 0 : i32
    %c0_i32_1 = arith.constant 0 : i32
    return %c0_i32, %c0_i32_0 : i32, i32
  }
  func.func @transform_15(%arg0: i32) -> (i32, i32) {
    %c0_i32 = arith.constant 0 : i32
    %c0_i32_0 = arith.constant 0 : i32
    %c0_i32_1 = arith.constant 0 : i32
    return %c0_i32, %c0_i32_0 : i32, i32
  }
  func.func @transform_16(%arg0: i32) -> (i32, i32) {
    %c0_i32 = arith.constant 0 : i32
    %c0_i32_0 = arith.constant 0 : i32
    %c0_i32_1 = arith.constant 0 : i32
    return %c0_i32, %c0_i32_0 : i32, i32
  }
}

</mosaic_0001>

<bundles_post_ra>
// kernel: row_decoder_forward.1
= control target key start
LH: loop header
LB: loop body
LE: loop exit
PB: predicated region body
PF: predicated region fallthrough
CT: control target
= control target key end

     0   :  { %s10387_s0 = inlined_call_operand.vmem [shape: bf16[8,544], index: 0, kind: input, shape index: {}]   ;;  %s10388_s1 = inlined_call_operand.hbm [shape: f32[8,512], index: 1, kind: input, shape index: {}]   ;;  %s10389_s2 = inlined_call_operand.hbm [shape: f32[8,512], index: 2, kind: input, shape index: {}]   ;;  %s10390_s3 = inlined_call_operand.vmem [shape: bf16[128,512], index: 3, kind: input, shape index: {}]   ;;  %s10391_s4 = inlined_call_operand.hbm [shape: bf16[512,512], index: 4, kind: input, shape index: {}]   ;;  %s10392_s5 = inlined_call_operand.hbm [shape: f32[1,512], index: 5, kind: input, shape index: {}]   ;;  %s10393_s6 = inlined_call_operand.hbm [shape: bf16[512,512], index: 6, kind: input, shape index: {}]   ;;  %s10394_s7 = inlined_call_operand.hbm [shape: f32[1,512], index: 7, kind: input, shape index: {}]   ;;  %s10395_s8 = inlined_call_operand.hbm [shape: f32[1,2048], index: 8, kind: input, shape index: {}]   ;;  %s10396_s9 = inlined_call_operand.hbm [shape: f32[1,128], index: 9, kind: input, shape index: {}]   ;;  %s10397_s10 = inlined_call_operand.hbm [shape: bf16[544,2048], index: 10, kind: input, shape index: {}]   ;;  %s10398_s11 = inlined_call_operand.hbm [shape: bf16[512,2048], index: 11, kind: input, shape index: {}]   ;;  %s10399_s12 = inlined_call_operand.hbm [shape: bf16[512,128], index: 12, kind: input, shape index: {}]   ;;  %s10400_s13 = inlined_call_operand.hbm [shape: f32[8,128], index: 13, kind: output, shape index: {0}]   ;;  %s10401_s14 = inlined_call_operand.hbm [shape: f32[8,512], index: 14, kind: output, shape index: {1}]   ;;  %s10402_s15 = inlined_call_operand.hbm [shape: f32[8,512], index: 15, kind: output, shape index: {2}]   ;;  %s10403_s16 = inlined_call_operand.hbm [shape: f32[8,128], index: 16, kind: output, shape index: {3}]  }
   0x1   :  { %10424 = sst [smem:[#allocation59_spill]] %s10387_s0 }
   0x2   :  { %22 = vsyncpa [#allocation7], 0 }
   0x3   :  { %23 = vsyncpa [#allocation10], 0 }
   0x4   :  { %24 = vsyncpa [#allocation13], 0 }
   0x5   :  { %25 = vsyncpa [#allocation16], 0 }
   0x6   :  { %26 = vsyncpa [#allocation19], 0 }
   0x7   :  { %27 = vsyncpa [#allocation8], 0 }
   0x8   :  { %28 = vsyncpa [#allocation22], 0 }
   0x9   :  { %29 = vsyncpa [#allocation25], 0  ;;  %s8731_s21 = smov [#allocation9]   ;;  %s8732_s23 = smov [#allocation12]  }
   0xa   :  { %s48_s22 = sshll.u32 %s8731_s21, 4  ;;  %s72_s24 = sshll.u32 %s8732_s23, 4  ;;  %s49_s22 = int_to_ptr.vmem [resolvable:$true] %s48_s22  ;;  %s73_s24 = int_to_ptr.vmem [resolvable:$true] %s72_s24 }
   0xb   :  { %s8423_s27 = scalar_lea.hbm %s10389_s2, 512 }
   0xc   :  { %p8424_p0 = scmp.ne.s32.totalorder %s10389_s2, %s8423_s27  ;;  %p8427_p1 = scmp.lt.u32.totalorder %s8423_s27, %s10389_s2 }
   0xe   :  { %p8429_p2 = pnand %p8427_p1, %p8424_p0 }
  0x10   :  { %8432 = shalt.err (!%p8429_p2)
}
  0x11   :  { %s8433_s17 = scalar_lea.vmem %s49_s22, 512  ;;  %p8438_p4 = scmp.lt.s32.totalorder %s49_s22, %s49_s22 }
  0x12   :  { %p8434_p3 = scmp.ne.s32.totalorder %s49_s22, %s8433_s17  ;;  %p8439_p5 = scmp.lt.s32.totalorder %s8433_s17, %s8433_s17 }
  0x14   :  { %p8440_p6 = por %p8439_p5, %p8438_p4 }
  0x16   :  { %p8441_p7 = pnand %p8440_p6, %p8434_p3 }
  0x18   :  { %8444 = shalt.err (!%p8441_p7)
}
  0x19   :  { %51 = dma.hbm_to_vmem [thread:$0]  %s10389_s2, 512, %s49_s22, [#allocation10]  }
  0x1a   :  { %s8445_s23 = scalar_lea.hbm %s10392_s5, 64 }
  0x1b   :  { %p8446_p8 = scmp.ne.s32.totalorder %s10392_s5, %s8445_s23  ;;  %p8449_p9 = scmp.lt.u32.totalorder %s8445_s23, %s10392_s5 }
  0x1d   :  { %p8451_p10 = pnand %p8449_p9, %p8446_p8 }
  0x1f   :  { %8454 = shalt.err (!%p8451_p10)
}
  0x20   :  { %s8455_s29 = scalar_lea.vmem %s73_s24, 64  ;;  %p8460_p12 = scmp.lt.s32.totalorder %s73_s24, %s73_s24 }
  0x21   :  { %p8456_p11 = scmp.ne.s32.totalorder %s73_s24, %s8455_s29  ;;  %p8461_p13 = scmp.lt.s32.totalorder %s8455_s29, %s8455_s29 }
  0x23   :  { %p8462_p0 = por %p8461_p13, %p8460_p12 }
  0x25   :  { %p8463_p1 = pnand %p8462_p0, %p8456_p11 }
  0x27   :  { %8466 = shalt.err (!%p8463_p1)
}
  0x28   :  { %75 = dma.hbm_to_vmem [thread:$0]  %s10392_s5, 64, %s73_s24, [#allocation13]  }
  0x29   :  { %s8733_s30 = smov [#allocation15]   ;;  %s8734_s17 = smov [#allocation6]  }
  0x2a   :  { %s94_s0 = sshll.u32 %s8733_s30, 4  ;;  %s38_s18 = sshll.u32 %s8734_s17, 4  ;;  %s95_s0 = int_to_ptr.vmem [resolvable:$true] %s94_s0  ;;  %s39_s18 = int_to_ptr.vmem [resolvable:$true] %s38_s18 }
  0x2b   :  { %s8467_s21 = scalar_lea.hbm %s10394_s7, 64 }
  0x2c   :  { %p8468_p2 = scmp.ne.s32.totalorder %s10394_s7, %s8467_s21  ;;  %p8471_p3 = scmp.lt.u32.totalorder %s8467_s21, %s10394_s7 }
  0x2e   :  { %p8473_p4 = pnand %p8471_p3, %p8468_p2 }
  0x30   :  { %8476 = shalt.err (!%p8473_p4)
}
  0x31   :  { %s8477_s5 = scalar_lea.vmem %s95_s0, 64  ;;  %p8482_p6 = scmp.lt.s32.totalorder %s95_s0, %s95_s0 }
  0x32   :  { %p8478_p5 = scmp.ne.s32.totalorder %s95_s0, %s8477_s5  ;;  %p8483_p7 = scmp.lt.s32.totalorder %s8477_s5, %s8477_s5 }
  0x34   :  { %p8484_p8 = por %p8483_p7, %p8482_p6 }
  0x36   :  { %p8485_p9 = pnand %p8484_p8, %p8478_p5 }
  0x38   :  { %8488 = shalt.err (!%p8485_p9)
}
  0x39   :  { %97 = dma.hbm_to_vmem [thread:$0]  %s10394_s7, 64, %s95_s0, [#allocation16]  }
  0x3a   :  { %s8489_s22 = scalar_lea.hbm %s10388_s1, 512 }
  0x3b   :  { %p8490_p10 = scmp.ne.s32.totalorder %s10388_s1, %s8489_s22  ;;  %p8493_p11 = scmp.lt.u32.totalorder %s8489_s22, %s10388_s1 }
  0x3d   :  { %p8495_p12 = pnand %p8493_p11, %p8490_p10 }
  0x3f   :  { %8498 = shalt.err (!%p8495_p12)
}
  0x40   :  { %s8499_s21 = scalar_lea.vmem %s39_s18, 512  ;;  %p8504_p0 = scmp.lt.s32.totalorder %s39_s18, %s39_s18 }
  0x41   :  { %p8500_p13 = scmp.ne.s32.totalorder %s39_s18, %s8499_s21  ;;  %p8505_p1 = scmp.lt.s32.totalorder %s8499_s21, %s8499_s21 }
  0x43   :  { %p8506_p2 = por %p8505_p1, %p8504_p0 }
  0x45   :  { %p8507_p3 = pnand %p8506_p2, %p8500_p13 }
  0x47   :  { %8510 = shalt.err (!%p8507_p3)
}
  0x48   :  { %41 = dma.hbm_to_vmem [thread:$0]  %s10388_s1, 512, %s39_s18, [#allocation7]  }
  0x49   :  { %s8735_s23 = smov [#allocation11]   ;;  %s8511_s5 = scalar_lea.hbm %s10391_s4, 16384 }
  0x4a   :  { %s59_s25 = sshll.u32 %s8735_s23, 4  ;;  %p8512_p4 = scmp.ne.s32.totalorder %s10391_s4, %s8511_s5  ;;  %s60_s25 = int_to_ptr.vmem [resolvable:$true] %s59_s25 }
  0x4b   :  { %p8515_p5 = scmp.lt.u32.totalorder %s8511_s5, %s10391_s4 }
  0x4d   :  { %p8517_p6 = pnand %p8515_p5, %p8512_p4 }
  0x4f   :  { %8520 = shalt.err (!%p8517_p6)
}
  0x50   :  { %s8521_s22 = scalar_lea.vmem %s60_s25, 16384  ;;  %p8526_p8 = scmp.lt.s32.totalorder %s60_s25, %s60_s25 }
  0x51   :  { %p8522_p7 = scmp.ne.s32.totalorder %s60_s25, %s8521_s22  ;;  %p8527_p9 = scmp.lt.s32.totalorder %s8521_s22, %s8521_s22 }
  0x53   :  { %p8528_p10 = por %p8527_p9, %p8526_p8 }
  0x55   :  { %p8529_p11 = pnand %p8528_p10, %p8522_p7 }
  0x57   :  { %8532 = shalt.err (!%p8529_p11)
}
  0x58   :  { %s8736_s1 = smov 256   ;;  %s8737_s18 = smov 16  }
  0x59   :  { %65 = dma.hbm_to_vmem [thread:$0]  %s10391_s4, 16384, %s60_s25, [#allocation10], %s8736_s1, %s8736_s1, %s8737_s18  }
  0x5a   :  { %s8738_s19 = smov [#allocation14]   ;;  %s8739_s21 = smov [#allocation17]  }
  0x5b   :  { %s81_s20 = sshll.u32 %s8738_s19, 4  ;;  %s104_s7 = sshll.u32 %s8739_s21, 4  ;;  %s82_s20 = int_to_ptr.vmem [resolvable:$true] %s81_s20  ;;  %s105_s7 = int_to_ptr.vmem [resolvable:$true] %s104_s7 }
  0x5c   :  { %s8533_s26 = scalar_lea.hbm %s10393_s6, 16384 }
  0x5d   :  { %p8534_p12 = scmp.ne.s32.totalorder %s10393_s6, %s8533_s26  ;;  %p8537_p13 = scmp.lt.u32.totalorder %s8533_s26, %s10393_s6 }
  0x5f   :  { %p8539_p0 = pnand %p8537_p13, %p8534_p12 }
  0x61   :  { %8542 = shalt.err (!%p8539_p0)
}
  0x62   :  { %s8543_s4 = scalar_lea.vmem %s82_s20, 16384  ;;  %p8548_p2 = scmp.lt.s32.totalorder %s82_s20, %s82_s20 }
  0x63   :  { %p8544_p1 = scmp.ne.s32.totalorder %s82_s20, %s8543_s4  ;;  %p8549_p3 = scmp.lt.s32.totalorder %s8543_s4, %s8543_s4 }
  0x65   :  { %p8550_p4 = por %p8549_p3, %p8548_p2 }
  0x67   :  { %p8551_p5 = pnand %p8550_p4, %p8544_p1 }
  0x69   :  { %8554 = shalt.err (!%p8551_p5)
}
  0x6a   :  { %87 = dma.hbm_to_vmem [thread:$0]  %s10393_s6, 16384, %s82_s20, [#allocation13], %s8736_s1, %s8736_s1, %s8737_s18  }
  0x6b   :  { %s8555_s30 = scalar_lea.hbm %s10395_s8, 256 }
  0x6c   :  { %p8556_p6 = scmp.ne.s32.totalorder %s10395_s8, %s8555_s30  ;;  %p8559_p7 = scmp.lt.u32.totalorder %s8555_s30, %s10395_s8 }
  0x6e   :  { %p8561_p8 = pnand %p8559_p7, %p8556_p6 }
  0x70   :  { %8564 = shalt.err (!%p8561_p8)
}
  0x71   :  { %s8565_s23 = scalar_lea.vmem %s105_s7, 256  ;;  %p8570_p10 = scmp.lt.s32.totalorder %s105_s7, %s105_s7 }
  0x72   :  { %p8566_p9 = scmp.ne.s32.totalorder %s105_s7, %s8565_s23  ;;  %p8571_p11 = scmp.lt.s32.totalorder %s8565_s23, %s8565_s23 }
  0x74   :  { %p8572_p12 = por %p8571_p11, %p8570_p10 }
  0x76   :  { %p8573_p13 = pnand %p8572_p12, %p8566_p9 }
  0x78   :  { %8576 = shalt.err (!%p8573_p13)
}
  0x79   :  { %107 = dma.hbm_to_vmem [thread:$0]  %s10395_s8, 256, %s105_s7, [#allocation16]  }
  0x7a   :  { %s8740_s20 = smov [#allocation18]   ;;  %s8577_s24 = scalar_lea.hbm %s10396_s9, 16 }
  0x7b   :  { %s114_s26 = sshll.u32 %s8740_s20, 4  ;;  %p8578_p0 = scmp.ne.s32.totalorder %s10396_s9, %s8577_s24  ;;  %s115_s26 = int_to_ptr.vmem [resolvable:$true] %s114_s26 }
  0x7c   :  { %p8581_p1 = scmp.lt.u32.totalorder %s8577_s24, %s10396_s9 }
  0x7e   :  { %p8583_p2 = pnand %p8581_p1, %p8578_p0 }
  0x80   :  { %8586 = shalt.err (!%p8583_p2)
}
  0x81   :  { %s8587_s2 = scalar_lea.vmem %s115_s26, 16  ;;  %s8591_s8 = scalar_lea.vmem %s115_s26, 32 }
  0x82   :  { %p8588_p3 = scmp.ne.s32.totalorder %s115_s26, %s8587_s2  ;;  %p8592_p4 = scmp.lt.s32.totalorder %s115_s26, %s115_s26 }
  0x83   :  { %p8593_p5 = scmp.lt.s32.totalorder %s8591_s8, %s8587_s2 }
  0x85   :  { %p8594_p6 = por %p8593_p5, %p8592_p4 }
  0x87   :  { %p8595_p7 = pnand %p8594_p6, %p8588_p3 }
  0x89   :  { %8598 = shalt.err (!%p8595_p7)
}
  0x8a   :  { %117 = dma.hbm_to_vmem [thread:$0]  %s10396_s9, 16, %s115_s26, [#allocation19]  }
  0x8b   :  { %8709 = dma.done.wait [#allocation7], 512  }
  0x8c   :  { %8710 = vsyncadd [#allocation7], 4294966784 }
  0x8d   :  { %8711 = dma.done.wait [#allocation10], 16896  }
  0x8e   :  { %8712 = vsyncadd [#allocation10], 4294950400 }
  0x8f   :  { %8713 = dma.done.wait [#allocation13], 16448  }
  0x90   :  { %8714 = vsyncadd [#allocation13], 4294950848 }
  0x91   :  { %8715 = dma.done.wait [#allocation16], 320  }
  0x92   :  { %8716 = vsyncadd [#allocation16], 4294966976 }
  0x93   :  { %8717 = dma.done.wait [#allocation19], 16  }
  0x94   :  { %8718 = vsyncadd [#allocation19], 4294967280  ;;  %s147_s30 = sld [smem:[#allocation0]]   ;;  %163 = sst [smem:[#allocation27 + $0x2]] %s8737_s18  ;;  %vm3172_vm0 = vcmask 130112   ;;  %vm3237_vm1 = vcmask 1041409  }
  0x95   :  { %s8741_s17 = smov [#allocation2]   ;;  %s8742_s21 = smov 2048   ;;  %vm3239_vm2 = vcmask 1042434   ;;  %vm3241_vm3 = vcmask 1043459   ;;  %vm3243_vm4 = vcmask 1044484   ;;  %vm3245_vm5 = vcmask 1045509  }
  0x96   :  { %s155_s19 = sshll.u32 %s8741_s17, 4  ;;  %159 = sst [smem:[#allocation27]] %s8742_s21  ;;  %vm3247_vm6 = vcmask 1046534   ;;  %vm3249_vm7 = vcmask 1047559   ;;  %vm3252_vm8 = vcmask 130048   ;;  %s156_s19 = int_to_ptr.vmem [resolvable:$true] %s155_s19 }
  0x97   :  { %161 = sst [smem:[#allocation27 + $0x1]] %s8742_s21  ;;  %s8743_s9 = smov 64  }
  0x98   :  { %165 = sst [smem:[#allocation27 + $0x3]] %s8743_s9  ;;  %s8744_s0 = smov 128  }
  0x99   :  { %167 = sst [smem:[#allocation27 + $0x4]] %s8744_s0  ;;  %s8745_s6 = smov 2  }
  0x9a   :  { %s7267_s23 = sshll.u32 %s147_s30, 26  ;;  %169 = sst [smem:[#allocation27 + $0x5]] %s8745_s6 }
  0x9b   :  { %s7268_s1 = sadd.s32 134217728, %s7267_s23  ;;  %s8746_s20 = smov 1024  }
  0x9c   :  { %171 = sst [smem:[#allocation27 + $0x6]] %s8746_s20  ;;  %s8747_s26 = smov 4  }
  0x9d   :  { %173 = sst [smem:[#allocation27 + $0x7]] %s8743_s9  ;;  %s8748_s27 = smov [#allocation5]  }
  0x9e   :  { %175 = sst [smem:[#allocation27 + $0x8]] %s8747_s26  ;;  %s8749_s5 = smov [#allocation26]  }
  0x9f   :  { %177 = dma.general %s10397_s10, 69632, %s156_s19, %s8748_s27, %s8749_s5, [#allocation27], %s7268_s1, 0  }
  0xa0   :  { %194 = sst [smem:[#allocation29]] %s8742_s21  ;;  %s8750_s4 = smov [#allocation3]  }
  0xa1   :  { %196 = sst [smem:[#allocation29 + $0x1]] %s8742_s21  ;;  %s190_s25 = sshll.u32 %s8750_s4, 4  ;;  %s191_s25 = int_to_ptr.vmem [resolvable:$true] %s190_s25 }
  0xa2   :  { %198 = sst [smem:[#allocation29 + $0x2]] %s8737_s18  ;;  %s8751_s29 = smov [#allocation5 + $0x1]  }
  0xa3   :  { %200 = sst [smem:[#allocation29 + $0x3]] %s8743_s9  ;;  %s8752_s2 = smov [#allocation28]  }
  0xa4   :  { %202 = sst [smem:[#allocation29 + $0x4]] %s8744_s0  ;;  %s8599_s28 = scalar_lea.hbm %s10399_s12, 4096 }
  0xa5   :  { %204 = sst [smem:[#allocation29 + $0x5]] %s8745_s6  ;;  %p8600_p8 = scmp.ne.s32.totalorder %s10399_s12, %s8599_s28 }
  0xa6   :  { %206 = sst [smem:[#allocation29 + $0x6]] %s8746_s20  ;;  %p8603_p9 = scmp.lt.u32.totalorder %s8599_s28, %s10399_s12 }
  0xa7   :  { %208 = sst [smem:[#allocation29 + $0x7]] %s8743_s9 }
  0xa8   :  { %210 = sst [smem:[#allocation29 + $0x8]] %s8747_s26  ;;  %s8755_s26 = smov [#allocation4]  }
  0xa9   :  { %212 = dma.general %s10398_s11, 65536, %s191_s25, %s8751_s29, %s8752_s2, [#allocation29], %s7268_s1, 0  }
  0xaa   :  { %v8951_v0 = vld [vmem:[#allocation9] sm:$0xff]  ;;  %v8953_v1 = vld [vmem:[#allocation9 + $0x8] sm:$0xff]  ;;  %v8955_v2 = vld [vmem:[#allocation9 + $0x10] sm:$0xff]  ;;  %s221_s27 = sshll.u32 %s8755_s26, 4  ;;  %p8605_p10 = pnand %p8603_p9, %p8600_p8  ;;  %s222_s27 = int_to_ptr.vmem [resolvable:$true] %s221_s27 }
  0xab   :  { %10425 = vst [vmem:[#allocation45_spill] sm:$0xff] %v8951_v0  ;;  %10426 = vst [vmem:[#allocation46_spill] sm:$0xff] %v8953_v1  ;;  %v8957_v3 = vld [vmem:[#allocation9 + $0x18] sm:$0xff]  ;;  %v7739_v4 = vld [vmem:[#allocation11 + $0x4] ss:$16 sps:$4 sm:$0xff]  }
  0xac   :  { %10427 = vst [vmem:[#allocation47_spill] sm:$0xff] %v8955_v2  ;;  %10428 = vst [vmem:[#allocation48_spill] sm:$0xff] %v8957_v3  ;;  %v7741_v5 = vld [vmem:[#allocation11 + $0xc] ss:$16 sps:$4 sm:$0xff]   ;;  %v7743_v6 = vld [vmem:[#allocation11] ss:$16 sps:$4 sm:$0xff]   ;;  %1059 = vmatprep.subr.bf16.mxu0 %v7739_v4 }
  0xad   :  { %v7744_v7 = vld [vmem:[#allocation11 + $0x8] ss:$16 sps:$4 sm:$0xff]   ;;  %v7745_v8 = vld [vmem:[#allocation11 + $0x24] ss:$16 sps:$4 sm:$0xff]   ;;  %1141 = vmatprep.subr.bf16.mxu1 %v7741_v5  ;;  %1060 = vmatpush1.bf16.msra.mxu0 %v7743_v6  ;;  %v7747_v9 = vld [vmem:[#allocation11 + $0x2c] ss:$16 sps:$4 sm:$0xff]  }
  0xae   :  { %1142 = vmatpush1.bf16.msra.mxu1 %v7744_v7  ;;  %1061 = vmatprep.subr.bf16.mxu0 %v7745_v8  ;;  %v7749_v10 = vld [vmem:[#allocation11 + $0x20] ss:$16 sps:$4 sm:$0xff]   ;;  %v7750_v11 = vld [vmem:[#allocation11 + $0x28] ss:$16 sps:$4 sm:$0xff]   ;;  %v7751_v12 = vld [vmem:[#allocation11 + $0x44] ss:$16 sps:$4 sm:$0xff]  }
  0xaf   :  { %1143 = vmatprep.subr.bf16.mxu1 %v7747_v9  ;;  %v7753_v13 = vld [vmem:[#allocation11 + $0x4c] ss:$16 sps:$4 sm:$0xff]   ;;  %v7755_v14 = vld [vmem:[#allocation11 + $0x40] ss:$16 sps:$4 sm:$0xff]   ;;  %v7756_v15 = vld [vmem:[#allocation11 + $0x48] ss:$16 sps:$4 sm:$0xff]  }
  0xb0   :  { %v7757_v16 = vld [vmem:[#allocation11 + $0x64] ss:$16 sps:$4 sm:$0xff]   ;;  %v7759_v17 = vld [vmem:[#allocation11 + $0x6c] ss:$16 sps:$4 sm:$0xff]   ;;  %v7761_v18 = vld [vmem:[#allocation11 + $0x60] ss:$16 sps:$4 sm:$0xff]  }
  0xb1   :  { %1062 = vmatpush1.bf16.msra.mxu0 %v7749_v10  ;;  %v7762_v19 = vld [vmem:[#allocation11 + $0x68] ss:$16 sps:$4 sm:$0xff]   ;;  %v7763_v20 = vld [vmem:[#allocation11 + $0x84] ss:$16 sps:$4 sm:$0xff]   ;;  %v7765_v21 = vld [vmem:[#allocation11 + $0x8c] ss:$16 sps:$4 sm:$0xff]  }
  0xb2   :  { %1144 = vmatpush1.bf16.msra.mxu1 %v7750_v11  ;;  %1063 = vmatprep.subr.bf16.mxu0 %v7751_v12  ;;  %v7767_v22 = vld [vmem:[#allocation11 + $0x80] ss:$16 sps:$4 sm:$0xff]   ;;  %v7768_v23 = vld [vmem:[#allocation11 + $0x88] ss:$16 sps:$4 sm:$0xff]   ;;  %v7769_v24 = vld [vmem:[#allocation11 + $0xa4] ss:$16 sps:$4 sm:$0xff]  }
  0xb3   :  { %1145 = vmatprep.subr.bf16.mxu1 %v7753_v13  ;;  %v7771_v25 = vld [vmem:[#allocation11 + $0xac] ss:$16 sps:$4 sm:$0xff]   ;;  %v7773_v26 = vld [vmem:[#allocation11 + $0xa0] ss:$16 sps:$4 sm:$0xff]   ;;  %v7774_v27 = vld [vmem:[#allocation11 + $0xa8] ss:$16 sps:$4 sm:$0xff]  }
  0xb4   :  { %v7775_v28 = vld [vmem:[#allocation11 + $0xc4] ss:$16 sps:$4 sm:$0xff]   ;;  %v7777_v29 = vld [vmem:[#allocation11 + $0xcc] ss:$16 sps:$4 sm:$0xff]   ;;  %v7779_v30 = vld [vmem:[#allocation11 + $0xc0] ss:$16 sps:$4 sm:$0xff]  }
  0xb5   :  { %1064 = vmatpush1.bf16.msra.mxu0 %v7755_v14  ;;  %v7780_v31 = vld [vmem:[#allocation11 + $0xc8] ss:$16 sps:$4 sm:$0xff]   ;;  %v7781_v32 = vld [vmem:[#allocation11 + $0xe4] ss:$16 sps:$4 sm:$0xff]   ;;  %v7783_v33 = vld [vmem:[#allocation11 + $0xec] ss:$16 sps:$4 sm:$0xff]  }
  0xb6   :  { %1146 = vmatpush1.bf16.msra.mxu1 %v7756_v15  ;;  %1065 = vmatprep.subr.bf16.mxu0 %v7757_v16  ;;  %v7785_v34 = vld [vmem:[#allocation11 + $0xe0] ss:$16 sps:$4 sm:$0xff]   ;;  %v7786_v35 = vld [vmem:[#allocation11 + $0xe8] ss:$16 sps:$4 sm:$0xff]   ;;  %v7787_v36 = vld [vmem:[#allocation11 + $0x104] ss:$16 sps:$4 sm:$0xff]  }
  0xb7   :  { %1147 = vmatprep.subr.bf16.mxu1 %v7759_v17  ;;  %v7789_v37 = vld [vmem:[#allocation11 + $0x10c] ss:$16 sps:$4 sm:$0xff]   ;;  %v7791_v38 = vld [vmem:[#allocation11 + $0x100] ss:$16 sps:$4 sm:$0xff]   ;;  %v7792_v39 = vld [vmem:[#allocation11 + $0x108] ss:$16 sps:$4 sm:$0xff]  }
  0xb8   :  { %v7793_v40 = vld [vmem:[#allocation11 + $0x124] ss:$16 sps:$4 sm:$0xff]   ;;  %v7795_v41 = vld [vmem:[#allocation11 + $0x12c] ss:$16 sps:$4 sm:$0xff]   ;;  %v7797_v42 = vld [vmem:[#allocation11 + $0x120] ss:$16 sps:$4 sm:$0xff]  }
  0xb9   :  { %1066 = vmatpush1.bf16.msra.mxu0 %v7761_v18  ;;  %v7798_v43 = vld [vmem:[#allocation11 + $0x128] ss:$16 sps:$4 sm:$0xff]   ;;  %v7799_v44 = vld [vmem:[#allocation11 + $0x144] ss:$16 sps:$4 sm:$0xff]   ;;  %v7801_v45 = vld [vmem:[#allocation11 + $0x14c] ss:$16 sps:$4 sm:$0xff]  }
  0xba   :  { %1148 = vmatpush1.bf16.msra.mxu1 %v7762_v19  ;;  %1067 = vmatprep.subr.bf16.mxu0 %v7763_v20  ;;  %v7803_v46 = vld [vmem:[#allocation11 + $0x140] ss:$16 sps:$4 sm:$0xff]   ;;  %v7804_v47 = vld [vmem:[#allocation11 + $0x148] ss:$16 sps:$4 sm:$0xff]   ;;  %v7805_v48 = vld [vmem:[#allocation11 + $0x164] ss:$16 sps:$4 sm:$0xff]  }
  0xbb   :  { %1149 = vmatprep.subr.bf16.mxu1 %v7765_v21  ;;  %v7807_v49 = vld [vmem:[#allocation11 + $0x16c] ss:$16 sps:$4 sm:$0xff]   ;;  %v7809_v51 = vld [vmem:[#allocation11 + $0x160] ss:$16 sps:$4 sm:$0xff]   ;;  %v7810_v53 = vld [vmem:[#allocation11 + $0x168] ss:$16 sps:$4 sm:$0xff]  }
  0xbc   :  { %v226_v50 = vld [vmem:[#allocation6 + $0x8] sm:$0xff]  ;;  %v7811_v54 = vld [vmem:[#allocation11 + $0x184] ss:$16 sps:$4 sm:$0xff]   ;;  %v7815_v56 = vld [vmem:[#allocation11 + $0x180] ss:$16 sps:$4 sm:$0xff]  }
  0xbd   :  { %1068 = vmatpush1.bf16.msra.mxu0 %v7767_v22  ;;  %v266_v52 = vpack.c.bf16 %v226_v50, %v226_v50  ;;  %v7813_v55 = vld [vmem:[#allocation11 + $0x18c] ss:$16 sps:$4 sm:$0xff]   ;;  %v7816_v57 = vld [vmem:[#allocation11 + $0x188] ss:$16 sps:$4 sm:$0xff]   ;;  %v7817_v58 = vld [vmem:[#allocation11 + $0x1a4] ss:$16 sps:$4 sm:$0xff]  }
  0xbe   :  { %1150 = vmatpush1.bf16.msra.mxu1 %v7768_v23  ;;  %1069 = vmatprep.subr.bf16.mxu0 %v7769_v24  ;;  %v7819_v59 = vld [vmem:[#allocation11 + $0x1ac] ss:$16 sps:$4 sm:$0xff]   ;;  %v7821_v60 = vld [vmem:[#allocation11 + $0x1a0] ss:$16 sps:$4 sm:$0xff]   ;;  %v7822_v61 = vld [vmem:[#allocation11 + $0x1a8] ss:$16 sps:$4 sm:$0xff]  }
  0xbf   :  { %1151 = vmatprep.subr.bf16.mxu1 %v7771_v25  ;;  %1091 = vmatprep.mubr.bf16.mxu0 %v266_v52  ;;  %v7823_v62 = vld [vmem:[#allocation11 + $0x1c4] ss:$16 sps:$4 sm:$0xff]   ;;  %v7825_v63 = vld [vmem:[#allocation11 + $0x1cc] ss:$16 sps:$4 sm:$0xff]   ;;  %v7827_v4 = vld [vmem:[#allocation11 + $0x1c0] ss:$16 sps:$4 sm:$0xff]  }
  0xc0   :  { %1173 = vmatprep.mubr.bf16.mxu1 %v266_v52  ;;  %v7828_v5 = vld [vmem:[#allocation11 + $0x1c8] ss:$16 sps:$4 sm:$0xff]   ;;  %v7829_v6 = vld [vmem:[#allocation11 + $0x1e4] ss:$16 sps:$4 sm:$0xff]   ;;  %v7831_v7 = vld [vmem:[#allocation11 + $0x1ec] ss:$16 sps:$4 sm:$0xff]  }
  0xc1   :  { %1070 = vmatpush1.bf16.msra.mxu0 %v7773_v26  ;;  %v7833_v8 = vld [vmem:[#allocation11 + $0x1e0] ss:$16 sps:$4 sm:$0xff]   ;;  %v7834_v9 = vld [vmem:[#allocation11 + $0x1e8] ss:$16 sps:$4 sm:$0xff]   ;;  %v7837_v11 = vld [vmem:[#allocation11 + $0x204] ss:$16 sps:$4 sm:$0xff]  }
  0xc2   :  { %1152 = vmatpush1.bf16.msra.mxu1 %v7774_v27  ;;  %1071 = vmatprep.subr.bf16.mxu0 %v7775_v28  ;;  %v225_v10 = vld [vmem:[#allocation6] sm:$0xff]  ;;  %v7840_v12 = vld [vmem:[#allocation11 + $0x20c] ss:$16 sps:$4 sm:$0xff]   ;;  %v7838_v15 = vld [vmem:[#allocation11 + $0x208] ss:$16 sps:$4 sm:$0xff]  }
  0xc3   :  { %1153 = vmatprep.subr.bf16.mxu1 %v7777_v29  ;;  %v265_v13 = vpack.c.bf16 %v225_v10, %v225_v10  ;;  %v7835_v14 = vld [vmem:[#allocation11 + $0x200] ss:$16 sps:$4 sm:$0xff]   ;;  %v7843_v16 = vld [vmem:[#allocation11 + $0x224] ss:$16 sps:$4 sm:$0xff]   ;;  %v7846_v17 = vld [vmem:[#allocation11 + $0x22c] ss:$16 sps:$4 sm:$0xff]  }
  0xc4   :  { %v7841_v18 = vld [vmem:[#allocation11 + $0x220] ss:$16 sps:$4 sm:$0xff]   ;;  %v7844_v19 = vld [vmem:[#allocation11 + $0x228] ss:$16 sps:$4 sm:$0xff]   ;;  %v7849_v20 = vld [vmem:[#allocation11 + $0x244] ss:$16 sps:$4 sm:$0xff]  }
  0xc5   :  { %1072 = vmatpush1.bf16.msra.mxu0 %v7779_v30  ;;  %v7852_v21 = vld [vmem:[#allocation11 + $0x24c] ss:$16 sps:$4 sm:$0xff]   ;;  %v7847_v22 = vld [vmem:[#allocation11 + $0x240] ss:$16 sps:$4 sm:$0xff]   ;;  %v7850_v23 = vld [vmem:[#allocation11 + $0x248] ss:$16 sps:$4 sm:$0xff]  }
  0xc6   :  { %1154 = vmatpush1.bf16.msra.mxu1 %v7780_v31  ;;  %1073 = vmatprep.subr.bf16.mxu0 %v7781_v32  ;;  %v7855_v24 = vld [vmem:[#allocation11 + $0x264] ss:$16 sps:$4 sm:$0xff]   ;;  %v7858_v25 = vld [vmem:[#allocation11 + $0x26c] ss:$16 sps:$4 sm:$0xff]   ;;  %v7853_v26 = vld [vmem:[#allocation11 + $0x260] ss:$16 sps:$4 sm:$0xff]  }
  0xc7   :  { %1155 = vmatprep.subr.bf16.mxu1 %v7783_v33  ;;  %v7856_v27 = vld [vmem:[#allocation11 + $0x268] ss:$16 sps:$4 sm:$0xff]   ;;  %v7861_v28 = vld [vmem:[#allocation11 + $0x284] ss:$16 sps:$4 sm:$0xff]   ;;  %v7864_v29 = vld [vmem:[#allocation11 + $0x28c] ss:$16 sps:$4 sm:$0xff]  }
  0xc8   :  { %v7859_v30 = vld [vmem:[#allocation11 + $0x280] ss:$16 sps:$4 sm:$0xff]   ;;  %v7862_v31 = vld [vmem:[#allocation11 + $0x288] ss:$16 sps:$4 sm:$0xff]   ;;  %v7867_v32 = vld [vmem:[#allocation11 + $0x2a4] ss:$16 sps:$4 sm:$0xff]  }
  0xc9   :  { %1074 = vmatpush1.bf16.msra.mxu0 %v7785_v34  ;;  %v7870_v33 = vld [vmem:[#allocation11 + $0x2ac] ss:$16 sps:$4 sm:$0xff]   ;;  %v7865_v34 = vld [vmem:[#allocation11 + $0x2a0] ss:$16 sps:$4 sm:$0xff]   ;;  %v7891_v50 = vld [vmem:[#allocation11 + $0x324] ss:$16 sps:$4 sm:$0xff]  }
  0xca   :  { %1156 = vmatpush1.bf16.msra.mxu1 %v7786_v35  ;;  %1075 = vmatprep.subr.bf16.mxu0 %v7787_v36  ;;  %v7868_v35 = vld [vmem:[#allocation11 + $0x2a8] ss:$16 sps:$4 sm:$0xff]   ;;  %v7873_v36 = vld [vmem:[#allocation11 + $0x2c4] ss:$16 sps:$4 sm:$0xff]   ;;  %v7889_v52 = vld [vmem:[#allocation11 + $0x320] ss:$16 sps:$4 sm:$0xff]  }
  0xcb   :  { %1157 = vmatprep.subr.bf16.mxu1 %v7789_v37  ;;  %v7876_v37 = vld [vmem:[#allocation11 + $0x2cc] ss:$16 sps:$4 sm:$0xff]   ;;  %v7921_v10 = vld [vmem:[#allocation11 + $0x3c4] ss:$16 sps:$4 sm:$0xff]  }
  0xcd   :  { %1076 = vmatpush1.bf16.msra.mxu0 %v7791_v38  ;;  %v228_v38 = vld [vmem:[#allocation6 + $0x18] sm:$0xff] }
  0xce   :  { %1158 = vmatpush1.bf16.msra.mxu1 %v7792_v39  ;;  %1077 = vmatprep.subr.bf16.mxu0 %v7793_v40  ;;  %v268_v39 = vpack.c.bf16 %v228_v38, %v228_v38  ;;  %v7871_v40 = vld [vmem:[#allocation11 + $0x2c0] ss:$16 sps:$4 sm:$0xff]   ;;  %v7952_v38 = vld [vmem:[#allocation14 + $0x68] ss:$16 sps:$4 sm:$0xff]  }
  0xcf   :  { %1159 = vmatprep.subr.bf16.mxu1 %v7795_v41  ;;  %v7874_v41 = vld [vmem:[#allocation11 + $0x2c8] ss:$16 sps:$4 sm:$0xff]  }
  0xd1   :  { %1078 = vmatpush1.bf16.msra.mxu0 %v7797_v42  ;;  %v7879_v42 = vld [vmem:[#allocation11 + $0x2e4] ss:$16 sps:$4 sm:$0xff]  }
  0xd2   :  { %1160 = vmatpush1.bf16.msra.mxu1 %v7798_v43  ;;  %1079 = vmatprep.subr.bf16.mxu0 %v7799_v44  ;;  %v7882_v43 = vld [vmem:[#allocation11 + $0x2ec] ss:$16 sps:$4 sm:$0xff]   ;;  %v7877_v44 = vld [vmem:[#allocation11 + $0x2e0] ss:$16 sps:$4 sm:$0xff]  }
  0xd3   :  { %1161 = vmatprep.subr.bf16.mxu1 %v7801_v45  ;;  %v7880_v45 = vld [vmem:[#allocation11 + $0x2e8] ss:$16 sps:$4 sm:$0xff]  }
  0xd5   :  { %1080 = vmatpush1.bf16.msra.mxu0 %v7803_v46  ;;  %v7885_v46 = vld [vmem:[#allocation11 + $0x304] ss:$16 sps:$4 sm:$0xff]  }
  0xd6   :  { %1162 = vmatpush1.bf16.msra.mxu1 %v7804_v47  ;;  %1081 = vmatprep.subr.bf16.mxu0 %v7805_v48  ;;  %v7888_v47 = vld [vmem:[#allocation11 + $0x30c] ss:$16 sps:$4 sm:$0xff]   ;;  %v7883_v48 = vld [vmem:[#allocation11 + $0x300] ss:$16 sps:$4 sm:$0xff]  }
  0xd7   :  { %1163 = vmatprep.subr.bf16.mxu1 %v7807_v49  ;;  %v7886_v49 = vld [vmem:[#allocation11 + $0x308] ss:$16 sps:$4 sm:$0xff]  }
  0xd9   :  { %1082 = vmatpush1.bf16.msra.mxu0 %v7809_v51  ;;  %v7894_v51 = vld [vmem:[#allocation11 + $0x32c] ss:$16 sps:$4 sm:$0xff]  }
  0xda   :  { %1164 = vmatpush1.bf16.msra.mxu1 %v7810_v53  ;;  %1083 = vmatprep.subr.bf16.mxu0 %v7811_v54  ;;  %v7892_v53 = vld [vmem:[#allocation11 + $0x328] ss:$16 sps:$4 sm:$0xff]   ;;  %v7897_v54 = vld [vmem:[#allocation11 + $0x344] ss:$16 sps:$4 sm:$0xff]  }
  0xdb   :  { %1165 = vmatprep.subr.bf16.mxu1 %v7813_v55  ;;  %v7900_v55 = vld [vmem:[#allocation11 + $0x34c] ss:$16 sps:$4 sm:$0xff]  }
  0xdd   :  { %1084 = vmatpush1.bf16.msra.mxu0 %v7815_v56  ;;  %v7895_v56 = vld [vmem:[#allocation11 + $0x340] ss:$16 sps:$4 sm:$0xff]  }
  0xde   :  { %1166 = vmatpush1.bf16.msra.mxu1 %v7816_v57  ;;  %1085 = vmatprep.subr.bf16.mxu0 %v7817_v58  ;;  %v7898_v57 = vld [vmem:[#allocation11 + $0x348] ss:$16 sps:$4 sm:$0xff]   ;;  %v7903_v58 = vld [vmem:[#allocation11 + $0x364] ss:$16 sps:$4 sm:$0xff]  }
  0xdf   :  { %1167 = vmatprep.subr.bf16.mxu1 %v7819_v59  ;;  %v7906_v59 = vld [vmem:[#allocation11 + $0x36c] ss:$16 sps:$4 sm:$0xff]  }
  0xe1   :  { %1086 = vmatpush1.bf16.msra.mxu0 %v7821_v60  ;;  %v7901_v60 = vld [vmem:[#allocation11 + $0x360] ss:$16 sps:$4 sm:$0xff]  }
  0xe2   :  { %1168 = vmatpush1.bf16.msra.mxu1 %v7822_v61  ;;  %1087 = vmatprep.subr.bf16.mxu0 %v7823_v62  ;;  %v7904_v61 = vld [vmem:[#allocation11 + $0x368] ss:$16 sps:$4 sm:$0xff]   ;;  %v7909_v62 = vld [vmem:[#allocation11 + $0x384] ss:$16 sps:$4 sm:$0xff]  }
  0xe3   :  { %1169 = vmatprep.subr.bf16.mxu1 %v7825_v63  ;;  %v7912_v63 = vld [vmem:[#allocation11 + $0x38c] ss:$16 sps:$4 sm:$0xff]  }
  0xe5   :  { %1088 = vmatpush1.bf16.msra.mxu0 %v7827_v4  ;;  %v7907_v4 = vld [vmem:[#allocation11 + $0x380] ss:$16 sps:$4 sm:$0xff]  }
  0xe6   :  { %1170 = vmatpush1.bf16.msra.mxu1 %v7828_v5  ;;  %1089 = vmatprep.subr.bf16.mxu0 %v7829_v6  ;;  %v7910_v5 = vld [vmem:[#allocation11 + $0x388] ss:$16 sps:$4 sm:$0xff]   ;;  %v7915_v6 = vld [vmem:[#allocation11 + $0x3a4] ss:$16 sps:$4 sm:$0xff]  }
  0xe7   :  { %1171 = vmatprep.subr.bf16.mxu1 %v7831_v7  ;;  %v7918_v7 = vld [vmem:[#allocation11 + $0x3ac] ss:$16 sps:$4 sm:$0xff]  }
  0xe9   :  { %1090 = vmatpush1.bf16.msra.mxu0 %v7833_v8  ;;  %v7913_v8 = vld [vmem:[#allocation11 + $0x3a0] ss:$16 sps:$4 sm:$0xff]  }
  0xea   :  { %1172 = vmatpush1.bf16.msra.mxu1 %v7834_v9  ;;  %1100 = vmatprep.subr.bf16.mxu0 %v7837_v11  ;;  %v7916_v9 = vld [vmem:[#allocation11 + $0x3a8] ss:$16 sps:$4 sm:$0xff]   ;;  %v7924_v11 = vld [vmem:[#allocation11 + $0x3cc] ss:$16 sps:$4 sm:$0xff]  }
  0xeb   :  { %1182 = vmatprep.subr.bf16.mxu1 %v7840_v12  ;;  %v7919_v12 = vld [vmem:[#allocation11 + $0x3c0] ss:$16 sps:$4 sm:$0xff]  }
  0xec   :  { %1092 = vmatmul.mubr.bf16.vlgmr.msra.gmra.mrb[0].mxu0 %v265_v13 }
  0xed   :  { %1101 = vmatpush1.bf16.msra.mxu0 %v7835_v14  ;;  %1174 = vmatmul.mubr.bf16.vlgmr.msra.gmra.mrb[0].mxu1 %v265_v13  ;;  %v7922_v13 = vld [vmem:[#allocation11 + $0x3c8] ss:$16 sps:$4 sm:$0xff]   ;;  %v7927_v14 = vld [vmem:[#allocation11 + $0x3e4] ss:$16 sps:$4 sm:$0xff]  }
  0xee   :  { %1183 = vmatpush1.bf16.msra.mxu1 %v7838_v15  ;;  %1102 = vmatprep.subr.bf16.mxu0 %v7843_v16  ;;  %v7930_v15 = vld [vmem:[#allocation11 + $0x3ec] ss:$16 sps:$4 sm:$0xff]   ;;  %v7925_v16 = vld [vmem:[#allocation11 + $0x3e0] ss:$16 sps:$4 sm:$0xff]  }
  0xef   :  { %1184 = vmatprep.subr.bf16.mxu1 %v7846_v17  ;;  %1132 = vmatprep.mubr.bf16.mxu0 %v268_v39  ;;  %v227_v17 = vld [vmem:[#allocation6 + $0x10] sm:$0xff] }
  0xf0   :  { %1214 = vmatprep.mubr.bf16.mxu1 %v268_v39  ;;  %v7957_v39 = vld [vmem:[#allocation14 + $0x84] ss:$16 sps:$4 sm:$0xff]  }
  0xf1   :  { %1103 = vmatpush1.bf16.msra.mxu0 %v7841_v18  ;;  %v7928_v18 = vld [vmem:[#allocation11 + $0x3e8] ss:$16 sps:$4 sm:$0xff]  }
  0xf2   :  { %1185 = vmatpush1.bf16.msra.mxu1 %v7844_v19  ;;  %1104 = vmatprep.subr.bf16.mxu0 %v7849_v20  ;;  %v7933_v19 = vld [vmem:[#allocation14 + $0x4] ss:$16 sps:$4 sm:$0xff]   ;;  %v7936_v20 = vld [vmem:[#allocation14 + $0xc] ss:$16 sps:$4 sm:$0xff]  }
  0xf3   :  { %1186 = vmatprep.subr.bf16.mxu1 %v7852_v21  ;;  %v267_v21 = vpack.c.bf16 %v227_v17, %v227_v17  ;;  %v8009_v17 = vld [vmem:[#allocation14 + $0x1a0] ss:$16 sps:$4 sm:$0xff]  }
  0xf5   :  { %1105 = vmatpush1.bf16.msra.mxu0 %v7847_v22  ;;  %v7931_v22 = vld [vmem:[#allocation14] ss:$16 sps:$4 sm:$0xff]  }
  0xf6   :  { %1187 = vmatpush1.bf16.msra.mxu1 %v7850_v23  ;;  %1106 = vmatprep.subr.bf16.mxu0 %v7855_v24  ;;  %v7934_v23 = vld [vmem:[#allocation14 + $0x8] ss:$16 sps:$4 sm:$0xff]   ;;  %v7939_v24 = vld [vmem:[#allocation14 + $0x24] ss:$16 sps:$4 sm:$0xff]  }
  0xf7   :  { %1188 = vmatprep.subr.bf16.mxu1 %v7858_v25  ;;  %v7942_v25 = vld [vmem:[#allocation14 + $0x2c] ss:$16 sps:$4 sm:$0xff]  }
  0xf9   :  { %1107 = vmatpush1.bf16.msra.mxu0 %v7853_v26  ;;  %v8962_v26 = vld [vmem:[%s10390_s3] sm:$0xff] }
  0xfa   :  { %1189 = vmatpush1.bf16.msra.mxu1 %v7856_v27  ;;  %1108 = vmatprep.subr.bf16.mxu0 %v7861_v28  ;;  %v8967_v27 = vld [vmem:[%s10390_s3 + $0x10] sm:$0xff] }
  0xfb   :  { %1190 = vmatprep.subr.bf16.mxu1 %v7864_v29  ;;  %v7400_v28 = vcombine.high %v8962_v26, %v8967_v27  ;;  %v7937_v29 = vld [vmem:[#allocation14 + $0x20] ss:$16 sps:$4 sm:$0xff]  }
  0xfd   :  { %1109 = vmatpush1.bf16.msra.mxu0 %v7859_v30  ;;  %v7940_v30 = vld [vmem:[#allocation14 + $0x28] ss:$16 sps:$4 sm:$0xff]  }
  0xfe   :  { %1191 = vmatpush1.bf16.msra.mxu1 %v7862_v31  ;;  %1110 = vmatprep.subr.bf16.mxu0 %v7867_v32  ;;  %v7945_v31 = vld [vmem:[#allocation14 + $0x44] ss:$16 sps:$4 sm:$0xff]   ;;  %v7948_v32 = vld [vmem:[#allocation14 + $0x4c] ss:$16 sps:$4 sm:$0xff]  }
  0xff   :  { %1192 = vmatprep.subr.bf16.mxu1 %v7870_v33  ;;  %v7943_v33 = vld [vmem:[#allocation14 + $0x40] ss:$16 sps:$4 sm:$0xff]  }
 0x101   :  { %1111 = vmatpush1.bf16.msra.mxu0 %v7865_v34  ;;  %v7946_v34 = vld [vmem:[#allocation14 + $0x48] ss:$16 sps:$4 sm:$0xff]  }
 0x102   :  { %1193 = vmatpush1.bf16.msra.mxu1 %v7868_v35  ;;  %1112 = vmatprep.subr.bf16.mxu0 %v7873_v36  ;;  %v7951_v35 = vld [vmem:[#allocation14 + $0x64] ss:$16 sps:$4 sm:$0xff]   ;;  %v7954_v36 = vld [vmem:[#allocation14 + $0x6c] ss:$16 sps:$4 sm:$0xff]  }
 0x103   :  { %1194 = vmatprep.subr.bf16.mxu1 %v7876_v37  ;;  %v7949_v37 = vld [vmem:[#allocation14 + $0x60] ss:$16 sps:$4 sm:$0xff]  }
 0x105   :  { %1113 = vmatpush1.bf16.msra.mxu0 %v7871_v40  ;;  %v7960_v40 = vld [vmem:[#allocation14 + $0x8c] ss:$16 sps:$4 sm:$0xff]  }
 0x106   :  { %1195 = vmatpush1.bf16.msra.mxu1 %v7874_v41  ;;  %1114 = vmatprep.subr.bf16.mxu0 %v7879_v42  ;;  %v7955_v41 = vld [vmem:[#allocation14 + $0x80] ss:$16 sps:$4 sm:$0xff]   ;;  %v7958_v42 = vld [vmem:[#allocation14 + $0x88] ss:$16 sps:$4 sm:$0xff]  }
 0x107   :  { %1196 = vmatprep.subr.bf16.mxu1 %v7882_v43  ;;  %v7963_v43 = vld [vmem:[#allocation14 + $0xa4] ss:$16 sps:$4 sm:$0xff]  }
 0x109   :  { %1115 = vmatpush1.bf16.msra.mxu0 %v7877_v44  ;;  %v7966_v44 = vld [vmem:[#allocation14 + $0xac] ss:$16 sps:$4 sm:$0xff]  }
 0x10a   :  { %1197 = vmatpush1.bf16.msra.mxu1 %v7880_v45  ;;  %1116 = vmatprep.subr.bf16.mxu0 %v7885_v46  ;;  %v7961_v45 = vld [vmem:[#allocation14 + $0xa0] ss:$16 sps:$4 sm:$0xff]   ;;  %v7964_v46 = vld [vmem:[#allocation14 + $0xa8] ss:$16 sps:$4 sm:$0xff]  }
 0x10b   :  { %1198 = vmatprep.subr.bf16.mxu1 %v7888_v47  ;;  %v7969_v47 = vld [vmem:[#allocation14 + $0xc4] ss:$16 sps:$4 sm:$0xff]  }
 0x10d   :  { %1117 = vmatpush1.bf16.msra.mxu0 %v7883_v48  ;;  %v7972_v48 = vld [vmem:[#allocation14 + $0xcc] ss:$16 sps:$4 sm:$0xff]  }
 0x10e   :  { %1199 = vmatpush1.bf16.msra.mxu1 %v7886_v49  ;;  %1118 = vmatprep.subr.bf16.mxu0 %v7891_v50  ;;  %v7967_v49 = vld [vmem:[#allocation14 + $0xc0] ss:$16 sps:$4 sm:$0xff]   ;;  %v7970_v50 = vld [vmem:[#allocation14 + $0xc8] ss:$16 sps:$4 sm:$0xff]  }
 0x10f   :  { %1200 = vmatprep.subr.bf16.mxu1 %v7894_v51  ;;  %v7975_v51 = vld [vmem:[#allocation14 + $0xe4] ss:$16 sps:$4 sm:$0xff]  }
 0x111   :  { %1119 = vmatpush1.bf16.msra.mxu0 %v7889_v52  ;;  %v7978_v52 = vld [vmem:[#allocation14 + $0xec] ss:$16 sps:$4 sm:$0xff]  }
 0x112   :  { %1201 = vmatpush1.bf16.msra.mxu1 %v7892_v53  ;;  %1120 = vmatprep.subr.bf16.mxu0 %v7897_v54  ;;  %v7973_v53 = vld [vmem:[#allocation14 + $0xe0] ss:$16 sps:$4 sm:$0xff]   ;;  %v7976_v54 = vld [vmem:[#allocation14 + $0xe8] ss:$16 sps:$4 sm:$0xff]  }
 0x113   :  { %1202 = vmatprep.subr.bf16.mxu1 %v7900_v55  ;;  %v7981_v55 = vld [vmem:[#allocation14 + $0x104] ss:$16 sps:$4 sm:$0xff]  }
 0x115   :  { %1121 = vmatpush1.bf16.msra.mxu0 %v7895_v56  ;;  %v7984_v56 = vld [vmem:[#allocation14 + $0x10c] ss:$16 sps:$4 sm:$0xff]  }
 0x116   :  { %1203 = vmatpush1.bf16.msra.mxu1 %v7898_v57  ;;  %1122 = vmatprep.subr.bf16.mxu0 %v7903_v58  ;;  %v7979_v57 = vld [vmem:[#allocation14 + $0x100] ss:$16 sps:$4 sm:$0xff]   ;;  %v7982_v58 = vld [vmem:[#allocation14 + $0x108] ss:$16 sps:$4 sm:$0xff]  }
 0x117   :  { %1204 = vmatprep.subr.bf16.mxu1 %v7906_v59  ;;  %v7987_v59 = vld [vmem:[#allocation14 + $0x124] ss:$16 sps:$4 sm:$0xff]  }
 0x119   :  { %1123 = vmatpush1.bf16.msra.mxu0 %v7901_v60  ;;  %v7990_v60 = vld [vmem:[#allocation14 + $0x12c] ss:$16 sps:$4 sm:$0xff]  }
 0x11a   :  { %1205 = vmatpush1.bf16.msra.mxu1 %v7904_v61  ;;  %1124 = vmatprep.subr.bf16.mxu0 %v7909_v62  ;;  %v7985_v61 = vld [vmem:[#allocation14 + $0x120] ss:$16 sps:$4 sm:$0xff]   ;;  %v7988_v62 = vld [vmem:[#allocation14 + $0x128] ss:$16 sps:$4 sm:$0xff]  }
 0x11b   :  { %1206 = vmatprep.subr.bf16.mxu1 %v7912_v63  ;;  %v7993_v63 = vld [vmem:[#allocation14 + $0x144] ss:$16 sps:$4 sm:$0xff]  }
 0x11d   :  { %1125 = vmatpush1.bf16.msra.mxu0 %v7907_v4  ;;  %v7996_v4 = vld [vmem:[#allocation14 + $0x14c] ss:$16 sps:$4 sm:$0xff]  }
 0x11e   :  { %1207 = vmatpush1.bf16.msra.mxu1 %v7910_v5  ;;  %1126 = vmatprep.subr.bf16.mxu0 %v7915_v6  ;;  %v7991_v5 = vld [vmem:[#allocation14 + $0x140] ss:$16 sps:$4 sm:$0xff]   ;;  %v7994_v6 = vld [vmem:[#allocation14 + $0x148] ss:$16 sps:$4 sm:$0xff]  }
 0x11f   :  { %1208 = vmatprep.subr.bf16.mxu1 %v7918_v7  ;;  %v7999_v7 = vld [vmem:[#allocation14 + $0x164] ss:$16 sps:$4 sm:$0xff]  }
 0x121   :  { %1127 = vmatpush1.bf16.msra.mxu0 %v7913_v8  ;;  %v8002_v8 = vld [vmem:[#allocation14 + $0x16c] ss:$16 sps:$4 sm:$0xff]  }
 0x122   :  { %1209 = vmatpush1.bf16.msra.mxu1 %v7916_v9  ;;  %1128 = vmatprep.subr.bf16.mxu0 %v7921_v10  ;;  %v7997_v9 = vld [vmem:[#allocation14 + $0x160] ss:$16 sps:$4 sm:$0xff]   ;;  %v8000_v10 = vld [vmem:[#allocation14 + $0x168] ss:$16 sps:$4 sm:$0xff]  }
 0x123   :  { %1210 = vmatprep.subr.bf16.mxu1 %v7924_v11  ;;  %v8005_v11 = vld [vmem:[#allocation14 + $0x184] ss:$16 sps:$4 sm:$0xff]  }
 0x125   :  { %1129 = vmatpush1.bf16.msra.mxu0 %v7919_v12  ;;  %v8008_v12 = vld [vmem:[#allocation14 + $0x18c] ss:$16 sps:$4 sm:$0xff]  }
 0x126   :  { %1211 = vmatpush1.bf16.msra.mxu1 %v7922_v13  ;;  %1130 = vmatprep.subr.bf16.mxu0 %v7927_v14  ;;  %v8003_v13 = vld [vmem:[#allocation14 + $0x180] ss:$16 sps:$4 sm:$0xff]   ;;  %v8006_v14 = vld [vmem:[#allocation14 + $0x188] ss:$16 sps:$4 sm:$0xff]  }
 0x127   :  { %1212 = vmatprep.subr.bf16.mxu1 %v7930_v15  ;;  %v8011_v15 = vld [vmem:[#allocation14 + $0x1a4] ss:$16 sps:$4 sm:$0xff]  }
 0x129   :  { %1131 = vmatpush1.bf16.msra.mxu0 %v7925_v16  ;;  %v8014_v16 = vld [vmem:[#allocation14 + $0x1ac] ss:$16 sps:$4 sm:$0xff]  }
 0x12a   :  { %1213 = vmatpush1.bf16.msra.mxu1 %v7928_v18  ;;  %2151 = vmatprep.subr.bf16.mxu0 %v7933_v19  ;;  %v8012_v18 = vld [vmem:[#allocation14 + $0x1a8] ss:$16 sps:$4 sm:$0xff]   ;;  %v8017_v19 = vld [vmem:[#allocation14 + $0x1c4] ss:$16 sps:$4 sm:$0xff]  }
 0x12b   :  { %2377 = vmatprep.subr.bf16.mxu1 %v7936_v20  ;;  %v8020_v20 = vld [vmem:[#allocation14 + $0x1cc] ss:$16 sps:$4 sm:$0xff]  }
 0x12c   :  { %1133 = vmatmul.mubr.bf16.vlgmr.msra.gmra.mrb[0].mxu0 %v267_v21 }
 0x12d   :  { %1215 = vmatmul.mubr.bf16.vlgmr.msra.gmra.mrb[0].mxu1 %v267_v21  ;;  %2152 = vmatpush1.bf16.msra.mxu0 %v7931_v22  ;;  %v8015_v21 = vld [vmem:[#allocation14 + $0x1c0] ss:$16 sps:$4 sm:$0xff]   ;;  %v8018_v22 = vld [vmem:[#allocation14 + $0x1c8] ss:$16 sps:$4 sm:$0xff]  }
 0x12e   :  { %2378 = vmatpush1.bf16.msra.mxu1 %v7934_v23  ;;  %2153 = vmatprep.subr.bf16.mxu0 %v7939_v24  ;;  %v8023_v23 = vld [vmem:[#allocation14 + $0x1e4] ss:$16 sps:$4 sm:$0xff]   ;;  %v8026_v24 = vld [vmem:[#allocation14 + $0x1ec] ss:$16 sps:$4 sm:$0xff]  }
 0x12f   :  { %2379 = vmatprep.subr.bf16.mxu1 %v7942_v25  ;;  %2183 = vmatprep.mubr.bf16.mxu0 %v7400_v28  ;;  %v8021_v25 = vld [vmem:[#allocation14 + $0x1e0] ss:$16 sps:$4 sm:$0xff]  }
 0x130   :  { %2409 = vmatprep.mubr.bf16.mxu1 %v7400_v28  ;;  %v8024_v28 = vld [vmem:[#allocation14 + $0x1e8] ss:$16 sps:$4 sm:$0xff]  }
 0x131   :  { %2154 = vmatpush1.bf16.msra.mxu0 %v7937_v29  ;;  %v8031_v29 = vld [vmem:[#allocation14 + $0x204] ss:$16 sps:$4 sm:$0xff]  }
 0x132   :  { %2380 = vmatpush1.bf16.msra.mxu1 %v7940_v30  ;;  %2155 = vmatprep.subr.bf16.mxu0 %v7945_v31  ;;  %v8034_v30 = vld [vmem:[#allocation14 + $0x20c] ss:$16 sps:$4 sm:$0xff]   ;;  %v7399_v31 = vcombine.low %v8962_v26, %v8967_v27  ;;  %v8035_v26 = vld [vmem:[#allocation14 + $0x220] ss:$16 sps:$4 sm:$0xff]   ;;  %v8038_v27 = vld [vmem:[#allocation14 + $0x228] ss:$16 sps:$4 sm:$0xff]  }
 0x133   :  { %2381 = vmatprep.subr.bf16.mxu1 %v7948_v32  ;;  %v237_v32 = vld [vmem:[%s10390_s3 + $0x20] sm:$0xff] }
 0x135   :  { %2156 = vmatpush1.bf16.msra.mxu0 %v7943_v33  ;;  %v239_v33 = vld [vmem:[%s10390_s3 + $0x30] sm:$0xff] }
 0x136   :  { %2382 = vmatpush1.bf16.msra.mxu1 %v7946_v34  ;;  %2157 = vmatprep.subr.bf16.mxu0 %v7951_v35  ;;  %v8029_v34 = vld [vmem:[#allocation14 + $0x200] ss:$16 sps:$4 sm:$0xff]   ;;  %v8032_v35 = vld [vmem:[#allocation14 + $0x208] ss:$16 sps:$4 sm:$0xff]  }
 0x137   :  { %2383 = vmatprep.subr.bf16.mxu1 %v7954_v36  ;;  %v8037_v36 = vld [vmem:[#allocation14 + $0x224] ss:$16 sps:$4 sm:$0xff]  }
 0x139   :  { %2158 = vmatpush1.bf16.msra.mxu0 %v7949_v37  ;;  %v8040_v37 = vld [vmem:[#allocation14 + $0x22c] ss:$16 sps:$4 sm:$0xff]  }
 0x13a   :  { %2384 = vmatpush1.bf16.msra.mxu1 %v7952_v38  ;;  %2159 = vmatprep.subr.bf16.mxu0 %v7957_v39  ;;  %v7404_v38 = vcombine.high %v237_v32, %v239_v33  ;;  %v8045_v39 = vld [vmem:[#allocation14 + $0x244] ss:$16 sps:$4 sm:$0xff]  }
 0x13b   :  { %2385 = vmatprep.subr.bf16.mxu1 %v7960_v40  ;;  %v8048_v40 = vld [vmem:[#allocation14 + $0x24c] ss:$16 sps:$4 sm:$0xff]  }
 0x13d   :  { %2160 = vmatpush1.bf16.msra.mxu0 %v7955_v41  ;;  %v7403_v41 = vcombine.low %v237_v32, %v239_v33  ;;  %v257_v32 = vld [vmem:[%s10390_s3 + $0xc0] sm:$0xff]  ;;  %v259_v33 = vld [vmem:[%s10390_s3 + $0xd0] sm:$0xff] }
 0x13e   :  { %2386 = vmatpush1.bf16.msra.mxu1 %v7958_v42  ;;  %2161 = vmatprep.subr.bf16.mxu0 %v7963_v43  ;;  %v241_v42 = vld [vmem:[%s10390_s3 + $0x40] sm:$0xff]  ;;  %v243_v43 = vld [vmem:[%s10390_s3 + $0x50] sm:$0xff] }
 0x13f   :  { %2387 = vmatprep.subr.bf16.mxu1 %v7966_v44  ;;  %v8043_v44 = vld [vmem:[#allocation14 + $0x240] ss:$16 sps:$4 sm:$0xff]  }
 0x141   :  { %2162 = vmatpush1.bf16.msra.mxu0 %v7961_v45  ;;  %v8046_v45 = vld [vmem:[#allocation14 + $0x248] ss:$16 sps:$4 sm:$0xff]  }
 0x142   :  { %2388 = vmatpush1.bf16.msra.mxu1 %v7964_v46  ;;  %2163 = vmatprep.subr.bf16.mxu0 %v7969_v47  ;;  %v8051_v46 = vld [vmem:[#allocation14 + $0x264] ss:$16 sps:$4 sm:$0xff]   ;;  %v8054_v47 = vld [vmem:[#allocation14 + $0x26c] ss:$16 sps:$4 sm:$0xff]  }
 0x143   :  { %2389 = vmatprep.subr.bf16.mxu1 %v7972_v48  ;;  %v7408_v48 = vcombine.high %v241_v42, %v243_v43 }
 0x145   :  { %2164 = vmatpush1.bf16.msra.mxu0 %v7967_v49  ;;  %v8049_v49 = vld [vmem:[#allocation14 + $0x260] ss:$16 sps:$4 sm:$0xff]  }
 0x146   :  { %2390 = vmatpush1.bf16.msra.mxu1 %v7970_v50  ;;  %2165 = vmatprep.subr.bf16.mxu0 %v7975_v51  ;;  %v8052_v50 = vld [vmem:[#allocation14 + $0x268] ss:$16 sps:$4 sm:$0xff]   ;;  %v8059_v51 = vld [vmem:[#allocation14 + $0x284] ss:$16 sps:$4 sm:$0xff]  }
 0x147   :  { %2391 = vmatprep.subr.bf16.mxu1 %v7978_v52  ;;  %v8062_v52 = vld [vmem:[#allocation14 + $0x28c] ss:$16 sps:$4 sm:$0xff]  }
 0x149   :  { %2166 = vmatpush1.bf16.msra.mxu0 %v7973_v53  ;;  %v7407_v53 = vcombine.low %v241_v42, %v243_v43  ;;  %v261_v42 = vld [vmem:[%s10390_s3 + $0xe0] sm:$0xff]  ;;  %v263_v43 = vld [vmem:[%s10390_s3 + $0xf0] sm:$0xff] }
 0x14a   :  { %2392 = vmatpush1.bf16.msra.mxu1 %v7976_v54  ;;  %2167 = vmatprep.subr.bf16.mxu0 %v7981_v55  ;;  %v245_v54 = vld [vmem:[%s10390_s3 + $0x60] sm:$0xff]  ;;  %v247_v55 = vld [vmem:[%s10390_s3 + $0x70] sm:$0xff] }
 0x14b   :  { %2393 = vmatprep.subr.bf16.mxu1 %v7984_v56  ;;  %v8057_v56 = vld [vmem:[#allocation14 + $0x280] ss:$16 sps:$4 sm:$0xff]  }
 0x14d   :  { %2168 = vmatpush1.bf16.msra.mxu0 %v7979_v57  ;;  %v8060_v57 = vld [vmem:[#allocation14 + $0x288] ss:$16 sps:$4 sm:$0xff]  }
 0x14e   :  { %2394 = vmatpush1.bf16.msra.mxu1 %v7982_v58  ;;  %2169 = vmatprep.subr.bf16.mxu0 %v7987_v59  ;;  %v8065_v58 = vld [vmem:[#allocation14 + $0x2a4] ss:$16 sps:$4 sm:$0xff]   ;;  %v8068_v59 = vld [vmem:[#allocation14 + $0x2ac] ss:$16 sps:$4 sm:$0xff]  }
 0x14f   :  { %2395 = vmatprep.subr.bf16.mxu1 %v7990_v60  ;;  %v7412_v60 = vcombine.high %v245_v54, %v247_v55 }
 0x151   :  { %2170 = vmatpush1.bf16.msra.mxu0 %v7985_v61  ;;  %v8063_v61 = vld [vmem:[#allocation14 + $0x2a0] ss:$16 sps:$4 sm:$0xff]  }
 0x152   :  { %2396 = vmatpush1.bf16.msra.mxu1 %v7988_v62  ;;  %2171 = vmatprep.subr.bf16.mxu0 %v7993_v63  ;;  %v8066_v62 = vld [vmem:[#allocation14 + $0x2a8] ss:$16 sps:$4 sm:$0xff]   ;;  %v8073_v63 = vld [vmem:[#allocation14 + $0x2c4] ss:$16 sps:$4 sm:$0xff]  }
 0x153   :  { %2397 = vmatprep.subr.bf16.mxu1 %v7996_v4  ;;  %v8076_v4 = vld [vmem:[#allocation14 + $0x2cc] ss:$16 sps:$4 sm:$0xff]  }
 0x155   :  { %2172 = vmatpush1.bf16.msra.mxu0 %v7991_v5  ;;  %v7411_v5 = vcombine.low %v245_v54, %v247_v55  ;;  %v234_v54 = vld [vmem:[%s10390_s3 + $0x8] sm:$0xff]  ;;  %v236_v55 = vld [vmem:[%s10390_s3 + $0x18] sm:$0xff] }
 0x156   :  { %2398 = vmatpush1.bf16.msra.mxu1 %v7994_v6  ;;  %2173 = vmatprep.subr.bf16.mxu0 %v7999_v7  ;;  %v249_v6 = vld [vmem:[%s10390_s3 + $0x80] sm:$0xff]  ;;  %v251_v7 = vld [vmem:[%s10390_s3 + $0x90] sm:$0xff] }
 0x157   :  { %2399 = vmatprep.subr.bf16.mxu1 %v8002_v8  ;;  %v8071_v8 = vld [vmem:[#allocation14 + $0x2c0] ss:$16 sps:$4 sm:$0xff]  }
 0x159   :  { %2174 = vmatpush1.bf16.msra.mxu0 %v7997_v9  ;;  %v8074_v9 = vld [vmem:[#allocation14 + $0x2c8] ss:$16 sps:$4 sm:$0xff]  }
 0x15a   :  { %2400 = vmatpush1.bf16.msra.mxu1 %v8000_v10  ;;  %2175 = vmatprep.subr.bf16.mxu0 %v8005_v11  ;;  %v8079_v10 = vld [vmem:[#allocation14 + $0x2e4] ss:$16 sps:$4 sm:$0xff]   ;;  %v8082_v11 = vld [vmem:[#allocation14 + $0x2ec] ss:$16 sps:$4 sm:$0xff]  }
 0x15b   :  { %2401 = vmatprep.subr.bf16.mxu1 %v8008_v12  ;;  %v7416_v12 = vcombine.high %v249_v6, %v251_v7 }
 0x15d   :  { %2176 = vmatpush1.bf16.msra.mxu0 %v8003_v13  ;;  %v8077_v13 = vld [vmem:[#allocation14 + $0x2e0] ss:$16 sps:$4 sm:$0xff]  }
 0x15e   :  { %2402 = vmatpush1.bf16.msra.mxu1 %v8006_v14  ;;  %2177 = vmatprep.subr.bf16.mxu0 %v8011_v15  ;;  %v8080_v14 = vld [vmem:[#allocation14 + $0x2e8] ss:$16 sps:$4 sm:$0xff]   ;;  %v8087_v15 = vld [vmem:[#allocation14 + $0x304] ss:$16 sps:$4 sm:$0xff]  }
 0x15f   :  { %2403 = vmatprep.subr.bf16.mxu1 %v8014_v16  ;;  %v8090_v16 = vld [vmem:[#allocation14 + $0x30c] ss:$16 sps:$4 sm:$0xff]  }
 0x161   :  { %2178 = vmatpush1.bf16.msra.mxu0 %v8009_v17  ;;  %v7415_v17 = vcombine.low %v249_v6, %v251_v7  ;;  %v242_v7 = vld [vmem:[%s10390_s3 + $0x48] sm:$0xff] }
 0x162   :  { %2404 = vmatpush1.bf16.msra.mxu1 %v8012_v18  ;;  %2179 = vmatprep.subr.bf16.mxu0 %v8017_v19  ;;  %v253_v18 = vld [vmem:[%s10390_s3 + $0xa0] sm:$0xff]  ;;  %v255_v19 = vld [vmem:[%s10390_s3 + $0xb0] sm:$0xff] }
 0x163   :  { %2405 = vmatprep.subr.bf16.mxu1 %v8020_v20  ;;  %v8085_v20 = vld [vmem:[#allocation14 + $0x300] ss:$16 sps:$4 sm:$0xff]  }
 0x165   :  { %2180 = vmatpush1.bf16.msra.mxu0 %v8015_v21  ;;  %v8088_v21 = vld [vmem:[#allocation14 + $0x308] ss:$16 sps:$4 sm:$0xff]  }
 0x166   :  { %2406 = vmatpush1.bf16.msra.mxu1 %v8018_v22  ;;  %2181 = vmatprep.subr.bf16.mxu0 %v8023_v23  ;;  %v8093_v22 = vld [vmem:[#allocation14 + $0x324] ss:$16 sps:$4 sm:$0xff]   ;;  %v8096_v23 = vld [vmem:[#allocation14 + $0x32c] ss:$16 sps:$4 sm:$0xff]  }
 0x167   :  { %2407 = vmatprep.subr.bf16.mxu1 %v8026_v24  ;;  %v7420_v24 = vcombine.high %v253_v18, %v255_v19 }
 0x169   :  { %2182 = vmatpush1.bf16.msra.mxu0 %v8021_v25  ;;  %v8091_v25 = vld [vmem:[#allocation14 + $0x320] ss:$16 sps:$4 sm:$0xff]  }
 0x16a   :  { %2408 = vmatpush1.bf16.msra.mxu1 %v8024_v28  ;;  %2264 = vmatprep.subr.bf16.mxu0 %v8031_v29  ;;  %v8094_v28 = vld [vmem:[#allocation14 + $0x328] ss:$16 sps:$4 sm:$0xff]   ;;  %v8101_v29 = vld [vmem:[#allocation14 + $0x344] ss:$16 sps:$4 sm:$0xff]  }
 0x16b   :  { %2490 = vmatprep.subr.bf16.mxu1 %v8034_v30  ;;  %v8104_v30 = vld [vmem:[#allocation14 + $0x34c] ss:$16 sps:$4 sm:$0xff]  }
 0x16c   :  { %2184 = vmatmul.mubr.bf16.vlgmr.msra.gmra.mrb[4].mxu0 %v7399_v31 }
 0x16d   :  { %2410 = vmatmul.mubr.bf16.vlgmr.msra.gmra.mrb[4].mxu1 %v7399_v31  ;;  %2265 = vmatpush1.bf16.msra.mxu0 %v8029_v34  ;;  %v7419_v31 = vcombine.low %v253_v18, %v255_v19  ;;  %v8099_v34 = vld [vmem:[#allocation14 + $0x340] ss:$16 sps:$4 sm:$0xff]   ;;  %v254_v19 = vld [vmem:[%s10390_s3 + $0xa8] sm:$0xff] }
 0x16e   :  { %2491 = vmatpush1.bf16.msra.mxu1 %v8032_v35  ;;  %2266 = vmatprep.subr.bf16.mxu0 %v8037_v36  ;;  %v8102_v35 = vld [vmem:[#allocation14 + $0x348] ss:$16 sps:$4 sm:$0xff]   ;;  %v8107_v36 = vld [vmem:[#allocation14 + $0x364] ss:$16 sps:$4 sm:$0xff]  }
 0x16f   :  { %2492 = vmatprep.subr.bf16.mxu1 %v8040_v37  ;;  %2193 = vmatprep.mubr.bf16.mxu0 %v7404_v38  ;;  %v8110_v37 = vld [vmem:[#allocation14 + $0x36c] ss:$16 sps:$4 sm:$0xff]  }
 0x170   :  { %2419 = vmatprep.mubr.bf16.mxu1 %v7404_v38  ;;  %v7424_v38 = vcombine.high %v257_v32, %v259_v33 }
 0x171   :  { %2267 = vmatpush1.bf16.msra.mxu0 %v8035_v26  ;;  %v8105_v26 = vld [vmem:[#allocation14 + $0x360] ss:$16 sps:$4 sm:$0xff]  }
 0x172   :  { %2493 = vmatpush1.bf16.msra.mxu1 %v8038_v27  ;;  %2268 = vmatprep.subr.bf16.mxu0 %v8045_v39  ;;  %v8108_v27 = vld [vmem:[#allocation14 + $0x368] ss:$16 sps:$4 sm:$0xff]   ;;  %v8115_v39 = vld [vmem:[#allocation14 + $0x384] ss:$16 sps:$4 sm:$0xff]  }
 0x173   :  { %2494 = vmatprep.subr.bf16.mxu1 %v8048_v40  ;;  %v8118_v40 = vld [vmem:[#allocation14 + $0x38c] ss:$16 sps:$4 sm:$0xff]  }
 0x174   :  { %2194 = vmatmul.mubr.bf16.gmra.mrb[8].mxu0 %v7403_v41 }
 0x175   :  { %2420 = vmatmul.mubr.bf16.gmra.mrb[8].mxu1 %v7403_v41  ;;  %2269 = vmatpush1.bf16.msra.mxu0 %v8043_v44  ;;  %v7423_v41 = vcombine.low %v257_v32, %v259_v33  ;;  %v8113_v44 = vld [vmem:[#allocation14 + $0x380] ss:$16 sps:$4 sm:$0xff]  }
 0x176   :  { %2495 = vmatpush1.bf16.msra.mxu1 %v8046_v45  ;;  %2270 = vmatprep.subr.bf16.mxu0 %v8051_v46  ;;  %v8116_v45 = vld [vmem:[#allocation14 + $0x388] ss:$16 sps:$4 sm:$0xff]   ;;  %v8121_v46 = vld [vmem:[#allocation14 + $0x3a4] ss:$16 sps:$4 sm:$0xff]  }
 0x177   :  { %2496 = vmatprep.subr.bf16.mxu1 %v8054_v47  ;;  %2203 = vmatprep.mubr.bf16.mxu0 %v7408_v48  ;;  %v8124_v47 = vld [vmem:[#allocation14 + $0x3ac] ss:$16 sps:$4 sm:$0xff]  }
 0x178   :  { %2429 = vmatprep.mubr.bf16.mxu1 %v7408_v48  ;;  %v7428_v48 = vcombine.high %v261_v42, %v263_v43 }
 0x179   :  { %2271 = vmatpush1.bf16.msra.mxu0 %v8049_v49  ;;  %v8119_v49 = vld [vmem:[#allocation14 + $0x3a0] ss:$16 sps:$4 sm:$0xff]  }
 0x17a   :  { %2497 = vmatpush1.bf16.msra.mxu1 %v8052_v50  ;;  %2272 = vmatprep.subr.bf16.mxu0 %v8059_v51  ;;  %v8122_v50 = vld [vmem:[#allocation14 + $0x3a8] ss:$16 sps:$4 sm:$0xff]   ;;  %v8129_v51 = vld [vmem:[#allocation14 + $0x3c4] ss:$16 sps:$4 sm:$0xff]  }
 0x17b   :  { %2498 = vmatprep.subr.bf16.mxu1 %v8062_v52  ;;  %v8132_v52 = vld [vmem:[#allocation14 + $0x3cc] ss:$16 sps:$4 sm:$0xff]  }
 0x17c   :  { %2204 = vmatmul.mubr.bf16.gmra.mrb[12].mxu0 %v7407_v53 }
 0x17d   :  { %2430 = vmatmul.mubr.bf16.gmra.mrb[12].mxu1 %v7407_v53  ;;  %2273 = vmatpush1.bf16.msra.mxu0 %v8057_v56  ;;  %v7427_v53 = vcombine.low %v261_v42, %v263_v43  ;;  %v8127_v56 = vld [vmem:[#allocation14 + $0x3c0] ss:$16 sps:$4 sm:$0xff]  }
 0x17e   :  { %2499 = vmatpush1.bf16.msra.mxu1 %v8060_v57  ;;  %2274 = vmatprep.subr.bf16.mxu0 %v8065_v58  ;;  %v8130_v57 = vld [vmem:[#allocation14 + $0x3c8] ss:$16 sps:$4 sm:$0xff]   ;;  %v8135_v58 = vld [vmem:[#allocation14 + $0x3e4] ss:$16 sps:$4 sm:$0xff]  }
 0x17f   :  { %2500 = vmatprep.subr.bf16.mxu1 %v8068_v59  ;;  %2213 = vmatprep.mubr.bf16.mxu0 %v7412_v60  ;;  %v8138_v59 = vld [vmem:[#allocation14 + $0x3ec] ss:$16 sps:$4 sm:$0xff]  }
 0x180   :  { %2439 = vmatprep.mubr.bf16.mxu1 %v7412_v60  ;;  %v7402_v60 = vcombine.high %v234_v54, %v236_v55 }
 0x181   :  { %2275 = vmatpush1.bf16.msra.mxu0 %v8063_v61  ;;  %v8133_v61 = vld [vmem:[#allocation14 + $0x3e0] ss:$16 sps:$4 sm:$0xff]  }
 0x182   :  { %2501 = vmatpush1.bf16.msra.mxu1 %v8066_v62  ;;  %2276 = vmatprep.subr.bf16.mxu0 %v8073_v63  ;;  %v8136_v62 = vld [vmem:[#allocation14 + $0x3e8] ss:$16 sps:$4 sm:$0xff]  }
 0x183   :  { %2502 = vmatprep.subr.bf16.mxu1 %v8076_v4  ;;  %v238_v63 = vld [vmem:[%s10390_s3 + $0x28] sm:$0xff]  ;;  %v240_v4 = vld [vmem:[%s10390_s3 + $0x38] sm:$0xff] }
 0x184   :  { %2214 = vmatmul.mubr.bf16.gmra.mrb[16].mxu0 %v7411_v5  ;;  %v7406_v6 = vcombine.high %v238_v63, %v240_v4 }
 0x185   :  { %2440 = vmatmul.mubr.bf16.gmra.mrb[16].mxu1 %v7411_v5  ;;  %2277 = vmatpush1.bf16.msra.mxu0 %v8071_v8  ;;  %v7401_v5 = vcombine.low %v234_v54, %v236_v55  ;;  %v244_v8 = vld [vmem:[%s10390_s3 + $0x58] sm:$0xff] }
 0x186   :  { %2503 = vmatpush1.bf16.msra.mxu1 %v8074_v9  ;;  %2278 = vmatprep.subr.bf16.mxu0 %v8079_v10  ;;  %v7405_v9 = vcombine.low %v238_v63, %v240_v4  ;;  %v7410_v10 = vcombine.high %v242_v7, %v244_v8 }
 0x187   :  { %2504 = vmatprep.subr.bf16.mxu1 %v8082_v11  ;;  %2223 = vmatprep.mubr.bf16.mxu0 %v7416_v12  ;;  %v246_v11 = vld [vmem:[%s10390_s3 + $0x68] sm:$0xff] }
 0x188   :  { %2449 = vmatprep.mubr.bf16.mxu1 %v7416_v12  ;;  %v248_v12 = vld [vmem:[%s10390_s3 + $0x78] sm:$0xff] }
 0x189   :  { %2279 = vmatpush1.bf16.msra.mxu0 %v8077_v13  ;;  %v7409_v13 = vcombine.low %v242_v7, %v244_v8 }
 0x18a   :  { %2505 = vmatpush1.bf16.msra.mxu1 %v8080_v14  ;;  %2280 = vmatprep.subr.bf16.mxu0 %v8087_v15  ;;  %v7414_v14 = vcombine.high %v246_v11, %v248_v12  ;;  %v250_v15 = vld [vmem:[%s10390_s3 + $0x88] sm:$0xff] }
 0x18b   :  { %2506 = vmatprep.subr.bf16.mxu1 %v8090_v16  ;;  %v252_v16 = vld [vmem:[%s10390_s3 + $0x98] sm:$0xff] }
 0x18c   :  { %2224 = vmatmul.mubr.bf16.gmra.mrb[20].mxu0 %v7415_v17  ;;  %v7418_v18 = vcombine.high %v250_v15, %v252_v16 }
 0x18d   :  { %2450 = vmatmul.mubr.bf16.gmra.mrb[20].mxu1 %v7415_v17  ;;  %2281 = vmatpush1.bf16.msra.mxu0 %v8085_v20  ;;  %v7413_v17 = vcombine.low %v246_v11, %v248_v12  ;;  %v256_v20 = vld [vmem:[%s10390_s3 + $0xb8] sm:$0xff]  ;;  %v2603_v11 = vld [vmem:[#allocation15] sm:$0xf] }
 0x18e   :  { %2507 = vmatpush1.bf16.msra.mxu1 %v8088_v21  ;;  %2282 = vmatprep.subr.bf16.mxu0 %v8093_v22  ;;  %v7417_v21 = vcombine.low %v250_v15, %v252_v16  ;;  %v7422_v22 = vcombine.high %v254_v19, %v256_v20 }
 0x18f   :  { %2508 = vmatprep.subr.bf16.mxu1 %v8096_v23  ;;  %2233 = vmatprep.mubr.bf16.mxu0 %v7420_v24  ;;  %v258_v23 = vld [vmem:[%s10390_s3 + $0xc8] sm:$0xff] }
 0x190   :  { %2459 = vmatprep.mubr.bf16.mxu1 %v7420_v24  ;;  %v260_v24 = vld [vmem:[%s10390_s3 + $0xd8] sm:$0xff] }
 0x191   :  { %2283 = vmatpush1.bf16.msra.mxu0 %v8091_v25  ;;  %v7421_v25 = vcombine.low %v254_v19, %v256_v20 }
 0x192   :  { %2509 = vmatpush1.bf16.msra.mxu1 %v8094_v28  ;;  %2284 = vmatprep.subr.bf16.mxu0 %v8101_v29  ;;  %v7426_v28 = vcombine.high %v258_v23, %v260_v24  ;;  %v262_v29 = vld [vmem:[%s10390_s3 + $0xe8] sm:$0xff] }
 0x193   :  { %2510 = vmatprep.subr.bf16.mxu1 %v8104_v30  ;;  %v264_v30 = vld [vmem:[%s10390_s3 + $0xf8] sm:$0xff] }
 0x194   :  { %2234 = vmatmul.mubr.bf16.gmra.mrb[24].mxu0 %v7419_v31  ;;  %v7430_v32 = vcombine.high %v262_v29, %v264_v30  ;;  %v7429_v33 = vcombine.low %v262_v29, %v264_v30 }
 0x195   :  { %2460 = vmatmul.mubr.bf16.gmra.mrb[24].mxu1 %v7419_v31  ;;  %2285 = vmatpush1.bf16.msra.mxu0 %v8099_v34  ;;  %v7425_v31 = vcombine.low %v258_v23, %v260_v24  ;;  %v399_v34 = vlaneseq }
 0x196   :  { %2511 = vmatpush1.bf16.msra.mxu1 %v8102_v35  ;;  %2286 = vmatprep.subr.bf16.mxu0 %v8107_v36 }
 0x197   :  { %2512 = vmatprep.subr.bf16.mxu1 %v8110_v37  ;;  %2243 = vmatprep.mubr.bf16.mxu0 %v7424_v38  ;;  %v9064_v35 = vshrl.u32 %v399_v34, 7  ;;  %v397_v37 = vld [vmem:[#allocation12] sm:$0xf] }
 0x198   :  { %2469 = vmatprep.mubr.bf16.mxu1 %v7424_v38 }
 0x199   :  { %2287 = vmatpush1.bf16.msra.mxu0 %v8105_v26  ;;  %v9067_v36 = vsub.s32 0, %v9064_v35  ;;  %v9070_v38 = vsub.s32 2, %v9064_v35  ;;  %v9073_v26 = vsub.s32 1, %v9064_v35 }
 0x19a   :  { %2513 = vmatpush1.bf16.msra.mxu1 %v8108_v27  ;;  %2288 = vmatprep.subr.bf16.mxu0 %v8115_v39  ;;  %v8753_v27 = vmov 1966171168  }
 0x19b   :  { %2514 = vmatprep.subr.bf16.mxu1 %v8118_v40  ;;  %10429 = vst [vmem:[#allocation49_spill] sm:$0xff] %v9067_v36  ;;  %10430 = vst [vmem:[#allocation50_spill] sm:$0xff] %v9070_v38  ;;  %v2698_v39 = vunpack.c.l.s4 %v8753_v27  ;;  %v9076_v40 = vsub.s32 3, %v9064_v35  ;;  %v410_v42 = vrot.slane %v397_v37, %v9070_v38  ;;  %v406_v43 = vrot.slane %v397_v37, %v9073_v26 }
 0x19c   :  { %2244 = vmatmul.mubr.bf16.gmra.mrb[28].mxu0 %v7423_v41  ;;  %10431 = vst [vmem:[#allocation51_spill] sm:$0xff] %v9073_v26  ;;  %v9087_v15 = vrot.slane %v2603_v11, %v9070_v38  ;;  %v9090_v16 = vrot.slane %v2603_v11, %v9073_v26 }
 0x19d   :  { %2470 = vmatmul.mubr.bf16.gmra.mrb[28].mxu1 %v7423_v41  ;;  %2289 = vmatpush1.bf16.msra.mxu0 %v8113_v44  ;;  %10432 = vst [vmem:[#allocation52_spill] sm:$0xff] %v9076_v40  ;;  %v402_v41 = vrot.slane %v397_v37, %v9067_v36  ;;  %v2699_v44 = vunpack.c.0.s8 %v2698_v39 }
 0x19e   :  { %2515 = vmatpush1.bf16.msra.mxu1 %v8116_v45  ;;  %2290 = vmatprep.subr.bf16.mxu0 %v8121_v46  ;;  %v414_v45 = vrot.slane %v397_v37, %v9076_v40 }
 0x19f   :  { %2516 = vmatprep.subr.bf16.mxu1 %v8124_v47  ;;  %2253 = vmatprep.mubr.bf16.mxu0 %v7428_v48 }
 0x1a0   :  { %2479 = vmatprep.mubr.bf16.mxu1 %v7428_v48 }
 0x1a1   :  { %2291 = vmatpush1.bf16.msra.mxu0 %v8119_v49 }
 0x1a2   :  { %2517 = vmatpush1.bf16.msra.mxu1 %v8122_v50  ;;  %2292 = vmatprep.subr.bf16.mxu0 %v8129_v51 }
 0x1a3   :  { %2518 = vmatprep.subr.bf16.mxu1 %v8132_v52  ;;  %v2702_v52 = vsub.s32 %v2699_v44, %v9064_v35 }
 0x1a4   :  { %2254 = vmatmul.mubr.bf16.gmra.mrb[32].mxu0 %v7427_v53 }
 0x1a5   :  { %2480 = vmatmul.mubr.bf16.gmra.mrb[32].mxu1 %v7427_v53  ;;  %2293 = vmatpush1.bf16.msra.mxu0 %v8127_v56 }
 0x1a6   :  { %2519 = vmatpush1.bf16.msra.mxu1 %v8130_v57  ;;  %2294 = vmatprep.subr.bf16.mxu0 %v8135_v58 }
 0x1a7   :  { %2520 = vmatprep.subr.bf16.mxu1 %v8138_v59  ;;  %2296 = vmatprep.mubr.bf16.mxu0 %v7402_v60 }
 0x1a8   :  { %2522 = vmatprep.mubr.bf16.mxu1 %v7402_v60 }
 0x1a9   :  { %2295 = vmatpush1.bf16.msra.mxu0 %v8133_v61 }
 0x1aa   :  { %2521 = vmatpush1.bf16.msra.mxu1 %v8136_v62 }
 0x1ac   :  { %2297 = vmatmul.mubr.bf16.vlgmr.msra.gmra.mrb[4].mxu0 %v7401_v5 }
 0x1ad   :  { %2523 = vmatmul.mubr.bf16.vlgmr.msra.gmra.mrb[4].mxu1 %v7401_v5  ;;  %2306 = vmatprep.mubr.bf16.mxu0 %v7406_v6 }
 0x1ae   :  { %2532 = vmatprep.mubr.bf16.mxu1 %v7406_v6 }
 0x1b4   :  { %2307 = vmatmul.mubr.bf16.gmra.mrb[8].mxu0 %v7405_v9 }
 0x1b5   :  { %2533 = vmatmul.mubr.bf16.gmra.mrb[8].mxu1 %v7405_v9  ;;  %2316 = vmatprep.mubr.bf16.mxu0 %v7410_v10 }
 0x1b6   :  { %2542 = vmatprep.mubr.bf16.mxu1 %v7410_v10 }
 0x1bc   :  { %2317 = vmatmul.mubr.bf16.gmra.mrb[12].mxu0 %v7409_v13 }
 0x1bd   :  { %2543 = vmatmul.mubr.bf16.gmra.mrb[12].mxu1 %v7409_v13  ;;  %2326 = vmatprep.mubr.bf16.mxu0 %v7414_v14 }
 0x1be   :  { %2552 = vmatprep.mubr.bf16.mxu1 %v7414_v14  ;;  %v9084_v14 = vrot.slane %v2603_v11, %v9067_v36 }
 0x1c4   :  { %2327 = vmatmul.mubr.bf16.gmra.mrb[16].mxu0 %v7413_v17 }
 0x1c5   :  { %2553 = vmatmul.mubr.bf16.gmra.mrb[16].mxu1 %v7413_v17  ;;  %2336 = vmatprep.mubr.bf16.mxu0 %v7418_v18  ;;  %v9093_v17 = vrot.slane %v2603_v11, %v9076_v40 }
 0x1c6   :  { %2562 = vmatprep.mubr.bf16.mxu1 %v7418_v18 }
 0x1cc   :  { %2337 = vmatmul.mubr.bf16.gmra.mrb[20].mxu0 %v7417_v21 }
 0x1cd   :  { %2563 = vmatmul.mubr.bf16.gmra.mrb[20].mxu1 %v7417_v21  ;;  %2346 = vmatprep.mubr.bf16.mxu0 %v7422_v22 }
 0x1ce   :  { %2572 = vmatprep.mubr.bf16.mxu1 %v7422_v22 }
 0x1d4   :  { %2347 = vmatmul.mubr.bf16.gmra.mrb[24].mxu0 %v7421_v25 }
 0x1d5   :  { %2573 = vmatmul.mubr.bf16.gmra.mrb[24].mxu1 %v7421_v25  ;;  %2356 = vmatprep.mubr.bf16.mxu0 %v7426_v28 }
 0x1d6   :  { %2582 = vmatprep.mubr.bf16.mxu1 %v7426_v28 }
 0x1dc   :  { %2357 = vmatmul.mubr.bf16.gmra.mrb[28].mxu0 %v7425_v31 }
 0x1dd   :  { %2583 = vmatmul.mubr.bf16.gmra.mrb[28].mxu1 %v7425_v31  ;;  %2366 = vmatprep.mubr.bf16.mxu0 %v7430_v32 }
 0x1de   :  { %2592 = vmatprep.mubr.bf16.mxu1 %v7430_v32 }
 0x1e4   :  { %2367 = vmatmul.mubr.bf16.gmra.mrb[32].mxu0 %v7429_v33 }
 0x1e5   :  { %2593 = vmatmul.mubr.bf16.gmra.mrb[32].mxu1 %v7429_v33 }
 0x1ff   :  { %v1134_v46 = vpop.f32.mrb[0].mxu0 }
 0x200   :  { %v7632_v47 = vadd.f32 %v1134_v46, %v402_v41  ;;  %v1216_v48 = vpop.f32.mrb[0].mxu1  ;;  %v1136_v49 = vpop.f32.mrb[1].mxu0 }
 0x201   :  { %v7634_v50 = vadd.f32 %v1216_v48, %v410_v42  ;;  %v7633_v51 = vadd.f32 %v1136_v49, %v406_v43  ;;  %v1218_v53 = vpop.f32.mrb[1].mxu1  ;;  %v1138_v54 = vpop.f32.mrb[2].mxu0 }
 0x202   :  { %v7635_v55 = vadd.f32 %v1218_v53, %v414_v45  ;;  %v1220_v56 = vpop.f32.mrb[2].mxu1  ;;  %v1139_v57 = vpop.f32.mrb[3].mxu0 }
 0x203   :  { %v2693_v58 = vcombine.low %v7632_v47, %v7633_v51  ;;  %v2694_v59 = vcombine.high %v7632_v47, %v7633_v51  ;;  %v1221_v60 = vpop.f32.mrb[3].mxu1 }
 0x204   :  { %v2695_v61 = vcombine.low %v7634_v50, %v7635_v55  ;;  %v2696_v62 = vcombine.high %v7634_v50, %v7635_v55 }
 0x205   :  { %v2703_v63 = vrot.slane %v2693_v58, %v2702_v52  ;;  %v2710_v4 = vrot.slane %v2694_v59, %v2702_v52 }
 0x206   :  { %v2717_v5 = vrot.slane %v2695_v61, %v2702_v52  ;;  %v2724_v6 = vrot.slane %v2696_v62, %v2702_v52 }
 0x208   :  { %v2725_v7 = vcombine.low %v2703_v63, %v2717_v5  ;;  %v2726_v8 = vcombine.high %v2703_v63, %v2717_v5  ;;  %v2727_v9 = vcombine.low %v2710_v4, %v2724_v6  ;;  %v2728_v10 = vcombine.high %v2710_v4, %v2724_v6 }
 0x20a   :  { %v2735_v12 = vrot.slane %v2725_v7, %v2702_v52  ;;  %v2749_v13 = vrot.slane %v2726_v8, %v2702_v52  ;;  %v9095_v18 = vrot.slane %v2727_v9, %v2702_v52  ;;  %v9097_v19 = vrot.slane %v2728_v10, %v2702_v52 }
 0x20c   :  { %v2764_v21 = vrot.slane %v2735_v12, %v9067_v36  ;;  %v2772_v22 = vrot.slane %v2735_v12, %v9070_v38  ;;  %v2768_v28 = vrot.slane %v2735_v12, %v9073_v26  ;;  %v2776_v29 = vrot.slane %v2735_v12, %v9076_v40 }
 0x20d   :  { %v2780_v30 = vrot.slane %v2749_v13, %v9067_v36  ;;  %v2788_v27 = vrot.slane %v2749_v13, %v9070_v38  ;;  %v2784_v39 = vrot.slane %v2749_v13, %v9073_v26  ;;  %v2757_v46 = vcombine.high %v2735_v12, %v2735_v12 }
 0x20e   :  { %v2792_v57 = vrot.slane %v2749_v13, %v9076_v40  ;;  %v2759_v58 = vcombine.high %v2749_v13, %v2749_v13  ;;  %v9117_v60 = vrot.slane %v9095_v18, %v9067_v36  ;;  %v9121_v61 = vrot.slane %v9095_v18, %v9070_v38 }
 0x20f   :  { %v9125_v63 = vrot.slane %v9095_v18, %v9073_v26  ;;  %v9129_v4 = vrot.slane %v9095_v18, %v9076_v40  ;;  %v9133_v5 = vrot.slane %v9097_v19, %v9067_v36  ;;  %v9137_v9 = vrot.slane %v2757_v46, %v9067_v36 }
 0x210   :  { %v9141_v10 = vrot.slane %v9097_v19, %v9070_v38 }
 0x27f   :  { %v2298_v20 = vpop.f32.mrb[4].mxu0 }
 0x280   :  { %v2625_v23 = vadd.f32 %v9084_v14, %v2298_v20  ;;  %v2524_v24 = vpop.f32.mrb[4].mxu1  ;;  %v2300_v25 = vpop.f32.mrb[5].mxu0 }
 0x281   :  { %v2627_v31 = vadd.f32 %v9087_v15, %v2524_v24  ;;  %v2626_v32 = vadd.f32 %v9090_v16, %v2300_v25  ;;  %v2526_v33 = vpop.f32.mrb[5].mxu1  ;;  %v2302_v37 = vpop.f32.mrb[6].mxu0 }
 0x282   :  { %v2921_v41 = vadd.f32 %v2764_v21, %v2625_v23  ;;  %v2628_v42 = vadd.f32 %v9093_v17, %v2526_v33  ;;  %v2629_v43 = vadd.f32 %v9084_v14, %v2302_v37  ;;  %v2528_v44 = vpop.f32.mrb[6].mxu1  ;;  %v2304_v45 = vpop.f32.mrb[7].mxu0 }
 0x283   :  { %v2923_v47 = vadd.f32 %v2772_v22, %v2627_v31  ;;  %v2922_v48 = vadd.f32 %v2768_v28, %v2626_v32  ;;  %v2631_v49 = vadd.f32 %v9087_v15, %v2528_v44  ;;  %v2630_v50 = vadd.f32 %v9090_v16, %v2304_v45  ;;  %v2530_v51 = vpop.f32.mrb[7].mxu1 }
 0x284   :  { %8155 = vtanh.f32 %v2921_v41  ;;  %v2924_v52 = vadd.f32 %v2776_v29, %v2628_v42  ;;  %v2925_v53 = vadd.f32 %v2764_v21, %v2629_v43  ;;  %v2632_v54 = vadd.f32 %v9093_v17, %v2530_v51 }
 0x285   :  { %v2927_v55 = vadd.f32 %v2772_v22, %v2631_v49  ;;  %v2926_v56 = vadd.f32 %v2768_v28, %v2630_v50  ;;  %8157 = vtanh.f32 %v2922_v48  ;;  %v9146_v21 = vrot.slane %v2757_v46, %v9070_v38 }
 0x286   :  { %v2928_v59 = vadd.f32 %v2776_v29, %v2632_v54  ;;  %8159 = vtanh.f32 %v2923_v47  ;;  %v2800_v45 = vrot.slane %v2757_v46, %v9073_v26  ;;  %v2808_v49 = vrot.slane %v2757_v46, %v9076_v40 }
 0x287   :  { %v2308_v62 = vpop.f32.mrb[8].mxu0  ;;  %8161 = vtanh.f32 %v2924_v52  ;;  %v9156_v50 = vrot.slane %v2759_v58, %v9067_v36  ;;  %v9166_v46 = vrot.slane %v2759_v58, %v9076_v40 }
 0x288   :  { %v2633_v6 = vadd.f32 %v9084_v14, %v2308_v62  ;;  %v2534_v7 = vpop.f32.mrb[8].mxu1  ;;  %v2310_v8 = vpop.f32.mrb[9].mxu0  ;;  %8163 = vtanh.f32 %v2925_v53 }
 0x289   :  { %v2635_v11 = vadd.f32 %v9087_v15, %v2534_v7  ;;  %v2634_v12 = vadd.f32 %v9090_v16, %v2310_v8  ;;  %v2536_v13 = vpop.f32.mrb[9].mxu1  ;;  %v2312_v20 = vpop.f32.mrb[10].mxu0  ;;  %8165 = vtanh.f32 %v2926_v56  ;;  %v9170_v56 = vrot.slane %v9097_v19, %v9073_v26 }
 0x28a   :  { %v2929_v22 = vadd.f32 %v2780_v30, %v2633_v6  ;;  %v2636_v23 = vadd.f32 %v9093_v17, %v2536_v13  ;;  %v2637_v24 = vadd.f32 %v9084_v14, %v2312_v20  ;;  %v2538_v25 = vpop.f32.mrb[10].mxu1  ;;  %v2314_v28 = vpop.f32.mrb[11].mxu0  ;;  %8167 = vtanh.f32 %v2927_v55 }
 0x28b   :  { %v2931_v29 = vadd.f32 %v2788_v27, %v2635_v11  ;;  %v2930_v31 = vadd.f32 %v2784_v39, %v2634_v12  ;;  %v2639_v32 = vadd.f32 %v9087_v15, %v2538_v25  ;;  %v2540_v33 = vpop.f32.mrb[11].mxu1  ;;  %v2638_v42 = vadd.f32 %v9090_v16, %v2314_v28 }
 0x28c   :  { %8169 = vtanh.f32 %v2929_v22  ;;  %v2932_v37 = vadd.f32 %v2792_v57, %v2636_v23  ;;  %v2933_v41 = vadd.f32 %v2780_v30, %v2637_v24  ;;  %v2640_v44 = vadd.f32 %v9093_v17, %v2540_v33 }
 0x28d   :  { %8171 = vtanh.f32 %v2928_v59  ;;  %v2935_v43 = vadd.f32 %v2788_v27, %v2639_v32  ;;  %v2934_v48 = vadd.f32 %v2784_v39, %v2638_v42  ;;  %v9159_v30 = vrot.slane %v2759_v58, %v9070_v38 }
 0x28e   :  { %v8156_v47 = vpop.eup %8155  ;;  %8173 = vtanh.f32 %v2930_v31  ;;  %v2936_v51 = vadd.f32 %v2792_v57, %v2640_v44  ;;  %v9162_v27 = vrot.slane %v2759_v58, %v9073_v26 }
 0x28f   :  { %8175 = vtanh.f32 %v2931_v29  ;;  %v2318_v52 = vpop.f32.mrb[12].mxu0  ;;  %v8158_v53 = vpop.eup %8157 }
 0x290   :  { %8177 = vtanh.f32 %v2932_v37  ;;  %v2641_v54 = vadd.f32 %v9084_v14, %v2318_v52  ;;  %v2544_v55 = vpop.f32.mrb[12].mxu1  ;;  %v2320_v39 = vpop.f32.mrb[13].mxu0  ;;  %v3049_v8 = vadd.f32 %v8158_v53, %v8156_v47  ;;  %v9185_v53 = vrot.slane %v9097_v19, %v9076_v40 }
 0x291   :  { %v8160_v57 = vpop.eup %8159  ;;  %8179 = vtanh.f32 %v2933_v41  ;;  %v2643_v59 = vadd.f32 %v9087_v15, %v2544_v55  ;;  %v2642_v62 = vadd.f32 %v9090_v16, %v2320_v39  ;;  %v2546_v6 = vpop.f32.mrb[13].mxu1 }
 0x292   :  { %v2322_v7 = vpop.f32.mrb[14].mxu0  ;;  %v8162_v11 = vpop.eup %8161  ;;  %8181 = vtanh.f32 %v2934_v48  ;;  %v2937_v12 = vadd.f32 %v9137_v9, %v2641_v54  ;;  %v2644_v58 = vadd.f32 %v9093_v17, %v2546_v6  ;;  %v9194_v6 = vcombine.high %v9097_v19, %v9097_v19 }
 0x293   :  { %v2645_v13 = vadd.f32 %v9084_v14, %v2322_v7  ;;  %v2548_v20 = vpop.f32.mrb[14].mxu1  ;;  %v2324_v22 = vpop.f32.mrb[15].mxu0  ;;  %8183 = vtanh.f32 %v2935_v43  ;;  %v2939_v24 = vadd.f32 %v9146_v21, %v2643_v59  ;;  %v2938_v25 = vadd.f32 %v2800_v45, %v2642_v62 }
 0x294   :  { %v8164_v23 = vpop.eup %8163  ;;  %v2647_v28 = vadd.f32 %v9087_v15, %v2548_v20  ;;  %v2550_v29 = vpop.f32.mrb[15].mxu1  ;;  %8185 = vtanh.f32 %v2937_v12  ;;  %v2940_v32 = vadd.f32 %v2808_v49, %v2644_v58  ;;  %v2646_v37 = vadd.f32 %v9090_v16, %v2324_v22 }
 0x295   :  { %v8166_v31 = vpop.eup %8165  ;;  %v2941_v33 = vadd.f32 %v9137_v9, %v2645_v13  ;;  %8187 = vtanh.f32 %v2936_v51  ;;  %v2648_v44 = vadd.f32 %v9093_v17, %v2550_v29  ;;  %v3050_v43 = vadd.f32 %v8160_v57, %v3049_v8 }
 0x296   :  { %v8168_v41 = vpop.eup %8167  ;;  %v2943_v42 = vadd.f32 %v9146_v21, %v2647_v28  ;;  %8189 = vtanh.f32 %v2938_v25  ;;  %v2942_v48 = vadd.f32 %v2800_v45, %v2646_v37  ;;  %v3054_v52 = vadd.f32 %v8166_v31, %v8164_v23 }
 0x297   :  { %v8170_v47 = vpop.eup %8169  ;;  %8191 = vtanh.f32 %v2939_v24  ;;  %v2944_v9 = vadd.f32 %v2808_v49, %v2648_v44  ;;  %v3051_v55 = vadd.f32 %v8162_v11, %v3050_v43  ;;  %v2328_v39 = vpop.f32.mrb[16].mxu0  ;;  %v9189_v51 = vcombine.high %v9095_v18, %v9095_v18 }
 0x298   :  { %v8172_v54 = vpop.eup %8171  ;;  %8193 = vtanh.f32 %v2940_v32  ;;  %v2649_v57 = vadd.f32 %v9084_v14, %v2328_v39  ;;  %v2554_v59 = vpop.f32.mrb[16].mxu1  ;;  %v3055_v62 = vadd.f32 %v8168_v41, %v3054_v52 }
 0x299   :  { %v8174_v21 = vpop.eup %8173  ;;  %v2330_v45 = vpop.f32.mrb[17].mxu0  ;;  %8195 = vtanh.f32 %v2941_v33  ;;  %3052 = vadd.xlane.f32.xlu0 %v3051_v55  ;;  %v2651_v49 = vadd.f32 %v9087_v15, %v2554_v59 }
 0x29a   :  { %v8176_v7 = vpop.eup %8175  ;;  %v2650_v8 = vadd.f32 %v9090_v16, %v2330_v45  ;;  %v2556_v18 = vpop.f32.mrb[17].mxu1  ;;  %v3059_v12 = vadd.f32 %v8174_v21, %v8170_v47  ;;  %8197 = vtanh.f32 %v2942_v48  ;;  %v2945_v13 = vadd.f32 %v9156_v50, %v2649_v57 }
 0x29b   :  { %v2332_v11 = vpop.f32.mrb[18].mxu0  ;;  %v8178_v58 = vpop.eup %8177  ;;  %v2652_v20 = vadd.f32 %v9093_v17, %v2556_v18  ;;  %8199 = vtanh.f32 %v2943_v42  ;;  %v2947_v25 = vadd.f32 %v9159_v30, %v2651_v49  ;;  %v3056_v47 = vadd.f32 %v8172_v54, %v3055_v62 }
 0x29c   :  { %v2653_v22 = vadd.f32 %v9084_v14, %v2332_v11  ;;  %v2558_v19 = vpop.f32.mrb[18].mxu1  ;;  %v2334_v23 = vpop.f32.mrb[19].mxu0  ;;  %v2946_v28 = vadd.f32 %v9162_v27, %v2650_v8  ;;  %8201 = vtanh.f32 %v2945_v13  ;;  %v3060_v55 = vadd.f32 %v8176_v7, %v3059_v12 }
 0x29d   :  { %v8180_v24 = vpop.eup %8179  ;;  %v2655_v29 = vadd.f32 %v9087_v15, %v2558_v19  ;;  %v2560_v31 = vpop.f32.mrb[19].mxu1  ;;  %v2948_v33 = vadd.f32 %v9166_v46, %v2652_v20  ;;  %v2654_v41 = vadd.f32 %v9090_v16, %v2334_v23  ;;  %8203 = vtanh.f32 %v2944_v9  ;;  %3057 = vadd.xlane.f32.xlu0 %v3056_v47 }
 0x29e   :  { %v8182_v32 = vpop.eup %8181  ;;  %v2949_v37 = vadd.f32 %v9156_v50, %v2653_v22  ;;  %v2656_v42 = vadd.f32 %v9093_v17, %v2560_v31  ;;  %8205 = vtanh.f32 %v2946_v28  ;;  %v9213_v9 = vrot.slane %v9189_v51, %v9067_v36 }
 0x29f   :  { %v8184_v44 = vpop.eup %8183  ;;  %v2951_v43 = vadd.f32 %v9159_v30, %v2655_v29  ;;  %v2950_v52 = vadd.f32 %v9162_v27, %v2654_v41  ;;  %v3064_v39 = vadd.f32 %v8182_v32, %v8180_v24  ;;  %8207 = vtanh.f32 %v2947_v25  ;;  %v2338_v50 = vpop.f32.mrb[20].mxu0 }
 0x2a0   :  { %v8186_v48 = vpop.eup %8185  ;;  %v2952_v57 = vadd.f32 %v9166_v46, %v2656_v42  ;;  %v9217_v30 = vrot.slane %v9189_v51, %v9070_v38  ;;  %8209 = vtanh.f32 %v2948_v33  ;;  %v3061_v59 = vadd.f32 %v8178_v58, %v3060_v55  ;;  %v2564_v45 = vpop.f32.mrb[20].mxu1 }
 0x2a1   :  { %v8188_v21 = vpop.eup %8187  ;;  %v2657_v27 = vadd.f32 %v9084_v14, %v2338_v50  ;;  %v2340_v62 = vpop.f32.mrb[21].mxu0  ;;  %v3065_v7 = vadd.f32 %v8184_v44, %v3064_v39  ;;  %8211 = vtanh.f32 %v2949_v37  ;;  %v2659_v46 = vadd.f32 %v9087_v15, %v2564_v45 }
 0x2a2   :  { %v8190_v54 = vpop.eup %8189  ;;  %v2658_v8 = vadd.f32 %v9090_v16, %v2340_v62  ;;  %v2566_v18 = vpop.f32.mrb[21].mxu1  ;;  %8213 = vtanh.f32 %v2950_v52  ;;  %3062 = vadd.xlane.f32.xlu1 %v3061_v59 }
 0x2a3   :  { %v8192_v49 = vpop.eup %8191  ;;  %v2342_v11 = vpop.f32.mrb[22].mxu0  ;;  %v3069_v12 = vadd.f32 %v8190_v54, %v8186_v48  ;;  %v2953_v20 = vadd.f32 %v9117_v60, %v2657_v27  ;;  %v2660_v58 = vadd.f32 %v9093_v17, %v2566_v18  ;;  %8215 = vtanh.f32 %v2951_v43 }
 0x2a4   :  { %v8194_v13 = vpop.eup %8193  ;;  %v2661_v22 = vadd.f32 %v9084_v14, %v2342_v11  ;;  %v2568_v19 = vpop.f32.mrb[22].mxu1  ;;  %v2955_v25 = vadd.f32 %v9121_v61, %v2659_v46  ;;  %v2954_v28 = vadd.f32 %v9125_v63, %v2658_v8  ;;  %v3066_v47 = vadd.f32 %v8188_v21, %v3065_v7 }
 0x2a5   :  { %v2344_v23 = vpop.f32.mrb[23].mxu0  ;;  %v8196_v24 = vpop.eup %8195  ;;  %v2663_v29 = vadd.f32 %v9087_v15, %v2568_v19  ;;  %8217 = vtanh.f32 %v2953_v20  ;;  %v2956_v33 = vadd.f32 %v9129_v4, %v2660_v58  ;;  %v3070_v55 = vadd.f32 %v8192_v49, %v3069_v12 }
 0x2a6   :  { %v2570_v31 = vpop.f32.mrb[23].mxu1  ;;  %v8198_v32 = vpop.eup %8197  ;;  %v2957_v37 = vadd.f32 %v9117_v60, %v2661_v22  ;;  %v2662_v41 = vadd.f32 %v9090_v16, %v2344_v23  ;;  %8219 = vtanh.f32 %v2952_v57  ;;  %3067 = vadd.xlane.f32.xlu1 %v3066_v47  ;;  %v9237_v57 = vrot.slane %v9189_v51, %v9073_v26 }
 0x2a7   :  { %v8200_v44 = vpop.eup %8199  ;;  %v2959_v42 = vadd.f32 %v9121_v61, %v2663_v29  ;;  %v2664_v43 = vadd.f32 %v9093_v17, %v2570_v31  ;;  %8221 = vtanh.f32 %v2954_v28  ;;  %v3074_v39 = vadd.f32 %v8198_v32, %v8196_v24  ;;  %v2348_v60 = vpop.f32.mrb[24].mxu0 }
 0x2a8   :  { %v8202_v48 = vpop.eup %8201  ;;  %v2958_v52 = vadd.f32 %v9125_v63, %v2662_v41  ;;  %8223 = vtanh.f32 %v2955_v25  ;;  %v9241_v61 = vrot.slane %v9189_v51, %v9076_v40  ;;  %v3071_v59 = vadd.f32 %v8194_v13, %v3070_v55  ;;  %v2574_v27 = vpop.f32.mrb[24].mxu1 }
 0x2a9   :  { %v8204_v50 = vpop.eup %8203  ;;  %v2960_v54 = vadd.f32 %v9129_v4, %v2664_v43  ;;  %8225 = vtanh.f32 %v2956_v33  ;;  %v2665_v63 = vadd.f32 %v9084_v14, %v2348_v60  ;;  %v2350_v45 = vpop.f32.mrb[25].mxu0  ;;  %v3075_v62 = vadd.f32 %v8200_v44, %v3074_v39 }
 0x2aa   :  { %v8206_v21 = vpop.eup %8205  ;;  %8227 = vtanh.f32 %v2957_v37  ;;  %v2667_v4 = vadd.f32 %v9087_v15, %v2574_v27  ;;  %v2666_v49 = vadd.f32 %v9090_v16, %v2350_v45  ;;  %v2576_v46 = vpop.f32.mrb[25].mxu1  ;;  %3072 = vadd.xlane.f32.xlu0 %v3071_v59 }
 0x2ab   :  { %v8208_v7 = vpop.eup %8207  ;;  %v2352_v8 = vpop.f32.mrb[26].mxu0  ;;  %v3079_v18 = vadd.f32 %v8206_v21, %v8202_v48  ;;  %8229 = vtanh.f32 %v2958_v52  ;;  %v2961_v51 = vadd.f32 %v9133_v5, %v2665_v63  ;;  %v2668_v12 = vadd.f32 %v9093_v17, %v2576_v46 }
 0x2ac   :  { %v8210_v11 = vpop.eup %8209  ;;  %v3076_v13 = vadd.f32 %v8204_v50, %v3075_v62  ;;  %v2578_v20 = vpop.f32.mrb[26].mxu1  ;;  %8231 = vtanh.f32 %v2959_v42  ;;  %v2963_v19 = vadd.f32 %v9141_v10, %v2667_v4  ;;  %v2962_v23 = vadd.f32 %v9170_v56, %v2666_v49 }
 0x2ad   :  { %v2354_v58 = vpop.f32.mrb[27].mxu0  ;;  %v8212_v22 = vpop.eup %8211  ;;  %v2669_v24 = vadd.f32 %v9084_v14, %v2352_v8  ;;  %8233 = vtanh.f32 %v2961_v51  ;;  %v2964_v29 = vadd.f32 %v9185_v53, %v2668_v12  ;;  %v2671_v31 = vadd.f32 %v9087_v15, %v2578_v20 }
 0x2ae   :  { %v2580_v25 = vpop.f32.mrb[27].mxu1  ;;  %v8214_v28 = vpop.eup %8213  ;;  %3077 = vadd.xlane.f32.xlu1 %v3076_v13  ;;  %v2670_v32 = vadd.f32 %v9090_v16, %v2354_v58  ;;  %8235 = vtanh.f32 %v2960_v54  ;;  %v3080_v44 = vadd.f32 %v8208_v7, %v3079_v18  ;;  %v9261_v54 = vrot.slane %v9194_v6, %v9067_v36 }
 0x2af   :  { %v8216_v33 = vpop.eup %8215  ;;  %v2965_v37 = vadd.f32 %v9133_v5, %v2669_v24  ;;  %v2672_v41 = vadd.f32 %v9093_v17, %v2580_v25  ;;  %8237 = vtanh.f32 %v2962_v23  ;;  %v2967_v43 = vadd.f32 %v9141_v10, %v2671_v31  ;;  %v2358_v50 = vpop.f32.mrb[28].mxu0 }
 0x2b0   :  { %v8218_v42 = vpop.eup %8217  ;;  %v2966_v47 = vadd.f32 %v9170_v56, %v2670_v32  ;;  %v3084_v48 = vadd.f32 %v8214_v28, %v8212_v22  ;;  %8239 = vtanh.f32 %v2963_v19  ;;  %v3081_v39 = vadd.f32 %v8210_v11, %v3080_v44  ;;  %v2584_v21 = vpop.f32.mrb[28].mxu1 }
 0x2b1   :  { %v8220_v52 = vpop.eup %8219  ;;  %v2968_v55 = vadd.f32 %v9185_v53, %v2672_v41  ;;  %8241 = vtanh.f32 %v2964_v29  ;;  %v2673_v60 = vadd.f32 %v9084_v14, %v2358_v50  ;;  %v2360_v59 = vpop.f32.mrb[29].mxu0  ;;  %v9266_v56 = vrot.slane %v9194_v6, %v9070_v38 }
 0x2b2   :  { %v8222_v5 = vpop.eup %8221  ;;  %v3085_v10 = vadd.f32 %v8216_v33, %v3084_v48  ;;  %8243 = vtanh.f32 %v2965_v37  ;;  %3082 = vadd.xlane.f32.xlu0 %v3081_v39  ;;  %v2675_v53 = vadd.f32 %v9087_v15, %v2584_v21  ;;  %v2674_v27 = vadd.f32 %v9090_v16, %v2360_v59  ;;  %v2586_v45 = vpop.f32.mrb[29].mxu1 }
 0x2b3   :  { %v8224_v63 = vpop.eup %8223  ;;  %v2362_v62 = vpop.f32.mrb[30].mxu0  ;;  %v3089_v7 = vadd.f32 %v8222_v5, %v8218_v42  ;;  %8245 = vtanh.f32 %v2966_v47  ;;  %v2969_v49 = vadd.f32 %v9213_v9, %v2673_v60  ;;  %v2676_v46 = vadd.f32 %v9093_v17, %v2586_v45 }
 0x2b4   :  { %v8226_v4 = vpop.eup %8225  ;;  %v3086_v8 = vadd.f32 %v8220_v52, %v3085_v10  ;;  %v2588_v18 = vpop.f32.mrb[30].mxu1  ;;  %8247 = vtanh.f32 %v2967_v43  ;;  %v2971_v12 = vadd.f32 %v9217_v30, %v2675_v53  ;;  %v2970_v13 = vadd.f32 %v9237_v57, %v2674_v27 }
 0x2b5   :  { %v2364_v11 = vpop.f32.mrb[31].mxu0  ;;  %v8228_v51 = vpop.eup %8227  ;;  %v2677_v20 = vadd.f32 %v9084_v14, %v2362_v62  ;;  %8249 = vtanh.f32 %v2969_v49  ;;  %v2972_v19 = vadd.f32 %v9241_v61, %v2676_v46  ;;  %v2679_v23 = vadd.f32 %v9087_v15, %v2588_v18 }
 0x2b6   :  { %v2590_v58 = vpop.f32.mrb[31].mxu1  ;;  %v8230_v22 = vpop.eup %8229  ;;  %3087 = vadd.xlane.f32.xlu1 %v3086_v8  ;;  %v2678_v24 = vadd.f32 %v9090_v16, %v2364_v11  ;;  %8251 = vtanh.f32 %v2968_v55  ;;  %v3090_v31 = vadd.f32 %v8224_v63, %v3089_v7  ;;  %v2880_v48 = vrot.slane %v9194_v6, %v9073_v26 }
 0x2b7   :  { %v8232_v25 = vpop.eup %8231  ;;  %v2973_v28 = vadd.f32 %v9213_v9, %v2677_v20  ;;  %v2680_v29 = vadd.f32 %v9093_v17, %v2590_v58  ;;  %8253 = vtanh.f32 %v2970_v13  ;;  %v2975_v33 = vadd.f32 %v9217_v30, %v2679_v23  ;;  %v2368_v47 = vpop.f32.mrb[32].mxu0 }
 0x2b8   :  { %v8234_v32 = vpop.eup %8233  ;;  %v2974_v37 = vadd.f32 %v9237_v57, %v2678_v24  ;;  %v3094_v41 = vadd.f32 %v8230_v22, %v8228_v51  ;;  %8255 = vtanh.f32 %v2971_v12  ;;  %v3091_v43 = vadd.f32 %v8226_v4, %v3090_v31  ;;  %v2594_v55 = vpop.f32.mrb[32].mxu1 }
 0x2b9   :  { %v8236_v44 = vpop.eup %8235  ;;  %v2976_v42 = vadd.f32 %v9241_v61, %v2680_v29  ;;  %8257 = vtanh.f32 %v2973_v28  ;;  %v2681_v52 = vadd.f32 %v9084_v14, %v2368_v47  ;;  %v2370_v39 = vpop.f32.mrb[33].mxu0  ;;  %v2888_v30 = vrot.slane %v9194_v6, %v9076_v40 }
 0x2ba   :  { %v8238_v9 = vpop.eup %8237  ;;  %v3095_v57 = vadd.f32 %v8232_v25, %v3094_v41  ;;  %8259 = vtanh.f32 %v2972_v19  ;;  %3092 = vadd.xlane.f32.xlu0 %v3091_v43  ;;  %v2683_v61 = vadd.f32 %v9087_v15, %v2594_v55  ;;  %v2682_v5 = vadd.f32 %v9090_v16, %v2370_v39  ;;  %v2596_v60 = vpop.f32.mrb[33].mxu1 }
 0x2bb   :  { %v8240_v50 = vpop.eup %8239  ;;  %v2372_v21 = vpop.f32.mrb[34].mxu0  ;;  %v3099_v59 = vadd.f32 %v8238_v9, %v8234_v32  ;;  %8261 = vtanh.f32 %v2974_v37  ;;  %v2977_v63 = vadd.f32 %v9261_v54, %v2681_v52  ;;  %v2684_v53 = vadd.f32 %v9093_v17, %v2596_v60 }
 0x2bc   :  { %v8242_v10 = vpop.eup %8241  ;;  %v3096_v27 = vadd.f32 %v8236_v44, %v3095_v57  ;;  %v2598_v45 = vpop.f32.mrb[34].mxu1  ;;  %8263 = vtanh.f32 %v2975_v33  ;;  %v2979_v7 = vadd.f32 %v9266_v56, %v2683_v61  ;;  %v2978_v4 = vadd.f32 %v2880_v48, %v2682_v5 }
 0x2bd   :  { %v2374_v6 = vpop.f32.mrb[35].mxu0  ;;  %v8244_v62 = vpop.eup %8243  ;;  %v2685_v49 = vadd.f32 %v9084_v14, %v2372_v21  ;;  %8265 = vtanh.f32 %v2977_v63  ;;  %v2980_v18 = vadd.f32 %v2888_v30, %v2684_v53  ;;  %v2687_v11 = vadd.f32 %v9087_v15, %v2598_v45 }
 0x2be   :  { %v2600_v46 = vpop.f32.mrb[35].mxu1  ;;  %v8246_v8 = vpop.eup %8245  ;;  %3097 = vadd.xlane.f32.xlu1 %v3096_v27  ;;  %v2686_v51 = vadd.f32 %v9090_v16, %v2374_v6  ;;  %8267 = vtanh.f32 %v2976_v42  ;;  %v3100_v58 = vadd.f32 %v8240_v50, %v3099_v59 }
 0x2bf   :  { %v8248_v12 = vpop.eup %8247  ;;  %v2981_v13 = vadd.f32 %v9261_v54, %v2685_v49  ;;  %v2688_v20 = vadd.f32 %v9093_v17, %v2600_v46  ;;  %8269 = vtanh.f32 %v2978_v4  ;;  %v2983_v14 = vadd.f32 %v9266_v56, %v2687_v11 }
 0x2c0   :  { %v8250_v22 = vpop.eup %8249  ;;  %v2982_v19 = vadd.f32 %v2880_v48, %v2686_v51  ;;  %v3104_v23 = vadd.f32 %v8246_v8, %v8244_v62  ;;  %8271 = vtanh.f32 %v2979_v7  ;;  %v3101_v28 = vadd.f32 %v8242_v10, %v3100_v58 }
 0x2c1   :  { %v8252_v24 = vpop.eup %8251  ;;  %v2984_v25 = vadd.f32 %v2888_v30, %v2688_v20  ;;  %8273 = vtanh.f32 %v2981_v13  ;;  %v9300_v8 = vand.u32 127, %v399_v34 }
 0x2c2   :  { %v8254_v15 = vpop.eup %8253  ;;  %v3105_v16 = vadd.f32 %v8248_v12, %v3104_v23  ;;  %8275 = vtanh.f32 %v2980_v18  ;;  %3102 = vadd.xlane.f32.xlu0 %v3101_v28 }
 0x2c3   :  { %v8256_v29 = vpop.eup %8255  ;;  %v3109_v54 = vadd.f32 %v8254_v15, %v8250_v22  ;;  %8277 = vtanh.f32 %v2982_v19  ;;  %10433 = vst [vmem:[#allocation53_spill] sm:$0xff] %v9300_v8  ;;  %v3167_v18 = vadd.s32 4294967288, %v9300_v8  ;;  %v9318_v34 = vsub.s32 %v9300_v8, %v9064_v35 }
 0x2c4   :  { %v8258_v31 = vpop.eup %8257  ;;  %v3106_v17 = vadd.f32 %v8252_v24, %v3105_v16  ;;  %8279 = vtanh.f32 %v2983_v14 }
 0x2c5   :  { %v8260_v32 = vpop.eup %8259  ;;  %v3110_v33 = vadd.f32 %v8256_v29, %v3109_v54  ;;  %8281 = vtanh.f32 %v2984_v25  ;;  %v9308_v20 = vsub.s32 %v3167_v18, %v9064_v35 }
 0x2c6   :  { %v8262_v37 = vpop.eup %8261  ;;  %3107 = vadd.xlane.f32.xlu1 %v3106_v17 }
 0x2c7   :  { %v8264_v56 = vpop.eup %8263  ;;  %v3111_v41 = vadd.f32 %v8260_v32, %v3110_v33  ;;  %v3114_v44 = vadd.f32 %v8262_v37, %v8258_v31 }
 0x2c8   :  { %v8266_v42 = vpop.eup %8265 }
 0x2c9   :  { %v8268_v43 = vpop.eup %8267  ;;  %3112 = vadd.xlane.f32.xlu0 %v3111_v41  ;;  %v3115_v47 = vadd.f32 %v8264_v56, %v3114_v44 }
 0x2ca   :  { %v8270_v48 = vpop.eup %8269 }
 0x2cb   :  { %v8272_v9 = vpop.eup %8271  ;;  %v3116_v52 = vadd.f32 %v8268_v43, %v3115_v47  ;;  %v3119_v55 = vadd.f32 %v8270_v48, %v8266_v42 }
 0x2cc   :  { %v8274_v39 = vpop.eup %8273 }
 0x2cd   :  { %v8276_v30 = vpop.eup %8275  ;;  %3117 = vadd.xlane.f32.xlu1 %v3116_v52  ;;  %v3120_v57 = vadd.f32 %v8272_v9, %v3119_v55 }
 0x2ce   :  { %v8278_v50 = vpop.eup %8277 }
 0x2cf   :  { %v3121_v61 = vadd.f32 %v8276_v30, %v3120_v57  ;;  %v3124_v5 = vadd.f32 %v8278_v50, %v8274_v39  ;;  %v8280_v60 = vpop.eup %8279 }
 0x2d0   :  { %v8282_v59 = vpop.eup %8281 }
 0x2d1   :  { %3122 = vadd.xlane.f32.xlu0 %v3121_v61  ;;  %v3125_v21 = vadd.f32 %v8280_v60, %v3124_v5 }
 0x2d3   :  { %v3126_v10 = vadd.f32 %v8282_v59, %v3125_v21 }
 0x2d5   :  { %3127 = vadd.xlane.f32.xlu1 %v3126_v10 }
 0x326   :  { %v3053_v63 = vpop.xlane.xlu0 %3052 }
 0x327   :  { %v9324_v28 = vmul.f32 0.01953125, %v3053_v63 }
 0x329   :  { %v3166_v47 = vrot.slane %v9324_v28, %v9318_v34 }
 0x32a   :  { %v3058_v27 = vpop.xlane.xlu0 %3057 }
 0x32b   :  { %v9310_v58 = vmul.f32 0.01953125, %v3058_v27 }
 0x32d   :  { %v3171_v32 = vrot.slane %v9310_v58, %v9308_v20 }
 0x32f   :  { %v3063_v53 = vpop.xlane.xlu1 %3062  ;;  %v3173_v57 = vsel %vm3172_vm0, %v3171_v32, %v3166_v47  ;;  %v9395_v32 = vsub.s32 5, %v9064_v35 }
 0x330   :  { %v9312_v22 = vmul.f32 0.01953125, %v3063_v53 }
 0x331   :  { %10434 = vst [vmem:[#allocation54_spill] sm:$0xff] %v9395_v32 }
 0x332   :  { %v3177_v33 = vrot.slane %v9312_v22, %v9318_v34 }
 0x333   :  { %v3068_v45 = vpop.xlane.xlu1 %3067 }
 0x334   :  { %v9303_v12 = vmul.f32 0.01953125, %v3068_v45 }
 0x336   :  { %v3181_v15 = vrot.slane %v9303_v12, %v9308_v20 }
 0x337   :  { %v3073_v6 = vpop.xlane.xlu0 %3072 }
 0x338   :  { %v9320_v19 = vmul.f32 0.01953125, %v3073_v6  ;;  %v3182_v48 = vsel %vm3172_vm0, %v3181_v15, %v3177_v33 }
 0x339   :  { %v3238_v60 = vsel %vm3237_vm1, %v3182_v48, %v3173_v57 }
 0x33a   :  { %v3186_v41 = vrot.slane %v9320_v19, %v9318_v34 }
 0x33b   :  { %v3078_v62 = vpop.xlane.xlu1 %3077 }
 0x33c   :  { %v9305_v13 = vmul.f32 0.01953125, %v3078_v62 }
 0x33e   :  { %v3190_v54 = vrot.slane %v9305_v13, %v9308_v20 }
 0x33f   :  { %v3083_v7 = vpop.xlane.xlu0 %3082 }
 0x340   :  { %v9328_v16 = vmul.f32 0.01953125, %v3083_v7  ;;  %v3191_v55 = vsel %vm3172_vm0, %v3190_v54, %v3186_v41 }
 0x341   :  { %v3240_v63 = vsel %vm3239_vm2, %v3191_v55, %v3238_v60 }
 0x342   :  { %v3195_v9 = vrot.slane %v9328_v16, %v9318_v34 }
 0x343   :  { %v3088_v4 = vpop.xlane.xlu1 %3087 }
 0x344   :  { %v9314_v14 = vmul.f32 0.01953125, %v3088_v4 }
 0x346   :  { %v3199_v37 = vrot.slane %v9314_v14, %v9308_v20 }
 0x347   :  { %v3093_v49 = vpop.xlane.xlu0 %3092 }
 0x348   :  { %v9334_v31 = vmul.f32 0.01953125, %v3093_v49  ;;  %v3200_v50 = vsel %vm3172_vm0, %v3199_v37, %v3195_v9 }
 0x349   :  { %v3242_v45 = vsel %vm3241_vm3, %v3200_v50, %v3240_v63  ;;  %v9426_v63 = vsub.s32 4, %v9064_v35 }
 0x34a   :  { %v3204_v39 = vrot.slane %v9334_v31, %v9318_v34 }
 0x34b   :  { %v3098_v46 = vpop.xlane.xlu1 %3097  ;;  %10437 = vst [vmem:[#allocation57_spill] sm:$0xff] %v9426_v63 }
 0x34c   :  { %v9322_v23 = vmul.f32 0.01953125, %v3098_v46 }
 0x34e   :  { %v3208_v44 = vrot.slane %v9322_v23, %v9308_v20 }
 0x34f   :  { %v3103_v11 = vpop.xlane.xlu0 %3102 }
 0x350   :  { %v9344_v56 = vmul.f32 0.01953125, %v3103_v11  ;;  %v3209_v21 = vsel %vm3172_vm0, %v3208_v44, %v3204_v39  ;;  %v9401_v44 = vsub.s32 6, %v9064_v35 }
 0x351   :  { %v3244_v4 = vsel %vm3243_vm4, %v3209_v21, %v3242_v45 }
 0x352   :  { %v3213_v61 = vrot.slane %v9344_v56, %v9318_v34  ;;  %10435 = vst [vmem:[#allocation55_spill] sm:$0xff] %v9401_v44 }
 0x353   :  { %v3108_v51 = vpop.xlane.xlu1 %3107 }
 0x354   :  { %v9330_v29 = vmul.f32 0.01953125, %v3108_v51 }
 0x356   :  { %v3113_v24 = vpop.xlane.xlu0 %3112  ;;  %v3217_v52 = vrot.slane %v9330_v29, %v9308_v20 }
 0x357   :  { %v9350_v42 = vmul.f32 0.01953125, %v3113_v24  ;;  %v10405_v24 = vmov 0  }
 0x358   :  { %v3218_v53 = vsel %vm3172_vm0, %v3217_v52, %v3213_v61  ;;  %7738 = vset.pattern.permute.xlu0 %v10405_v24  ;;  %7737 = vset.pattern.permute.xlu1 %v10405_v24 }
 0x359   :  { %v3222_v59 = vrot.slane %v9350_v42, %v9318_v34  ;;  %v3246_v49 = vsel %vm3245_vm5, %v3218_v53, %v3244_v4 }
 0x35a   :  { %v3118_v25 = vpop.xlane.xlu1 %3117 }
 0x35b   :  { %v9336_v17 = vmul.f32 0.01953125, %v3118_v25 }
 0x35d   :  { %v3226_v30 = vrot.slane %v9336_v17, %v9308_v20 }
 0x35e   :  { %v3123_v43 = vpop.xlane.xlu0 %3122 }
 0x35f   :  { %v9368_v5 = vmul.f32 0.01953125, %v3123_v43  ;;  %v3227_v6 = vsel %vm3172_vm0, %v3226_v30, %v3222_v59 }
 0x360   :  { %v3248_v18 = vsel %vm3247_vm6, %v3227_v6, %v3246_v49 }
 0x361   :  { %v3231_v62 = vrot.slane %v9368_v5, %v9318_v34 }
 0x362   :  { %v3128_v10 = vpop.xlane.xlu1 %3127 }
 0x363   :  { %v9376_v27 = vmul.f32 0.01953125, %v3128_v10 }
 0x365   :  { %v3235_v7 = vrot.slane %v9376_v27, %v9308_v20 }
 0x367   :  { %v3236_v46 = vsel %vm3172_vm0, %v3235_v7, %v3231_v62 }
 0x368   :  { %v3250_v11 = vsel %vm3249_vm7, %v3236_v46, %v3248_v18 }
 0x369   :  { %v3253_v51 = vsel %vm3252_vm8, %v3250_v11, -inf }
 0x36a   :  { %3254 = vmax.xlane.f32.xlu0 %v3253_v51 }
 0x3f7   :  { %v3255_v25 = vpop.xlane.xlu0 %3254 }
 0x3f8   :  { %v3260_v15 = vrot.slane %v3255_v25, %v9067_v36  ;;  %v3264_v54 = vrot.slane %v3255_v25, %v9073_v26  ;;  %v9404_v43 = vrot.slane %v3255_v25, %v9395_v32  ;;  %v3268_v9 = vrot.slane %v3255_v25, %v9070_v38 }
 0x3f9   :  { %v3272_v61 = vrot.slane %v3255_v25, %v9076_v40 }
 0x3fa   :  { %v3297_v33 = vsub.f32 %v9324_v28, %v3260_v15  ;;  %v3298_v37 = vsub.f32 %v9310_v58, %v3260_v15  ;;  %v3299_v41 = vsub.f32 %v9312_v22, %v3264_v54  ;;  %v3300_v52 = vsub.f32 %v9303_v12, %v3264_v54 }
 0x3fb   :  { %v9409_v28 = vsub.s32 7, %v9064_v35  ;;  %v3284_v58 = vrot.slane %v3255_v25, %v9401_v44  ;;  %v3307_v22 = vsub.f32 %v9344_v56, %v9404_v43  ;;  %v3301_v39 = vsub.f32 %v9320_v19, %v3268_v9 }
 0x3fc   :  { %v3313_v47 = vmul.f32 1.442695, %v3297_v33  ;;  %v3315_v48 = vmul.f32 1.442695, %v3298_v37  ;;  %v3317_v55 = vmul.f32 1.442695, %v3299_v41  ;;  %v3302_v60 = vsub.f32 %v9305_v13, %v3268_v9 }
 0x3fd   :  { %10436 = vst [vmem:[#allocation56_spill] sm:$0xff] %v9409_v28  ;;  %v3319_v30 = vmul.f32 1.442695, %v3300_v52  ;;  %v3288_v57 = vrot.slane %v3255_v25, %v9409_v28  ;;  %v3309_v50 = vsub.f32 %v9350_v42, %v3284_v58  ;;  %v3333_v12 = vmul.f32 1.442695, %v3307_v22 }
 0x3fe   :  { %8283 = vpow2.f32 %v3313_v47  ;;  %v3321_v21 = vmul.f32 1.442695, %v3301_v39  ;;  %v3303_v42 = vsub.f32 %v9328_v16, %v3272_v61  ;;  %v3323_v53 = vmul.f32 1.442695, %v3302_v60 }
 0x3ff   :  { %8285 = vpow2.f32 %v3315_v48  ;;  %v3311_v10 = vsub.f32 %v9368_v5, %v3288_v57  ;;  %v3337_v56 = vmul.f32 1.442695, %v3309_v50  ;;  %v3276_v5 = vrot.slane %v3255_v25, %v9426_v63 }
 0x400   :  { %8287 = vpow2.f32 %v3317_v55  ;;  %v3304_v6 = vsub.f32 %v9314_v14, %v3272_v61  ;;  %v3325_v62 = vmul.f32 1.442695, %v3303_v42  ;;  %v3308_v51 = vsub.f32 %v9330_v29, %v9404_v43 }
 0x401   :  { %8289 = vpow2.f32 %v3319_v30  ;;  %v3341_v45 = vmul.f32 1.442695, %v3311_v10  ;;  %v3305_v7 = vsub.f32 %v9334_v31, %v3276_v5  ;;  %v3306_v46 = vsub.f32 %v9322_v23, %v3276_v5 }
 0x402   :  { %8291 = vpow2.f32 %v3333_v12  ;;  %v3327_v4 = vmul.f32 1.442695, %v3304_v6  ;;  %v3310_v23 = vsub.f32 %v9336_v17, %v3284_v58  ;;  %v3335_v54 = vmul.f32 1.442695, %v3308_v51 }
 0x403   :  { %8293 = vpow2.f32 %v3321_v21  ;;  %v3329_v18 = vmul.f32 1.442695, %v3305_v7  ;;  %v3331_v25 = vmul.f32 1.442695, %v3306_v46  ;;  %v3312_v37 = vsub.f32 %v9376_v27, %v3288_v57 }
 0x404   :  { %8295 = vpow2.f32 %v3337_v56  ;;  %v3339_v29 = vmul.f32 1.442695, %v3310_v23 }
 0x405   :  { %8297 = vpow2.f32 %v3323_v53  ;;  %v3343_v43 = vmul.f32 1.442695, %v3312_v37 }
 0x406   :  { %8299 = vpow2.f32 %v3341_v45 }
 0x407   :  { %8301 = vpow2.f32 %v3325_v62 }
 0x408   :  { %v9419_v59 = vpop.eup %8283  ;;  %8303 = vpow2.f32 %v3327_v4 }
 0x409   :  { %v9422_v19 = vpop.eup %8285  ;;  %3362 = vperm.xlu1 %7737, %v9419_v59   ;;  %8305 = vpow2.f32 %v3329_v18 }
 0x40a   :  { %3365 = vperm.xlu0 %7738, %v9422_v19   ;;  %v9430_v13 = vpop.eup %8287  ;;  %8307 = vpow2.f32 %v3331_v25 }
 0x40b   :  { %v9435_v35 = vpop.eup %8289  ;;  %8309 = vpow2.f32 %v3335_v54 }
 0x40c   :  { %v9438_v16 = vpop.eup %8291  ;;  %8311 = vpow2.f32 %v3339_v29 }
 0x40d   :  { %3368 = vperm.xlu1 %7737, %v9430_v13   ;;  %v9442_v49 = vpop.eup %8293  ;;  %8313 = vpow2.f32 %v3343_v43 }
 0x40e   :  { %3392 = vperm.xlu0 %7738, %v9438_v16   ;;  %v9445_v14 = vpop.eup %8295 }
 0x40f   :  { %v9449_v11 = vpop.eup %8297 }
 0x410   :  { %v9452_v31 = vpop.eup %8299 }
 0x411   :  { %3371 = vperm.xlu1 %7737, %v9435_v35   ;;  %v9457_v15 = vpop.eup %8301 }
 0x412   :  { %3398 = vperm.xlu0 %7738, %v9445_v14   ;;  %v9461_v33 = vpop.eup %8303 }
 0x413   :  { %v9465_v41 = vpop.eup %8305 }
 0x414   :  { %v9468_v47 = vpop.eup %8307 }
 0x415   :  { %3374 = vperm.xlu1 %7737, %v9442_v49   ;;  %v9471_v17 = vpop.eup %8309 }
 0x416   :  { %3404 = vperm.xlu0 %7738, %v9452_v31   ;;  %v9474_v48 = vpop.eup %8311 }
 0x417   :  { %v9477_v27 = vpop.eup %8313 }
 0x419   :  { %3377 = vperm.xlu1 %7737, %v9449_v11  }
 0x41d   :  { %3380 = vperm.xlu1 %7737, %v9457_v15  }
 0x421   :  { %3383 = vperm.xlu1 %7737, %v9461_v33  }
 0x425   :  { %3386 = vperm.xlu1 %7737, %v9465_v41  }
 0x429   :  { %3389 = vperm.xlu1 %7737, %v9468_v47  }
 0x42d   :  { %3395 = vperm.xlu1 %7737, %v9471_v17  }
 0x431   :  { %3401 = vperm.xlu1 %7737, %v9474_v48  }
 0x435   :  { %3407 = vperm.xlu1 %7737, %v9477_v27  }
 0x488   :  { %v3363_v9 = vpop.permute.xlu1 %3362 }
 0x489   :  { %v3366_v30 = vpop.permute.xlu0 %3365  ;;  %v3412_v53 = vrot.slane %v3363_v9, %v9318_v34 }
 0x48a   :  { %v3416_v42 = vrot.slane %v3366_v30, %v9308_v20 }
 0x48c   :  { %v3369_v52 = vpop.permute.xlu1 %3368  ;;  %v3417_v23 = vsel %vm3172_vm0, %v3416_v42, %v3412_v53 }
 0x48d   :  { %v3393_v12 = vpop.permute.xlu0 %3392  ;;  %v3421_v45 = vrot.slane %v3369_v52, %v9318_v34 }
 0x48e   :  { %v3457_v54 = vrot.slane %v3393_v12, %v9318_v34 }
 0x490   :  { %v3372_v55 = vpop.permute.xlu1 %3371 }
 0x491   :  { %v3425_v60 = vrot.slane %v3372_v55, %v9308_v20  ;;  %v3399_v21 = vpop.permute.xlu0 %3398 }
 0x492   :  { %v3466_v43 = vrot.slane %v3399_v21, %v9318_v34 }
 0x493   :  { %v3426_v7 = vsel %vm3172_vm0, %v3425_v60, %v3421_v45 }
 0x494   :  { %v3375_v58 = vpop.permute.xlu1 %3374  ;;  %v3481_v9 = vsel %vm3237_vm1, %v3426_v7, %v3417_v23 }
 0x495   :  { %v3430_v6 = vrot.slane %v3375_v58, %v9318_v34  ;;  %v3405_v52 = vpop.permute.xlu0 %3404 }
 0x498   :  { %v3378_v22 = vpop.permute.xlu1 %3377 }
 0x499   :  { %v3434_v10 = vrot.slane %v3378_v22, %v9308_v20 }
 0x49b   :  { %v3435_v18 = vsel %vm3172_vm0, %v3434_v10, %v3430_v6 }
 0x49c   :  { %v3381_v39 = vpop.permute.xlu1 %3380  ;;  %v3482_v58 = vsel %vm3239_vm2, %v3435_v18, %v3481_v9 }
 0x49d   :  { %v3439_v4 = vrot.slane %v3381_v39, %v9318_v34 }
 0x4a0   :  { %v3384_v57 = vpop.permute.xlu1 %3383 }
 0x4a1   :  { %v3443_v5 = vrot.slane %v3384_v57, %v9308_v20 }
 0x4a3   :  { %v3444_v37 = vsel %vm3172_vm0, %v3443_v5, %v3439_v4 }
 0x4a4   :  { %v3387_v50 = vpop.permute.xlu1 %3386  ;;  %v3483_v39 = vsel %vm3241_vm3, %v3444_v37, %v3482_v58 }
 0x4a5   :  { %v3448_v51 = vrot.slane %v3387_v50, %v9318_v34  ;;  %v3475_v50 = vrot.slane %v3405_v52, %v9318_v34 }
 0x4a8   :  { %v3390_v61 = vpop.permute.xlu1 %3389 }
 0x4a9   :  { %v3452_v62 = vrot.slane %v3390_v61, %v9308_v20 }
 0x4ab   :  { %v3453_v55 = vsel %vm3172_vm0, %v3452_v62, %v3448_v51 }
 0x4ac   :  { %v3396_v56 = vpop.permute.xlu1 %3395  ;;  %v3484_v12 = vsel %vm3243_vm4, %v3453_v55, %v3483_v39 }
 0x4ad   :  { %v3461_v46 = vrot.slane %v3396_v56, %v9308_v20 }
 0x4af   :  { %v3462_v22 = vsel %vm3172_vm0, %v3461_v46, %v3457_v54 }
 0x4b0   :  { %v3402_v25 = vpop.permute.xlu1 %3401  ;;  %v3485_v60 = vsel %vm3245_vm5, %v3462_v22, %v3484_v12 }
 0x4b1   :  { %v3470_v29 = vrot.slane %v3402_v25, %v9308_v20 }
 0x4b3   :  { %v3471_v30 = vsel %vm3172_vm0, %v3470_v29, %v3466_v43 }
 0x4b4   :  { %v3408_v57 = vpop.permute.xlu1 %3407  ;;  %v3486_v10 = vsel %vm3247_vm6, %v3471_v30, %v3485_v60 }
 0x4b5   :  { %v3479_v61 = vrot.slane %v3408_v57, %v9308_v20 }
 0x4b7   :  { %v3480_v21 = vsel %vm3172_vm0, %v3479_v61, %v3475_v50 }
 0x4b8   :  { %v3487_v56 = vsel %vm3249_vm7, %v3480_v21, %v3486_v10 }
 0x4b9   :  { %v3489_v42 = vsel %vm3252_vm8, %v3487_v56, 0.0 }
 0x4ba   :  { %3490 = vadd.xlane.f32.xlu0 %v3489_v42 }
 0x547   :  { %v3491_v53 = vpop.xlane.xlu0 %3490 }
 0x548   :  { %8315 = vrcp.f32 %v3491_v53 }
 0x552   :  { %v8316_v45 = vpop.eup %8315 }
 0x553   :  { %v3513_v34 = vrot.slane %v8316_v45, %v9426_v63  ;;  %v3497_v5 = vrot.slane %v8316_v45, %v9067_v36  ;;  %v3525_v62 = vrot.slane %v8316_v45, %v9409_v28  ;;  %v3501_v46 = vrot.slane %v8316_v45, %v9073_v26 }
 0x555   :  { %v3542_v20 = vmul.f32 %v9465_v41, %v3513_v34  ;;  %v3534_v6 = vmul.f32 %v9419_v59, %v3497_v5  ;;  %v3548_v7 = vmul.f32 %v9452_v31, %v3525_v62  ;;  %v3535_v4 = vmul.f32 %v9422_v19, %v3497_v5 }
 0x556   :  { %v3536_v18 = vmul.f32 %v9430_v13, %v3501_v46  ;;  %v3537_v51 = vmul.f32 %v9435_v35, %v3501_v46  ;;  %v3505_v41 = vrot.slane %v8316_v45, %v9070_v38  ;;  %v3509_v31 = vrot.slane %v8316_v45, %v9076_v40 }
 0x557   :  { %3656 = vperm.xlu0 %7738, %v3542_v20   ;;  %3616 = vperm.xlu1 %7737, %v3534_v6   ;;  %v3543_v13 = vmul.f32 %v9468_v47, %v3513_v34  ;;  %v3517_v35 = vrot.slane %v8316_v45, %v9395_v32 }
 0x558   :  { %v3538_v59 = vmul.f32 %v9442_v49, %v3505_v41  ;;  %v3539_v25 = vmul.f32 %v9449_v11, %v3505_v41  ;;  %v3540_v19 = vmul.f32 %v9457_v15, %v3509_v31  ;;  %v3541_v23 = vmul.f32 %v9461_v33, %v3509_v31 }
 0x559   :  { %v3544_v54 = vmul.f32 %v9438_v16, %v3517_v35  ;;  %v3545_v49 = vmul.f32 %v9471_v17, %v3517_v35  ;;  %v3521_v11 = vrot.slane %v8316_v45, %v9401_v44  ;;  %v3549_v33 = vmul.f32 %v9477_v27, %v3525_v62 }
 0x55b   :  { %3686 = vperm.xlu0 %7738, %v3548_v7   ;;  %3621 = vperm.xlu1 %7737, %v3535_v4   ;;  %v3546_v37 = vmul.f32 %v9445_v14, %v3521_v11  ;;  %v3547_v15 = vmul.f32 %v9474_v48, %v3521_v11 }
 0x55f   :  { %3626 = vperm.xlu1 %7737, %v3536_v18  }
 0x563   :  { %3631 = vperm.xlu1 %7737, %v3537_v51  }
 0x567   :  { %3636 = vperm.xlu1 %7737, %v3538_v59  }
 0x56b   :  { %3641 = vperm.xlu1 %7737, %v3539_v25  }
 0x56f   :  { %3646 = vperm.xlu1 %7737, %v3540_v19  }
 0x573   :  { %3651 = vperm.xlu1 %7737, %v3541_v23  }
 0x577   :  { %3661 = vperm.xlu1 %7737, %v3543_v13  }
 0x57b   :  { %3666 = vperm.xlu1 %7737, %v3544_v54  }
 0x57f   :  { %3671 = vperm.xlu1 %7737, %v3545_v49  }
 0x583   :  { %3676 = vperm.xlu1 %7737, %v3546_v37  }
 0x587   :  { %3681 = vperm.xlu1 %7737, %v3547_v15  }
 0x58b   :  { %3691 = vperm.xlu1 %7737, %v3549_v33  }
 0x58c   :  { %8608 = shalt.err (!%p8605_p10)  }
 0x58d   :  { %s8609_s8 = scalar_lea.vmem %s222_s27, 4096  ;;  %p8614_p12 = scmp.lt.s32.totalorder %s222_s27, %s222_s27 }
 0x58e   :  { %p8610_p11 = scmp.ne.s32.totalorder %s222_s27, %s8609_s8  ;;  %p8615_p13 = scmp.lt.s32.totalorder %s8609_s8, %s8609_s8 }
 0x590   :  { %p8616_p0 = por %p8615_p13, %p8614_p12 }
 0x592   :  { %p8617_p1 = pnand %p8616_p0, %p8610_p11 }
 0x594   :  { %8620 = shalt.err (!%p8617_p1)  }
 0x595   :  { %224 = dma.hbm_to_vmem [thread:$0]  %s10399_s12, 4096, %s222_s27, [#allocation5 + $0x2]  ;;  %v9551_v16 = vld [vmem:[%s10390_s3 + $0x80] sm:$0xff]  ;;  %v9558_v17 = vld [vmem:[%s10390_s3 + $0x88] sm:$0xff]  ;;  %v9593_v61 = vld [vmem:[%s10390_s3 + $0x10] sm:$0xff] }
 0x596   :  { %v9565_v29 = vld [vmem:[%s10390_s3] sm:$0xff]  ;;  %v9572_v52 = vld [vmem:[%s10390_s3 + $0x8] sm:$0xff]  ;;  %v3554_v60 = vunpack.c.l.bf16 %v9593_v61  ;;  %v3555_v21 = vunpack.c.h.bf16 %v9593_v61  ;;  %v9600_v10 = vld [vmem:[%s10390_s3 + $0x18] sm:$0xff]  ;;  %v10441_v61 = vunpack.c.h.bf16 %v9558_v17 }
 0x597   :  { %v3550_v43 = vunpack.c.l.bf16 %v9565_v29  ;;  %v3551_v9 = vunpack.c.h.bf16 %v9565_v29  ;;  %v3552_v55 = vunpack.c.l.bf16 %v9572_v52  ;;  %v3553_v58 = vunpack.c.h.bf16 %v9572_v52  ;;  %v9579_v22 = vld [vmem:[%s10390_s3 + $0xe0] sm:$0xff]  ;;  %v9586_v57 = vld [vmem:[%s10390_s3 + $0xe8] sm:$0xff]  ;;  %v9621_v62 = vld [vmem:[%s10390_s3 + $0x30] sm:$0xff] }
 0x598   :  { %v3556_v56 = vunpack.c.l.bf16 %v9600_v10  ;;  %v3557_v42 = vunpack.c.h.bf16 %v9600_v10  ;;  %v9607_v53 = vld [vmem:[%s10390_s3 + $0x20] sm:$0xff]  ;;  %v9614_v5 = vld [vmem:[%s10390_s3 + $0x28] sm:$0xff]  ;;  %v9628_v46 = vld [vmem:[%s10390_s3 + $0x38] sm:$0xff]  ;;  %v10439_v52 = vunpack.c.h.bf16 %v9551_v16  ;;  %v10450_v28 = vunpack.c.l.bf16 %v9621_v62 }
 0x599   :  { %v9635_v41 = vld [vmem:[%s10390_s3 + $0x40] sm:$0xff]  ;;  %v9642_v31 = vld [vmem:[%s10390_s3 + $0x48] sm:$0xff]  ;;  %v9649_v13 = vld [vmem:[%s10390_s3 + $0x50] sm:$0xff]  ;;  %v10451_v40 = vunpack.c.h.bf16 %v9621_v62  ;;  %v10453_v38 = vunpack.c.h.bf16 %v9628_v46 }
 0x59a   :  { %v9656_v49 = vld [vmem:[%s10390_s3 + $0x58] sm:$0xff]  ;;  %v9663_v15 = vld [vmem:[%s10390_s3 + $0x60] sm:$0xff]  ;;  %v9670_v54 = vld [vmem:[%s10390_s3 + $0x68] sm:$0xff] }
 0x59b   :  { %v9677_v37 = vld [vmem:[%s10390_s3 + $0x70] sm:$0xff]  ;;  %v9684_v24 = vld [vmem:[%s10390_s3 + $0x78] sm:$0xff]  ;;  %v9705_v18 = vld [vmem:[%s10390_s3 + $0xa0] sm:$0xff] }
 0x59c   :  { %v9691_v11 = vld [vmem:[%s10390_s3 + $0x90] sm:$0xff]  ;;  %v9698_v33 = vld [vmem:[%s10390_s3 + $0x98] sm:$0xff]  ;;  %v9712_v4 = vld [vmem:[%s10390_s3 + $0xa8] sm:$0xff] }
 0x59d   :  { %v9719_v7 = vld [vmem:[%s10390_s3 + $0xb0] sm:$0xff]  ;;  %v9726_v23 = vld [vmem:[%s10390_s3 + $0xb8] sm:$0xff]  ;;  %v9733_v19 = vld [vmem:[%s10390_s3 + $0xc0] sm:$0xff] }
 0x59e   :  { %v9740_v25 = vld [vmem:[%s10390_s3 + $0xc8] sm:$0xff]  ;;  %v9747_v59 = vld [vmem:[%s10390_s3 + $0xd0] sm:$0xff]  ;;  %v9754_v6 = vld [vmem:[%s10390_s3 + $0xd8] sm:$0xff] }
 0x59f   :  { %v9761_v20 = vld [vmem:[%s10390_s3 + $0xf0] sm:$0xff]  ;;  %v9768_v34 = vld [vmem:[%s10390_s3 + $0xf8] sm:$0xff] }
 0x5d6   :  { %v3657_v51 = vpop.permute.xlu0 %3656  ;;  %v3617_v35 = vpop.permute.xlu1 %3616 }
 0x5d7   :  { %v3694_v45 = vmul.f32 %v3617_v35, %v3550_v43  ;;  %v3695_v48 = vmul.f32 %v3617_v35, %v3551_v9  ;;  %v3696_v39 = vmul.f32 %v3617_v35, %v3552_v55  ;;  %v3697_v12 = vmul.f32 %v3617_v35, %v3553_v58 }
 0x5d8   :  { %v10438_v43 = vunpack.c.l.bf16 %v9551_v16  ;;  %v9794_v55 = vmul.f32 %v3657_v51, %v10439_v52  ;;  %v10440_v58 = vunpack.c.l.bf16 %v9558_v17  ;;  %v10443_v16 = vunpack.c.h.bf16 %v9579_v22 }
 0x5d9   :  { %v10445_v17 = vunpack.c.h.bf16 %v9586_v57 }
 0x5da   :  { %v3622_v30 = vpop.permute.xlu1 %3621  ;;  %v3687_v47 = vpop.permute.xlu0 %3686  ;;  %v9790_v9 = vmul.f32 %v3657_v51, %v10438_v43  ;;  %v10442_v43 = vunpack.c.l.bf16 %v9579_v22 }
 0x5db   :  { %v3698_v14 = vmul.f32 %v3622_v30, %v3554_v60  ;;  %v3699_v27 = vmul.f32 %v3622_v30, %v3555_v21  ;;  %v3700_v50 = vmul.f32 %v3622_v30, %v3556_v56  ;;  %v3701_v29 = vmul.f32 %v3622_v30, %v3557_v42 }
 0x5dc   :  { %v9798_v60 = vmul.f32 %v3657_v51, %v10440_v58  ;;  %v9802_v21 = vmul.f32 %v3657_v51, %v10441_v61  ;;  %v9806_v8 = vmul.f32 %v3687_v47, %v10442_v43  ;;  %v9810_v52 = vmul.f32 %v3687_v47, %v10443_v16 }
 0x5dd   :  { %v3758_v56 = vadd.f32 %v3698_v14, %v3694_v45  ;;  %v3765_v35 = vadd.f32 %v3699_v27, %v3695_v48  ;;  %v3772_v10 = vadd.f32 %v3700_v50, %v3696_v39  ;;  %v3779_v30 = vadd.f32 %v3701_v29, %v3697_v12 }
 0x5de   :  { %v3627_v42 = vpop.permute.xlu1 %3626  ;;  %v10444_v58 = vunpack.c.l.bf16 %v9586_v57  ;;  %v9818_v51 = vmul.f32 %v3687_v47, %v10445_v17  ;;  %v10446_v50 = vunpack.c.l.bf16 %v9607_v53  ;;  %v10447_v45 = vunpack.c.h.bf16 %v9607_v53 }
 0x5df   :  { %v3759_v14 = vrot.slane %v3758_v56, 4  ;;  %v3766_v48 = vrot.slane %v3765_v35, 4  ;;  %v3773_v27 = vrot.slane %v3772_v10, 4  ;;  %v3780_v39 = vrot.slane %v3779_v30, 4 }
 0x5e0   :  { %v9814_v3 = vmul.f32 %v3687_v47, %v10444_v58  ;;  %v3702_v12 = vmul.f32 %v3627_v42, %v10446_v50  ;;  %v3703_v22 = vmul.f32 %v3627_v42, %v10447_v45  ;;  %v10448_v29 = vunpack.c.l.bf16 %v9614_v5 }
 0x5e1   :  { %v10449_v43 = vunpack.c.h.bf16 %v9614_v5  ;;  %v3760_v58 = vadd.f32 %v3759_v14, %v3758_v56  ;;  %v3767_v57 = vadd.f32 %v3766_v48, %v3765_v35  ;;  %v3774_v47 = vadd.f32 %v3773_v27, %v3772_v10 }
 0x5e2   :  { %v3704_v61 = vmul.f32 %v3627_v42, %v10448_v29  ;;  %v3781_v17 = vadd.f32 %v3780_v39, %v3779_v30  ;;  %v3632_v2 = vpop.permute.xlu1 %3631  ;;  %v10452_v53 = vunpack.c.l.bf16 %v9628_v46 }
 0x5e3   :  { %v3705_v16 = vmul.f32 %v3627_v42, %v10449_v43  ;;  %v3706_v44 = vmul.f32 %v3632_v2, %v10450_v28  ;;  %v3707_v50 = vmul.f32 %v3632_v2, %v10451_v40  ;;  %v3709_v29 = vmul.f32 %v3632_v2, %v10453_v38 }
 0x5e4   :  { %v3708_v45 = vmul.f32 %v3632_v2, %v10452_v53  ;;  %v3761_v1 = vrot.slane %v3760_v58, 2  ;;  %v3768_v5 = vrot.slane %v3767_v57, 2  ;;  %v3775_v42 = vrot.slane %v3774_v47, 2 }
 0x5e5   :  { %v3782_v56 = vrot.slane %v3781_v17, 2  ;;  %v3786_v35 = vadd.f32 %v3706_v44, %v3702_v12  ;;  %v3793_v10 = vadd.f32 %v3707_v50, %v3703_v22  ;;  %v3807_v14 = vadd.f32 %v3709_v29, %v3705_v16 }
 0x5e6   :  { %v3800_v30 = vadd.f32 %v3708_v45, %v3704_v61  ;;  %v3762_v48 = vadd.f32 %v3761_v1, %v3760_v58  ;;  %v3769_v27 = vadd.f32 %v3768_v5, %v3767_v57  ;;  %v3776_v28 = vadd.f32 %v3775_v42, %v3774_v47  ;;  %v3637_v62 = vpop.permute.xlu1 %3636 }
 0x5e7   :  { %v3783_v39 = vadd.f32 %v3782_v56, %v3781_v17  ;;  %v3787_v40 = vrot.slane %v3786_v35, 4  ;;  %v3794_v43 = vrot.slane %v3793_v10, 4  ;;  %v3808_v53 = vrot.slane %v3807_v14, 4 }
 0x5e8   :  { %v3801_v0 = vrot.slane %v3800_v30, 4  ;;  %v3763_v32 = vrot.slane %v3762_v48, 1  ;;  %v3770_v46 = vrot.slane %v3769_v27, 1  ;;  %v3777_v2 = vrot.slane %v3776_v28, 1 }
 0x5e9   :  { %v3784_v38 = vrot.slane %v3783_v39, 1  ;;  %v3788_v63 = vadd.f32 %v3787_v40, %v3786_v35  ;;  %v3795_v26 = vadd.f32 %v3794_v43, %v3793_v10  ;;  %v3809_v44 = vadd.f32 %v3808_v53, %v3807_v14 }
 0x5ea   :  { %v3802_v36 = vadd.f32 %v3801_v0, %v3800_v30  ;;  %v9836_v12 = vadd.f32 %v3763_v32, %v3762_v48  ;;  %v9838_v22 = vadd.f32 %v3770_v46, %v3769_v27  ;;  %v9840_v1 = vadd.f32 %v3777_v2, %v3776_v28  ;;  %v3642_v16 = vpop.permute.xlu1 %3641 }
 0x5eb   :  { %v9842_v61 = vadd.f32 %v3784_v38, %v3783_v39  ;;  %v3789_v58 = vrot.slane %v3788_v63, 2  ;;  %v3796_v57 = vrot.slane %v3795_v26, 2  ;;  %v3810_v17 = vrot.slane %v3809_v44, 2 }
 0x5ec   :  { %v3803_v47 = vrot.slane %v3802_v36, 2  ;;  %v10454_v50 = vunpack.c.l.bf16 %v9635_v41  ;;  %v10455_v29 = vunpack.c.h.bf16 %v9635_v41  ;;  %v10456_v32 = vunpack.c.l.bf16 %v9642_v31 }
 0x5ed   :  { %v10457_v42 = vunpack.c.h.bf16 %v9642_v31  ;;  %v3790_v35 = vadd.f32 %v3789_v58, %v3788_v63  ;;  %v3797_v10 = vadd.f32 %v3796_v57, %v3795_v26  ;;  %v3811_v14 = vadd.f32 %v3810_v17, %v3809_v44 }
 0x5ee   :  { %v3710_v45 = vmul.f32 %v3637_v62, %v10454_v50  ;;  %v3711_v0 = vmul.f32 %v3637_v62, %v10455_v29  ;;  %v3712_v5 = vmul.f32 %v3637_v62, %v10456_v32  ;;  %v3804_v30 = vadd.f32 %v3803_v47, %v3802_v36  ;;  %v3647_v46 = vpop.permute.xlu1 %3646 }
 0x5ef   :  { %v3713_v56 = vmul.f32 %v3637_v62, %v10457_v42  ;;  %v10458_v48 = vunpack.c.l.bf16 %v9649_v13  ;;  %v10459_v28 = vunpack.c.h.bf16 %v9649_v13  ;;  %v10460_v40 = vunpack.c.l.bf16 %v9656_v49 }
 0x5f0   :  { %v10461_v43 = vunpack.c.h.bf16 %v9656_v49  ;;  %v3791_v2 = vrot.slane %v3790_v35, 1  ;;  %v3798_v31 = vrot.slane %v3797_v10, 1  ;;  %v3805_v62 = vrot.slane %v3804_v30, 1 }
 0x5f1   :  { %v3714_v27 = vmul.f32 %v3642_v16, %v10458_v48  ;;  %v3715_v39 = vmul.f32 %v3642_v16, %v10459_v28  ;;  %v3716_v41 = vmul.f32 %v3642_v16, %v10460_v40  ;;  %v3812_v63 = vrot.slane %v3811_v14, 1 }
 0x5f2   :  { %v3717_v53 = vmul.f32 %v3642_v16, %v10461_v43  ;;  %v9860_v58 = vadd.f32 %v3791_v2, %v3790_v35  ;;  %v9862_v57 = vadd.f32 %v3798_v31, %v3797_v10  ;;  %v9864_v13 = vadd.f32 %v3805_v62, %v3804_v30  ;;  %v3652_v29 = vpop.permute.xlu1 %3651 }
 0x5f3   :  { %v3814_v26 = vadd.f32 %v3714_v27, %v3710_v45  ;;  %v3821_v36 = vadd.f32 %v3715_v39, %v3711_v0  ;;  %v3828_v38 = vadd.f32 %v3716_v41, %v3712_v5  ;;  %v9866_v47 = vadd.f32 %v3812_v63, %v3811_v14 }
 0x5f4   :  { %v3835_v44 = vadd.f32 %v3717_v53, %v3713_v56  ;;  %10462 = vst [vmem:[#allocation58_spill] sm:$0xff] %v9864_v13  ;;  %v10463_v32 = vunpack.c.l.bf16 %v9663_v15  ;;  %v10464_v45 = vunpack.c.h.bf16 %v9663_v15  ;;  %v10465_v5 = vunpack.c.l.bf16 %v9670_v54 }
 0x5f5   :  { %v3815_v17 = vrot.slane %v3814_v26, 4  ;;  %v3822_v49 = vrot.slane %v3821_v36, 4  ;;  %v3829_v16 = vrot.slane %v3828_v38, 4  ;;  %v10466_v35 = vunpack.c.h.bf16 %v9670_v54 }
 0x5f6   :  { %v3836_v50 = vrot.slane %v3835_v44, 4  ;;  %v3718_v42 = vmul.f32 %v3647_v46, %v10463_v32  ;;  %v3719_v0 = vmul.f32 %v3647_v46, %v10464_v45  ;;  %v3720_v56 = vmul.f32 %v3647_v46, %v10465_v5  ;;  %v3662_v63 = vpop.permute.xlu1 %3661 }
 0x5f7   :  { %v3721_v10 = vmul.f32 %v3647_v46, %v10466_v35  ;;  %v3816_v30 = vadd.f32 %v3815_v17, %v3814_v26  ;;  %v3823_v14 = vadd.f32 %v3822_v49, %v3821_v36  ;;  %v3830_v48 = vadd.f32 %v3829_v16, %v3828_v38 }
 0x5f8   :  { %v3837_v27 = vadd.f32 %v3836_v50, %v3835_v44  ;;  %v10467_v28 = vunpack.c.l.bf16 %v9677_v37  ;;  %v10468_v40 = vunpack.c.h.bf16 %v9677_v37  ;;  %v10469_v43 = vunpack.c.l.bf16 %v9684_v24 }
 0x5f9   :  { %v10470_v53 = vunpack.c.h.bf16 %v9684_v24  ;;  %v3817_v31 = vrot.slane %v3816_v30, 2  ;;  %v3824_v62 = vrot.slane %v3823_v14, 2  ;;  %v3831_v54 = vrot.slane %v3830_v48, 2 }
 0x5fa   :  { %v3722_v39 = vmul.f32 %v3652_v29, %v10467_v28  ;;  %v3723_v41 = vmul.f32 %v3652_v29, %v10468_v40  ;;  %v3724_v15 = vmul.f32 %v3652_v29, %v10469_v43  ;;  %v3838_v46 = vrot.slane %v3837_v27, 2 }
 0x5fb   :  { %v3725_v2 = vmul.f32 %v3652_v29, %v10470_v53  ;;  %v3818_v17 = vadd.f32 %v3817_v31, %v3816_v30  ;;  %v3825_v49 = vadd.f32 %v3824_v62, %v3823_v14  ;;  %v3832_v16 = vadd.f32 %v3831_v54, %v3830_v48 }
 0x5fc   :  { %v3842_v26 = vadd.f32 %v3722_v39, %v3718_v42  ;;  %v3849_v36 = vadd.f32 %v3723_v41, %v3719_v0  ;;  %v3856_v38 = vadd.f32 %v3724_v15, %v3720_v56  ;;  %v3839_v37 = vadd.f32 %v3838_v46, %v3837_v27  ;;  %v3667_v42 = vpop.permute.xlu1 %3666 }
 0x5fd   :  { %v3863_v44 = vadd.f32 %v3725_v2, %v3721_v10  ;;  %v3819_v35 = vrot.slane %v3818_v17, 1  ;;  %v3826_v24 = vrot.slane %v3825_v49, 1  ;;  %v3833_v29 = vrot.slane %v3832_v16, 1 }
 0x5fe   :  { %v3843_v50 = vrot.slane %v3842_v26, 4  ;;  %v3850_v32 = vrot.slane %v3849_v36, 4  ;;  %v3857_v45 = vrot.slane %v3856_v38, 4  ;;  %v3840_v28 = vrot.slane %v3839_v37, 1 }
 0x5ff   :  { %v3864_v5 = vrot.slane %v3863_v44, 4  ;;  %v9884_v0 = vadd.f32 %v3819_v35, %v3818_v17  ;;  %v9886_v56 = vadd.f32 %v3826_v24, %v3825_v49  ;;  %v9888_v10 = vadd.f32 %v3833_v29, %v3832_v16 }
 0x600   :  { %v3844_v40 = vadd.f32 %v3843_v50, %v3842_v26  ;;  %v3851_v43 = vadd.f32 %v3850_v32, %v3849_v36  ;;  %v3858_v53 = vadd.f32 %v3857_v45, %v3856_v38  ;;  %v9890_v30 = vadd.f32 %v3840_v28, %v3839_v37  ;;  %v3672_v35 = vpop.permute.xlu1 %3671 }
 0x601   :  { %v3865_v13 = vadd.f32 %v3864_v5, %v3863_v44  ;;  %v10471_v41 = vunpack.c.l.bf16 %v9691_v11  ;;  %v10472_v2 = vunpack.c.h.bf16 %v9691_v11  ;;  %v10473_v62 = vunpack.c.l.bf16 %v9698_v33 }
 0x602   :  { %v3845_v14 = vrot.slane %v3844_v40, 2  ;;  %v3852_v48 = vrot.slane %v3851_v43, 2  ;;  %v3859_v27 = vrot.slane %v3858_v53, 2  ;;  %v10474_v46 = vunpack.c.h.bf16 %v9698_v33 }
 0x603   :  { %v3866_v39 = vrot.slane %v3865_v13, 2  ;;  %v3730_v15 = vmul.f32 %v3662_v63, %v10471_v41  ;;  %v3731_v31 = vmul.f32 %v3662_v63, %v10472_v2  ;;  %v3732_v54 = vmul.f32 %v3662_v63, %v10473_v62 }
 0x604   :  { %v3733_v26 = vmul.f32 %v3662_v63, %v10474_v46  ;;  %v3846_v36 = vadd.f32 %v3845_v14, %v3844_v40  ;;  %v3853_v38 = vadd.f32 %v3852_v48, %v3851_v43  ;;  %v3860_v44 = vadd.f32 %v3859_v27, %v3858_v53 }
 0x605   :  { %v3867_v17 = vadd.f32 %v3866_v39, %v3865_v13  ;;  %v3870_v49 = vadd.f32 %v3730_v15, %v9790_v9  ;;  %v3877_v16 = vadd.f32 %v3731_v31, %v9794_v55  ;;  %v3884_v37 = vadd.f32 %v3732_v54, %v9798_v60 }
 0x606   :  { %v3891_v50 = vadd.f32 %v3733_v26, %v9802_v21  ;;  %v3847_v11 = vrot.slane %v3846_v36, 1  ;;  %v3854_v32 = vrot.slane %v3853_v38, 1  ;;  %v3861_v45 = vrot.slane %v3860_v44, 1 }
 0x607   :  { %v3868_v5 = vrot.slane %v3867_v17, 1  ;;  %v3871_v24 = vrot.slane %v3870_v49, 4  ;;  %v3878_v33 = vrot.slane %v3877_v16, 4  ;;  %v3885_v63 = vrot.slane %v3884_v37, 4 }
 0x608   :  { %v3892_v29 = vrot.slane %v3891_v50, 4  ;;  %v9904_v28 = vadd.f32 %v3847_v11, %v3846_v36  ;;  %v9906_v13 = vadd.f32 %v3854_v32, %v3853_v38  ;;  %v9908_v9 = vadd.f32 %v3861_v45, %v3860_v44 }
 0x609   :  { %v9910_v55 = vadd.f32 %v3868_v5, %v3867_v17  ;;  %v3872_v60 = vadd.f32 %v3871_v24, %v3870_v49  ;;  %v3879_v40 = vadd.f32 %v3878_v33, %v3877_v16  ;;  %v3886_v21 = vadd.f32 %v3885_v63, %v3884_v37  ;;  %v3677_v37 = vpop.permute.xlu1 %3676 }
 0x60a   :  { %v3893_v43 = vadd.f32 %v3892_v29, %v3891_v50  ;;  %v10475_v53 = vunpack.c.l.bf16 %v9705_v18  ;;  %v10476_v48 = vunpack.c.h.bf16 %v9705_v18  ;;  %v10477_v39 = vunpack.c.l.bf16 %v9712_v4 }
 0x60b   :  { %v10478_v15 = vunpack.c.h.bf16 %v9712_v4  ;;  %v3873_v31 = vrot.slane %v3872_v60, 2  ;;  %v3880_v62 = vrot.slane %v3879_v40, 2  ;;  %v3887_v54 = vrot.slane %v3886_v21, 2 }
 0x60c   :  { %v3734_v14 = vmul.f32 %v3667_v42, %v10475_v53  ;;  %v3735_v27 = vmul.f32 %v3667_v42, %v10476_v48  ;;  %v3736_v41 = vmul.f32 %v3667_v42, %v10477_v39  ;;  %v3894_v46 = vrot.slane %v3893_v43, 2 }
 0x60d   :  { %v3737_v2 = vmul.f32 %v3667_v42, %v10478_v15  ;;  %v10479_v26 = vunpack.c.l.bf16 %v9719_v7  ;;  %v10480_v38 = vunpack.c.h.bf16 %v9719_v7  ;;  %v10481_v17 = vunpack.c.l.bf16 %v9726_v23 }
 0x60e   :  { %v10482_v49 = vunpack.c.h.bf16 %v9726_v23  ;;  %v3874_v50 = vadd.f32 %v3873_v31, %v3872_v60  ;;  %v3881_v4 = vadd.f32 %v3880_v62, %v3879_v40  ;;  %v3888_v42 = vadd.f32 %v3887_v54, %v3886_v21 }
 0x60f   :  { %v3738_v36 = vmul.f32 %v3672_v35, %v10479_v26  ;;  %v3739_v44 = vmul.f32 %v3672_v35, %v10480_v38  ;;  %v3740_v18 = vmul.f32 %v3672_v35, %v10481_v17  ;;  %v3895_v11 = vadd.f32 %v3894_v46, %v3893_v43 }
 0x610   :  { %v3741_v16 = vmul.f32 %v3672_v35, %v10482_v49  ;;  %v3875_v33 = vrot.slane %v3874_v50, 1  ;;  %v3882_v63 = vrot.slane %v3881_v4, 1  ;;  %v3889_v29 = vrot.slane %v3888_v42, 1 }
 0x611   :  { %v3898_v32 = vadd.f32 %v3738_v36, %v3734_v14  ;;  %v3905_v45 = vadd.f32 %v3739_v44, %v3735_v27  ;;  %v3912_v5 = vadd.f32 %v3740_v18, %v3736_v41  ;;  %v3896_v7 = vrot.slane %v3895_v11, 1  ;;  %v3682_v27 = vpop.permute.xlu1 %3681 }
 0x612   :  { %v3919_v24 = vadd.f32 %v3741_v16, %v3737_v2  ;;  %v9928_v26 = vadd.f32 %v3875_v33, %v3874_v50  ;;  %v9930_v23 = vadd.f32 %v3882_v63, %v3881_v4  ;;  %v9932_v35 = vadd.f32 %v3889_v29, %v3888_v42 }
 0x613   :  { %v3899_v53 = vrot.slane %v3898_v32, 4  ;;  %v3906_v48 = vrot.slane %v3905_v45, 4  ;;  %v3913_v39 = vrot.slane %v3912_v5, 4  ;;  %v9934_v60 = vadd.f32 %v3896_v7, %v3895_v11 }
 0x614   :  { %v3920_v15 = vrot.slane %v3919_v24, 4  ;;  %v10483_v41 = vunpack.c.l.bf16 %v9733_v19  ;;  %v10484_v31 = vunpack.c.h.bf16 %v9733_v19  ;;  %v10485_v54 = vunpack.c.l.bf16 %v9740_v25 }
 0x615   :  { %v3900_v40 = vadd.f32 %v3899_v53, %v3898_v32  ;;  %v3907_v21 = vadd.f32 %v3906_v48, %v3905_v45  ;;  %v3914_v43 = vadd.f32 %v3913_v39, %v3912_v5  ;;  %v10486_v36 = vunpack.c.h.bf16 %v9740_v25 }
 0x616   :  { %v3921_v14 = vadd.f32 %v3920_v15, %v3919_v24  ;;  %v3742_v2 = vmul.f32 %v3677_v37, %v10483_v41  ;;  %v3743_v62 = vmul.f32 %v3677_v37, %v10484_v31  ;;  %v3744_v46 = vmul.f32 %v3677_v37, %v10485_v54 }
 0x617   :  { %v3745_v38 = vmul.f32 %v3677_v37, %v10486_v36  ;;  %v3901_v44 = vrot.slane %v3900_v40, 2  ;;  %v3908_v17 = vrot.slane %v3907_v21, 2  ;;  %v3915_v18 = vrot.slane %v3914_v43, 2  ;;  %v3692_v36 = vpop.permute.xlu1 %3691 }
 0x618   :  { %v3922_v49 = vrot.slane %v3921_v14, 2  ;;  %v10487_v16 = vunpack.c.l.bf16 %v9747_v59  ;;  %v10488_v4 = vunpack.c.h.bf16 %v9747_v59  ;;  %v10489_v11 = vunpack.c.l.bf16 %v9754_v6 }
 0x619   :  { %v10490_v32 = vunpack.c.h.bf16 %v9754_v6  ;;  %v3902_v5 = vadd.f32 %v3901_v44, %v3900_v40  ;;  %v3909_v24 = vadd.f32 %v3908_v17, %v3907_v21  ;;  %v3916_v25 = vadd.f32 %v3915_v18, %v3914_v43 }
 0x61a   :  { %v3746_v50 = vmul.f32 %v3682_v27, %v10487_v16  ;;  %v3747_v42 = vmul.f32 %v3682_v27, %v10488_v4  ;;  %v3748_v19 = vmul.f32 %v3682_v27, %v10489_v11  ;;  %v3923_v37 = vadd.f32 %v3922_v49, %v3921_v14 }
 0x61b   :  { %v3749_v45 = vmul.f32 %v3682_v27, %v10490_v32  ;;  %v3903_v53 = vrot.slane %v3902_v5, 1  ;;  %v3910_v48 = vrot.slane %v3909_v24, 1  ;;  %v3917_v39 = vrot.slane %v3916_v25, 1 }
 0x61c   :  { %v3926_v33 = vadd.f32 %v3746_v50, %v3742_v2  ;;  %v3933_v63 = vadd.f32 %v3747_v42, %v3743_v62  ;;  %v3940_v29 = vadd.f32 %v3748_v19, %v3744_v46  ;;  %v3924_v15 = vrot.slane %v3923_v37, 1 }
 0x61d   :  { %v3947_v7 = vadd.f32 %v3749_v45, %v3745_v38  ;;  %v9952_v16 = vadd.f32 %v3903_v53, %v3902_v5  ;;  %v9954_v6 = vadd.f32 %v3910_v48, %v3909_v24  ;;  %v9956_v40 = vadd.f32 %v3917_v39, %v3916_v25 }
 0x61e   :  { %v3927_v59 = vrot.slane %v3926_v33, 4  ;;  %v3934_v41 = vrot.slane %v3933_v63, 4  ;;  %v3941_v31 = vrot.slane %v3940_v29, 4  ;;  %v9958_v21 = vadd.f32 %v3924_v15, %v3923_v37 }
 0x61f   :  { %v3948_v54 = vrot.slane %v3947_v7, 4  ;;  %v10491_v62 = vunpack.c.l.bf16 %v9761_v20  ;;  %v10492_v38 = vunpack.c.h.bf16 %v9761_v20  ;;  %v10493_v17 = vunpack.c.l.bf16 %v9768_v34 }
 0x620   :  { %v3928_v43 = vadd.f32 %v3927_v59, %v3926_v33  ;;  %v3935_v14 = vadd.f32 %v3934_v41, %v3933_v63  ;;  %v3942_v27 = vadd.f32 %v3941_v31, %v3940_v29  ;;  %v10494_v49 = vunpack.c.h.bf16 %v9768_v34 }
 0x621   :  { %v3949_v2 = vadd.f32 %v3948_v54, %v3947_v7  ;;  %v3754_v46 = vmul.f32 %v3692_v36, %v10491_v62  ;;  %v3755_v44 = vmul.f32 %v3692_v36, %v10492_v38  ;;  %v3756_v18 = vmul.f32 %v3692_v36, %v10493_v17 }
 0x622   :  { %v3757_v50 = vmul.f32 %v3692_v36, %v10494_v49  ;;  %v3929_v4 = vrot.slane %v3928_v43, 2  ;;  %v3936_v42 = vrot.slane %v3935_v14, 2  ;;  %v3943_v11 = vrot.slane %v3942_v27, 2 }
 0x623   :  { %v3950_v19 = vrot.slane %v3949_v2, 2  ;;  %v3954_v32 = vadd.f32 %v3754_v46, %v9806_v8  ;;  %v3961_v45 = vadd.f32 %v3755_v44, %v9810_v52  ;;  %v3968_v5 = vadd.f32 %v3756_v18, %v9814_v3 }
 0x624   :  { %v3975_v24 = vadd.f32 %v3757_v50, %v9818_v51  ;;  %v3930_v20 = vadd.f32 %v3929_v4, %v3928_v43  ;;  %v3937_v25 = vadd.f32 %v3936_v42, %v3935_v14  ;;  %v3944_v37 = vadd.f32 %v3943_v11, %v3942_v27 }
 0x625   :  { %v3951_v33 = vadd.f32 %v3950_v19, %v3949_v2  ;;  %v3955_v63 = vrot.slane %v3954_v32, 4  ;;  %v3962_v29 = vrot.slane %v3961_v45, 4  ;;  %v3969_v34 = vrot.slane %v3968_v5, 4 }
 0x626   :  { %v3976_v7 = vrot.slane %v3975_v24, 4  ;;  %v3931_v53 = vrot.slane %v3930_v20, 1  ;;  %v3938_v48 = vrot.slane %v3937_v25, 1  ;;  %v3945_v39 = vrot.slane %v3944_v37, 1 }
 0x627   :  { %v3952_v15 = vrot.slane %v3951_v33, 1  ;;  %v3956_v59 = vadd.f32 %v3955_v63, %v3954_v32  ;;  %v3963_v8 = vadd.f32 %v3962_v29, %v3961_v45  ;;  %v3970_v41 = vadd.f32 %v3969_v34, %v3968_v5 }
 0x628   :  { %v3977_v52 = vadd.f32 %v3976_v7, %v3975_v24  ;;  %v9972_v31 = vadd.f32 %v3931_v53, %v3930_v20  ;;  %v3939_v3 = vadd.f32 %v3938_v48, %v3937_v25  ;;  %v9974_v51 = vadd.f32 %v3945_v39, %v3944_v37 }
 0x629   :  { %v9976_v54 = vadd.f32 %v3952_v15, %v3951_v33  ;;  %v3957_v36 = vrot.slane %v3956_v59, 2  ;;  %v3964_v43 = vrot.slane %v3963_v8, 2  ;;  %v3971_v14 = vrot.slane %v3970_v41, 2 }
 0x62a   :  { %v3978_v27 = vrot.slane %v3977_v52, 2 }
 0x62b   :  { %v3958_v2 = vadd.f32 %v3957_v36, %v3956_v59  ;;  %v3965_v62 = vadd.f32 %v3964_v43, %v3963_v8  ;;  %v3972_v46 = vadd.f32 %v3971_v14, %v3970_v41 }
 0x62c   :  { %v3979_v38 = vadd.f32 %v3978_v27, %v3977_v52 }
 0x62d   :  { %v3959_v44 = vrot.slane %v3958_v2, 1  ;;  %v3966_v17 = vrot.slane %v3965_v62, 1  ;;  %v3973_v18 = vrot.slane %v3972_v46, 1 }
 0x62e   :  { %v3980_v49 = vrot.slane %v3979_v38, 1 }
 0x62f   :  { %v9978_v50 = vadd.f32 %v3959_v44, %v3958_v2  ;;  %v3967_v4 = vadd.f32 %v3966_v17, %v3965_v62  ;;  %v9980_v42 = vadd.f32 %v3973_v18, %v3972_v46 }
 0x630   :  { %v3981_v11 = vadd.f32 %v3980_v49, %v3979_v38 }
 0x631   :  { %8719 = dma.done.wait [#allocation5], 69632 }
 0x632   :  { %8720 = vsyncadd [#allocation5], 4294897664 }
 0x633   :  { %8721 = dma.done.wait [#allocation5 + $0x1], 65536 }
 0x634   :  { %8722 = vsyncadd [#allocation5 + $0x1], 4294901760  ;;  %v4538_v19 = vpack.c.bf16 %v9838_v22, %v9838_v22  ;;  %v4542_v32 = vpack.c.bf16 %v9862_v57, %v9862_v57  ;;  %v4546_v45 = vpack.c.bf16 %v9886_v56, %v9886_v56  ;;  %v4550_v5 = vpack.c.bf16 %v9906_v13, %v9906_v13  ;;  %v4570_v52 = vld [vmem:[#allocation3 + $0x8] sm:$0xff]  ;;  %v4585_v44 = vld [vmem:[#allocation3 + $0x80] sm:$0xff]  ;;  %s10496_s20 = sld [smem:[#allocation59_spill]] }
 0x635   :  { %v4554_v24 = vpack.c.bf16 %v9930_v23, %v9930_v23  ;;  %v4558_v20 = vpack.c.bf16 %v9954_v6, %v9954_v6  ;;  %v4562_v25 = vpack.c.bf16 %v3939_v3, %v3939_v3  ;;  %v4566_v37 = vpack.c.bf16 %v3967_v4, %v3967_v4  ;;  %v4569_v3 = vld [vmem:[#allocation3] sm:$0xff]  ;;  %5181 = vmatprep.subr.bf16.mxu0 %v4570_v52  ;;  %v4586_v27 = vld [vmem:[#allocation3 + $0x88] sm:$0xff] }
 0x636   :  { %v5114_v33 = vunpack.c.l.b16 %v4538_v19  ;;  %v5118_v63 = vunpack.c.l.b16 %v4542_v32  ;;  %v5122_v22 = vunpack.c.l.b16 %v4546_v45  ;;  %v5126_v29 = vunpack.c.l.b16 %v4550_v5  ;;  %5182 = vmatpush1.bf16.msra.mxu0 %v4569_v3  ;;  %v4841_v17 = vld [vmem:[#allocation3 + $0x880] sm:$0xff]  ;;  %v4858_v19 = vld [vmem:[#allocation3 + $0x908] sm:$0xff] }
 0x637   :  { %v5130_v34 = vunpack.c.l.b16 %v4554_v24  ;;  %v5134_v57 = vunpack.c.l.b16 %v4558_v20  ;;  %v5138_v7 = vunpack.c.l.b16 %v4562_v25  ;;  %v5142_v53 = vunpack.c.l.b16 %v4566_v37  ;;  %5183 = vmatprep.subr.bf16.mxu0 %v4586_v27  ;;  %v4601_v25 = vld [vmem:[#allocation3 + $0x100] sm:$0xff]  ;;  %v4938_v52 = vld [vmem:[#allocation3 + $0xb88] sm:$0xff] }
 0x638   :  { %v5152_v56 = vsel %vm3237_vm1, %v5118_v63, %v5114_v33  ;;  %v4540_v13 = vpack.c.bf16 %v9842_v61, %v9842_v61  ;;  %v4544_v23 = vpack.c.bf16 %v9866_v47, %v9866_v47  ;;  %v4548_v6 = vpack.c.bf16 %v9890_v30, %v9890_v30  ;;  %v4826_v30 = vld [vmem:[#allocation3 + $0x808] sm:$0xff]  ;;  %v4857_v37 = vld [vmem:[#allocation3 + $0x900] sm:$0xff] }
 0x639   :  { %v5153_v48 = vsel %vm3239_vm2, %v5122_v22, %v5152_v56  ;;  %v4552_v39 = vpack.c.bf16 %v9910_v55, %v9910_v55  ;;  %v4556_v15 = vpack.c.bf16 %v9934_v60, %v9934_v60  ;;  %v4560_v59 = vpack.c.bf16 %v9958_v21, %v9958_v21  ;;  %5222 = vmatprep.subr.bf16.mxu1 %v4826_v30  ;;  %v4825_v60 = vld [vmem:[#allocation3 + $0x800] sm:$0xff]  ;;  %v4842_v21 = vld [vmem:[#allocation3 + $0x888] sm:$0xff] }
 0x63a   :  { %v5154_v8 = vsel %vm3241_vm3, %v5126_v29, %v5153_v48  ;;  %v4564_v61 = vpack.c.bf16 %v9976_v54, %v9976_v54  ;;  %v4568_v47 = vpack.c.bf16 %v3981_v11, %v3981_v11  ;;  %v5116_v41 = vunpack.c.l.b16 %v4540_v13  ;;  %5223 = vmatpush1.bf16.msra.mxu1 %v4825_v60  ;;  %v4602_v11 = vld [vmem:[#allocation3 + $0x108] sm:$0xff]  ;;  %5184 = vmatpush1.bf16.msra.mxu0 %v4585_v44  ;;  %v4633_v13 = vld [vmem:[#allocation3 + $0x200] sm:$0xff] }
 0x63b   :  { %v5155_v36 = vsel %vm3243_vm4, %v5130_v34, %v5154_v8  ;;  %v5120_v43 = vunpack.c.l.b16 %v4544_v23  ;;  %v5124_v55 = vunpack.c.l.b16 %v4548_v6  ;;  %v5128_v14 = vunpack.c.l.b16 %v4552_v39  ;;  %5224 = vmatprep.subr.bf16.mxu1 %v4842_v21  ;;  %5185 = vmatprep.subr.bf16.mxu0 %v4602_v11  ;;  %v4618_v63 = vld [vmem:[#allocation3 + $0x188] sm:$0xff]  ;;  %v4889_v23 = vld [vmem:[#allocation3 + $0xa00] sm:$0xff] }
 0x63c   :  { %v5156_v2 = vsel %vm3245_vm5, %v5134_v57, %v5155_v36  ;;  %v5132_v62 = vunpack.c.l.b16 %v4556_v15  ;;  %v5136_v46 = vunpack.c.l.b16 %v4560_v59  ;;  %v5140_v49 = vunpack.c.l.b16 %v4564_v61  ;;  %v4874_v22 = vld [vmem:[#allocation3 + $0x988] sm:$0xff]  ;;  %v4617_v57 = vld [vmem:[#allocation3 + $0x180] sm:$0xff] }
 0x63d   :  { %v5157_v54 = vsel %vm3247_vm6, %v5138_v7, %v5156_v2  ;;  %v5166_v38 = vsel %vm3237_vm1, %v5120_v43, %v5116_v41  ;;  %v5144_v45 = vunpack.c.l.b16 %v4568_v47  ;;  %v4873_v7 = vld [vmem:[#allocation3 + $0x980] sm:$0xff]  ;;  %v4890_v56 = vld [vmem:[#allocation3 + $0xa08] sm:$0xff]  ;;  %v4537_v21 = vpack.c.bf16 %v9836_v12, %v9836_v12 }
 0x63e   :  { %v5158_v18 = vsel %vm3249_vm7, %v5142_v53, %v5157_v54  ;;  %v5167_v4 = vsel %vm3239_vm2, %v5124_v55, %v5166_v38  ;;  %5225 = vmatpush1.bf16.msra.mxu1 %v4841_v17  ;;  %5186 = vmatpush1.bf16.msra.mxu0 %v4601_v25  ;;  %v4634_v53 = vld [vmem:[#allocation3 + $0x208] sm:$0xff]  ;;  %v4649_v39 = vld [vmem:[#allocation3 + $0x280] sm:$0xff]  ;;  %v4541_v2 = vpack.c.bf16 %v9860_v58, %v9860_v58  ;;  %v10495_v54 = vld [vmem:[#allocation58_spill] sm:$0xff]  ;;  %vm5854_vm9 = vcmask 261120  }
 0x63f   :  { %v10017_v32 = vpack.c.b16 %v5158_v18, %v5158_v18  ;;  %v5168_v5 = vsel %vm3241_vm3, %v5128_v14, %v5167_v4  ;;  %5226 = vmatprep.subr.bf16.mxu1 %v4858_v19  ;;  %5187 = vmatprep.subr.bf16.mxu0 %v4618_v63  ;;  %v4650_v6 = vld [vmem:[#allocation3 + $0x288] sm:$0xff]  ;;  %v4905_v15 = vld [vmem:[#allocation3 + $0xa80] sm:$0xff]  ;;  %v4545_v17 = vpack.c.bf16 %v9884_v0, %v9884_v0 }
 0x640   :  { %v5169_v24 = vsel %vm3243_vm4, %v5132_v62, %v5168_v5  ;;  %v4906_v48 = vld [vmem:[#allocation3 + $0xa88] sm:$0xff]  ;;  %v4665_v61 = vld [vmem:[#allocation3 + $0x300] sm:$0xff]  ;;  %v4539_v62 = vpack.c.bf16 %v9840_v1, %v9840_v1  ;;  %v4547_v12 = vpack.c.bf16 %v9888_v10, %v9888_v10  ;;  %v5117_v4 = vunpack.c.l.b16 %v4541_v2 }
 0x641   :  { %v5170_v20 = vsel %vm3245_vm5, %v5136_v46, %v5169_v24  ;;  %5213 = vmatprep.mubr.bf16.mxu0 %v10017_v32  ;;  %v4666_v59 = vld [vmem:[#allocation3 + $0x308] sm:$0xff]  ;;  %v4921_v47 = vld [vmem:[#allocation3 + $0xb00] sm:$0xff]  ;;  %v4543_v46 = vpack.c.bf16 %v10495_v54, %v10495_v54  ;;  %v4549_v19 = vpack.c.bf16 %v9904_v28, %v9904_v28  ;;  %v5121_v24 = vunpack.c.l.b16 %v4545_v17 }
 0x642   :  { %v5171_v33 = vsel %vm3247_vm6, %v5140_v49, %v5170_v20  ;;  %5227 = vmatpush1.bf16.msra.mxu1 %v4857_v37  ;;  %5188 = vmatpush1.bf16.msra.mxu0 %v4617_v57  ;;  %v4922_v8 = vld [vmem:[#allocation3 + $0xb08] sm:$0xff]  ;;  %v4681_v30 = vld [vmem:[#allocation3 + $0x380] sm:$0xff]  ;;  %v5113_v49 = vunpack.c.l.b16 %v4537_v21  ;;  %v5115_v1 = vunpack.c.l.b16 %v4539_v62  ;;  %v5123_v10 = vunpack.c.l.b16 %v4547_v12 }
 0x643   :  { %v5172_v29 = vsel %vm3249_vm7, %v5144_v45, %v5171_v33  ;;  %5228 = vmatprep.subr.bf16.mxu1 %v4874_v22  ;;  %5189 = vmatprep.subr.bf16.mxu0 %v4634_v53  ;;  %v4682_v41 = vld [vmem:[#allocation3 + $0x388] sm:$0xff]  ;;  %v4937_v3 = vld [vmem:[#allocation3 + $0xb80] sm:$0xff]  ;;  %v5119_v11 = vunpack.c.l.b16 %v4543_v46  ;;  %v4551_v45 = vpack.c.bf16 %v9908_v9, %v9908_v9  ;;  %v4553_v63 = vpack.c.bf16 %v9928_v26, %v9928_v26 }
 0x644   :  { %v10025_v34 = vpack.c.b16 %v5172_v29, %v5172_v29  ;;  %v4698_v36 = vld [vmem:[#allocation3 + $0x408] sm:$0xff]  ;;  %v4697_v55 = vld [vmem:[#allocation3 + $0x400] sm:$0xff]  ;;  %v5145_v37 = vsel %vm3237_vm1, %v5117_v4, %v5113_v49  ;;  %v4555_v28 = vpack.c.bf16 %v9932_v35, %v9932_v35  ;;  %v5125_v9 = vunpack.c.l.b16 %v4549_v19  ;;  %v4572_v49 = vld [vmem:[#allocation3 + $0x18] sm:$0xff] }
 0x645   :  { %v4954_v43 = vld [vmem:[#allocation3 + $0xc08] sm:$0xff]  ;;  %v4953_v14 = vld [vmem:[#allocation3 + $0xc00] sm:$0xff]  ;;  %v5159_v33 = vsel %vm3237_vm1, %v5119_v11, %v5115_v1  ;;  %v5127_v22 = vunpack.c.l.b16 %v4551_v45  ;;  %v4557_v26 = vpack.c.bf16 %v9952_v16, %v9952_v16  ;;  %v4559_v35 = vpack.c.bf16 %v9956_v40, %v9956_v40  ;;  %v4828_v4 = vld [vmem:[#allocation3 + $0x818] sm:$0xff] }
 0x646   :  { %5254 = vmatprep.mubr.bf16.mxu1 %v10025_v34  ;;  %5229 = vmatpush1.bf16.msra.mxu1 %v4873_v7  ;;  %v4714_v60 = vld [vmem:[#allocation3 + $0x488] sm:$0xff]  ;;  %v4713_v38 = vld [vmem:[#allocation3 + $0x480] sm:$0xff]  ;;  %v5146_v7 = vsel %vm3239_vm2, %v5121_v24, %v5145_v37  ;;  %v5160_v53 = vsel %vm3239_vm2, %v5123_v10, %v5159_v33  ;;  %v4563_v16 = vpack.c.bf16 %v9974_v51, %v9974_v51  ;;  %v4571_v19 = vld [vmem:[#allocation3 + $0x10] sm:$0xff] }
 0x647   :  { %5230 = vmatprep.subr.bf16.mxu1 %v4890_v56  ;;  %5190 = vmatpush1.bf16.msra.mxu0 %v4633_v13  ;;  %v4970_v27 = vld [vmem:[#allocation3 + $0xc88] sm:$0xff]  ;;  %v4969_v44 = vld [vmem:[#allocation3 + $0xc80] sm:$0xff]  ;;  %v4827_v45 = vld [vmem:[#allocation3 + $0x810] sm:$0xff] }
 0x648   :  { %5191 = vmatprep.subr.bf16.mxu0 %v4650_v6  ;;  %v4730_v18 = vld [vmem:[#allocation3 + $0x508] sm:$0xff]  ;;  %v4729_v0 = vld [vmem:[#allocation3 + $0x500] sm:$0xff]  ;;  %v5131_v6 = vunpack.c.l.b16 %v4555_v28  ;;  %v4587_v24 = vld [vmem:[#allocation3 + $0x90] sm:$0xff] }
 0x649   :  { %v4986_v58 = vld [vmem:[#allocation3 + $0xd08] sm:$0xff]  ;;  %v4985_v5 = vld [vmem:[#allocation3 + $0xd00] sm:$0xff]  ;;  %v4843_v10 = vld [vmem:[#allocation3 + $0x890] sm:$0xff] }
 0x64a   :  { %5231 = vmatpush1.bf16.msra.mxu1 %v4889_v23  ;;  %v4746_v20 = vld [vmem:[#allocation3 + $0x588] sm:$0xff]  ;;  %v4745_v29 = vld [vmem:[#allocation3 + $0x580] sm:$0xff]  ;;  %v5129_v23 = vunpack.c.l.b16 %v4553_v63  ;;  %v4603_v37 = vld [vmem:[#allocation3 + $0x110] sm:$0xff] }
 0x64b   :  { %5232 = vmatprep.subr.bf16.mxu1 %v4906_v48  ;;  %5192 = vmatpush1.bf16.msra.mxu0 %v4649_v39  ;;  %v5002_v25 = vld [vmem:[#allocation3 + $0xd88] sm:$0xff]  ;;  %v5001_v57 = vld [vmem:[#allocation3 + $0xd80] sm:$0xff]  ;;  %v5147_v48 = vsel %vm3241_vm3, %v5125_v9, %v5146_v7  ;;  %v5161_v39 = vsel %vm3241_vm3, %v5127_v22, %v5160_v53  ;;  %v4859_v33 = vld [vmem:[#allocation3 + $0x910] sm:$0xff] }
 0x64c   :  { %5193 = vmatprep.subr.bf16.mxu0 %v4666_v59  ;;  %v4762_v56 = vld [vmem:[#allocation3 + $0x608] sm:$0xff]  ;;  %v5017_v59 = vld [vmem:[#allocation3 + $0xe00] sm:$0xff]  ;;  %v4620_v63 = vld [vmem:[#allocation3 + $0x198] sm:$0xff] }
 0x64d   :  { %v5018_v13 = vld [vmem:[#allocation3 + $0xe08] sm:$0xff]  ;;  %v5033_v51 = vld [vmem:[#allocation3 + $0xe80] sm:$0xff]  ;;  %v4876_v28 = vld [vmem:[#allocation3 + $0x998] sm:$0xff] }
 0x64e   :  { %5233 = vmatpush1.bf16.msra.mxu1 %v4905_v15  ;;  %v4761_v15 = vld [vmem:[#allocation3 + $0x600] sm:$0xff]  ;;  %v5034_v40 = vld [vmem:[#allocation3 + $0xe88] sm:$0xff]  ;;  %v4619_v9 = vld [vmem:[#allocation3 + $0x190] sm:$0xff] }
 0x64f   :  { %5234 = vmatprep.subr.bf16.mxu1 %v4922_v8  ;;  %5194 = vmatpush1.bf16.msra.mxu0 %v4665_v61  ;;  %v4561_v8 = vpack.c.bf16 %v9972_v31, %v9972_v31  ;;  %v4778_v61 = vld [vmem:[#allocation3 + $0x688] sm:$0xff]  ;;  %v4777_v31 = vld [vmem:[#allocation3 + $0x680] sm:$0xff]  ;;  %v4875_v22 = vld [vmem:[#allocation3 + $0x990] sm:$0xff] }
 0x650   :  { %5195 = vmatprep.subr.bf16.mxu0 %v4682_v41  ;;  %v5135_v41 = vunpack.c.l.b16 %v4559_v35  ;;  %v4635_v7 = vld [vmem:[#allocation3 + $0x210] sm:$0xff] }
 0x651   :  { %v4891_v53 = vld [vmem:[#allocation3 + $0xa10] sm:$0xff] }
 0x652   :  { %5235 = vmatpush1.bf16.msra.mxu1 %v4921_v47  ;;  %v5133_v47 = vunpack.c.l.b16 %v4557_v26  ;;  %v4651_v26 = vld [vmem:[#allocation3 + $0x290] sm:$0xff] }
 0x653   :  { %5236 = vmatprep.subr.bf16.mxu1 %v4938_v52  ;;  %5196 = vmatpush1.bf16.msra.mxu0 %v4681_v30  ;;  %v5148_v52 = vsel %vm3243_vm4, %v5129_v23, %v5147_v48  ;;  %v5162_v30 = vsel %vm3243_vm4, %v5131_v6, %v5161_v39  ;;  %v4907_v35 = vld [vmem:[#allocation3 + $0xa90] sm:$0xff]  ;;  %v4668_v23 = vld [vmem:[#allocation3 + $0x318] sm:$0xff] }
 0x654   :  { %5197 = vmatprep.subr.bf16.mxu0 %v4698_v36  ;;  %v4567_v36 = vpack.c.bf16 %v9980_v42, %v9980_v42  ;;  %v5163_v21 = vsel %vm3245_vm5, %v5135_v41, %v5162_v30  ;;  %v5049_v42 = vld [vmem:[#allocation3 + $0xf00] sm:$0xff]  ;;  %v4924_v6 = vld [vmem:[#allocation3 + $0xb18] sm:$0xff]  ;;  %v4667_v48 = vld [vmem:[#allocation3 + $0x310] sm:$0xff] }
 0x655   :  { %v4923_v39 = vld [vmem:[#allocation3 + $0xb10] sm:$0xff]  ;;  %v4972_v30 = vld [vmem:[#allocation3 + $0xc98] sm:$0xff] }
 0x656   :  { %5237 = vmatpush1.bf16.msra.mxu1 %v4937_v3  ;;  %v4565_v3 = vpack.c.bf16 %v9978_v50, %v9978_v50  ;;  %v5143_v62 = vunpack.c.l.b16 %v4567_v36  ;;  %v4793_v50 = vld [vmem:[#allocation3 + $0x700] sm:$0xff]  ;;  %v4955_v41 = vld [vmem:[#allocation3 + $0xc10] sm:$0xff] }
 0x657   :  { %5238 = vmatprep.subr.bf16.mxu1 %v4954_v43  ;;  %5198 = vmatpush1.bf16.msra.mxu0 %v4697_v55  ;;  %v5137_v43 = vunpack.c.l.b16 %v4561_v8  ;;  %v5139_v55 = vunpack.c.l.b16 %v4563_v16  ;;  %v4683_v8 = vld [vmem:[#allocation3 + $0x390] sm:$0xff] }
 0x658   :  { %5199 = vmatprep.subr.bf16.mxu0 %v4714_v60  ;;  %v5050_v60 = vld [vmem:[#allocation3 + $0xf08] sm:$0xff]  ;;  %v5141_v2 = vunpack.c.l.b16 %v4565_v3  ;;  %v4939_v16 = vld [vmem:[#allocation3 + $0xb90] sm:$0xff] }
 0x659   :  { %v5164_v46 = vsel %vm3247_vm6, %v5139_v55, %v5163_v21  ;;  %v4715_v3 = vld [vmem:[#allocation3 + $0x490] sm:$0xff] }
 0x65a   :  { %5239 = vmatpush1.bf16.msra.mxu1 %v4953_v14  ;;  %v4794_v14 = vld [vmem:[#allocation3 + $0x708] sm:$0xff]  ;;  %v5165_v12 = vsel %vm3249_vm7, %v5143_v62, %v5164_v46  ;;  %v4971_v36 = vld [vmem:[#allocation3 + $0xc90] sm:$0xff]  ;;  %v5020_v62 = vld [vmem:[#allocation3 + $0xe18] sm:$0xff] }
 0x65b   :  { %5240 = vmatprep.subr.bf16.mxu1 %v4970_v27  ;;  %5200 = vmatpush1.bf16.msra.mxu0 %v4713_v38  ;;  %v5149_v27 = vsel %vm3245_vm5, %v5133_v47, %v5148_v52  ;;  %v4810_v38 = vld [vmem:[#allocation3 + $0x788] sm:$0xff]  ;;  %v10076_v11 = vpack.c.b16 %v5165_v12, %v5165_v12  ;;  %v4699_v47 = vld [vmem:[#allocation3 + $0x410] sm:$0xff]  ;;  %v4716_v52 = vld [vmem:[#allocation3 + $0x498] sm:$0xff] }
 0x65c   :  { %5201 = vmatprep.subr.bf16.mxu0 %v4730_v18  ;;  %v5150_v54 = vsel %vm3247_vm6, %v5137_v43, %v5149_v27  ;;  %v4809_v18 = vld [vmem:[#allocation3 + $0x780] sm:$0xff]  ;;  %v4731_v43 = vld [vmem:[#allocation3 + $0x510] sm:$0xff]  ;;  %v5036_v46 = vld [vmem:[#allocation3 + $0xe98] sm:$0xff] }
 0x65d   :  { %v5151_v17 = vsel %vm3249_vm7, %v5141_v2, %v5150_v54  ;;  %v4987_v55 = vld [vmem:[#allocation3 + $0xd10] sm:$0xff]  ;;  %v4764_v2 = vld [vmem:[#allocation3 + $0x618] sm:$0xff] }
 0x65e   :  { %5241 = vmatpush1.bf16.msra.mxu1 %v4969_v44  ;;  %v5066_v44 = vld [vmem:[#allocation3 + $0xf88] sm:$0xff]  ;;  %v10074_v1 = vpack.c.b16 %v5151_v17, %v5151_v17  ;;  %v4747_v27 = vld [vmem:[#allocation3 + $0x590] sm:$0xff]  ;;  %v4780_v54 = vld [vmem:[#allocation3 + $0x698] sm:$0xff] }
 0x65f   :  { %5242 = vmatprep.subr.bf16.mxu1 %v4986_v58  ;;  %5202 = vmatpush1.bf16.msra.mxu0 %v4729_v0  ;;  %v5065_v58 = vld [vmem:[#allocation3 + $0xf80] sm:$0xff]  ;;  %v4588_v0 = vld [vmem:[#allocation3 + $0x98] sm:$0xff]  ;;  %v5003_v21 = vld [vmem:[#allocation3 + $0xd90] sm:$0xff] }
 0x660   :  { %5203 = vmatprep.subr.bf16.mxu0 %v4746_v20  ;;  %v4604_v20 = vld [vmem:[#allocation3 + $0x118] sm:$0xff] }
 0x661   :  { %v4796_v17 = vld [vmem:[#allocation3 + $0x718] sm:$0xff] }
 0x662   :  { %5243 = vmatpush1.bf16.msra.mxu1 %v4985_v5  ;;  %v4844_v5 = vld [vmem:[#allocation3 + $0x898] sm:$0xff] }
 0x663   :  { %5244 = vmatprep.subr.bf16.mxu1 %v5002_v25  ;;  %5204 = vmatpush1.bf16.msra.mxu0 %v4745_v29  ;;  %v4860_v25 = vld [vmem:[#allocation3 + $0x918] sm:$0xff] }
 0x664   :  { %5205 = vmatprep.subr.bf16.mxu0 %v4762_v56  ;;  %v4636_v29 = vld [vmem:[#allocation3 + $0x218] sm:$0xff] }
 0x665   :  { %v4652_v56 = vld [vmem:[#allocation3 + $0x298] sm:$0xff] }
 0x666   :  { %5245 = vmatpush1.bf16.msra.mxu1 %v5001_v57  ;;  %v4892_v57 = vld [vmem:[#allocation3 + $0xa18] sm:$0xff] }
 0x667   :  { %5246 = vmatprep.subr.bf16.mxu1 %v5018_v13  ;;  %5206 = vmatpush1.bf16.msra.mxu0 %v4761_v15  ;;  %v4908_v13 = vld [vmem:[#allocation3 + $0xa98] sm:$0xff] }
 0x668   :  { %5207 = vmatprep.subr.bf16.mxu0 %v4778_v61  ;;  %v4684_v15 = vld [vmem:[#allocation3 + $0x398] sm:$0xff] }
 0x669   :  { %v4700_v61 = vld [vmem:[#allocation3 + $0x418] sm:$0xff] }
 0x66a   :  { %5247 = vmatpush1.bf16.msra.mxu1 %v5017_v59  ;;  %v4940_v59 = vld [vmem:[#allocation3 + $0xb98] sm:$0xff] }
 0x66b   :  { %5248 = vmatprep.subr.bf16.mxu1 %v5034_v40  ;;  %5208 = vmatpush1.bf16.msra.mxu0 %v4777_v31  ;;  %v4956_v40 = vld [vmem:[#allocation3 + $0xc18] sm:$0xff] }
 0x66c   :  { %5209 = vmatprep.subr.bf16.mxu0 %v4794_v14  ;;  %v4732_v31 = vld [vmem:[#allocation3 + $0x518] sm:$0xff] }
 0x66d   :  { %v4748_v14 = vld [vmem:[#allocation3 + $0x598] sm:$0xff] }
 0x66e   :  { %5249 = vmatpush1.bf16.msra.mxu1 %v5033_v51  ;;  %v4988_v51 = vld [vmem:[#allocation3 + $0xd18] sm:$0xff] }
 0x66f   :  { %5250 = vmatprep.subr.bf16.mxu1 %v5050_v60  ;;  %5210 = vmatpush1.bf16.msra.mxu0 %v4793_v50  ;;  %v5004_v60 = vld [vmem:[#allocation3 + $0xd98] sm:$0xff]  ;;  %v4763_v50 = vld [vmem:[#allocation3 + $0x610] sm:$0xff] }
 0x670   :  { %5211 = vmatprep.subr.bf16.mxu0 %v4810_v38  ;;  %v4779_v38 = vld [vmem:[#allocation3 + $0x690] sm:$0xff]  ;;  %v5052_v12 = vld [vmem:[#allocation3 + $0xf18] sm:$0xff] }
 0x672   :  { %5251 = vmatpush1.bf16.msra.mxu1 %v5049_v42  ;;  %v5019_v42 = vld [vmem:[#allocation3 + $0xe10] sm:$0xff] }
 0x673   :  { %5252 = vmatprep.subr.bf16.mxu1 %v5066_v44  ;;  %5212 = vmatpush1.bf16.msra.mxu0 %v4809_v18  ;;  %v5035_v44 = vld [vmem:[#allocation3 + $0xe90] sm:$0xff] }
 0x674   :  { %5263 = vmatprep.subr.bf16.mxu0 %v4572_v49  ;;  %v4795_v18 = vld [vmem:[#allocation3 + $0x710] sm:$0xff]  ;;  %v4812_v49 = vld [vmem:[#allocation3 + $0x798] sm:$0xff] }
 0x676   :  { %5253 = vmatpush1.bf16.msra.mxu1 %v5065_v58  ;;  %5214 = vmatmul.mubr.bf16.vlgmr.msra.gmra.mrb[36].mxu0 %v10074_v1  ;;  %v5051_v58 = vld [vmem:[#allocation3 + $0xf10] sm:$0xff] }
 0x677   :  { %5304 = vmatprep.subr.bf16.mxu1 %v4828_v4  ;;  %5264 = vmatpush1.bf16.msra.mxu0 %v4571_v19  ;;  %v5068_v4 = vld [vmem:[#allocation3 + $0xf98] sm:$0xff]  ;;  %v4811_v19 = vld [vmem:[#allocation3 + $0x790] sm:$0xff] }
 0x678   :  { %5265 = vmatprep.subr.bf16.mxu0 %v4588_v0  ;;  %5295 = vmatprep.mubr.bf16.mxu0 %v10017_v32  ;;  %v4574_v0 = vld [vmem:[#allocation3 + $0x28] sm:$0xff] }
 0x679   :  { %5255 = vmatmul.mubr.bf16.vlgmr.msra.gmra.mrb[36].mxu1 %v10076_v11 }
 0x67a   :  { %5305 = vmatpush1.bf16.msra.mxu1 %v4827_v45  ;;  %5336 = vmatprep.mubr.bf16.mxu1 %v10025_v34  ;;  %v5067_v45 = vld [vmem:[#allocation3 + $0xf90] sm:$0xff] }
 0x67b   :  { %5306 = vmatprep.subr.bf16.mxu1 %v4844_v5  ;;  %5266 = vmatpush1.bf16.msra.mxu0 %v4587_v24  ;;  %v4830_v5 = vld [vmem:[#allocation3 + $0x828] sm:$0xff]  ;;  %v4573_v24 = vld [vmem:[#allocation3 + $0x20] sm:$0xff] }
 0x67c   :  { %5267 = vmatprep.subr.bf16.mxu0 %v4604_v20  ;;  %v4590_v20 = vld [vmem:[#allocation3 + $0xa8] sm:$0xff] }
 0x67e   :  { %5307 = vmatpush1.bf16.msra.mxu1 %v4843_v10  ;;  %v4829_v10 = vld [vmem:[#allocation3 + $0x820] sm:$0xff] }
 0x67f   :  { %5308 = vmatprep.subr.bf16.mxu1 %v4860_v25  ;;  %5268 = vmatpush1.bf16.msra.mxu0 %v4603_v37  ;;  %v4846_v25 = vld [vmem:[#allocation3 + $0x8a8] sm:$0xff]  ;;  %v4589_v37 = vld [vmem:[#allocation3 + $0xa0] sm:$0xff] }
 0x680   :  { %5269 = vmatprep.subr.bf16.mxu0 %v4620_v63  ;;  %v4606_v63 = vld [vmem:[#allocation3 + $0x128] sm:$0xff] }
 0x682   :  { %5309 = vmatpush1.bf16.msra.mxu1 %v4859_v33  ;;  %v4845_v33 = vld [vmem:[#allocation3 + $0x8a0] sm:$0xff] }
 0x683   :  { %5310 = vmatprep.subr.bf16.mxu1 %v4876_v28  ;;  %5270 = vmatpush1.bf16.msra.mxu0 %v4619_v9  ;;  %v4862_v28 = vld [vmem:[#allocation3 + $0x928] sm:$0xff]  ;;  %v4605_v9 = vld [vmem:[#allocation3 + $0x120] sm:$0xff] }
 0x684   :  { %5271 = vmatprep.subr.bf16.mxu0 %v4636_v29  ;;  %v4622_v29 = vld [vmem:[#allocation3 + $0x1a8] sm:$0xff] }
 0x686   :  { %5311 = vmatpush1.bf16.msra.mxu1 %v4875_v22  ;;  %v4861_v22 = vld [vmem:[#allocation3 + $0x920] sm:$0xff] }
 0x687   :  { %5312 = vmatprep.subr.bf16.mxu1 %v4892_v57  ;;  %5272 = vmatpush1.bf16.msra.mxu0 %v4635_v7  ;;  %v4878_v57 = vld [vmem:[#allocation3 + $0x9a8] sm:$0xff]  ;;  %v4621_v7 = vld [vmem:[#allocation3 + $0x1a0] sm:$0xff] }
 0x688   :  { %5273 = vmatprep.subr.bf16.mxu0 %v4652_v56  ;;  %v4638_v56 = vld [vmem:[#allocation3 + $0x228] sm:$0xff] }
 0x68a   :  { %5313 = vmatpush1.bf16.msra.mxu1 %v4891_v53  ;;  %v4877_v53 = vld [vmem:[#allocation3 + $0x9a0] sm:$0xff] }
 0x68b   :  { %5314 = vmatprep.subr.bf16.mxu1 %v4908_v13  ;;  %5274 = vmatpush1.bf16.msra.mxu0 %v4651_v26  ;;  %v4894_v13 = vld [vmem:[#allocation3 + $0xa28] sm:$0xff]  ;;  %v4637_v26 = vld [vmem:[#allocation3 + $0x220] sm:$0xff] }
 0x68c   :  { %5275 = vmatprep.subr.bf16.mxu0 %v4668_v23  ;;  %v4654_v23 = vld [vmem:[#allocation3 + $0x2a8] sm:$0xff] }
 0x68e   :  { %5315 = vmatpush1.bf16.msra.mxu1 %v4907_v35  ;;  %v4893_v35 = vld [vmem:[#allocation3 + $0xa20] sm:$0xff] }
 0x68f   :  { %5316 = vmatprep.subr.bf16.mxu1 %v4924_v6  ;;  %5276 = vmatpush1.bf16.msra.mxu0 %v4667_v48  ;;  %v4910_v6 = vld [vmem:[#allocation3 + $0xaa8] sm:$0xff]  ;;  %v4653_v48 = vld [vmem:[#allocation3 + $0x2a0] sm:$0xff] }
 0x690   :  { %5277 = vmatprep.subr.bf16.mxu0 %v4684_v15  ;;  %v4670_v15 = vld [vmem:[#allocation3 + $0x328] sm:$0xff] }
 0x692   :  { %5317 = vmatpush1.bf16.msra.mxu1 %v4923_v39  ;;  %v4909_v39 = vld [vmem:[#allocation3 + $0xaa0] sm:$0xff] }
 0x693   :  { %5318 = vmatprep.subr.bf16.mxu1 %v4940_v59  ;;  %5278 = vmatpush1.bf16.msra.mxu0 %v4683_v8  ;;  %v4926_v59 = vld [vmem:[#allocation3 + $0xb28] sm:$0xff]  ;;  %v4669_v8 = vld [vmem:[#allocation3 + $0x320] sm:$0xff] }
 0x694   :  { %5279 = vmatprep.subr.bf16.mxu0 %v4700_v61  ;;  %v4686_v61 = vld [vmem:[#allocation3 + $0x3a8] sm:$0xff] }
 0x696   :  { %5319 = vmatpush1.bf16.msra.mxu1 %v4939_v16  ;;  %v4925_v16 = vld [vmem:[#allocation3 + $0xb20] sm:$0xff] }
 0x697   :  { %5320 = vmatprep.subr.bf16.mxu1 %v4956_v40  ;;  %5280 = vmatpush1.bf16.msra.mxu0 %v4699_v47  ;;  %v4942_v40 = vld [vmem:[#allocation3 + $0xba8] sm:$0xff]  ;;  %v4685_v47 = vld [vmem:[#allocation3 + $0x3a0] sm:$0xff] }
 0x698   :  { %5281 = vmatprep.subr.bf16.mxu0 %v4716_v52  ;;  %v4702_v52 = vld [vmem:[#allocation3 + $0x428] sm:$0xff] }
 0x69a   :  { %5321 = vmatpush1.bf16.msra.mxu1 %v4955_v41  ;;  %v4941_v41 = vld [vmem:[#allocation3 + $0xba0] sm:$0xff] }
 0x69b   :  { %5322 = vmatprep.subr.bf16.mxu1 %v4972_v30  ;;  %5282 = vmatpush1.bf16.msra.mxu0 %v4715_v3  ;;  %v4958_v30 = vld [vmem:[#allocation3 + $0xc28] sm:$0xff]  ;;  %v4701_v3 = vld [vmem:[#allocation3 + $0x420] sm:$0xff] }
 0x69c   :  { %5283 = vmatprep.subr.bf16.mxu0 %v4732_v31  ;;  %v4718_v31 = vld [vmem:[#allocation3 + $0x4a8] sm:$0xff] }
 0x69e   :  { %5323 = vmatpush1.bf16.msra.mxu1 %v4971_v36  ;;  %v4957_v36 = vld [vmem:[#allocation3 + $0xc20] sm:$0xff] }
 0x69f   :  { %5324 = vmatprep.subr.bf16.mxu1 %v4988_v51  ;;  %5284 = vmatpush1.bf16.msra.mxu0 %v4731_v43  ;;  %v4974_v51 = vld [vmem:[#allocation3 + $0xca8] sm:$0xff]  ;;  %v4717_v43 = vld [vmem:[#allocation3 + $0x4a0] sm:$0xff] }
 0x6a0   :  { %5285 = vmatprep.subr.bf16.mxu0 %v4748_v14  ;;  %v4734_v14 = vld [vmem:[#allocation3 + $0x528] sm:$0xff] }
 0x6a2   :  { %5325 = vmatpush1.bf16.msra.mxu1 %v4987_v55  ;;  %v4973_v55 = vld [vmem:[#allocation3 + $0xca0] sm:$0xff] }
 0x6a3   :  { %5326 = vmatprep.subr.bf16.mxu1 %v5004_v60  ;;  %5286 = vmatpush1.bf16.msra.mxu0 %v4747_v27  ;;  %v4990_v60 = vld [vmem:[#allocation3 + $0xd28] sm:$0xff]  ;;  %v4733_v27 = vld [vmem:[#allocation3 + $0x520] sm:$0xff] }
 0x6a4   :  { %5287 = vmatprep.subr.bf16.mxu0 %v4764_v2  ;;  %v4750_v2 = vld [vmem:[#allocation3 + $0x5a8] sm:$0xff] }
 0x6a6   :  { %5327 = vmatpush1.bf16.msra.mxu1 %v5003_v21  ;;  %v4989_v21 = vld [vmem:[#allocation3 + $0xd20] sm:$0xff] }
 0x6a7   :  { %5328 = vmatprep.subr.bf16.mxu1 %v5020_v62  ;;  %5288 = vmatpush1.bf16.msra.mxu0 %v4763_v50  ;;  %v5006_v62 = vld [vmem:[#allocation3 + $0xda8] sm:$0xff]  ;;  %v4749_v50 = vld [vmem:[#allocation3 + $0x5a0] sm:$0xff] }
 0x6a8   :  { %5289 = vmatprep.subr.bf16.mxu0 %v4780_v54  ;;  %v4766_v54 = vld [vmem:[#allocation3 + $0x628] sm:$0xff] }
 0x6aa   :  { %5329 = vmatpush1.bf16.msra.mxu1 %v5019_v42  ;;  %v5005_v42 = vld [vmem:[#allocation3 + $0xda0] sm:$0xff] }
 0x6ab   :  { %5330 = vmatprep.subr.bf16.mxu1 %v5036_v46  ;;  %5290 = vmatpush1.bf16.msra.mxu0 %v4779_v38  ;;  %v5022_v46 = vld [vmem:[#allocation3 + $0xe28] sm:$0xff]  ;;  %v4765_v38 = vld [vmem:[#allocation3 + $0x620] sm:$0xff] }
 0x6ac   :  { %5291 = vmatprep.subr.bf16.mxu0 %v4796_v17  ;;  %v4782_v17 = vld [vmem:[#allocation3 + $0x6a8] sm:$0xff] }
 0x6ae   :  { %5331 = vmatpush1.bf16.msra.mxu1 %v5035_v44  ;;  %v5021_v44 = vld [vmem:[#allocation3 + $0xe20] sm:$0xff] }
 0x6af   :  { %5332 = vmatprep.subr.bf16.mxu1 %v5052_v12  ;;  %5292 = vmatpush1.bf16.msra.mxu0 %v4795_v18  ;;  %v5038_v12 = vld [vmem:[#allocation3 + $0xea8] sm:$0xff]  ;;  %v4781_v18 = vld [vmem:[#allocation3 + $0x6a0] sm:$0xff] }
 0x6b0   :  { %5293 = vmatprep.subr.bf16.mxu0 %v4812_v49  ;;  %v4798_v49 = vld [vmem:[#allocation3 + $0x728] sm:$0xff] }
 0x6b2   :  { %5333 = vmatpush1.bf16.msra.mxu1 %v5051_v58  ;;  %v5037_v58 = vld [vmem:[#allocation3 + $0xea0] sm:$0xff] }
 0x6b3   :  { %5334 = vmatprep.subr.bf16.mxu1 %v5068_v4  ;;  %5294 = vmatpush1.bf16.msra.mxu0 %v4811_v19  ;;  %v5054_v4 = vld [vmem:[#allocation3 + $0xf28] sm:$0xff]  ;;  %v4797_v19 = vld [vmem:[#allocation3 + $0x720] sm:$0xff] }
 0x6b4   :  { %5345 = vmatprep.subr.bf16.mxu0 %v4574_v0  ;;  %v4814_v0 = vld [vmem:[#allocation3 + $0x7a8] sm:$0xff] }
 0x6b6   :  { %5335 = vmatpush1.bf16.msra.mxu1 %v5067_v45  ;;  %5296 = vmatmul.mubr.bf16.vlgmr.msra.gmra.mrb[40].mxu0 %v10074_v1  ;;  %v5053_v45 = vld [vmem:[#allocation3 + $0xf20] sm:$0xff] }
 0x6b7   :  { %5386 = vmatprep.subr.bf16.mxu1 %v4830_v5  ;;  %5346 = vmatpush1.bf16.msra.mxu0 %v4573_v24  ;;  %v5070_v5 = vld [vmem:[#allocation3 + $0xfa8] sm:$0xff]  ;;  %v4813_v24 = vld [vmem:[#allocation3 + $0x7a0] sm:$0xff] }
 0x6b8   :  { %5347 = vmatprep.subr.bf16.mxu0 %v4590_v20  ;;  %5377 = vmatprep.mubr.bf16.mxu0 %v10017_v32  ;;  %v4576_v20 = vld [vmem:[#allocation3 + $0x38] sm:$0xff] }
 0x6b9   :  { %5337 = vmatmul.mubr.bf16.vlgmr.msra.gmra.mrb[40].mxu1 %v10076_v11 }
 0x6ba   :  { %5387 = vmatpush1.bf16.msra.mxu1 %v4829_v10  ;;  %5418 = vmatprep.mubr.bf16.mxu1 %v10025_v34  ;;  %v5069_v10 = vld [vmem:[#allocation3 + $0xfa0] sm:$0xff] }
 0x6bb   :  { %5388 = vmatprep.subr.bf16.mxu1 %v4846_v25  ;;  %5348 = vmatpush1.bf16.msra.mxu0 %v4589_v37  ;;  %v4832_v25 = vld [vmem:[#allocation3 + $0x838] sm:$0xff]  ;;  %v4575_v37 = vld [vmem:[#allocation3 + $0x30] sm:$0xff] }
 0x6bc   :  { %5349 = vmatprep.subr.bf16.mxu0 %v4606_v63  ;;  %v4592_v63 = vld [vmem:[#allocation3 + $0xb8] sm:$0xff] }
 0x6be   :  { %5389 = vmatpush1.bf16.msra.mxu1 %v4845_v33  ;;  %v4831_v33 = vld [vmem:[#allocation3 + $0x830] sm:$0xff] }
 0x6bf   :  { %5390 = vmatprep.subr.bf16.mxu1 %v4862_v28  ;;  %5350 = vmatpush1.bf16.msra.mxu0 %v4605_v9  ;;  %v4848_v28 = vld [vmem:[#allocation3 + $0x8b8] sm:$0xff]  ;;  %v4591_v9 = vld [vmem:[#allocation3 + $0xb0] sm:$0xff] }
 0x6c0   :  { %5351 = vmatprep.subr.bf16.mxu0 %v4622_v29  ;;  %v4608_v29 = vld [vmem:[#allocation3 + $0x138] sm:$0xff] }
 0x6c2   :  { %5391 = vmatpush1.bf16.msra.mxu1 %v4861_v22  ;;  %v4847_v22 = vld [vmem:[#allocation3 + $0x8b0] sm:$0xff] }
 0x6c3   :  { %5392 = vmatprep.subr.bf16.mxu1 %v4878_v57  ;;  %5352 = vmatpush1.bf16.msra.mxu0 %v4621_v7  ;;  %v4864_v57 = vld [vmem:[#allocation3 + $0x938] sm:$0xff]  ;;  %v4607_v7 = vld [vmem:[#allocation3 + $0x130] sm:$0xff] }
 0x6c4   :  { %5353 = vmatprep.subr.bf16.mxu0 %v4638_v56  ;;  %v4624_v56 = vld [vmem:[#allocation3 + $0x1b8] sm:$0xff] }
 0x6c6   :  { %5393 = vmatpush1.bf16.msra.mxu1 %v4877_v53  ;;  %v4863_v53 = vld [vmem:[#allocation3 + $0x930] sm:$0xff] }
 0x6c7   :  { %5394 = vmatprep.subr.bf16.mxu1 %v4894_v13  ;;  %5354 = vmatpush1.bf16.msra.mxu0 %v4637_v26  ;;  %v4880_v13 = vld [vmem:[#allocation3 + $0x9b8] sm:$0xff]  ;;  %v4623_v26 = vld [vmem:[#allocation3 + $0x1b0] sm:$0xff] }
 0x6c8   :  { %5355 = vmatprep.subr.bf16.mxu0 %v4654_v23  ;;  %v4640_v23 = vld [vmem:[#allocation3 + $0x238] sm:$0xff] }
 0x6ca   :  { %5395 = vmatpush1.bf16.msra.mxu1 %v4893_v35  ;;  %v4879_v35 = vld [vmem:[#allocation3 + $0x9b0] sm:$0xff] }
 0x6cb   :  { %5396 = vmatprep.subr.bf16.mxu1 %v4910_v6  ;;  %5356 = vmatpush1.bf16.msra.mxu0 %v4653_v48  ;;  %v4896_v6 = vld [vmem:[#allocation3 + $0xa38] sm:$0xff]  ;;  %v4639_v48 = vld [vmem:[#allocation3 + $0x230] sm:$0xff] }
 0x6cc   :  { %5357 = vmatprep.subr.bf16.mxu0 %v4670_v15  ;;  %v4656_v15 = vld [vmem:[#allocation3 + $0x2b8] sm:$0xff] }
 0x6ce   :  { %5397 = vmatpush1.bf16.msra.mxu1 %v4909_v39  ;;  %v4895_v39 = vld [vmem:[#allocation3 + $0xa30] sm:$0xff] }
 0x6cf   :  { %5398 = vmatprep.subr.bf16.mxu1 %v4926_v59  ;;  %5358 = vmatpush1.bf16.msra.mxu0 %v4669_v8  ;;  %v4912_v59 = vld [vmem:[#allocation3 + $0xab8] sm:$0xff]  ;;  %v4655_v8 = vld [vmem:[#allocation3 + $0x2b0] sm:$0xff] }
 0x6d0   :  { %5359 = vmatprep.subr.bf16.mxu0 %v4686_v61  ;;  %v4672_v61 = vld [vmem:[#allocation3 + $0x338] sm:$0xff] }
 0x6d2   :  { %5399 = vmatpush1.bf16.msra.mxu1 %v4925_v16  ;;  %v4911_v16 = vld [vmem:[#allocation3 + $0xab0] sm:$0xff] }
 0x6d3   :  { %5400 = vmatprep.subr.bf16.mxu1 %v4942_v40  ;;  %5360 = vmatpush1.bf16.msra.mxu0 %v4685_v47  ;;  %v4928_v40 = vld [vmem:[#allocation3 + $0xb38] sm:$0xff]  ;;  %v4671_v47 = vld [vmem:[#allocation3 + $0x330] sm:$0xff] }
 0x6d4   :  { %5361 = vmatprep.subr.bf16.mxu0 %v4702_v52  ;;  %v4688_v52 = vld [vmem:[#allocation3 + $0x3b8] sm:$0xff] }
 0x6d6   :  { %5401 = vmatpush1.bf16.msra.mxu1 %v4941_v41  ;;  %v4927_v41 = vld [vmem:[#allocation3 + $0xb30] sm:$0xff] }
 0x6d7   :  { %5402 = vmatprep.subr.bf16.mxu1 %v4958_v30  ;;  %5362 = vmatpush1.bf16.msra.mxu0 %v4701_v3  ;;  %v4944_v30 = vld [vmem:[#allocation3 + $0xbb8] sm:$0xff]  ;;  %v4687_v3 = vld [vmem:[#allocation3 + $0x3b0] sm:$0xff] }
 0x6d8   :  { %5363 = vmatprep.subr.bf16.mxu0 %v4718_v31  ;;  %v4704_v31 = vld [vmem:[#allocation3 + $0x438] sm:$0xff] }
 0x6da   :  { %5403 = vmatpush1.bf16.msra.mxu1 %v4957_v36  ;;  %v4943_v36 = vld [vmem:[#allocation3 + $0xbb0] sm:$0xff] }
 0x6db   :  { %5404 = vmatprep.subr.bf16.mxu1 %v4974_v51  ;;  %5364 = vmatpush1.bf16.msra.mxu0 %v4717_v43  ;;  %v4960_v51 = vld [vmem:[#allocation3 + $0xc38] sm:$0xff]  ;;  %v4703_v43 = vld [vmem:[#allocation3 + $0x430] sm:$0xff] }
 0x6dc   :  { %5365 = vmatprep.subr.bf16.mxu0 %v4734_v14  ;;  %v4720_v14 = vld [vmem:[#allocation3 + $0x4b8] sm:$0xff] }
 0x6de   :  { %5405 = vmatpush1.bf16.msra.mxu1 %v4973_v55  ;;  %v4959_v55 = vld [vmem:[#allocation3 + $0xc30] sm:$0xff] }
 0x6df   :  { %5406 = vmatprep.subr.bf16.mxu1 %v4990_v60  ;;  %5366 = vmatpush1.bf16.msra.mxu0 %v4733_v27  ;;  %v4976_v60 = vld [vmem:[#allocation3 + $0xcb8] sm:$0xff]  ;;  %v4719_v27 = vld [vmem:[#allocation3 + $0x4b0] sm:$0xff] }
 0x6e0   :  { %5367 = vmatprep.subr.bf16.mxu0 %v4750_v2  ;;  %v4736_v2 = vld [vmem:[#allocation3 + $0x538] sm:$0xff] }
 0x6e2   :  { %5407 = vmatpush1.bf16.msra.mxu1 %v4989_v21  ;;  %v4975_v21 = vld [vmem:[#allocation3 + $0xcb0] sm:$0xff] }
 0x6e3   :  { %5408 = vmatprep.subr.bf16.mxu1 %v5006_v62  ;;  %5368 = vmatpush1.bf16.msra.mxu0 %v4749_v50  ;;  %v4992_v62 = vld [vmem:[#allocation3 + $0xd38] sm:$0xff]  ;;  %v4735_v50 = vld [vmem:[#allocation3 + $0x530] sm:$0xff] }
 0x6e4   :  { %5369 = vmatprep.subr.bf16.mxu0 %v4766_v54  ;;  %v4752_v54 = vld [vmem:[#allocation3 + $0x5b8] sm:$0xff] }
 0x6e6   :  { %5409 = vmatpush1.bf16.msra.mxu1 %v5005_v42  ;;  %v4991_v42 = vld [vmem:[#allocation3 + $0xd30] sm:$0xff] }
 0x6e7   :  { %5410 = vmatprep.subr.bf16.mxu1 %v5022_v46  ;;  %5370 = vmatpush1.bf16.msra.mxu0 %v4765_v38  ;;  %v5008_v46 = vld [vmem:[#allocation3 + $0xdb8] sm:$0xff]  ;;  %v4751_v38 = vld [vmem:[#allocation3 + $0x5b0] sm:$0xff] }
 0x6e8   :  { %5371 = vmatprep.subr.bf16.mxu0 %v4782_v17  ;;  %v4768_v17 = vld [vmem:[#allocation3 + $0x638] sm:$0xff] }
 0x6ea   :  { %5411 = vmatpush1.bf16.msra.mxu1 %v5021_v44  ;;  %v5007_v44 = vld [vmem:[#allocation3 + $0xdb0] sm:$0xff] }
 0x6eb   :  { %5412 = vmatprep.subr.bf16.mxu1 %v5038_v12  ;;  %5372 = vmatpush1.bf16.msra.mxu0 %v4781_v18  ;;  %v5024_v12 = vld [vmem:[#allocation3 + $0xe38] sm:$0xff]  ;;  %v4767_v18 = vld [vmem:[#allocation3 + $0x630] sm:$0xff] }
 0x6ec   :  { %5373 = vmatprep.subr.bf16.mxu0 %v4798_v49  ;;  %v4784_v49 = vld [vmem:[#allocation3 + $0x6b8] sm:$0xff] }
 0x6ee   :  { %5413 = vmatpush1.bf16.msra.mxu1 %v5037_v58  ;;  %v5023_v58 = vld [vmem:[#allocation3 + $0xe30] sm:$0xff] }
 0x6ef   :  { %5414 = vmatprep.subr.bf16.mxu1 %v5054_v4  ;;  %5374 = vmatpush1.bf16.msra.mxu0 %v4797_v19  ;;  %v5040_v4 = vld [vmem:[#allocation3 + $0xeb8] sm:$0xff]  ;;  %v4783_v19 = vld [vmem:[#allocation3 + $0x6b0] sm:$0xff] }
 0x6f0   :  { %5375 = vmatprep.subr.bf16.mxu0 %v4814_v0  ;;  %v4800_v0 = vld [vmem:[#allocation3 + $0x738] sm:$0xff] }
 0x6f2   :  { %5415 = vmatpush1.bf16.msra.mxu1 %v5053_v45  ;;  %v5039_v45 = vld [vmem:[#allocation3 + $0xeb0] sm:$0xff] }
 0x6f3   :  { %5416 = vmatprep.subr.bf16.mxu1 %v5070_v5  ;;  %5376 = vmatpush1.bf16.msra.mxu0 %v4813_v24  ;;  %v5056_v5 = vld [vmem:[#allocation3 + $0xf38] sm:$0xff]  ;;  %v4799_v24 = vld [vmem:[#allocation3 + $0x730] sm:$0xff] }
 0x6f4   :  { %5427 = vmatprep.subr.bf16.mxu0 %v4576_v20  ;;  %v4816_v20 = vld [vmem:[#allocation3 + $0x7b8] sm:$0xff] }
 0x6f6   :  { %5417 = vmatpush1.bf16.msra.mxu1 %v5069_v10  ;;  %5378 = vmatmul.mubr.bf16.vlgmr.msra.gmra.mrb[44].mxu0 %v10074_v1  ;;  %v5055_v10 = vld [vmem:[#allocation3 + $0xf30] sm:$0xff] }
 0x6f7   :  { %5468 = vmatprep.subr.bf16.mxu1 %v4832_v25  ;;  %5428 = vmatpush1.bf16.msra.mxu0 %v4575_v37  ;;  %v5072_v25 = vld [vmem:[#allocation3 + $0xfb8] sm:$0xff]  ;;  %v4815_v37 = vld [vmem:[#allocation3 + $0x7b0] sm:$0xff] }
 0x6f8   :  { %5429 = vmatprep.subr.bf16.mxu0 %v4592_v63  ;;  %5459 = vmatprep.mubr.bf16.mxu0 %v10017_v32  ;;  %v4578_v63 = vld [vmem:[#allocation3 + $0x48] sm:$0xff] }
 0x6f9   :  { %5419 = vmatmul.mubr.bf16.vlgmr.msra.gmra.mrb[44].mxu1 %v10076_v11 }
 0x6fa   :  { %5469 = vmatpush1.bf16.msra.mxu1 %v4831_v33  ;;  %5500 = vmatprep.mubr.bf16.mxu1 %v10025_v34  ;;  %v5071_v33 = vld [vmem:[#allocation3 + $0xfb0] sm:$0xff] }
 0x6fb   :  { %5470 = vmatprep.subr.bf16.mxu1 %v4848_v28  ;;  %5430 = vmatpush1.bf16.msra.mxu0 %v4591_v9  ;;  %v4834_v28 = vld [vmem:[#allocation3 + $0x848] sm:$0xff]  ;;  %v4577_v9 = vld [vmem:[#allocation3 + $0x40] sm:$0xff] }
 0x6fc   :  { %5431 = vmatprep.subr.bf16.mxu0 %v4608_v29  ;;  %v4594_v29 = vld [vmem:[#allocation3 + $0xc8] sm:$0xff] }
 0x6fe   :  { %5471 = vmatpush1.bf16.msra.mxu1 %v4847_v22  ;;  %v4833_v22 = vld [vmem:[#allocation3 + $0x840] sm:$0xff] }
 0x6ff   :  { %5472 = vmatprep.subr.bf16.mxu1 %v4864_v57  ;;  %5432 = vmatpush1.bf16.msra.mxu0 %v4607_v7  ;;  %v4850_v57 = vld [vmem:[#allocation3 + $0x8c8] sm:$0xff]  ;;  %v4593_v7 = vld [vmem:[#allocation3 + $0xc0] sm:$0xff] }
 0x700   :  { %5433 = vmatprep.subr.bf16.mxu0 %v4624_v56  ;;  %v4610_v56 = vld [vmem:[#allocation3 + $0x148] sm:$0xff] }
 0x702   :  { %5473 = vmatpush1.bf16.msra.mxu1 %v4863_v53  ;;  %v4849_v53 = vld [vmem:[#allocation3 + $0x8c0] sm:$0xff] }
 0x703   :  { %5474 = vmatprep.subr.bf16.mxu1 %v4880_v13  ;;  %5434 = vmatpush1.bf16.msra.mxu0 %v4623_v26  ;;  %v4866_v13 = vld [vmem:[#allocation3 + $0x948] sm:$0xff]  ;;  %v4609_v26 = vld [vmem:[#allocation3 + $0x140] sm:$0xff] }
 0x704   :  { %5435 = vmatprep.subr.bf16.mxu0 %v4640_v23  ;;  %v4626_v23 = vld [vmem:[#allocation3 + $0x1c8] sm:$0xff] }
 0x706   :  { %5475 = vmatpush1.bf16.msra.mxu1 %v4879_v35  ;;  %v4865_v35 = vld [vmem:[#allocation3 + $0x940] sm:$0xff] }
 0x707   :  { %5476 = vmatprep.subr.bf16.mxu1 %v4896_v6  ;;  %5436 = vmatpush1.bf16.msra.mxu0 %v4639_v48  ;;  %v4882_v6 = vld [vmem:[#allocation3 + $0x9c8] sm:$0xff]  ;;  %v4625_v48 = vld [vmem:[#allocation3 + $0x1c0] sm:$0xff] }
 0x708   :  { %5437 = vmatprep.subr.bf16.mxu0 %v4656_v15  ;;  %v4642_v15 = vld [vmem:[#allocation3 + $0x248] sm:$0xff] }
 0x70a   :  { %5477 = vmatpush1.bf16.msra.mxu1 %v4895_v39  ;;  %v4881_v39 = vld [vmem:[#allocation3 + $0x9c0] sm:$0xff] }
 0x70b   :  { %5478 = vmatprep.subr.bf16.mxu1 %v4912_v59  ;;  %5438 = vmatpush1.bf16.msra.mxu0 %v4655_v8  ;;  %v4898_v59 = vld [vmem:[#allocation3 + $0xa48] sm:$0xff]  ;;  %v4641_v8 = vld [vmem:[#allocation3 + $0x240] sm:$0xff] }
 0x70c   :  { %5439 = vmatprep.subr.bf16.mxu0 %v4672_v61  ;;  %v4658_v61 = vld [vmem:[#allocation3 + $0x2c8] sm:$0xff] }
 0x70e   :  { %5479 = vmatpush1.bf16.msra.mxu1 %v4911_v16  ;;  %v4897_v16 = vld [vmem:[#allocation3 + $0xa40] sm:$0xff] }
 0x70f   :  { %5480 = vmatprep.subr.bf16.mxu1 %v4928_v40  ;;  %5440 = vmatpush1.bf16.msra.mxu0 %v4671_v47  ;;  %v4914_v40 = vld [vmem:[#allocation3 + $0xac8] sm:$0xff]  ;;  %v4657_v47 = vld [vmem:[#allocation3 + $0x2c0] sm:$0xff] }
 0x710   :  { %5441 = vmatprep.subr.bf16.mxu0 %v4688_v52 }
 0x712   :  { %5481 = vmatpush1.bf16.msra.mxu1 %v4927_v41  ;;  %v4913_v41 = vld [vmem:[#allocation3 + $0xac0] sm:$0xff] }
 0x713   :  { %5482 = vmatprep.subr.bf16.mxu1 %v4944_v30  ;;  %5442 = vmatpush1.bf16.msra.mxu0 %v4687_v3  ;;  %v4674_v3 = vld [vmem:[#allocation3 + $0x348] sm:$0xff] }
 0x714   :  { %5443 = vmatprep.subr.bf16.mxu0 %v4704_v31 }
 0x716   :  { %5483 = vmatpush1.bf16.msra.mxu1 %v4943_v36  ;;  %v4930_v36 = vld [vmem:[#allocation3 + $0xb48] sm:$0xff] }
 0x717   :  { %5484 = vmatprep.subr.bf16.mxu1 %v4960_v51  ;;  %5444 = vmatpush1.bf16.msra.mxu0 %v4703_v43 }
 0x718   :  { %5445 = vmatprep.subr.bf16.mxu0 %v4720_v14 }
 0x71a   :  { %5485 = vmatpush1.bf16.msra.mxu1 %v4959_v55 }
 0x71b   :  { %5486 = vmatprep.subr.bf16.mxu1 %v4976_v60  ;;  %5446 = vmatpush1.bf16.msra.mxu0 %v4719_v27 }
 0x71c   :  { %5447 = vmatprep.subr.bf16.mxu0 %v4736_v2  ;;  %v4673_v2 = vld [vmem:[#allocation3 + $0x340] sm:$0xff] }
 0x71e   :  { %5487 = vmatpush1.bf16.msra.mxu1 %v4975_v21 }
 0x71f   :  { %5488 = vmatprep.subr.bf16.mxu1 %v4992_v62  ;;  %5448 = vmatpush1.bf16.msra.mxu0 %v4735_v50  ;;  %v4929_v62 = vld [vmem:[#allocation3 + $0xb40] sm:$0xff]  ;;  %v4690_v50 = vld [vmem:[#allocation3 + $0x3c8] sm:$0xff] }
 0x720   :  { %5449 = vmatprep.subr.bf16.mxu0 %v4752_v54  ;;  %v4689_v54 = vld [vmem:[#allocation3 + $0x3c0] sm:$0xff] }
 0x722   :  { %5489 = vmatpush1.bf16.msra.mxu1 %v4991_v42  ;;  %v4946_v42 = vld [vmem:[#allocation3 + $0xbc8] sm:$0xff] }
 0x723   :  { %5490 = vmatprep.subr.bf16.mxu1 %v5008_v46  ;;  %5450 = vmatpush1.bf16.msra.mxu0 %v4751_v38  ;;  %v4945_v46 = vld [vmem:[#allocation3 + $0xbc0] sm:$0xff]  ;;  %v4706_v38 = vld [vmem:[#allocation3 + $0x448] sm:$0xff] }
 0x724   :  { %5451 = vmatprep.subr.bf16.mxu0 %v4768_v17  ;;  %v4705_v17 = vld [vmem:[#allocation3 + $0x440] sm:$0xff] }
 0x726   :  { %5491 = vmatpush1.bf16.msra.mxu1 %v5007_v44  ;;  %v4962_v44 = vld [vmem:[#allocation3 + $0xc48] sm:$0xff] }
 0x727   :  { %5492 = vmatprep.subr.bf16.mxu1 %v5024_v12  ;;  %5452 = vmatpush1.bf16.msra.mxu0 %v4767_v18  ;;  %v4961_v12 = vld [vmem:[#allocation3 + $0xc40] sm:$0xff]  ;;  %v4722_v18 = vld [vmem:[#allocation3 + $0x4c8] sm:$0xff] }
 0x728   :  { %5453 = vmatprep.subr.bf16.mxu0 %v4784_v49  ;;  %v4721_v49 = vld [vmem:[#allocation3 + $0x4c0] sm:$0xff] }
 0x72a   :  { %5493 = vmatpush1.bf16.msra.mxu1 %v5023_v58  ;;  %v4978_v58 = vld [vmem:[#allocation3 + $0xcc8] sm:$0xff] }
 0x72b   :  { %5494 = vmatprep.subr.bf16.mxu1 %v5040_v4  ;;  %5454 = vmatpush1.bf16.msra.mxu0 %v4783_v19  ;;  %v4977_v4 = vld [vmem:[#allocation3 + $0xcc0] sm:$0xff]  ;;  %v4738_v19 = vld [vmem:[#allocation3 + $0x548] sm:$0xff] }
 0x72c   :  { %5455 = vmatprep.subr.bf16.mxu0 %v4800_v0  ;;  %v4737_v0 = vld [vmem:[#allocation3 + $0x540] sm:$0xff] }
 0x72e   :  { %5495 = vmatpush1.bf16.msra.mxu1 %v5039_v45  ;;  %v4994_v45 = vld [vmem:[#allocation3 + $0xd48] sm:$0xff] }
 0x72f   :  { %5496 = vmatprep.subr.bf16.mxu1 %v5056_v5  ;;  %5456 = vmatpush1.bf16.msra.mxu0 %v4799_v24  ;;  %v4993_v5 = vld [vmem:[#allocation3 + $0xd40] sm:$0xff]  ;;  %v4754_v24 = vld [vmem:[#allocation3 + $0x5c8] sm:$0xff] }
 0x730   :  { %5457 = vmatprep.subr.bf16.mxu0 %v4816_v20  ;;  %v4753_v20 = vld [vmem:[#allocation3 + $0x5c0] sm:$0xff] }
 0x732   :  { %5497 = vmatpush1.bf16.msra.mxu1 %v5055_v10  ;;  %v5010_v10 = vld [vmem:[#allocation3 + $0xdc8] sm:$0xff] }
 0x733   :  { %5498 = vmatprep.subr.bf16.mxu1 %v5072_v25  ;;  %5458 = vmatpush1.bf16.msra.mxu0 %v4815_v37  ;;  %v5009_v25 = vld [vmem:[#allocation3 + $0xdc0] sm:$0xff]  ;;  %v4770_v37 = vld [vmem:[#allocation3 + $0x648] sm:$0xff] }
 0x734   :  { %5509 = vmatprep.subr.bf16.mxu0 %v4578_v63  ;;  %v4769_v63 = vld [vmem:[#allocation3 + $0x640] sm:$0xff] }
 0x736   :  { %5499 = vmatpush1.bf16.msra.mxu1 %v5071_v33  ;;  %5460 = vmatmul.mubr.bf16.vlgmr.msra.gmra.mrb[48].mxu0 %v10074_v1  ;;  %v5026_v33 = vld [vmem:[#allocation3 + $0xe48] sm:$0xff] }
 0x737   :  { %5550 = vmatprep.subr.bf16.mxu1 %v4834_v28  ;;  %5510 = vmatpush1.bf16.msra.mxu0 %v4577_v9  ;;  %v5025_v28 = vld [vmem:[#allocation3 + $0xe40] sm:$0xff]  ;;  %v4786_v9 = vld [vmem:[#allocation3 + $0x6c8] sm:$0xff] }
 0x738   :  { %5511 = vmatprep.subr.bf16.mxu0 %v4594_v29  ;;  %5541 = vmatprep.mubr.bf16.mxu0 %v10017_v32  ;;  %v4785_v29 = vld [vmem:[#allocation3 + $0x6c0] sm:$0xff] }
 0x739   :  { %5501 = vmatmul.mubr.bf16.vlgmr.msra.gmra.mrb[48].mxu1 %v10076_v11 }
 0x73a   :  { %5551 = vmatpush1.bf16.msra.mxu1 %v4833_v22  ;;  %5582 = vmatprep.mubr.bf16.mxu1 %v10025_v34  ;;  %v5042_v22 = vld [vmem:[#allocation3 + $0xec8] sm:$0xff] }
 0x73b   :  { %5552 = vmatprep.subr.bf16.mxu1 %v4850_v57  ;;  %5512 = vmatpush1.bf16.msra.mxu0 %v4593_v7  ;;  %v5041_v57 = vld [vmem:[#allocation3 + $0xec0] sm:$0xff]  ;;  %v4802_v7 = vld [vmem:[#allocation3 + $0x748] sm:$0xff] }
 0x73c   :  { %5513 = vmatprep.subr.bf16.mxu0 %v4610_v56  ;;  %v4801_v56 = vld [vmem:[#allocation3 + $0x740] sm:$0xff] }
 0x73e   :  { %5553 = vmatpush1.bf16.msra.mxu1 %v4849_v53  ;;  %v5058_v53 = vld [vmem:[#allocation3 + $0xf48] sm:$0xff] }
 0x73f   :  { %5554 = vmatprep.subr.bf16.mxu1 %v4866_v13  ;;  %5514 = vmatpush1.bf16.msra.mxu0 %v4609_v26  ;;  %v5057_v13 = vld [vmem:[#allocation3 + $0xf40] sm:$0xff]  ;;  %v4818_v26 = vld [vmem:[#allocation3 + $0x7c8] sm:$0xff] }
 0x740   :  { %5515 = vmatprep.subr.bf16.mxu0 %v4626_v23  ;;  %v4817_v23 = vld [vmem:[#allocation3 + $0x7c0] sm:$0xff] }
 0x742   :  { %5555 = vmatpush1.bf16.msra.mxu1 %v4865_v35  ;;  %v5074_v35 = vld [vmem:[#allocation3 + $0xfc8] sm:$0xff] }
 0x743   :  { %5556 = vmatprep.subr.bf16.mxu1 %v4882_v6  ;;  %5516 = vmatpush1.bf16.msra.mxu0 %v4625_v48  ;;  %v5073_v6 = vld [vmem:[#allocation3 + $0xfc0] sm:$0xff]  ;;  %v4580_v48 = vld [vmem:[#allocation3 + $0x58] sm:$0xff] }
 0x744   :  { %5517 = vmatprep.subr.bf16.mxu0 %v4642_v15  ;;  %v4579_v15 = vld [vmem:[#allocation3 + $0x50] sm:$0xff] }
 0x746   :  { %5557 = vmatpush1.bf16.msra.mxu1 %v4881_v39  ;;  %v4836_v39 = vld [vmem:[#allocation3 + $0x858] sm:$0xff] }
 0x747   :  { %5558 = vmatprep.subr.bf16.mxu1 %v4898_v59  ;;  %5518 = vmatpush1.bf16.msra.mxu0 %v4641_v8  ;;  %v4835_v59 = vld [vmem:[#allocation3 + $0x850] sm:$0xff]  ;;  %v4596_v8 = vld [vmem:[#allocation3 + $0xd8] sm:$0xff] }
 0x748   :  { %5519 = vmatprep.subr.bf16.mxu0 %v4658_v61  ;;  %v4595_v61 = vld [vmem:[#allocation3 + $0xd0] sm:$0xff] }
 0x749   :  { %v5215_v52 = vpop.f32.mrb[36].mxu0 }
 0x74a   :  { %5559 = vmatpush1.bf16.msra.mxu1 %v4897_v16  ;;  %v5217_v51 = vpop.f32.mrb[37].mxu0  ;;  %v4852_v16 = vld [vmem:[#allocation3 + $0x8d8] sm:$0xff] }
 0x74b   :  { %5560 = vmatprep.subr.bf16.mxu1 %v4914_v40  ;;  %v5219_v14 = vpop.f32.mrb[38].mxu0  ;;  %5520 = vmatpush1.bf16.msra.mxu0 %v4657_v47  ;;  %v4851_v40 = vld [vmem:[#allocation3 + $0x8d0] sm:$0xff]  ;;  %v4612_v47 = vld [vmem:[#allocation3 + $0x158] sm:$0xff] }
 0x74c   :  { %v5256_v30 = vpop.f32.mrb[36].mxu1  ;;  %v5220_v27 = vpop.f32.mrb[39].mxu0  ;;  %5521 = vmatprep.subr.bf16.mxu0 %v4674_v3  ;;  %v4628_v3 = vld [vmem:[#allocation3 + $0x1d8] sm:$0xff] }
 0x74d   :  { %v10094_v31 = vadd.f32 %v5256_v30, %v5215_v52  ;;  %v5258_v43 = vpop.f32.mrb[37].mxu1  ;;  %v4611_v52 = vld [vmem:[#allocation3 + $0x150] sm:$0xff]  ;;  %v4644_v14 = vld [vmem:[#allocation3 + $0x258] sm:$0xff] }
 0x74e   :  { %v10096_v55 = vadd.f32 %v5258_v43, %v5217_v51  ;;  %v5260_v60 = vpop.f32.mrb[38].mxu1  ;;  %5561 = vmatpush1.bf16.msra.mxu1 %v4913_v41  ;;  %v4868_v41 = vld [vmem:[#allocation3 + $0x958] sm:$0xff]  ;;  %v4867_v30 = vld [vmem:[#allocation3 + $0x950] sm:$0xff] }
 0x74f   :  { %v5261_v21 = vpop.f32.mrb[39].mxu1  ;;  %5562 = vmatprep.subr.bf16.mxu1 %v4930_v36  ;;  %5522 = vmatpush1.bf16.msra.mxu0 %v4673_v2  ;;  %v4884_v36 = vld [vmem:[#allocation3 + $0x9d8] sm:$0xff]  ;;  %v4627_v51 = vld [vmem:[#allocation3 + $0x1d0] sm:$0xff] }
 0x750   :  { %5523 = vmatprep.subr.bf16.mxu0 %v4690_v50  ;;  %v4883_v43 = vld [vmem:[#allocation3 + $0x9d0] sm:$0xff]  ;;  %v4900_v60 = vld [vmem:[#allocation3 + $0xa58] sm:$0xff] }
 0x751   :  { %v4643_v27 = vld [vmem:[#allocation3 + $0x250] sm:$0xff]  ;;  %v4660_v2 = vld [vmem:[#allocation3 + $0x2d8] sm:$0xff] }
 0x752   :  { %5563 = vmatpush1.bf16.msra.mxu1 %v4929_v62  ;;  %v4899_v21 = vld [vmem:[#allocation3 + $0xa50] sm:$0xff]  ;;  %v4916_v62 = vld [vmem:[#allocation3 + $0xad8] sm:$0xff] }
 0x753   :  { %5564 = vmatprep.subr.bf16.mxu1 %v4946_v42  ;;  %5524 = vmatpush1.bf16.msra.mxu0 %v4689_v54  ;;  %v4659_v50 = vld [vmem:[#allocation3 + $0x2d0] sm:$0xff] }
 0x754   :  { %5525 = vmatprep.subr.bf16.mxu0 %v4706_v38  ;;  %v4915_v42 = vld [vmem:[#allocation3 + $0xad0] sm:$0xff]  ;;  %v4676_v38 = vld [vmem:[#allocation3 + $0x358] sm:$0xff] }
 0x756   :  { %5565 = vmatpush1.bf16.msra.mxu1 %v4945_v46 }
 0x757   :  { %5566 = vmatprep.subr.bf16.mxu1 %v4962_v44  ;;  %5526 = vmatpush1.bf16.msra.mxu0 %v4705_v17  ;;  %v4932_v44 = vld [vmem:[#allocation3 + $0xb58] sm:$0xff] }
 0x758   :  { %5527 = vmatprep.subr.bf16.mxu0 %v4722_v18 }
 0x75a   :  { %5567 = vmatpush1.bf16.msra.mxu1 %v4961_v12 }
 0x75b   :  { %5568 = vmatprep.subr.bf16.mxu1 %v4978_v58  ;;  %5528 = vmatpush1.bf16.msra.mxu0 %v4721_v49 }
 0x75c   :  { %5529 = vmatprep.subr.bf16.mxu0 %v4738_v19 }
 0x75e   :  { %5569 = vmatpush1.bf16.msra.mxu1 %v4977_v4 }
 0x75f   :  { %5570 = vmatprep.subr.bf16.mxu1 %v4994_v45  ;;  %5530 = vmatpush1.bf16.msra.mxu0 %v4737_v0  ;;  %v4675_v0 = vld [vmem:[#allocation3 + $0x350] sm:$0xff] }
 0x760   :  { %5531 = vmatprep.subr.bf16.mxu0 %v4754_v24  ;;  %v4692_v24 = vld [vmem:[#allocation3 + $0x3d8] sm:$0xff] }
 0x762   :  { %5571 = vmatpush1.bf16.msra.mxu1 %v4993_v5  ;;  %v4931_v5 = vld [vmem:[#allocation3 + $0xb50] sm:$0xff] }
 0x763   :  { %5572 = vmatprep.subr.bf16.mxu1 %v5010_v10  ;;  %5532 = vmatpush1.bf16.msra.mxu0 %v4753_v20  ;;  %v4948_v10 = vld [vmem:[#allocation3 + $0xbd8] sm:$0xff]  ;;  %v4691_v20 = vld [vmem:[#allocation3 + $0x3d0] sm:$0xff] }
 0x764   :  { %5533 = vmatprep.subr.bf16.mxu0 %v4770_v37  ;;  %v4708_v37 = vld [vmem:[#allocation3 + $0x458] sm:$0xff] }
 0x766   :  { %5573 = vmatpush1.bf16.msra.mxu1 %v5009_v25  ;;  %v4947_v25 = vld [vmem:[#allocation3 + $0xbd0] sm:$0xff] }
 0x767   :  { %5574 = vmatprep.subr.bf16.mxu1 %v5026_v33  ;;  %5534 = vmatpush1.bf16.msra.mxu0 %v4769_v63  ;;  %v4964_v33 = vld [vmem:[#allocation3 + $0xc58] sm:$0xff]  ;;  %v4707_v63 = vld [vmem:[#allocation3 + $0x450] sm:$0xff] }
 0x768   :  { %5535 = vmatprep.subr.bf16.mxu0 %v4786_v9  ;;  %v4724_v9 = vld [vmem:[#allocation3 + $0x4d8] sm:$0xff] }
 0x76a   :  { %5575 = vmatpush1.bf16.msra.mxu1 %v5025_v28  ;;  %v4963_v28 = vld [vmem:[#allocation3 + $0xc50] sm:$0xff] }
 0x76b   :  { %5576 = vmatprep.subr.bf16.mxu1 %v5042_v22  ;;  %5536 = vmatpush1.bf16.msra.mxu0 %v4785_v29  ;;  %v4980_v22 = vld [vmem:[#allocation3 + $0xcd8] sm:$0xff]  ;;  %v4723_v29 = vld [vmem:[#allocation3 + $0x4d0] sm:$0xff] }
 0x76c   :  { %5537 = vmatprep.subr.bf16.mxu0 %v4802_v7  ;;  %v4740_v7 = vld [vmem:[#allocation3 + $0x558] sm:$0xff] }
 0x76e   :  { %5577 = vmatpush1.bf16.msra.mxu1 %v5041_v57  ;;  %v4979_v57 = vld [vmem:[#allocation3 + $0xcd0] sm:$0xff] }
 0x76f   :  { %5578 = vmatprep.subr.bf16.mxu1 %v5058_v53  ;;  %5538 = vmatpush1.bf16.msra.mxu0 %v4801_v56  ;;  %v4996_v53 = vld [vmem:[#allocation3 + $0xd58] sm:$0xff]  ;;  %v4739_v56 = vld [vmem:[#allocation3 + $0x550] sm:$0xff] }
 0x770   :  { %5539 = vmatprep.subr.bf16.mxu0 %v4818_v26  ;;  %v4756_v26 = vld [vmem:[#allocation3 + $0x5d8] sm:$0xff] }
 0x772   :  { %5579 = vmatpush1.bf16.msra.mxu1 %v5057_v13  ;;  %v4995_v13 = vld [vmem:[#allocation3 + $0xd50] sm:$0xff] }
 0x773   :  { %5580 = vmatprep.subr.bf16.mxu1 %v5074_v35  ;;  %5540 = vmatpush1.bf16.msra.mxu0 %v4817_v23  ;;  %v5012_v35 = vld [vmem:[#allocation3 + $0xdd8] sm:$0xff]  ;;  %v4755_v23 = vld [vmem:[#allocation3 + $0x5d0] sm:$0xff] }
 0x774   :  { %5591 = vmatprep.subr.bf16.mxu0 %v4580_v48  ;;  %v4772_v48 = vld [vmem:[#allocation3 + $0x658] sm:$0xff] }
 0x776   :  { %5581 = vmatpush1.bf16.msra.mxu1 %v5073_v6  ;;  %5542 = vmatmul.mubr.bf16.vlgmr.msra.gmra.mrb[52].mxu0 %v10074_v1  ;;  %v5011_v6 = vld [vmem:[#allocation3 + $0xdd0] sm:$0xff] }
 0x777   :  { %5632 = vmatprep.subr.bf16.mxu1 %v4836_v39  ;;  %5592 = vmatpush1.bf16.msra.mxu0 %v4579_v15  ;;  %v5028_v39 = vld [vmem:[#allocation3 + $0xe58] sm:$0xff]  ;;  %v4771_v15 = vld [vmem:[#allocation3 + $0x650] sm:$0xff] }
 0x778   :  { %5593 = vmatprep.subr.bf16.mxu0 %v4596_v8  ;;  %5623 = vmatprep.mubr.bf16.mxu0 %v10017_v32  ;;  %v4788_v8 = vld [vmem:[#allocation3 + $0x6d8] sm:$0xff] }
 0x779   :  { %5583 = vmatmul.mubr.bf16.vlgmr.msra.gmra.mrb[52].mxu1 %v10076_v11 }
 0x77a   :  { %5633 = vmatpush1.bf16.msra.mxu1 %v4835_v59  ;;  %5664 = vmatprep.mubr.bf16.mxu1 %v10025_v34  ;;  %v5027_v59 = vld [vmem:[#allocation3 + $0xe50] sm:$0xff] }
 0x77b   :  { %5634 = vmatprep.subr.bf16.mxu1 %v4852_v16  ;;  %5594 = vmatpush1.bf16.msra.mxu0 %v4595_v61  ;;  %v5044_v16 = vld [vmem:[#allocation3 + $0xed8] sm:$0xff]  ;;  %v4787_v61 = vld [vmem:[#allocation3 + $0x6d0] sm:$0xff] }
 0x77c   :  { %5595 = vmatprep.subr.bf16.mxu0 %v4612_v47  ;;  %v4804_v47 = vld [vmem:[#allocation3 + $0x758] sm:$0xff] }
 0x77e   :  { %5635 = vmatpush1.bf16.msra.mxu1 %v4851_v40  ;;  %v5043_v40 = vld [vmem:[#allocation3 + $0xed0] sm:$0xff] }
 0x77f   :  { %5636 = vmatprep.subr.bf16.mxu1 %v4868_v41  ;;  %5596 = vmatpush1.bf16.msra.mxu0 %v4611_v52  ;;  %v5060_v41 = vld [vmem:[#allocation3 + $0xf58] sm:$0xff]  ;;  %v4803_v52 = vld [vmem:[#allocation3 + $0x750] sm:$0xff] }
 0x780   :  { %5597 = vmatprep.subr.bf16.mxu0 %v4628_v3  ;;  %v4820_v3 = vld [vmem:[#allocation3 + $0x7d8] sm:$0xff] }
 0x782   :  { %5637 = vmatpush1.bf16.msra.mxu1 %v4867_v30  ;;  %v5059_v30 = vld [vmem:[#allocation3 + $0xf50] sm:$0xff] }
 0x783   :  { %5638 = vmatprep.subr.bf16.mxu1 %v4884_v36  ;;  %5598 = vmatpush1.bf16.msra.mxu0 %v4627_v51  ;;  %v5076_v36 = vld [vmem:[#allocation3 + $0xfd8] sm:$0xff]  ;;  %v4819_v51 = vld [vmem:[#allocation3 + $0x7d0] sm:$0xff] }
 0x784   :  { %5599 = vmatprep.subr.bf16.mxu0 %v4644_v14  ;;  %v4582_v14 = vld [vmem:[#allocation3 + $0x68] sm:$0xff] }
 0x786   :  { %5639 = vmatpush1.bf16.msra.mxu1 %v4883_v43  ;;  %v5075_v43 = vld [vmem:[#allocation3 + $0xfd0] sm:$0xff] }
 0x787   :  { %5640 = vmatprep.subr.bf16.mxu1 %v4900_v60  ;;  %5600 = vmatpush1.bf16.msra.mxu0 %v4643_v27  ;;  %v4838_v60 = vld [vmem:[#allocation3 + $0x868] sm:$0xff]  ;;  %v4581_v27 = vld [vmem:[#allocation3 + $0x60] sm:$0xff] }
 0x788   :  { %5601 = vmatprep.subr.bf16.mxu0 %v4660_v2  ;;  %v4598_v2 = vld [vmem:[#allocation3 + $0xe8] sm:$0xff] }
 0x789   :  { %v5297_v54 = vpop.f32.mrb[40].mxu0 }
 0x78a   :  { %5641 = vmatpush1.bf16.msra.mxu1 %v4899_v21  ;;  %v5299_v12 = vpop.f32.mrb[41].mxu0  ;;  %v4837_v21 = vld [vmem:[#allocation3 + $0x860] sm:$0xff] }
 0x78b   :  { %5642 = vmatprep.subr.bf16.mxu1 %v4916_v62  ;;  %v5301_v49 = vpop.f32.mrb[42].mxu0  ;;  %5602 = vmatpush1.bf16.msra.mxu0 %v4659_v50  ;;  %v4854_v62 = vld [vmem:[#allocation3 + $0x8e8] sm:$0xff]  ;;  %v4597_v50 = vld [vmem:[#allocation3 + $0xe0] sm:$0xff] }
 0x78c   :  { %v5338_v46 = vpop.f32.mrb[40].mxu1  ;;  %v5302_v19 = vpop.f32.mrb[43].mxu0  ;;  %5603 = vmatprep.subr.bf16.mxu0 %v4676_v38  ;;  %v4613_v38 = vld [vmem:[#allocation3 + $0x160] sm:$0xff] }
 0x78d   :  { %v10102_v17 = vadd.f32 %v5338_v46, %v5297_v54  ;;  %v5340_v18 = vpop.f32.mrb[41].mxu1  ;;  %v4614_v54 = vld [vmem:[#allocation3 + $0x168] sm:$0xff]  ;;  %v4629_v49 = vld [vmem:[#allocation3 + $0x1e0] sm:$0xff] }
 0x78e   :  { %v10104_v58 = vadd.f32 %v5340_v18, %v5299_v12  ;;  %v5342_v4 = vpop.f32.mrb[42].mxu1  ;;  %5643 = vmatpush1.bf16.msra.mxu1 %v4915_v42  ;;  %v4853_v42 = vld [vmem:[#allocation3 + $0x8e0] sm:$0xff]  ;;  %v4870_v46 = vld [vmem:[#allocation3 + $0x968] sm:$0xff] }
 0x78f   :  { %v5343_v45 = vpop.f32.mrb[43].mxu1  ;;  %5644 = vmatprep.subr.bf16.mxu1 %v4932_v44  ;;  %5604 = vmatpush1.bf16.msra.mxu0 %v4675_v0  ;;  %v4869_v44 = vld [vmem:[#allocation3 + $0x960] sm:$0xff]  ;;  %v4630_v12 = vld [vmem:[#allocation3 + $0x1e8] sm:$0xff] }
 0x790   :  { %5605 = vmatprep.subr.bf16.mxu0 %v4692_v24  ;;  %v4886_v18 = vld [vmem:[#allocation3 + $0x9e8] sm:$0xff]  ;;  %v4885_v4 = vld [vmem:[#allocation3 + $0x9e0] sm:$0xff] }
 0x791   :  { %v4646_v19 = vld [vmem:[#allocation3 + $0x268] sm:$0xff]  ;;  %v4645_v0 = vld [vmem:[#allocation3 + $0x260] sm:$0xff] }
 0x792   :  { %5645 = vmatpush1.bf16.msra.mxu1 %v4931_v5  ;;  %v4902_v45 = vld [vmem:[#allocation3 + $0xa68] sm:$0xff]  ;;  %v4901_v5 = vld [vmem:[#allocation3 + $0xa60] sm:$0xff] }
 0x793   :  { %5646 = vmatprep.subr.bf16.mxu1 %v4948_v10  ;;  %5606 = vmatpush1.bf16.msra.mxu0 %v4691_v20  ;;  %v4662_v24 = vld [vmem:[#allocation3 + $0x2e8] sm:$0xff]  ;;  %v4661_v20 = vld [vmem:[#allocation3 + $0x2e0] sm:$0xff] }
 0x794   :  { %5607 = vmatprep.subr.bf16.mxu0 %v4708_v37  ;;  %v4918_v10 = vld [vmem:[#allocation3 + $0xae8] sm:$0xff] }
 0x796   :  { %5647 = vmatpush1.bf16.msra.mxu1 %v4947_v25  ;;  %v4917_v25 = vld [vmem:[#allocation3 + $0xae0] sm:$0xff] }
 0x797   :  { %5648 = vmatprep.subr.bf16.mxu1 %v4964_v33  ;;  %5608 = vmatpush1.bf16.msra.mxu0 %v4707_v63  ;;  %v4678_v63 = vld [vmem:[#allocation3 + $0x368] sm:$0xff] }
 0x798   :  { %5609 = vmatprep.subr.bf16.mxu0 %v4724_v9 }
 0x79a   :  { %5649 = vmatpush1.bf16.msra.mxu1 %v4963_v28  ;;  %v4934_v28 = vld [vmem:[#allocation3 + $0xb68] sm:$0xff] }
 0x79b   :  { %5650 = vmatprep.subr.bf16.mxu1 %v4980_v22  ;;  %5610 = vmatpush1.bf16.msra.mxu0 %v4723_v29 }
 0x79c   :  { %5611 = vmatprep.subr.bf16.mxu0 %v4740_v7 }
 0x79e   :  { %5651 = vmatpush1.bf16.msra.mxu1 %v4979_v57 }
 0x79f   :  { %5652 = vmatprep.subr.bf16.mxu1 %v4996_v53  ;;  %5612 = vmatpush1.bf16.msra.mxu0 %v4739_v56 }
 0x7a0   :  { %5613 = vmatprep.subr.bf16.mxu0 %v4756_v26  ;;  %v4677_v26 = vld [vmem:[#allocation3 + $0x360] sm:$0xff] }
 0x7a2   :  { %5653 = vmatpush1.bf16.msra.mxu1 %v4995_v13 }
 0x7a3   :  { %5654 = vmatprep.subr.bf16.mxu1 %v5012_v35  ;;  %5614 = vmatpush1.bf16.msra.mxu0 %v4755_v23  ;;  %v4933_v35 = vld [vmem:[#allocation3 + $0xb60] sm:$0xff]  ;;  %v4694_v23 = vld [vmem:[#allocation3 + $0x3e8] sm:$0xff] }
 0x7a4   :  { %5615 = vmatprep.subr.bf16.mxu0 %v4772_v48  ;;  %v4693_v48 = vld [vmem:[#allocation3 + $0x3e0] sm:$0xff] }
 0x7a6   :  { %5655 = vmatpush1.bf16.msra.mxu1 %v5011_v6  ;;  %v4950_v6 = vld [vmem:[#allocation3 + $0xbe8] sm:$0xff] }
 0x7a7   :  { %5656 = vmatprep.subr.bf16.mxu1 %v5028_v39  ;;  %5616 = vmatpush1.bf16.msra.mxu0 %v4771_v15  ;;  %v4949_v39 = vld [vmem:[#allocation3 + $0xbe0] sm:$0xff]  ;;  %v4710_v15 = vld [vmem:[#allocation3 + $0x468] sm:$0xff] }
 0x7a8   :  { %5617 = vmatprep.subr.bf16.mxu0 %v4788_v8  ;;  %v4709_v8 = vld [vmem:[#allocation3 + $0x460] sm:$0xff] }
 0x7aa   :  { %5657 = vmatpush1.bf16.msra.mxu1 %v5027_v59  ;;  %v4966_v59 = vld [vmem:[#allocation3 + $0xc68] sm:$0xff] }
 0x7ab   :  { %5658 = vmatprep.subr.bf16.mxu1 %v5044_v16  ;;  %5618 = vmatpush1.bf16.msra.mxu0 %v4787_v61  ;;  %v4965_v16 = vld [vmem:[#allocation3 + $0xc60] sm:$0xff]  ;;  %v4726_v61 = vld [vmem:[#allocation3 + $0x4e8] sm:$0xff] }
 0x7ac   :  { %5619 = vmatprep.subr.bf16.mxu0 %v4804_v47  ;;  %v4725_v47 = vld [vmem:[#allocation3 + $0x4e0] sm:$0xff] }
 0x7ae   :  { %5659 = vmatpush1.bf16.msra.mxu1 %v5043_v40  ;;  %v4982_v40 = vld [vmem:[#allocation3 + $0xce8] sm:$0xff] }
 0x7af   :  { %5660 = vmatprep.subr.bf16.mxu1 %v5060_v41  ;;  %5620 = vmatpush1.bf16.msra.mxu0 %v4803_v52  ;;  %v4981_v41 = vld [vmem:[#allocation3 + $0xce0] sm:$0xff]  ;;  %v4742_v52 = vld [vmem:[#allocation3 + $0x568] sm:$0xff] }
 0x7b0   :  { %5621 = vmatprep.subr.bf16.mxu0 %v4820_v3  ;;  %v4741_v3 = vld [vmem:[#allocation3 + $0x560] sm:$0xff] }
 0x7b2   :  { %5661 = vmatpush1.bf16.msra.mxu1 %v5059_v30  ;;  %v4998_v30 = vld [vmem:[#allocation3 + $0xd68] sm:$0xff] }
 0x7b3   :  { %5662 = vmatprep.subr.bf16.mxu1 %v5076_v36  ;;  %5622 = vmatpush1.bf16.msra.mxu0 %v4819_v51  ;;  %v4997_v36 = vld [vmem:[#allocation3 + $0xd60] sm:$0xff]  ;;  %v4758_v51 = vld [vmem:[#allocation3 + $0x5e8] sm:$0xff] }
 0x7b4   :  { %5673 = vmatprep.subr.bf16.mxu0 %v4582_v14  ;;  %v4757_v14 = vld [vmem:[#allocation3 + $0x5e0] sm:$0xff] }
 0x7b6   :  { %5663 = vmatpush1.bf16.msra.mxu1 %v5075_v43  ;;  %5624 = vmatmul.mubr.bf16.vlgmr.msra.gmra.mrb[56].mxu0 %v10074_v1  ;;  %v5014_v43 = vld [vmem:[#allocation3 + $0xde8] sm:$0xff] }
 0x7b7   :  { %5714 = vmatprep.subr.bf16.mxu1 %v4838_v60  ;;  %5674 = vmatpush1.bf16.msra.mxu0 %v4581_v27  ;;  %v5013_v60 = vld [vmem:[#allocation3 + $0xde0] sm:$0xff]  ;;  %v4774_v27 = vld [vmem:[#allocation3 + $0x668] sm:$0xff] }
 0x7b8   :  { %5675 = vmatprep.subr.bf16.mxu0 %v4598_v2  ;;  %5705 = vmatprep.mubr.bf16.mxu0 %v10017_v32  ;;  %v4773_v2 = vld [vmem:[#allocation3 + $0x660] sm:$0xff] }
 0x7b9   :  { %5665 = vmatmul.mubr.bf16.vlgmr.msra.gmra.mrb[56].mxu1 %v10076_v11 }
 0x7ba   :  { %5715 = vmatpush1.bf16.msra.mxu1 %v4837_v21  ;;  %5746 = vmatprep.mubr.bf16.mxu1 %v10025_v34  ;;  %v5030_v21 = vld [vmem:[#allocation3 + $0xe68] sm:$0xff] }
 0x7bb   :  { %5716 = vmatprep.subr.bf16.mxu1 %v4854_v62  ;;  %5676 = vmatpush1.bf16.msra.mxu0 %v4597_v50  ;;  %v5029_v62 = vld [vmem:[#allocation3 + $0xe60] sm:$0xff]  ;;  %v4790_v50 = vld [vmem:[#allocation3 + $0x6e8] sm:$0xff] }
 0x7bc   :  { %5677 = vmatprep.subr.bf16.mxu0 %v4614_v54  ;;  %v4789_v54 = vld [vmem:[#allocation3 + $0x6e0] sm:$0xff] }
 0x7be   :  { %5717 = vmatpush1.bf16.msra.mxu1 %v4853_v42  ;;  %v5046_v42 = vld [vmem:[#allocation3 + $0xee8] sm:$0xff] }
 0x7bf   :  { %5718 = vmatprep.subr.bf16.mxu1 %v4870_v46  ;;  %5678 = vmatpush1.bf16.msra.mxu0 %v4613_v38  ;;  %v5045_v46 = vld [vmem:[#allocation3 + $0xee0] sm:$0xff]  ;;  %v4806_v38 = vld [vmem:[#allocation3 + $0x768] sm:$0xff] }
 0x7c0   :  { %5679 = vmatprep.subr.bf16.mxu0 %v4630_v12  ;;  %v4805_v12 = vld [vmem:[#allocation3 + $0x760] sm:$0xff] }
 0x7c2   :  { %5719 = vmatpush1.bf16.msra.mxu1 %v4869_v44  ;;  %v5062_v44 = vld [vmem:[#allocation3 + $0xf68] sm:$0xff] }
 0x7c3   :  { %5720 = vmatprep.subr.bf16.mxu1 %v4886_v18  ;;  %5680 = vmatpush1.bf16.msra.mxu0 %v4629_v49  ;;  %v5061_v18 = vld [vmem:[#allocation3 + $0xf60] sm:$0xff]  ;;  %v4822_v49 = vld [vmem:[#allocation3 + $0x7e8] sm:$0xff] }
 0x7c4   :  { %5681 = vmatprep.subr.bf16.mxu0 %v4646_v19  ;;  %v4821_v19 = vld [vmem:[#allocation3 + $0x7e0] sm:$0xff] }
 0x7c6   :  { %5721 = vmatpush1.bf16.msra.mxu1 %v4885_v4  ;;  %v5078_v4 = vld [vmem:[#allocation3 + $0xfe8] sm:$0xff] }
 0x7c7   :  { %5722 = vmatprep.subr.bf16.mxu1 %v4902_v45  ;;  %5682 = vmatpush1.bf16.msra.mxu0 %v4645_v0  ;;  %v5077_v45 = vld [vmem:[#allocation3 + $0xfe0] sm:$0xff]  ;;  %v4584_v0 = vld [vmem:[#allocation3 + $0x78] sm:$0xff] }
 0x7c8   :  { %5683 = vmatprep.subr.bf16.mxu0 %v4662_v24  ;;  %v4583_v24 = vld [vmem:[#allocation3 + $0x70] sm:$0xff] }
 0x7c9   :  { %v5379_v37 = vpop.f32.mrb[44].mxu0 }
 0x7ca   :  { %5723 = vmatpush1.bf16.msra.mxu1 %v4901_v5  ;;  %v5381_v22 = vpop.f32.mrb[45].mxu0  ;;  %v4840_v5 = vld [vmem:[#allocation3 + $0x878] sm:$0xff] }
 0x7cb   :  { %5724 = vmatprep.subr.bf16.mxu1 %v4918_v10  ;;  %v5383_v7 = vpop.f32.mrb[46].mxu0  ;;  %5684 = vmatpush1.bf16.msra.mxu0 %v4661_v20  ;;  %v4839_v10 = vld [vmem:[#allocation3 + $0x870] sm:$0xff]  ;;  %v4600_v20 = vld [vmem:[#allocation3 + $0xf8] sm:$0xff] }
 0x7cc   :  { %v5420_v33 = vpop.f32.mrb[44].mxu1  ;;  %v5384_v56 = vpop.f32.mrb[47].mxu0  ;;  %5685 = vmatprep.subr.bf16.mxu0 %v4678_v63  ;;  %v4616_v63 = vld [vmem:[#allocation3 + $0x178] sm:$0xff] }
 0x7cd   :  { %v10110_v9 = vadd.f32 %v5420_v33, %v5379_v37  ;;  %v5422_v29 = vpop.f32.mrb[45].mxu1  ;;  %v4599_v37 = vld [vmem:[#allocation3 + $0xf0] sm:$0xff]  ;;  %v4632_v7 = vld [vmem:[#allocation3 + $0x1f8] sm:$0xff] }
 0x7ce   :  { %v10112_v57 = vadd.f32 %v5422_v29, %v5381_v22  ;;  %v5424_v53 = vpop.f32.mrb[46].mxu1  ;;  %5725 = vmatpush1.bf16.msra.mxu1 %v4917_v25  ;;  %v4856_v25 = vld [vmem:[#allocation3 + $0x8f8] sm:$0xff]  ;;  %v4855_v33 = vld [vmem:[#allocation3 + $0x8f0] sm:$0xff] }
 0x7cf   :  { %v5425_v13 = vpop.f32.mrb[47].mxu1  ;;  %5726 = vmatprep.subr.bf16.mxu1 %v4934_v28  ;;  %5686 = vmatpush1.bf16.msra.mxu0 %v4677_v26  ;;  %v4872_v28 = vld [vmem:[#allocation3 + $0x978] sm:$0xff]  ;;  %v4615_v22 = vld [vmem:[#allocation3 + $0x170] sm:$0xff] }
 0x7d0   :  { %5687 = vmatprep.subr.bf16.mxu0 %v4694_v23  ;;  %v4871_v29 = vld [vmem:[#allocation3 + $0x970] sm:$0xff]  ;;  %v4888_v53 = vld [vmem:[#allocation3 + $0x9f8] sm:$0xff] }
 0x7d1   :  { %v4631_v56 = vld [vmem:[#allocation3 + $0x1f0] sm:$0xff]  ;;  %v4648_v26 = vld [vmem:[#allocation3 + $0x278] sm:$0xff] }
 0x7d2   :  { %5727 = vmatpush1.bf16.msra.mxu1 %v4933_v35  ;;  %v4887_v13 = vld [vmem:[#allocation3 + $0x9f0] sm:$0xff]  ;;  %v4904_v35 = vld [vmem:[#allocation3 + $0xa78] sm:$0xff] }
 0x7d3   :  { %5728 = vmatprep.subr.bf16.mxu1 %v4950_v6  ;;  %5688 = vmatpush1.bf16.msra.mxu0 %v4693_v48  ;;  %v4664_v23 = vld [vmem:[#allocation3 + $0x2f8] sm:$0xff]  ;;  %v4663_v48 = vld [vmem:[#allocation3 + $0x2f0] sm:$0xff] }
 0x7d4   :  { %5689 = vmatprep.subr.bf16.mxu0 %v4710_v15  ;;  %v4920_v6 = vld [vmem:[#allocation3 + $0xaf8] sm:$0xff] }
 0x7d6   :  { %5729 = vmatpush1.bf16.msra.mxu1 %v4949_v39  ;;  %v4919_v39 = vld [vmem:[#allocation3 + $0xaf0] sm:$0xff] }
 0x7d7   :  { %5730 = vmatprep.subr.bf16.mxu1 %v4966_v59  ;;  %5690 = vmatpush1.bf16.msra.mxu0 %v4709_v8  ;;  %v4680_v8 = vld [vmem:[#allocation3 + $0x378] sm:$0xff] }
 0x7d8   :  { %5691 = vmatprep.subr.bf16.mxu0 %v4726_v61 }
 0x7da   :  { %5731 = vmatpush1.bf16.msra.mxu1 %v4965_v16  ;;  %v4936_v16 = vld [vmem:[#allocation3 + $0xb78] sm:$0xff] }
 0x7db   :  { %5732 = vmatprep.subr.bf16.mxu1 %v4982_v40  ;;  %5692 = vmatpush1.bf16.msra.mxu0 %v4725_v47 }
 0x7dc   :  { %5693 = vmatprep.subr.bf16.mxu0 %v4742_v52 }
 0x7de   :  { %5733 = vmatpush1.bf16.msra.mxu1 %v4981_v41 }
 0x7df   :  { %5734 = vmatprep.subr.bf16.mxu1 %v4998_v30  ;;  %5694 = vmatpush1.bf16.msra.mxu0 %v4741_v3 }
 0x7e0   :  { %5695 = vmatprep.subr.bf16.mxu0 %v4758_v51  ;;  %v4679_v51 = vld [vmem:[#allocation3 + $0x370] sm:$0xff] }
 0x7e2   :  { %5735 = vmatpush1.bf16.msra.mxu1 %v4997_v36 }
 0x7e3   :  { %5736 = vmatprep.subr.bf16.mxu1 %v5014_v43  ;;  %5696 = vmatpush1.bf16.msra.mxu0 %v4757_v14  ;;  %v4935_v43 = vld [vmem:[#allocation3 + $0xb70] sm:$0xff]  ;;  %v4696_v14 = vld [vmem:[#allocation3 + $0x3f8] sm:$0xff] }
 0x7e4   :  { %5697 = vmatprep.subr.bf16.mxu0 %v4774_v27  ;;  %v4695_v27 = vld [vmem:[#allocation3 + $0x3f0] sm:$0xff] }
 0x7e6   :  { %5737 = vmatpush1.bf16.msra.mxu1 %v5013_v60  ;;  %v4952_v60 = vld [vmem:[#allocation3 + $0xbf8] sm:$0xff] }
 0x7e7   :  { %5738 = vmatprep.subr.bf16.mxu1 %v5030_v21  ;;  %5698 = vmatpush1.bf16.msra.mxu0 %v4773_v2  ;;  %v4951_v21 = vld [vmem:[#allocation3 + $0xbf0] sm:$0xff]  ;;  %v4712_v2 = vld [vmem:[#allocation3 + $0x478] sm:$0xff] }
 0x7e8   :  { %5699 = vmatprep.subr.bf16.mxu0 %v4790_v50  ;;  %v4711_v50 = vld [vmem:[#allocation3 + $0x470] sm:$0xff] }
 0x7ea   :  { %5739 = vmatpush1.bf16.msra.mxu1 %v5029_v62  ;;  %v4968_v62 = vld [vmem:[#allocation3 + $0xc78] sm:$0xff] }
 0x7eb   :  { %5740 = vmatprep.subr.bf16.mxu1 %v5046_v42  ;;  %5700 = vmatpush1.bf16.msra.mxu0 %v4789_v54  ;;  %v4967_v42 = vld [vmem:[#allocation3 + $0xc70] sm:$0xff]  ;;  %v4728_v54 = vld [vmem:[#allocation3 + $0x4f8] sm:$0xff] }
 0x7ec   :  { %5701 = vmatprep.subr.bf16.mxu0 %v4806_v38  ;;  %v4727_v38 = vld [vmem:[#allocation3 + $0x4f0] sm:$0xff] }
 0x7ee   :  { %5741 = vmatpush1.bf16.msra.mxu1 %v5045_v46  ;;  %v4984_v46 = vld [vmem:[#allocation3 + $0xcf8] sm:$0xff] }
 0x7ef   :  { %5742 = vmatprep.subr.bf16.mxu1 %v5062_v44  ;;  %5702 = vmatpush1.bf16.msra.mxu0 %v4805_v12  ;;  %v4983_v44 = vld [vmem:[#allocation3 + $0xcf0] sm:$0xff]  ;;  %v4744_v12 = vld [vmem:[#allocation3 + $0x578] sm:$0xff] }
 0x7f0   :  { %5703 = vmatprep.subr.bf16.mxu0 %v4822_v49  ;;  %v4743_v49 = vld [vmem:[#allocation3 + $0x570] sm:$0xff] }
 0x7f2   :  { %5743 = vmatpush1.bf16.msra.mxu1 %v5061_v18  ;;  %v5000_v18 = vld [vmem:[#allocation3 + $0xd78] sm:$0xff] }
 0x7f3   :  { %5744 = vmatprep.subr.bf16.mxu1 %v5078_v4  ;;  %5704 = vmatpush1.bf16.msra.mxu0 %v4821_v19  ;;  %v4999_v4 = vld [vmem:[#allocation3 + $0xd70] sm:$0xff]  ;;  %v4760_v19 = vld [vmem:[#allocation3 + $0x5f8] sm:$0xff] }
 0x7f4   :  { %5755 = vmatprep.subr.bf16.mxu0 %v4584_v0  ;;  %v4759_v0 = vld [vmem:[#allocation3 + $0x5f0] sm:$0xff] }
 0x7f6   :  { %5745 = vmatpush1.bf16.msra.mxu1 %v5077_v45  ;;  %5706 = vmatmul.mubr.bf16.vlgmr.msra.gmra.mrb[60].mxu0 %v10074_v1  ;;  %v5016_v45 = vld [vmem:[#allocation3 + $0xdf8] sm:$0xff] }
 0x7f7   :  { %5796 = vmatprep.subr.bf16.mxu1 %v4840_v5  ;;  %5756 = vmatpush1.bf16.msra.mxu0 %v4583_v24  ;;  %v5015_v5 = vld [vmem:[#allocation3 + $0xdf0] sm:$0xff]  ;;  %v4776_v24 = vld [vmem:[#allocation3 + $0x678] sm:$0xff] }
 0x7f8   :  { %5757 = vmatprep.subr.bf16.mxu0 %v4600_v20  ;;  %5787 = vmatprep.mubr.bf16.mxu0 %v10017_v32  ;;  %v4647_v32 = vld [vmem:[#allocation3 + $0x270] sm:$0xff] }
 0x7f9   :  { %5747 = vmatmul.mubr.bf16.vlgmr.msra.gmra.mrb[60].mxu1 %v10076_v11  ;;  %v4775_v20 = vld [vmem:[#allocation3 + $0x670] sm:$0xff] }
 0x7fa   :  { %5797 = vmatpush1.bf16.msra.mxu1 %v4839_v10  ;;  %5828 = vmatprep.mubr.bf16.mxu1 %v10025_v34  ;;  %v4903_v34 = vld [vmem:[#allocation3 + $0xa70] sm:$0xff]  ;;  %v5032_v10 = vld [vmem:[#allocation3 + $0xe78] sm:$0xff] }
 0x7fb   :  { %5798 = vmatprep.subr.bf16.mxu1 %v4856_v25  ;;  %5758 = vmatpush1.bf16.msra.mxu0 %v4599_v37  ;;  %v5031_v25 = vld [vmem:[#allocation3 + $0xe70] sm:$0xff]  ;;  %v4792_v37 = vld [vmem:[#allocation3 + $0x6f8] sm:$0xff] }
 0x7fc   :  { %5759 = vmatprep.subr.bf16.mxu0 %v4616_v63  ;;  %v4791_v63 = vld [vmem:[#allocation3 + $0x6f0] sm:$0xff] }
 0x7fe   :  { %5799 = vmatpush1.bf16.msra.mxu1 %v4855_v33  ;;  %v5048_v33 = vld [vmem:[#allocation3 + $0xef8] sm:$0xff] }
 0x7ff   :  { %5800 = vmatprep.subr.bf16.mxu1 %v4872_v28  ;;  %5760 = vmatpush1.bf16.msra.mxu0 %v4615_v22  ;;  %v5047_v28 = vld [vmem:[#allocation3 + $0xef0] sm:$0xff]  ;;  %v4808_v22 = vld [vmem:[#allocation3 + $0x778] sm:$0xff] }
 0x800   :  { %5761 = vmatprep.subr.bf16.mxu0 %v4632_v7  ;;  %v4807_v7 = vld [vmem:[#allocation3 + $0x770] sm:$0xff] }
 0x802   :  { %5801 = vmatpush1.bf16.msra.mxu1 %v4871_v29  ;;  %v5064_v29 = vld [vmem:[#allocation3 + $0xf78] sm:$0xff] }
 0x803   :  { %5802 = vmatprep.subr.bf16.mxu1 %v4888_v53  ;;  %5762 = vmatpush1.bf16.msra.mxu0 %v4631_v56  ;;  %v5063_v53 = vld [vmem:[#allocation3 + $0xf70] sm:$0xff]  ;;  %v4824_v56 = vld [vmem:[#allocation3 + $0x7f8] sm:$0xff] }
 0x804   :  { %5763 = vmatprep.subr.bf16.mxu0 %v4648_v26  ;;  %v4823_v26 = vld [vmem:[#allocation3 + $0x7f0] sm:$0xff] }
 0x806   :  { %5803 = vmatpush1.bf16.msra.mxu1 %v4887_v13  ;;  %v5080_v13 = vld [vmem:[#allocation3 + $0xff8] sm:$0xff] }
 0x807   :  { %5804 = vmatprep.subr.bf16.mxu1 %v4904_v35  ;;  %5764 = vmatpush1.bf16.msra.mxu0 %v4647_v32  ;;  %v5079_v35 = vld [vmem:[#allocation3 + $0xff0] sm:$0xff]  ;;  %v3994_v32 = vld [vmem:[#allocation2 + $0x8] sm:$0xff] }
 0x808   :  { %5765 = vmatprep.subr.bf16.mxu0 %v4664_v23  ;;  %v10125_v23 = vld [vmem:[%s10496_s20] sm:$0xff] }
 0x809   :  { %v5461_v15 = vpop.f32.mrb[48].mxu0 }
 0x80a   :  { %5805 = vmatpush1.bf16.msra.mxu1 %v4903_v34  ;;  %v5463_v40 = vpop.f32.mrb[49].mxu0  ;;  %v4250_v34 = vld [vmem:[#allocation2 + $0x808] sm:$0xff] }
 0x80b   :  { %5806 = vmatprep.subr.bf16.mxu1 %v4920_v6  ;;  %v5465_v52 = vpop.f32.mrb[50].mxu0  ;;  %5766 = vmatpush1.bf16.msra.mxu0 %v4663_v48  ;;  %v10130_v6 = vld [vmem:[%s10496_s20 + $0x8] sm:$0xff]  ;;  %v3993_v48 = vld [vmem:[#allocation2] sm:$0xff] }
 0x80c   :  { %v5502_v59 = vpop.f32.mrb[48].mxu1  ;;  %v5466_v3 = vpop.f32.mrb[51].mxu0  ;;  %5767 = vmatprep.subr.bf16.mxu0 %v4680_v8  ;;  %v10134_v8 = vcombine.high %v10125_v23, %v10125_v23  ;;  %v4026_v52 = vld [vmem:[#allocation2 + $0x108] sm:$0xff] }
 0x80d   :  { %v10118_v61 = vadd.f32 %v5502_v59, %v5461_v15  ;;  %v5504_v47 = vpop.f32.mrb[49].mxu1  ;;  %v4010_v15 = vld [vmem:[#allocation2 + $0x88] sm:$0xff]  ;;  %v4025_v3 = vld [vmem:[#allocation2 + $0x100] sm:$0xff] }
 0x80e   :  { %v10120_v41 = vadd.f32 %v5504_v47, %v5463_v40  ;;  %v5506_v30 = vpop.f32.mrb[50].mxu1  ;;  %5807 = vmatpush1.bf16.msra.mxu1 %v4919_v39  ;;  %v4249_v39 = vld [vmem:[#allocation2 + $0x800] sm:$0xff]  ;;  %v4266_v59 = vld [vmem:[#allocation2 + $0x888] sm:$0xff] }
 0x80f   :  { %v5507_v36 = vpop.f32.mrb[51].mxu1  ;;  %5808 = vmatprep.subr.bf16.mxu1 %v4936_v16  ;;  %5768 = vmatpush1.bf16.msra.mxu0 %v4679_v51  ;;  %v10138_v16 = vcombine.high %v10130_v6, %v10130_v6  ;;  %v4009_v40 = vld [vmem:[#allocation2 + $0x80] sm:$0xff]  ;;  %v4282_v30 = vld [vmem:[#allocation2 + $0x908] sm:$0xff] }
 0x810   :  { %5769 = vmatprep.subr.bf16.mxu0 %v4696_v14  ;;  %v4265_v47 = vld [vmem:[#allocation2 + $0x880] sm:$0xff]  ;;  %v4042_v36 = vld [vmem:[#allocation2 + $0x188] sm:$0xff] }
 0x811   :  { %v4041_v51 = vld [vmem:[#allocation2 + $0x180] sm:$0xff]  ;;  %v4058_v14 = vld [vmem:[#allocation2 + $0x208] sm:$0xff] }
 0x812   :  { %5809 = vmatpush1.bf16.msra.mxu1 %v4935_v43  ;;  %v4297_v43 = vld [vmem:[#allocation2 + $0x980] sm:$0xff] }
 0x813   :  { %5810 = vmatprep.subr.bf16.mxu1 %v4952_v60  ;;  %5770 = vmatpush1.bf16.msra.mxu0 %v4695_v27  ;;  %v4314_v60 = vld [vmem:[#allocation2 + $0xa08] sm:$0xff]  ;;  %v4057_v27 = vld [vmem:[#allocation2 + $0x200] sm:$0xff] }
 0x814   :  { %5771 = vmatprep.subr.bf16.mxu0 %v4712_v2  ;;  %v4074_v2 = vld [vmem:[#allocation2 + $0x288] sm:$0xff] }
 0x816   :  { %5811 = vmatpush1.bf16.msra.mxu1 %v4951_v21  ;;  %v4313_v21 = vld [vmem:[#allocation2 + $0xa00] sm:$0xff] }
 0x817   :  { %5812 = vmatprep.subr.bf16.mxu1 %v4968_v62  ;;  %5772 = vmatpush1.bf16.msra.mxu0 %v4711_v50  ;;  %v4330_v62 = vld [vmem:[#allocation2 + $0xa88] sm:$0xff]  ;;  %v4073_v50 = vld [vmem:[#allocation2 + $0x280] sm:$0xff] }
 0x818   :  { %5773 = vmatprep.subr.bf16.mxu0 %v4728_v54 }
 0x81a   :  { %5813 = vmatpush1.bf16.msra.mxu1 %v4967_v42  ;;  %v4329_v42 = vld [vmem:[#allocation2 + $0xa80] sm:$0xff] }
 0x81b   :  { %5814 = vmatprep.subr.bf16.mxu1 %v4984_v46  ;;  %5774 = vmatpush1.bf16.msra.mxu0 %v4727_v38  ;;  %v4090_v38 = vld [vmem:[#allocation2 + $0x308] sm:$0xff] }
 0x81c   :  { %5775 = vmatprep.subr.bf16.mxu0 %v4744_v12 }
 0x81e   :  { %5815 = vmatpush1.bf16.msra.mxu1 %v4983_v44  ;;  %v4346_v44 = vld [vmem:[#allocation2 + $0xb08] sm:$0xff] }
 0x81f   :  { %5816 = vmatprep.subr.bf16.mxu1 %v5000_v18  ;;  %5776 = vmatpush1.bf16.msra.mxu0 %v4743_v49 }
 0x820   :  { %5777 = vmatprep.subr.bf16.mxu0 %v4760_v19 }
 0x822   :  { %5817 = vmatpush1.bf16.msra.mxu1 %v4999_v4 }
 0x823   :  { %5818 = vmatprep.subr.bf16.mxu1 %v5016_v45  ;;  %5778 = vmatpush1.bf16.msra.mxu0 %v4759_v0 }
 0x824   :  { %5779 = vmatprep.subr.bf16.mxu0 %v4776_v24  ;;  %v4089_v24 = vld [vmem:[#allocation2 + $0x300] sm:$0xff] }
 0x826   :  { %5819 = vmatpush1.bf16.msra.mxu1 %v5015_v5 }
 0x827   :  { %5820 = vmatprep.subr.bf16.mxu1 %v5032_v10  ;;  %5780 = vmatpush1.bf16.msra.mxu0 %v4775_v20  ;;  %v4345_v10 = vld [vmem:[#allocation2 + $0xb00] sm:$0xff]  ;;  %v4106_v20 = vld [vmem:[#allocation2 + $0x388] sm:$0xff] }
 0x828   :  { %5781 = vmatprep.subr.bf16.mxu0 %v4792_v37  ;;  %v4105_v37 = vld [vmem:[#allocation2 + $0x380] sm:$0xff] }
 0x82a   :  { %5821 = vmatpush1.bf16.msra.mxu1 %v5031_v25  ;;  %v4362_v25 = vld [vmem:[#allocation2 + $0xb88] sm:$0xff] }
 0x82b   :  { %5822 = vmatprep.subr.bf16.mxu1 %v5048_v33  ;;  %5782 = vmatpush1.bf16.msra.mxu0 %v4791_v63  ;;  %v4361_v33 = vld [vmem:[#allocation2 + $0xb80] sm:$0xff]  ;;  %v4122_v63 = vld [vmem:[#allocation2 + $0x408] sm:$0xff] }
 0x82c   :  { %5783 = vmatprep.subr.bf16.mxu0 %v4808_v22  ;;  %v4121_v22 = vld [vmem:[#allocation2 + $0x400] sm:$0xff] }
 0x82e   :  { %5823 = vmatpush1.bf16.msra.mxu1 %v5047_v28  ;;  %v4378_v28 = vld [vmem:[#allocation2 + $0xc08] sm:$0xff] }
 0x82f   :  { %5824 = vmatprep.subr.bf16.mxu1 %v5064_v29  ;;  %5784 = vmatpush1.bf16.msra.mxu0 %v4807_v7  ;;  %v4377_v29 = vld [vmem:[#allocation2 + $0xc00] sm:$0xff]  ;;  %v4138_v7 = vld [vmem:[#allocation2 + $0x488] sm:$0xff] }
 0x830   :  { %5785 = vmatprep.subr.bf16.mxu0 %v4824_v56  ;;  %v4137_v56 = vld [vmem:[#allocation2 + $0x480] sm:$0xff] }
 0x832   :  { %5825 = vmatpush1.bf16.msra.mxu1 %v5063_v53  ;;  %v4394_v53 = vld [vmem:[#allocation2 + $0xc88] sm:$0xff] }
 0x833   :  { %5826 = vmatprep.subr.bf16.mxu1 %v5080_v13  ;;  %5786 = vmatpush1.bf16.msra.mxu0 %v4823_v26  ;;  %v4393_v13 = vld [vmem:[#allocation2 + $0xc80] sm:$0xff]  ;;  %v4154_v26 = vld [vmem:[#allocation2 + $0x508] sm:$0xff] }
 0x834   :  { %5858 = vmatprep.subr.bf16.mxu0 %v3994_v32  ;;  %v4153_v32 = vld [vmem:[#allocation2 + $0x500] sm:$0xff] }
 0x836   :  { %5827 = vmatpush1.bf16.msra.mxu1 %v5079_v35  ;;  %5788 = vmatmul.mubr.bf16.vlgmr.msra.gmra.mrb[64].mxu0 %v10074_v1  ;;  %v4281_v1 = vld [vmem:[#allocation2 + $0x900] sm:$0xff]  ;;  %v4410_v35 = vld [vmem:[#allocation2 + $0xd08] sm:$0xff] }
 0x837   :  { %5899 = vmatprep.subr.bf16.mxu1 %v4250_v34  ;;  %5859 = vmatpush1.bf16.msra.mxu0 %v3993_v48  ;;  %v4409_v34 = vld [vmem:[#allocation2 + $0xd00] sm:$0xff]  ;;  %v4170_v48 = vld [vmem:[#allocation2 + $0x588] sm:$0xff] }
 0x838   :  { %5860 = vmatprep.subr.bf16.mxu0 %v4010_v15  ;;  %5890 = vmatprep.mubr.bf16.mxu0 %v10134_v8  ;;  %v4169_v15 = vld [vmem:[#allocation2 + $0x580] sm:$0xff] }
 0x839   :  { %5829 = vmatmul.mubr.bf16.vlgmr.msra.gmra.mrb[64].mxu1 %v10076_v11  ;;  %v4298_v11 = vld [vmem:[#allocation2 + $0x988] sm:$0xff] }
 0x83a   :  { %5900 = vmatpush1.bf16.msra.mxu1 %v4249_v39  ;;  %5931 = vmatprep.mubr.bf16.mxu1 %v10138_v16  ;;  %v4426_v39 = vld [vmem:[#allocation2 + $0xd88] sm:$0xff] }
 0x83b   :  { %5901 = vmatprep.subr.bf16.mxu1 %v4266_v59  ;;  %5861 = vmatpush1.bf16.msra.mxu0 %v4009_v40  ;;  %v4425_v59 = vld [vmem:[#allocation2 + $0xd80] sm:$0xff]  ;;  %v4186_v40 = vld [vmem:[#allocation2 + $0x608] sm:$0xff] }
 0x83c   :  { %5862 = vmatprep.subr.bf16.mxu0 %v4026_v52  ;;  %v4185_v52 = vld [vmem:[#allocation2 + $0x600] sm:$0xff] }
 0x83e   :  { %5902 = vmatpush1.bf16.msra.mxu1 %v4265_v47  ;;  %v4442_v47 = vld [vmem:[#allocation2 + $0xe08] sm:$0xff] }
 0x83f   :  { %5903 = vmatprep.subr.bf16.mxu1 %v4282_v30  ;;  %5863 = vmatpush1.bf16.msra.mxu0 %v4025_v3  ;;  %v4441_v30 = vld [vmem:[#allocation2 + $0xe00] sm:$0xff]  ;;  %v4202_v3 = vld [vmem:[#allocation2 + $0x688] sm:$0xff] }
 0x840   :  { %5864 = vmatprep.subr.bf16.mxu0 %v4042_v36  ;;  %v4201_v36 = vld [vmem:[#allocation2 + $0x680] sm:$0xff] }
 0x842   :  { %5904 = vmatpush1.bf16.msra.mxu1 %v4281_v1  ;;  %v4458_v1 = vld [vmem:[#allocation2 + $0xe88] sm:$0xff] }
 0x843   :  { %5905 = vmatprep.subr.bf16.mxu1 %v4298_v11  ;;  %5865 = vmatpush1.bf16.msra.mxu0 %v4041_v51  ;;  %v4457_v11 = vld [vmem:[#allocation2 + $0xe80] sm:$0xff]  ;;  %v4218_v51 = vld [vmem:[#allocation2 + $0x708] sm:$0xff] }
 0x844   :  { %5866 = vmatprep.subr.bf16.mxu0 %v4058_v14  ;;  %v4217_v14 = vld [vmem:[#allocation2 + $0x700] sm:$0xff] }
 0x846   :  { %5906 = vmatpush1.bf16.msra.mxu1 %v4297_v43  ;;  %v4474_v43 = vld [vmem:[#allocation2 + $0xf08] sm:$0xff] }
 0x847   :  { %5907 = vmatprep.subr.bf16.mxu1 %v4314_v60  ;;  %5867 = vmatpush1.bf16.msra.mxu0 %v4057_v27  ;;  %v4473_v60 = vld [vmem:[#allocation2 + $0xf00] sm:$0xff]  ;;  %v4234_v27 = vld [vmem:[#allocation2 + $0x788] sm:$0xff] }
 0x848   :  { %5868 = vmatprep.subr.bf16.mxu0 %v4074_v2  ;;  %v4233_v2 = vld [vmem:[#allocation2 + $0x780] sm:$0xff] }
 0x849   :  { %v5543_v54 = vpop.f32.mrb[52].mxu0 }
 0x84a   :  { %5908 = vmatpush1.bf16.msra.mxu1 %v4313_v21  ;;  %v5545_v18 = vpop.f32.mrb[53].mxu0  ;;  %v4490_v21 = vld [vmem:[#allocation2 + $0xf88] sm:$0xff] }
 0x84b   :  { %5909 = vmatprep.subr.bf16.mxu1 %v4330_v62  ;;  %v5547_v19 = vpop.f32.mrb[54].mxu0  ;;  %5869 = vmatpush1.bf16.msra.mxu0 %v4073_v50  ;;  %v4489_v62 = vld [vmem:[#allocation2 + $0xf80] sm:$0xff]  ;;  %v4506_v50 = vld [vmem:[#allocation2 + $0x1008] sm:$0xff] }
 0x84c   :  { %v5584_v46 = vpop.f32.mrb[52].mxu1  ;;  %v5548_v0 = vpop.f32.mrb[55].mxu0  ;;  %5870 = vmatprep.subr.bf16.mxu0 %v4090_v38  ;;  %v4505_v38 = vld [vmem:[#allocation2 + $0x1000] sm:$0xff]  ;;  %v4011_v19 = vld [vmem:[#allocation2 + $0x90] sm:$0xff] }
 0x84d   :  { %v10144_v12 = vadd.f32 %v5584_v46, %v5543_v54  ;;  %v5586_v49 = vpop.f32.mrb[53].mxu1  ;;  %v10150_v54 = vcombine.low %v10125_v23, %v10125_v23  ;;  %v10154_v46 = vcombine.low %v10130_v6, %v10130_v6  ;;  %v4521_v23 = vld [vmem:[#allocation2 + $0x1080] sm:$0xff]  ;;  %v10497_v6 = vmov 0   ;;  %v4252_v0 = vld [vmem:[#allocation2 + $0x818] sm:$0xff] }
 0x84e   :  { %v10146_v4 = vadd.f32 %v5586_v49, %v5545_v18  ;;  %v5588_v45 = vpop.f32.mrb[54].mxu1  ;;  %5910 = vmatpush1.bf16.msra.mxu1 %v4329_v42  ;;  %v3996_v42 = vld [vmem:[#allocation2 + $0x18] sm:$0xff]  ;;  %v4522_v18 = vld [vmem:[#allocation2 + $0x1088] sm:$0xff] }
 0x84f   :  { %v5589_v5 = vpop.f32.mrb[55].mxu1  ;;  %5911 = vmatprep.subr.bf16.mxu1 %v4346_v44  ;;  %5871 = vmatpush1.bf16.msra.mxu0 %v4089_v24  ;;  %v3995_v44 = vld [vmem:[#allocation2 + $0x10] sm:$0xff]  ;;  %v4012_v49 = vld [vmem:[#allocation2 + $0x98] sm:$0xff] }
 0x850   :  { %5872 = vmatprep.subr.bf16.mxu0 %v4106_v20  ;;  %v4028_v45 = vld [vmem:[#allocation2 + $0x118] sm:$0xff]  ;;  %v10163_v5 = vld [vmem:[%s10496_s20 + $0x10] ss:$0 sps:$4 sm:$0xff]  }
 0x851   :  { %v4027_v24 = vld [vmem:[#allocation2 + $0x110] sm:$0xff]  ;;  %v4044_v20 = vld [vmem:[#allocation2 + $0x198] sm:$0xff] }
 0x852   :  { %5912 = vmatpush1.bf16.msra.mxu1 %v4345_v10  ;;  %v4251_v10 = vld [vmem:[#allocation2 + $0x810] sm:$0xff] }
 0x853   :  { %5913 = vmatprep.subr.bf16.mxu1 %v4362_v25  ;;  %5873 = vmatpush1.bf16.msra.mxu0 %v4105_v37  ;;  %v4268_v25 = vld [vmem:[#allocation2 + $0x898] sm:$0xff]  ;;  %v4043_v37 = vld [vmem:[#allocation2 + $0x190] sm:$0xff] }
 0x854   :  { %5874 = vmatprep.subr.bf16.mxu0 %v4122_v63  ;;  %v4060_v63 = vld [vmem:[#allocation2 + $0x218] sm:$0xff] }
 0x856   :  { %5914 = vmatpush1.bf16.msra.mxu1 %v4361_v33  ;;  %v4267_v33 = vld [vmem:[#allocation2 + $0x890] sm:$0xff] }
 0x857   :  { %5915 = vmatprep.subr.bf16.mxu1 %v4378_v28  ;;  %5875 = vmatpush1.bf16.msra.mxu0 %v4121_v22  ;;  %v4284_v28 = vld [vmem:[#allocation2 + $0x918] sm:$0xff]  ;;  %v4059_v22 = vld [vmem:[#allocation2 + $0x210] sm:$0xff] }
 0x858   :  { %5876 = vmatprep.subr.bf16.mxu0 %v4138_v7  ;;  %v4076_v7 = vld [vmem:[#allocation2 + $0x298] sm:$0xff] }
 0x85a   :  { %5916 = vmatpush1.bf16.msra.mxu1 %v4377_v29  ;;  %v4283_v29 = vld [vmem:[#allocation2 + $0x910] sm:$0xff] }
 0x85b   :  { %5917 = vmatprep.subr.bf16.mxu1 %v4394_v53  ;;  %5877 = vmatpush1.bf16.msra.mxu0 %v4137_v56  ;;  %v4300_v53 = vld [vmem:[#allocation2 + $0x998] sm:$0xff]  ;;  %v4075_v56 = vld [vmem:[#allocation2 + $0x290] sm:$0xff] }
 0x85c   :  { %5878 = vmatprep.subr.bf16.mxu0 %v4154_v26 }
 0x85e   :  { %5918 = vmatpush1.bf16.msra.mxu1 %v4393_v13  ;;  %v4299_v13 = vld [vmem:[#allocation2 + $0x990] sm:$0xff] }
 0x85f   :  { %5919 = vmatprep.subr.bf16.mxu1 %v4410_v35  ;;  %5879 = vmatpush1.bf16.msra.mxu0 %v4153_v32  ;;  %v4092_v32 = vld [vmem:[#allocation2 + $0x318] sm:$0xff] }
 0x860   :  { %5880 = vmatprep.subr.bf16.mxu0 %v4170_v48 }
 0x862   :  { %5920 = vmatpush1.bf16.msra.mxu1 %v4409_v34  ;;  %v4316_v34 = vld [vmem:[#allocation2 + $0xa18] sm:$0xff] }
 0x863   :  { %5921 = vmatprep.subr.bf16.mxu1 %v4426_v39  ;;  %5881 = vmatpush1.bf16.msra.mxu0 %v4169_v15 }
 0x864   :  { %5882 = vmatprep.subr.bf16.mxu0 %v4186_v40 }
 0x866   :  { %5922 = vmatpush1.bf16.msra.mxu1 %v4425_v59 }
 0x867   :  { %5923 = vmatprep.subr.bf16.mxu1 %v4442_v47  ;;  %5883 = vmatpush1.bf16.msra.mxu0 %v4185_v52 }
 0x868   :  { %5884 = vmatprep.subr.bf16.mxu0 %v4202_v3  ;;  %v4091_v3 = vld [vmem:[#allocation2 + $0x310] sm:$0xff] }
 0x86a   :  { %5924 = vmatpush1.bf16.msra.mxu1 %v4441_v30 }
 0x86b   :  { %5925 = vmatprep.subr.bf16.mxu1 %v4458_v1  ;;  %5885 = vmatpush1.bf16.msra.mxu0 %v4201_v36  ;;  %v4315_v1 = vld [vmem:[#allocation2 + $0xa10] sm:$0xff]  ;;  %v4108_v36 = vld [vmem:[#allocation2 + $0x398] sm:$0xff] }
 0x86c   :  { %5886 = vmatprep.subr.bf16.mxu0 %v4218_v51  ;;  %v4107_v51 = vld [vmem:[#allocation2 + $0x390] sm:$0xff] }
 0x86e   :  { %5926 = vmatpush1.bf16.msra.mxu1 %v4457_v11  ;;  %v4332_v11 = vld [vmem:[#allocation2 + $0xa98] sm:$0xff] }
 0x86f   :  { %5927 = vmatprep.subr.bf16.mxu1 %v4474_v43  ;;  %5887 = vmatpush1.bf16.msra.mxu0 %v4217_v14  ;;  %v4331_v43 = vld [vmem:[#allocation2 + $0xa90] sm:$0xff]  ;;  %v4124_v14 = vld [vmem:[#allocation2 + $0x418] sm:$0xff] }
 0x870   :  { %5888 = vmatprep.subr.bf16.mxu0 %v4234_v27  ;;  %v4123_v27 = vld [vmem:[#allocation2 + $0x410] sm:$0xff] }
 0x872   :  { %5928 = vmatpush1.bf16.msra.mxu1 %v4473_v60  ;;  %v4348_v60 = vld [vmem:[#allocation2 + $0xb18] sm:$0xff] }
 0x873   :  { %5929 = vmatprep.subr.bf16.mxu1 %v4490_v21  ;;  %5889 = vmatpush1.bf16.msra.mxu0 %v4233_v2  ;;  %v4347_v21 = vld [vmem:[#allocation2 + $0xb10] sm:$0xff]  ;;  %v4140_v2 = vld [vmem:[#allocation2 + $0x498] sm:$0xff] }
 0x874   :  { %5940 = vmatprep.subr.bf16.mxu0 %v4506_v50  ;;  %v4139_v50 = vld [vmem:[#allocation2 + $0x490] sm:$0xff] }
 0x876   :  { %5930 = vmatpush1.bf16.msra.mxu1 %v4489_v62  ;;  %5891 = vmatmul.mubr.bf16.vlgmr.msra.gmra.mrb[68].mxu0 %v10150_v54  ;;  %v4364_v62 = vld [vmem:[#allocation2 + $0xb98] sm:$0xff] }
 0x877   :  { %5981 = vmatprep.subr.bf16.mxu1 %v3996_v42  ;;  %5941 = vmatpush1.bf16.msra.mxu0 %v4505_v38  ;;  %v4363_v42 = vld [vmem:[#allocation2 + $0xb90] sm:$0xff]  ;;  %v4156_v38 = vld [vmem:[#allocation2 + $0x518] sm:$0xff] }
 0x878   :  { %5942 = vmatprep.subr.bf16.mxu0 %v4522_v18  ;;  %5972 = vmatprep.mubr.bf16.mxu0 %v10497_v6  ;;  %v4155_v18 = vld [vmem:[#allocation2 + $0x510] sm:$0xff] }
 0x879   :  { %5932 = vmatmul.mubr.bf16.vlgmr.msra.gmra.mrb[68].mxu1 %v10154_v46 }
 0x87a   :  { %5982 = vmatpush1.bf16.msra.mxu1 %v3995_v44  ;;  %6013 = vmatprep.mubr.bf16.mxu1 %v10134_v8  ;;  %v4380_v44 = vld [vmem:[#allocation2 + $0xc18] sm:$0xff] }
 0x87b   :  { %5983 = vmatprep.subr.bf16.mxu1 %v4012_v49  ;;  %5943 = vmatpush1.bf16.msra.mxu0 %v4521_v23  ;;  %v4379_v49 = vld [vmem:[#allocation2 + $0xc10] sm:$0xff]  ;;  %v4172_v23 = vld [vmem:[#allocation2 + $0x598] sm:$0xff] }
 0x87c   :  { %6022 = vmatprep.subr.bf16.mxu0 %v4252_v0  ;;  %v4395_v0 = vld [vmem:[#allocation2 + $0xc90] sm:$0xff] }
 0x87e   :  { %5984 = vmatpush1.bf16.msra.mxu1 %v4011_v19  ;;  %7564 = vmatmul.mubr.msk.bf16.vlgmr.msra.gmra.mrb[72].mxu0 %vm5854_vm9, %v10163_v5  ;;  %v4396_v19 = vld [vmem:[#allocation2 + $0xc98] sm:$0xff] }
 0x87f   :  { %5985 = vmatprep.subr.bf16.mxu1 %v4028_v45  ;;  %6023 = vmatpush1.bf16.msra.mxu0 %v4251_v10  ;;  %v4171_v45 = vld [vmem:[#allocation2 + $0x590] sm:$0xff]  ;;  %v4412_v10 = vld [vmem:[#allocation2 + $0xd18] sm:$0xff] }
 0x880   :  { %6024 = vmatprep.subr.bf16.mxu0 %v4268_v25  ;;  %6054 = vmatprep.mubr.bf16.mxu0 %v10138_v16  ;;  %v4411_v25 = vld [vmem:[#allocation2 + $0xd10] sm:$0xff] }
 0x882   :  { %5986 = vmatpush1.bf16.msra.mxu1 %v4027_v24  ;;  %v4188_v24 = vld [vmem:[#allocation2 + $0x618] sm:$0xff] }
 0x883   :  { %5987 = vmatprep.subr.bf16.mxu1 %v4044_v20  ;;  %6025 = vmatpush1.bf16.msra.mxu0 %v4267_v33  ;;  %v4187_v20 = vld [vmem:[#allocation2 + $0x610] sm:$0xff]  ;;  %v4428_v33 = vld [vmem:[#allocation2 + $0xd98] sm:$0xff] }
 0x884   :  { %6026 = vmatprep.subr.bf16.mxu0 %v4284_v28  ;;  %v4427_v28 = vld [vmem:[#allocation2 + $0xd90] sm:$0xff] }
 0x886   :  { %5988 = vmatpush1.bf16.msra.mxu1 %v4043_v37  ;;  %v4204_v37 = vld [vmem:[#allocation2 + $0x698] sm:$0xff] }
 0x887   :  { %5989 = vmatprep.subr.bf16.mxu1 %v4060_v63  ;;  %6027 = vmatpush1.bf16.msra.mxu0 %v4283_v29  ;;  %v4203_v63 = vld [vmem:[#allocation2 + $0x690] sm:$0xff]  ;;  %v4444_v29 = vld [vmem:[#allocation2 + $0xe18] sm:$0xff] }
 0x888   :  { %6028 = vmatprep.subr.bf16.mxu0 %v4300_v53  ;;  %v4443_v53 = vld [vmem:[#allocation2 + $0xe10] sm:$0xff] }
 0x889   :  { %v5625_v26 = vpop.f32.mrb[56].mxu0 }
 0x88a   :  { %5990 = vmatpush1.bf16.msra.mxu1 %v4059_v22  ;;  %v5627_v39 = vpop.f32.mrb[57].mxu0  ;;  %v4220_v22 = vld [vmem:[#allocation2 + $0x718] sm:$0xff] }
 0x88b   :  { %5991 = vmatprep.subr.bf16.mxu1 %v4076_v7  ;;  %v5629_v40 = vpop.f32.mrb[58].mxu0  ;;  %6029 = vmatpush1.bf16.msra.mxu0 %v4299_v13  ;;  %v4219_v7 = vld [vmem:[#allocation2 + $0x710] sm:$0xff]  ;;  %v4460_v13 = vld [vmem:[#allocation2 + $0xe98] sm:$0xff] }
 0x88c   :  { %v5666_v35 = vpop.f32.mrb[56].mxu1  ;;  %v5630_v52 = vpop.f32.mrb[59].mxu0  ;;  %6030 = vmatprep.subr.bf16.mxu0 %v4316_v34  ;;  %v4508_v34 = vld [vmem:[#allocation2 + $0x1018] sm:$0xff] }
 0x88d   :  { %v10168_v48 = vadd.f32 %v5666_v35, %v5625_v26  ;;  %v5668_v15 = vpop.f32.mrb[57].mxu1  ;;  %v4235_v26 = vld [vmem:[#allocation2 + $0x790] sm:$0xff]  ;;  %v4492_v40 = vld [vmem:[#allocation2 + $0xf98] sm:$0xff] }
 0x88e   :  { %v10170_v59 = vadd.f32 %v5668_v15, %v5627_v39  ;;  %v5670_v47 = vpop.f32.mrb[58].mxu1  ;;  %5992 = vmatpush1.bf16.msra.mxu1 %v4075_v56  ;;  %v4236_v56 = vld [vmem:[#allocation2 + $0x798] sm:$0xff]  ;;  %v4459_v35 = vld [vmem:[#allocation2 + $0xe90] sm:$0xff] }
 0x88f   :  { %v5671_v30 = vpop.f32.mrb[59].mxu1  ;;  %5993 = vmatprep.subr.bf16.mxu1 %v4092_v32  ;;  %6031 = vmatpush1.bf16.msra.mxu0 %v4315_v1  ;;  %v4476_v32 = vld [vmem:[#allocation2 + $0xf18] sm:$0xff]  ;;  %v4475_v39 = vld [vmem:[#allocation2 + $0xf10] sm:$0xff]  ;;  %v4254_v1 = vld [vmem:[#allocation2 + $0x828] sm:$0xff] }
 0x890   :  { %6032 = vmatprep.subr.bf16.mxu0 %v4332_v11  ;;  %v4507_v15 = vld [vmem:[#allocation2 + $0x1010] sm:$0xff]  ;;  %v4524_v47 = vld [vmem:[#allocation2 + $0x1098] sm:$0xff]  ;;  %v4253_v11 = vld [vmem:[#allocation2 + $0x820] sm:$0xff] }
 0x891   :  { %v4491_v52 = vld [vmem:[#allocation2 + $0xf90] sm:$0xff] }
 0x892   :  { %5994 = vmatpush1.bf16.msra.mxu1 %v4091_v3  ;;  %v4523_v30 = vld [vmem:[#allocation2 + $0x1090] sm:$0xff]  ;;  %v3998_v3 = vld [vmem:[#allocation2 + $0x28] sm:$0xff] }
 0x893   :  { %5995 = vmatprep.subr.bf16.mxu1 %v4108_v36  ;;  %6033 = vmatpush1.bf16.msra.mxu0 %v4331_v43  ;;  %v3997_v36 = vld [vmem:[#allocation2 + $0x20] sm:$0xff]  ;;  %v4270_v43 = vld [vmem:[#allocation2 + $0x8a8] sm:$0xff] }
 0x894   :  { %6034 = vmatprep.subr.bf16.mxu0 %v4348_v60  ;;  %v4269_v60 = vld [vmem:[#allocation2 + $0x8a0] sm:$0xff] }
 0x896   :  { %5996 = vmatpush1.bf16.msra.mxu1 %v4107_v51  ;;  %v4014_v51 = vld [vmem:[#allocation2 + $0xa8] sm:$0xff] }
 0x897   :  { %5997 = vmatprep.subr.bf16.mxu1 %v4124_v14  ;;  %6035 = vmatpush1.bf16.msra.mxu0 %v4347_v21  ;;  %v4013_v14 = vld [vmem:[#allocation2 + $0xa0] sm:$0xff]  ;;  %v4286_v21 = vld [vmem:[#allocation2 + $0x928] sm:$0xff] }
 0x898   :  { %6036 = vmatprep.subr.bf16.mxu0 %v4364_v62  ;;  %v4285_v62 = vld [vmem:[#allocation2 + $0x920] sm:$0xff] }
 0x89a   :  { %5998 = vmatpush1.bf16.msra.mxu1 %v4123_v27  ;;  %v4030_v27 = vld [vmem:[#allocation2 + $0x128] sm:$0xff] }
 0x89b   :  { %5999 = vmatprep.subr.bf16.mxu1 %v4140_v2  ;;  %6037 = vmatpush1.bf16.msra.mxu0 %v4363_v42  ;;  %v4029_v2 = vld [vmem:[#allocation2 + $0x120] sm:$0xff]  ;;  %v4302_v42 = vld [vmem:[#allocation2 + $0x9a8] sm:$0xff] }
 0x89c   :  { %6038 = vmatprep.subr.bf16.mxu0 %v4380_v44  ;;  %v4301_v44 = vld [vmem:[#allocation2 + $0x9a0] sm:$0xff] }
 0x89e   :  { %6000 = vmatpush1.bf16.msra.mxu1 %v4139_v50  ;;  %v4046_v50 = vld [vmem:[#allocation2 + $0x1a8] sm:$0xff] }
 0x89f   :  { %6001 = vmatprep.subr.bf16.mxu1 %v4156_v38  ;;  %6039 = vmatpush1.bf16.msra.mxu0 %v4379_v49  ;;  %v4045_v38 = vld [vmem:[#allocation2 + $0x1a0] sm:$0xff] }
 0x8a0   :  { %6040 = vmatprep.subr.bf16.mxu0 %v4396_v19  ;;  %v4318_v19 = vld [vmem:[#allocation2 + $0xa28] sm:$0xff] }
 0x8a2   :  { %6002 = vmatpush1.bf16.msra.mxu1 %v4155_v18 }
 0x8a3   :  { %6003 = vmatprep.subr.bf16.mxu1 %v4172_v23  ;;  %6041 = vmatpush1.bf16.msra.mxu0 %v4395_v0  ;;  %v4062_v23 = vld [vmem:[#allocation2 + $0x228] sm:$0xff] }
 0x8a4   :  { %6042 = vmatprep.subr.bf16.mxu0 %v4412_v10 }
 0x8a6   :  { %6004 = vmatpush1.bf16.msra.mxu1 %v4171_v45 }
 0x8a7   :  { %6005 = vmatprep.subr.bf16.mxu1 %v4188_v24  ;;  %6043 = vmatpush1.bf16.msra.mxu0 %v4411_v25 }
 0x8a8   :  { %6044 = vmatprep.subr.bf16.mxu0 %v4428_v33 }
 0x8aa   :  { %6006 = vmatpush1.bf16.msra.mxu1 %v4187_v20 }
 0x8ab   :  { %6007 = vmatprep.subr.bf16.mxu1 %v4204_v37  ;;  %6045 = vmatpush1.bf16.msra.mxu0 %v4427_v28  ;;  %v4317_v28 = vld [vmem:[#allocation2 + $0xa20] sm:$0xff] }
 0x8ac   :  { %6046 = vmatprep.subr.bf16.mxu0 %v4444_v29  ;;  %v4334_v29 = vld [vmem:[#allocation2 + $0xaa8] sm:$0xff] }
 0x8ae   :  { %6008 = vmatpush1.bf16.msra.mxu1 %v4203_v63  ;;  %v4061_v63 = vld [vmem:[#allocation2 + $0x220] sm:$0xff] }
 0x8af   :  { %6009 = vmatprep.subr.bf16.mxu1 %v4220_v22  ;;  %6047 = vmatpush1.bf16.msra.mxu0 %v4443_v53  ;;  %v4078_v22 = vld [vmem:[#allocation2 + $0x2a8] sm:$0xff]  ;;  %v4333_v53 = vld [vmem:[#allocation2 + $0xaa0] sm:$0xff] }
 0x8b0   :  { %6048 = vmatprep.subr.bf16.mxu0 %v4460_v13  ;;  %v4350_v13 = vld [vmem:[#allocation2 + $0xb28] sm:$0xff] }
 0x8b2   :  { %6010 = vmatpush1.bf16.msra.mxu1 %v4219_v7  ;;  %v4077_v7 = vld [vmem:[#allocation2 + $0x2a0] sm:$0xff] }
 0x8b3   :  { %6011 = vmatprep.subr.bf16.mxu1 %v4236_v56  ;;  %6049 = vmatpush1.bf16.msra.mxu0 %v4459_v35  ;;  %v4094_v56 = vld [vmem:[#allocation2 + $0x328] sm:$0xff]  ;;  %v4349_v35 = vld [vmem:[#allocation2 + $0xb20] sm:$0xff] }
 0x8b4   :  { %6050 = vmatprep.subr.bf16.mxu0 %v4476_v32  ;;  %v4110_v32 = vld [vmem:[#allocation2 + $0x3a8] sm:$0xff] }
 0x8b6   :  { %6012 = vmatpush1.bf16.msra.mxu1 %v4235_v26  ;;  %v4093_v26 = vld [vmem:[#allocation2 + $0x320] sm:$0xff] }
 0x8b7   :  { %6063 = vmatprep.subr.bf16.mxu1 %v4508_v34  ;;  %6051 = vmatpush1.bf16.msra.mxu0 %v4475_v39  ;;  %v4366_v34 = vld [vmem:[#allocation2 + $0xba8] sm:$0xff]  ;;  %v4109_v39 = vld [vmem:[#allocation2 + $0x3a0] sm:$0xff] }
 0x8b8   :  { %6052 = vmatprep.subr.bf16.mxu0 %v4492_v40  ;;  %v4126_v40 = vld [vmem:[#allocation2 + $0x428] sm:$0xff] }
 0x8b9   :  { %6014 = vmatmul.mubr.bf16.vlgmr.msra.gmra.mrb[72].mxu1 %v10150_v54 }
 0x8ba   :  { %6064 = vmatpush1.bf16.msra.mxu1 %v4507_v15  ;;  %6095 = vmatprep.mubr.bf16.mxu1 %v10497_v6  ;;  %v4365_v15 = vld [vmem:[#allocation2 + $0xba0] sm:$0xff] }
 0x8bb   :  { %6065 = vmatprep.subr.bf16.mxu1 %v4524_v47  ;;  %6053 = vmatpush1.bf16.msra.mxu0 %v4491_v52  ;;  %v4382_v47 = vld [vmem:[#allocation2 + $0xc28] sm:$0xff]  ;;  %v4125_v52 = vld [vmem:[#allocation2 + $0x420] sm:$0xff] }
 0x8bc   :  { %6104 = vmatprep.subr.bf16.mxu0 %v3998_v3  ;;  %v4142_v3 = vld [vmem:[#allocation2 + $0x4a8] sm:$0xff] }
 0x8be   :  { %6066 = vmatpush1.bf16.msra.mxu1 %v4523_v30  ;;  %6055 = vmatmul.mubr.bf16.vlgmr.msra.gmra.mrb[76].mxu0 %v10154_v46  ;;  %v4381_v30 = vld [vmem:[#allocation2 + $0xc20] sm:$0xff] }
 0x8bf   :  { %6145 = vmatprep.subr.bf16.mxu1 %v4254_v1  ;;  %6105 = vmatpush1.bf16.msra.mxu0 %v3997_v36  ;;  %v4398_v1 = vld [vmem:[#allocation2 + $0xca8] sm:$0xff]  ;;  %v4141_v36 = vld [vmem:[#allocation2 + $0x4a0] sm:$0xff] }
 0x8c0   :  { %6106 = vmatprep.subr.bf16.mxu0 %v4014_v51  ;;  %6136 = vmatprep.mubr.bf16.mxu0 %v10134_v8  ;;  %v4158_v51 = vld [vmem:[#allocation2 + $0x528] sm:$0xff] }
 0x8c1   :  { %7565 = vmatmul.mubr.msk.bf16.vlgmr.msra.gmra.mrb[76].mxu1 %vm5854_vm9, %v10163_v5 }
 0x8c2   :  { %6146 = vmatpush1.bf16.msra.mxu1 %v4253_v11  ;;  %6177 = vmatprep.mubr.bf16.mxu1 %v10138_v16  ;;  %v4397_v11 = vld [vmem:[#allocation2 + $0xca0] sm:$0xff] }
 0x8c3   :  { %6147 = vmatprep.subr.bf16.mxu1 %v4270_v43  ;;  %6107 = vmatpush1.bf16.msra.mxu0 %v4013_v14  ;;  %v4414_v43 = vld [vmem:[#allocation2 + $0xd28] sm:$0xff]  ;;  %v4157_v14 = vld [vmem:[#allocation2 + $0x520] sm:$0xff] }
 0x8c4   :  { %6108 = vmatprep.subr.bf16.mxu0 %v4030_v27  ;;  %v4174_v27 = vld [vmem:[#allocation2 + $0x5a8] sm:$0xff] }
 0x8c6   :  { %6148 = vmatpush1.bf16.msra.mxu1 %v4269_v60  ;;  %v4413_v60 = vld [vmem:[#allocation2 + $0xd20] sm:$0xff] }
 0x8c7   :  { %6149 = vmatprep.subr.bf16.mxu1 %v4286_v21  ;;  %6109 = vmatpush1.bf16.msra.mxu0 %v4029_v2  ;;  %v4430_v21 = vld [vmem:[#allocation2 + $0xda8] sm:$0xff]  ;;  %v4173_v2 = vld [vmem:[#allocation2 + $0x5a0] sm:$0xff] }
 0x8c8   :  { %6110 = vmatprep.subr.bf16.mxu0 %v4046_v50  ;;  %v4190_v50 = vld [vmem:[#allocation2 + $0x628] sm:$0xff] }
 0x8c9   :  { %v5707_v18 = vpop.f32.mrb[60].mxu0 }
 0x8ca   :  { %6150 = vmatpush1.bf16.msra.mxu1 %v4285_v62  ;;  %v5709_v0 = vpop.f32.mrb[61].mxu0  ;;  %v4429_v62 = vld [vmem:[#allocation2 + $0xda0] sm:$0xff] }
 0x8cb   :  { %6151 = vmatprep.subr.bf16.mxu1 %v4302_v42  ;;  %v5711_v20 = vpop.f32.mrb[62].mxu0  ;;  %6111 = vmatpush1.bf16.msra.mxu0 %v4045_v38  ;;  %v4446_v42 = vld [vmem:[#allocation2 + $0xe28] sm:$0xff]  ;;  %v4189_v38 = vld [vmem:[#allocation2 + $0x620] sm:$0xff] }
 0x8cc   :  { %v5748_v49 = vpop.f32.mrb[60].mxu1  ;;  %v5712_v37 = vpop.f32.mrb[63].mxu0  ;;  %6112 = vmatprep.subr.bf16.mxu0 %v4062_v23  ;;  %v4205_v23 = vld [vmem:[#allocation2 + $0x6a0] sm:$0xff] }
 0x8cd   :  { %v10179_v45 = vadd.f32 %v5748_v49, %v5707_v18  ;;  %v5750_v24 = vpop.f32.mrb[61].mxu1  ;;  %v4206_v18 = vld [vmem:[#allocation2 + $0x6a8] sm:$0xff]  ;;  %v4221_v20 = vld [vmem:[#allocation2 + $0x720] sm:$0xff] }
 0x8ce   :  { %v10181_v10 = vadd.f32 %v5750_v24, %v5709_v0  ;;  %v5752_v25 = vpop.f32.mrb[62].mxu1  ;;  %6152 = vmatpush1.bf16.msra.mxu1 %v4301_v44  ;;  %v4445_v44 = vld [vmem:[#allocation2 + $0xe20] sm:$0xff]  ;;  %v4462_v49 = vld [vmem:[#allocation2 + $0xea8] sm:$0xff] }
 0x8cf   :  { %v5753_v33 = vpop.f32.mrb[63].mxu1  ;;  %6153 = vmatprep.subr.bf16.mxu1 %v4318_v19  ;;  %6113 = vmatpush1.bf16.msra.mxu0 %v4061_v63  ;;  %v4461_v19 = vld [vmem:[#allocation2 + $0xea0] sm:$0xff]  ;;  %v4222_v0 = vld [vmem:[#allocation2 + $0x728] sm:$0xff] }
 0x8d0   :  { %6114 = vmatprep.subr.bf16.mxu0 %v4078_v22  ;;  %v4478_v24 = vld [vmem:[#allocation2 + $0xf28] sm:$0xff]  ;;  %v4477_v25 = vld [vmem:[#allocation2 + $0xf20] sm:$0xff] }
 0x8d1   :  { %v4238_v37 = vld [vmem:[#allocation2 + $0x7a8] sm:$0xff]  ;;  %v4237_v63 = vld [vmem:[#allocation2 + $0x7a0] sm:$0xff] }
 0x8d2   :  { %6154 = vmatpush1.bf16.msra.mxu1 %v4317_v28  ;;  %v4494_v33 = vld [vmem:[#allocation2 + $0xfa8] sm:$0xff]  ;;  %v4493_v28 = vld [vmem:[#allocation2 + $0xfa0] sm:$0xff] }
 0x8d3   :  { %6155 = vmatprep.subr.bf16.mxu1 %v4334_v29  ;;  %6115 = vmatpush1.bf16.msra.mxu0 %v4077_v7  ;;  %v4510_v22 = vld [vmem:[#allocation2 + $0x1028] sm:$0xff]  ;;  %v4000_v29 = vld [vmem:[#allocation2 + $0x38] sm:$0xff]  ;;  %v4509_v7 = vld [vmem:[#allocation2 + $0x1020] sm:$0xff] }
 0x8d4   :  { %6116 = vmatprep.subr.bf16.mxu0 %v4094_v56  ;;  %v4526_v56 = vld [vmem:[#allocation2 + $0x10a8] sm:$0xff] }
 0x8d6   :  { %6156 = vmatpush1.bf16.msra.mxu1 %v4333_v53  ;;  %v3999_v53 = vld [vmem:[#allocation2 + $0x30] sm:$0xff] }
 0x8d7   :  { %6157 = vmatprep.subr.bf16.mxu1 %v4350_v13  ;;  %6117 = vmatpush1.bf16.msra.mxu0 %v4093_v26  ;;  %v4016_v13 = vld [vmem:[#allocation2 + $0xb8] sm:$0xff]  ;;  %v4525_v26 = vld [vmem:[#allocation2 + $0x10a0] sm:$0xff] }
 0x8d8   :  { %6118 = vmatprep.subr.bf16.mxu0 %v4110_v32  ;;  %v4032_v32 = vld [vmem:[#allocation2 + $0x138] sm:$0xff] }
 0x8da   :  { %6158 = vmatpush1.bf16.msra.mxu1 %v4349_v35  ;;  %v4015_v35 = vld [vmem:[#allocation2 + $0xb0] sm:$0xff] }
 0x8db   :  { %6159 = vmatprep.subr.bf16.mxu1 %v4366_v34  ;;  %6119 = vmatpush1.bf16.msra.mxu0 %v4109_v39  ;;  %v4256_v34 = vld [vmem:[#allocation2 + $0x838] sm:$0xff]  ;;  %v4031_v39 = vld [vmem:[#allocation2 + $0x130] sm:$0xff] }
 0x8dc   :  { %6120 = vmatprep.subr.bf16.mxu0 %v4126_v40  ;;  %v4048_v40 = vld [vmem:[#allocation2 + $0x1b8] sm:$0xff] }
 0x8de   :  { %6160 = vmatpush1.bf16.msra.mxu1 %v4365_v15  ;;  %v4255_v15 = vld [vmem:[#allocation2 + $0x830] sm:$0xff] }
 0x8df   :  { %6161 = vmatprep.subr.bf16.mxu1 %v4382_v47  ;;  %6121 = vmatpush1.bf16.msra.mxu0 %v4125_v52  ;;  %v4272_v47 = vld [vmem:[#allocation2 + $0x8b8] sm:$0xff]  ;;  %v4047_v52 = vld [vmem:[#allocation2 + $0x1b0] sm:$0xff] }
 0x8e0   :  { %6122 = vmatprep.subr.bf16.mxu0 %v4142_v3 }
 0x8e2   :  { %6162 = vmatpush1.bf16.msra.mxu1 %v4381_v30  ;;  %v4271_v30 = vld [vmem:[#allocation2 + $0x8b0] sm:$0xff] }
 0x8e3   :  { %6163 = vmatprep.subr.bf16.mxu1 %v4398_v1  ;;  %6123 = vmatpush1.bf16.msra.mxu0 %v4141_v36  ;;  %v4064_v36 = vld [vmem:[#allocation2 + $0x238] sm:$0xff] }
 0x8e4   :  { %6124 = vmatprep.subr.bf16.mxu0 %v4158_v51 }
 0x8e6   :  { %6164 = vmatpush1.bf16.msra.mxu1 %v4397_v11  ;;  %v4288_v11 = vld [vmem:[#allocation2 + $0x938] sm:$0xff] }
 0x8e7   :  { %6165 = vmatprep.subr.bf16.mxu1 %v4414_v43  ;;  %6125 = vmatpush1.bf16.msra.mxu0 %v4157_v14 }
 0x8e8   :  { %6126 = vmatprep.subr.bf16.mxu0 %v4174_v27 }
 0x8ea   :  { %6166 = vmatpush1.bf16.msra.mxu1 %v4413_v60 }
 0x8eb   :  { %6167 = vmatprep.subr.bf16.mxu1 %v4430_v21  ;;  %6127 = vmatpush1.bf16.msra.mxu0 %v4173_v2 }
 0x8ec   :  { %6128 = vmatprep.subr.bf16.mxu0 %v4190_v50  ;;  %v4063_v50 = vld [vmem:[#allocation2 + $0x230] sm:$0xff] }
 0x8ee   :  { %6168 = vmatpush1.bf16.msra.mxu1 %v4429_v62 }
 0x8ef   :  { %6169 = vmatprep.subr.bf16.mxu1 %v4446_v42  ;;  %6129 = vmatpush1.bf16.msra.mxu0 %v4189_v38  ;;  %v4287_v42 = vld [vmem:[#allocation2 + $0x930] sm:$0xff]  ;;  %v4080_v38 = vld [vmem:[#allocation2 + $0x2b8] sm:$0xff] }
 0x8f0   :  { %6130 = vmatprep.subr.bf16.mxu0 %v4206_v18  ;;  %v4079_v18 = vld [vmem:[#allocation2 + $0x2b0] sm:$0xff] }
 0x8f2   :  { %6170 = vmatpush1.bf16.msra.mxu1 %v4445_v44  ;;  %v4304_v44 = vld [vmem:[#allocation2 + $0x9b8] sm:$0xff] }
 0x8f3   :  { %6171 = vmatprep.subr.bf16.mxu1 %v4462_v49  ;;  %6131 = vmatpush1.bf16.msra.mxu0 %v4205_v23  ;;  %v4303_v49 = vld [vmem:[#allocation2 + $0x9b0] sm:$0xff]  ;;  %v4096_v23 = vld [vmem:[#allocation2 + $0x338] sm:$0xff] }
 0x8f4   :  { %6132 = vmatprep.subr.bf16.mxu0 %v4222_v0  ;;  %v4095_v0 = vld [vmem:[#allocation2 + $0x330] sm:$0xff] }
 0x8f6   :  { %6172 = vmatpush1.bf16.msra.mxu1 %v4461_v19  ;;  %v4320_v19 = vld [vmem:[#allocation2 + $0xa38] sm:$0xff] }
 0x8f7   :  { %6173 = vmatprep.subr.bf16.mxu1 %v4478_v24  ;;  %6133 = vmatpush1.bf16.msra.mxu0 %v4221_v20  ;;  %v4319_v24 = vld [vmem:[#allocation2 + $0xa30] sm:$0xff]  ;;  %v4112_v20 = vld [vmem:[#allocation2 + $0x3b8] sm:$0xff] }
 0x8f8   :  { %6134 = vmatprep.subr.bf16.mxu0 %v4238_v37  ;;  %v4111_v37 = vld [vmem:[#allocation2 + $0x3b0] sm:$0xff] }
 0x8fa   :  { %6174 = vmatpush1.bf16.msra.mxu1 %v4477_v25  ;;  %v4336_v25 = vld [vmem:[#allocation2 + $0xab8] sm:$0xff] }
 0x8fb   :  { %6175 = vmatprep.subr.bf16.mxu1 %v4494_v33  ;;  %6135 = vmatpush1.bf16.msra.mxu0 %v4237_v63  ;;  %v4335_v33 = vld [vmem:[#allocation2 + $0xab0] sm:$0xff]  ;;  %v4128_v63 = vld [vmem:[#allocation2 + $0x438] sm:$0xff] }
 0x8fc   :  { %6186 = vmatprep.subr.bf16.mxu0 %v4510_v22  ;;  %v4127_v22 = vld [vmem:[#allocation2 + $0x430] sm:$0xff] }
 0x8fe   :  { %6176 = vmatpush1.bf16.msra.mxu1 %v4493_v28  ;;  %6137 = vmatmul.mubr.bf16.vlgmr.msra.gmra.mrb[80].mxu0 %v10150_v54  ;;  %v4352_v28 = vld [vmem:[#allocation2 + $0xb38] sm:$0xff] }
 0x8ff   :  { %6227 = vmatprep.subr.bf16.mxu1 %v4000_v29  ;;  %6187 = vmatpush1.bf16.msra.mxu0 %v4509_v7  ;;  %v4351_v29 = vld [vmem:[#allocation2 + $0xb30] sm:$0xff]  ;;  %v4144_v7 = vld [vmem:[#allocation2 + $0x4b8] sm:$0xff] }
 0x900   :  { %6188 = vmatprep.subr.bf16.mxu0 %v4526_v56  ;;  %6218 = vmatprep.mubr.bf16.mxu0 %v10497_v6  ;;  %v4143_v56 = vld [vmem:[#allocation2 + $0x4b0] sm:$0xff] }
 0x901   :  { %6178 = vmatmul.mubr.bf16.vlgmr.msra.gmra.mrb[80].mxu1 %v10154_v46 }
 0x902   :  { %6228 = vmatpush1.bf16.msra.mxu1 %v3999_v53  ;;  %6259 = vmatprep.mubr.bf16.mxu1 %v10134_v8  ;;  %v4368_v53 = vld [vmem:[#allocation2 + $0xbb8] sm:$0xff] }
 0x903   :  { %6229 = vmatprep.subr.bf16.mxu1 %v4016_v13  ;;  %6189 = vmatpush1.bf16.msra.mxu0 %v4525_v26  ;;  %v4367_v13 = vld [vmem:[#allocation2 + $0xbb0] sm:$0xff]  ;;  %v4160_v26 = vld [vmem:[#allocation2 + $0x538] sm:$0xff] }
 0x904   :  { %6268 = vmatprep.subr.bf16.mxu0 %v4256_v34  ;;  %v4383_v34 = vld [vmem:[#allocation2 + $0xc30] sm:$0xff] }
 0x906   :  { %6230 = vmatpush1.bf16.msra.mxu1 %v4015_v35  ;;  %7566 = vmatmul.mubr.msk.bf16.vlgmr.msra.gmra.mrb[84].mxu0 %vm5854_vm9, %v10163_v5  ;;  %v4384_v35 = vld [vmem:[#allocation2 + $0xc38] sm:$0xff] }
 0x907   :  { %6231 = vmatprep.subr.bf16.mxu1 %v4032_v32  ;;  %6269 = vmatpush1.bf16.msra.mxu0 %v4255_v15  ;;  %v4159_v32 = vld [vmem:[#allocation2 + $0x530] sm:$0xff]  ;;  %v4400_v15 = vld [vmem:[#allocation2 + $0xcb8] sm:$0xff] }
 0x908   :  { %6270 = vmatprep.subr.bf16.mxu0 %v4272_v47  ;;  %6300 = vmatprep.mubr.bf16.mxu0 %v10138_v16  ;;  %v4399_v47 = vld [vmem:[#allocation2 + $0xcb0] sm:$0xff] }
 0x909   :  { %v5789_v3 = vpop.f32.mrb[64].mxu0 }
 0x90a   :  { %6232 = vmatpush1.bf16.msra.mxu1 %v4031_v39  ;;  %v5791_v43 = vpop.f32.mrb[65].mxu0  ;;  %v4176_v39 = vld [vmem:[#allocation2 + $0x5b8] sm:$0xff] }
 0x90b   :  { %6233 = vmatprep.subr.bf16.mxu1 %v4048_v40  ;;  %v5793_v27 = vpop.f32.mrb[66].mxu0  ;;  %6271 = vmatpush1.bf16.msra.mxu0 %v4271_v30  ;;  %v4175_v40 = vld [vmem:[#allocation2 + $0x5b0] sm:$0xff]  ;;  %v4416_v30 = vld [vmem:[#allocation2 + $0xd38] sm:$0xff] }
 0x90c   :  { %v5830_v1 = vpop.f32.mrb[64].mxu1  ;;  %v5794_v2 = vpop.f32.mrb[67].mxu0  ;;  %6272 = vmatprep.subr.bf16.mxu0 %v4288_v11  ;;  %v4432_v11 = vld [vmem:[#allocation2 + $0xdb8] sm:$0xff] }
 0x90d   :  { %v10190_v51 = vadd.f32 %v5830_v1, %v5789_v3  ;;  %v5832_v14 = vpop.f32.mrb[65].mxu1  ;;  %v4191_v3 = vld [vmem:[#allocation2 + $0x630] sm:$0xff]  ;;  %v4224_v27 = vld [vmem:[#allocation2 + $0x738] sm:$0xff] }
 0x90e   :  { %v10192_v60 = vadd.f32 %v5832_v14, %v5791_v43  ;;  %v5834_v21 = vpop.f32.mrb[66].mxu1  ;;  %6234 = vmatpush1.bf16.msra.mxu1 %v4047_v52  ;;  %v4192_v52 = vld [vmem:[#allocation2 + $0x638] sm:$0xff]  ;;  %v4415_v1 = vld [vmem:[#allocation2 + $0xd30] sm:$0xff] }
 0x90f   :  { %v5835_v62 = vpop.f32.mrb[67].mxu1  ;;  %6235 = vmatprep.subr.bf16.mxu1 %v4064_v36  ;;  %6273 = vmatpush1.bf16.msra.mxu0 %v4287_v42  ;;  %v4208_v36 = vld [vmem:[#allocation2 + $0x6b8] sm:$0xff]  ;;  %v4207_v43 = vld [vmem:[#allocation2 + $0x6b0] sm:$0xff] }
 0x910   :  { %6274 = vmatprep.subr.bf16.mxu0 %v4304_v44  ;;  %v4431_v14 = vld [vmem:[#allocation2 + $0xdb0] sm:$0xff]  ;;  %v4448_v21 = vld [vmem:[#allocation2 + $0xe38] sm:$0xff] }
 0x911   :  { %v4223_v2 = vld [vmem:[#allocation2 + $0x730] sm:$0xff]  ;;  %v4464_v42 = vld [vmem:[#allocation2 + $0xeb8] sm:$0xff] }
 0x912   :  { %6236 = vmatpush1.bf16.msra.mxu1 %v4063_v50  ;;  %v4447_v62 = vld [vmem:[#allocation2 + $0xe30] sm:$0xff]  ;;  %v4240_v50 = vld [vmem:[#allocation2 + $0x7b8] sm:$0xff] }
 0x913   :  { %6237 = vmatprep.subr.bf16.mxu1 %v4080_v38  ;;  %6275 = vmatpush1.bf16.msra.mxu0 %v4303_v49  ;;  %v4239_v38 = vld [vmem:[#allocation2 + $0x7b0] sm:$0xff]  ;;  %v4512_v49 = vld [vmem:[#allocation2 + $0x1038] sm:$0xff] }
 0x914   :  { %6276 = vmatprep.subr.bf16.mxu0 %v4320_v19  ;;  %v4463_v44 = vld [vmem:[#allocation2 + $0xeb0] sm:$0xff] }
 0x915   :  { %v4511_v19 = vld [vmem:[#allocation2 + $0x1030] sm:$0xff] }
 0x916   :  { %6238 = vmatpush1.bf16.msra.mxu1 %v4079_v18  ;;  %v4480_v18 = vld [vmem:[#allocation2 + $0xf38] sm:$0xff] }
 0x917   :  { %6239 = vmatprep.subr.bf16.mxu1 %v4096_v23  ;;  %6277 = vmatpush1.bf16.msra.mxu0 %v4319_v24  ;;  %v4479_v23 = vld [vmem:[#allocation2 + $0xf30] sm:$0xff]  ;;  %v4528_v24 = vld [vmem:[#allocation2 + $0x10b8] sm:$0xff] }
 0x918   :  { %6278 = vmatprep.subr.bf16.mxu0 %v4336_v25  ;;  %v4527_v25 = vld [vmem:[#allocation2 + $0x10b0] sm:$0xff] }
 0x91a   :  { %6240 = vmatpush1.bf16.msra.mxu1 %v4095_v0  ;;  %v4496_v0 = vld [vmem:[#allocation2 + $0xfb8] sm:$0xff] }
 0x91b   :  { %6241 = vmatprep.subr.bf16.mxu1 %v4112_v20  ;;  %6279 = vmatpush1.bf16.msra.mxu0 %v4335_v33  ;;  %v4495_v20 = vld [vmem:[#allocation2 + $0xfb0] sm:$0xff]  ;;  %v4258_v33 = vld [vmem:[#allocation2 + $0x848] sm:$0xff] }
 0x91c   :  { %6280 = vmatprep.subr.bf16.mxu0 %v4352_v28  ;;  %v4257_v28 = vld [vmem:[#allocation2 + $0x840] sm:$0xff] }
 0x91e   :  { %6242 = vmatpush1.bf16.msra.mxu1 %v4111_v37  ;;  %v4002_v37 = vld [vmem:[#allocation2 + $0x48] sm:$0xff] }
 0x91f   :  { %6243 = vmatprep.subr.bf16.mxu1 %v4128_v63  ;;  %6281 = vmatpush1.bf16.msra.mxu0 %v4351_v29  ;;  %v4001_v63 = vld [vmem:[#allocation2 + $0x40] sm:$0xff]  ;;  %v4274_v29 = vld [vmem:[#allocation2 + $0x8c8] sm:$0xff] }
 0x920   :  { %6282 = vmatprep.subr.bf16.mxu0 %v4368_v53  ;;  %v4273_v53 = vld [vmem:[#allocation2 + $0x8c0] sm:$0xff] }
 0x922   :  { %6244 = vmatpush1.bf16.msra.mxu1 %v4127_v22  ;;  %v4018_v22 = vld [vmem:[#allocation2 + $0xc8] sm:$0xff] }
 0x923   :  { %6245 = vmatprep.subr.bf16.mxu1 %v4144_v7  ;;  %6283 = vmatpush1.bf16.msra.mxu0 %v4367_v13  ;;  %v4017_v7 = vld [vmem:[#allocation2 + $0xc0] sm:$0xff] }
 0x924   :  { %6284 = vmatprep.subr.bf16.mxu0 %v4384_v35  ;;  %v4290_v35 = vld [vmem:[#allocation2 + $0x948] sm:$0xff] }
 0x926   :  { %6246 = vmatpush1.bf16.msra.mxu1 %v4143_v56 }
 0x927   :  { %6247 = vmatprep.subr.bf16.mxu1 %v4160_v26  ;;  %6285 = vmatpush1.bf16.msra.mxu0 %v4383_v34  ;;  %v4034_v26 = vld [vmem:[#allocation2 + $0x148] sm:$0xff] }
 0x928   :  { %6286 = vmatprep.subr.bf16.mxu0 %v4400_v15 }
 0x92a   :  { %6248 = vmatpush1.bf16.msra.mxu1 %v4159_v32 }
 0x92b   :  { %6249 = vmatprep.subr.bf16.mxu1 %v4176_v39  ;;  %6287 = vmatpush1.bf16.msra.mxu0 %v4399_v47 }
 0x92c   :  { %6288 = vmatprep.subr.bf16.mxu0 %v4416_v30 }
 0x92e   :  { %6250 = vmatpush1.bf16.msra.mxu1 %v4175_v40 }
 0x92f   :  { %6251 = vmatprep.subr.bf16.mxu1 %v4192_v52  ;;  %6289 = vmatpush1.bf16.msra.mxu0 %v4415_v1  ;;  %v4289_v1 = vld [vmem:[#allocation2 + $0x940] sm:$0xff] }
 0x930   :  { %6290 = vmatprep.subr.bf16.mxu0 %v4432_v11  ;;  %v4050_v11 = vld [vmem:[#allocation2 + $0x1c8] sm:$0xff] }
 0x932   :  { %6252 = vmatpush1.bf16.msra.mxu1 %v4191_v3  ;;  %v4033_v3 = vld [vmem:[#allocation2 + $0x140] sm:$0xff] }
 0x933   :  { %6253 = vmatprep.subr.bf16.mxu1 %v4208_v36  ;;  %6291 = vmatpush1.bf16.msra.mxu0 %v4431_v14 }
 0x934   :  { %6292 = vmatprep.subr.bf16.mxu0 %v4448_v21  ;;  %v4322_v21 = vld [vmem:[#allocation2 + $0xa48] sm:$0xff] }
 0x936   :  { %6254 = vmatpush1.bf16.msra.mxu1 %v4207_v43  ;;  %v4306_v43 = vld [vmem:[#allocation2 + $0x9c8] sm:$0xff] }
 0x937   :  { %6255 = vmatprep.subr.bf16.mxu1 %v4224_v27  ;;  %6293 = vmatpush1.bf16.msra.mxu0 %v4447_v62  ;;  %v4066_v27 = vld [vmem:[#allocation2 + $0x248] sm:$0xff] }
 0x938   :  { %6294 = vmatprep.subr.bf16.mxu0 %v4464_v42 }
 0x93a   :  { %6256 = vmatpush1.bf16.msra.mxu1 %v4223_v2 }
 0x93b   :  { %6257 = vmatprep.subr.bf16.mxu1 %v4240_v50  ;;  %6295 = vmatpush1.bf16.msra.mxu0 %v4463_v44  ;;  %v4065_v44 = vld [vmem:[#allocation2 + $0x240] sm:$0xff] }
 0x93c   :  { %6296 = vmatprep.subr.bf16.mxu0 %v4480_v18  ;;  %v4321_v18 = vld [vmem:[#allocation2 + $0xa40] sm:$0xff] }
 0x93e   :  { %6258 = vmatpush1.bf16.msra.mxu1 %v4239_v38 }
 0x93f   :  { %6309 = vmatprep.subr.bf16.mxu1 %v4512_v49  ;;  %6297 = vmatpush1.bf16.msra.mxu0 %v4479_v23  ;;  %v4082_v49 = vld [vmem:[#allocation2 + $0x2c8] sm:$0xff] }
 0x940   :  { %6298 = vmatprep.subr.bf16.mxu0 %v4496_v0  ;;  %v4338_v23 = vld [vmem:[#allocation2 + $0xac8] sm:$0xff]  ;;  %v4337_v0 = vld [vmem:[#allocation2 + $0xac0] sm:$0xff] }
 0x941   :  { %6260 = vmatmul.mubr.bf16.vlgmr.msra.gmra.mrb[84].mxu1 %v10150_v54 }
 0x942   :  { %6310 = vmatpush1.bf16.msra.mxu1 %v4511_v19  ;;  %6341 = vmatprep.mubr.bf16.mxu1 %v10497_v6  ;;  %v4081_v19 = vld [vmem:[#allocation2 + $0x2c0] sm:$0xff] }
 0x943   :  { %6311 = vmatprep.subr.bf16.mxu1 %v4528_v24  ;;  %6299 = vmatpush1.bf16.msra.mxu0 %v4495_v20  ;;  %v4098_v24 = vld [vmem:[#allocation2 + $0x348] sm:$0xff] }
 0x944   :  { %6350 = vmatprep.subr.bf16.mxu0 %v4002_v37  ;;  %v4354_v20 = vld [vmem:[#allocation2 + $0xb48] sm:$0xff]  ;;  %v4353_v37 = vld [vmem:[#allocation2 + $0xb40] sm:$0xff] }
 0x946   :  { %6312 = vmatpush1.bf16.msra.mxu1 %v4527_v25  ;;  %6301 = vmatmul.mubr.bf16.vlgmr.msra.gmra.mrb[88].mxu0 %v10154_v46  ;;  %v4097_v25 = vld [vmem:[#allocation2 + $0x340] sm:$0xff] }
 0x947   :  { %6391 = vmatprep.subr.bf16.mxu1 %v4258_v33  ;;  %6351 = vmatpush1.bf16.msra.mxu0 %v4001_v63  ;;  %v4114_v33 = vld [vmem:[#allocation2 + $0x3c8] sm:$0xff] }
 0x948   :  { %6352 = vmatprep.subr.bf16.mxu0 %v4018_v22  ;;  %6382 = vmatprep.mubr.bf16.mxu0 %v10134_v8  ;;  %v4370_v63 = vld [vmem:[#allocation2 + $0xbc8] sm:$0xff]  ;;  %v4369_v22 = vld [vmem:[#allocation2 + $0xbc0] sm:$0xff] }
 0x949   :  { %7567 = vmatmul.mubr.msk.bf16.vlgmr.msra.gmra.mrb[88].mxu1 %vm5854_vm9, %v10163_v5  ;;  %v5892_v56 = vpop.f32.mrb[68].mxu0 }
 0x94a   :  { %6392 = vmatpush1.bf16.msra.mxu1 %v4257_v28  ;;  %6423 = vmatprep.mubr.bf16.mxu1 %v10138_v16  ;;  %v5893_v32 = vadd.f32 %v5892_v56, %v10094_v31  ;;  %v5894_v34 = vpop.f32.mrb[69].mxu0  ;;  %v4049_v31 = vld [vmem:[#allocation2 + $0x1c0] sm:$0xff] }
 0x94b   :  { %6393 = vmatprep.subr.bf16.mxu1 %v4274_v29  ;;  %v5895_v5 = vadd.f32 %v5894_v34, %v10096_v55  ;;  %v5896_v15 = vpop.f32.mrb[70].mxu0  ;;  %6353 = vmatpush1.bf16.msra.mxu0 %v4017_v7  ;;  %v4305_v55 = vld [vmem:[#allocation2 + $0x9c0] sm:$0xff]  ;;  %v4130_v29 = vld [vmem:[#allocation2 + $0x448] sm:$0xff] }
 0x94c   :  { %v5933_v13 = vpop.f32.mrb[68].mxu1  ;;  %v5897_v52 = vpop.f32.mrb[71].mxu0  ;;  %6354 = vmatprep.subr.bf16.mxu0 %v4034_v26  ;;  %v4113_v28 = vld [vmem:[#allocation2 + $0x3c0] sm:$0xff]  ;;  %v4386_v7 = vld [vmem:[#allocation2 + $0xc48] sm:$0xff] }
 0x94d   :  { %v5935_v39 = vpop.f32.mrb[69].mxu1  ;;  %v5934_v47 = vadd.f32 %v5933_v13, %v5893_v32  ;;  %v4385_v56 = vld [vmem:[#allocation2 + $0xc40] sm:$0xff]  ;;  %v4146_v13 = vld [vmem:[#allocation2 + $0x4c8] sm:$0xff] }
 0x94e   :  { %v5937_v40 = vpop.f32.mrb[70].mxu1  ;;  %6394 = vmatpush1.bf16.msra.mxu1 %v4273_v53  ;;  %v5936_v36 = vadd.f32 %v5935_v39, %v5895_v5  ;;  %v4129_v53 = vld [vmem:[#allocation2 + $0x440] sm:$0xff]  ;;  %v4402_v26 = vld [vmem:[#allocation2 + $0xcc8] sm:$0xff] }
 0x94f   :  { %v5938_v30 = vpop.f32.mrb[71].mxu1  ;;  %6395 = vmatprep.subr.bf16.mxu1 %v4290_v35  ;;  %6355 = vmatpush1.bf16.msra.mxu0 %v4033_v3  ;;  %v4145_v35 = vld [vmem:[#allocation2 + $0x4c0] sm:$0xff]  ;;  %v4162_v34 = vld [vmem:[#allocation2 + $0x548] sm:$0xff] }
 0x950   :  { %6356 = vmatprep.subr.bf16.mxu0 %v4050_v11  ;;  %v4401_v32 = vld [vmem:[#allocation2 + $0xcc0] sm:$0xff]  ;;  %v4418_v39 = vld [vmem:[#allocation2 + $0xd48] sm:$0xff] }
 0x951   :  { %v5974_v14 = vpop.f32.mrb[72].mxu0  ;;  %v4161_v5 = vld [vmem:[#allocation2 + $0x540] sm:$0xff]  ;;  %v4178_v40 = vld [vmem:[#allocation2 + $0x5c8] sm:$0xff] }
 0x952   :  { %6396 = vmatpush1.bf16.msra.mxu1 %v4289_v1  ;;  %v10203_v2 = vadd.f32 %v5974_v14, %v5934_v47  ;;  %v5976_v62 = vpop.f32.mrb[73].mxu0  ;;  %v4417_v15 = vld [vmem:[#allocation2 + $0xd40] sm:$0xff]  ;;  %v4434_v47 = vld [vmem:[#allocation2 + $0xdc8] sm:$0xff] }
 0x953   :  { %6397 = vmatprep.subr.bf16.mxu1 %v4306_v43  ;;  %v10205_v50 = vadd.f32 %v5976_v62, %v5936_v36  ;;  %v5978_v42 = vpop.f32.mrb[74].mxu0  ;;  %6357 = vmatpush1.bf16.msra.mxu0 %v4049_v31  ;;  %v4177_v52 = vld [vmem:[#allocation2 + $0x5c0] sm:$0xff]  ;;  %v4194_v3 = vld [vmem:[#allocation2 + $0x648] sm:$0xff] }
 0x954   :  { %v5979_v38 = vpop.f32.mrb[75].mxu0  ;;  %6358 = vmatprep.subr.bf16.mxu0 %v4066_v27  ;;  %v4433_v30 = vld [vmem:[#allocation2 + $0xdc0] sm:$0xff]  ;;  %v4450_v1 = vld [vmem:[#allocation2 + $0xe48] sm:$0xff] }
 0x955   :  { %v4193_v36 = vld [vmem:[#allocation2 + $0x640] sm:$0xff]  ;;  %v4210_v43 = vld [vmem:[#allocation2 + $0x6c8] sm:$0xff] }
 0x956   :  { %6398 = vmatpush1.bf16.msra.mxu1 %v4305_v55  ;;  %v4449_v11 = vld [vmem:[#allocation2 + $0xe40] sm:$0xff]  ;;  %v4466_v31 = vld [vmem:[#allocation2 + $0xec8] sm:$0xff] }
 0x957   :  { %6399 = vmatprep.subr.bf16.mxu1 %v4322_v21  ;;  %6359 = vmatpush1.bf16.msra.mxu0 %v4065_v44  ;;  %v4209_v55 = vld [vmem:[#allocation2 + $0x6c0] sm:$0xff]  ;;  %v4226_v27 = vld [vmem:[#allocation2 + $0x748] sm:$0xff] }
 0x958   :  { %6360 = vmatprep.subr.bf16.mxu0 %v4082_v49  ;;  %v4465_v14 = vld [vmem:[#allocation2 + $0xec0] sm:$0xff]  ;;  %v4482_v21 = vld [vmem:[#allocation2 + $0xf48] sm:$0xff] }
 0x959   :  { %v4225_v62 = vld [vmem:[#allocation2 + $0x740] sm:$0xff]  ;;  %v4242_v38 = vld [vmem:[#allocation2 + $0x7c8] sm:$0xff] }
 0x95a   :  { %6400 = vmatpush1.bf16.msra.mxu1 %v4321_v18  ;;  %v4481_v42 = vld [vmem:[#allocation2 + $0xf40] sm:$0xff]  ;;  %v4498_v44 = vld [vmem:[#allocation2 + $0xfc8] sm:$0xff] }
 0x95b   :  { %6401 = vmatprep.subr.bf16.mxu1 %v4338_v23  ;;  %6361 = vmatpush1.bf16.msra.mxu0 %v4081_v19  ;;  %v4241_v18 = vld [vmem:[#allocation2 + $0x7c0] sm:$0xff]  ;;  %v4514_v23 = vld [vmem:[#allocation2 + $0x1048] sm:$0xff]  ;;  %v4004_v19 = vld [vmem:[#allocation2 + $0x58] sm:$0xff] }
 0x95c   :  { %6362 = vmatprep.subr.bf16.mxu0 %v4098_v24  ;;  %v4497_v49 = vld [vmem:[#allocation2 + $0xfc0] sm:$0xff]  ;;  %v4003_v24 = vld [vmem:[#allocation2 + $0x50] sm:$0xff] }
 0x95e   :  { %6402 = vmatpush1.bf16.msra.mxu1 %v4337_v0  ;;  %v4513_v0 = vld [vmem:[#allocation2 + $0x1040] sm:$0xff] }
 0x95f   :  { %6403 = vmatprep.subr.bf16.mxu1 %v4354_v20  ;;  %6363 = vmatpush1.bf16.msra.mxu0 %v4097_v25  ;;  %v4530_v20 = vld [vmem:[#allocation2 + $0x10c8] sm:$0xff]  ;;  %v4020_v25 = vld [vmem:[#allocation2 + $0xd8] sm:$0xff] }
 0x960   :  { %6364 = vmatprep.subr.bf16.mxu0 %v4114_v33  ;;  %v4019_v33 = vld [vmem:[#allocation2 + $0xd0] sm:$0xff] }
 0x962   :  { %6404 = vmatpush1.bf16.msra.mxu1 %v4353_v37  ;;  %v4529_v37 = vld [vmem:[#allocation2 + $0x10c0] sm:$0xff] }
 0x963   :  { %6405 = vmatprep.subr.bf16.mxu1 %v4370_v63  ;;  %6365 = vmatpush1.bf16.msra.mxu0 %v4113_v28  ;;  %v4036_v28 = vld [vmem:[#allocation2 + $0x158] sm:$0xff] }
 0x964   :  { %6366 = vmatprep.subr.bf16.mxu0 %v4130_v29 }
 0x966   :  { %6406 = vmatpush1.bf16.msra.mxu1 %v4369_v22  ;;  %v4260_v22 = vld [vmem:[#allocation2 + $0x858] sm:$0xff] }
 0x967   :  { %6407 = vmatprep.subr.bf16.mxu1 %v4386_v7  ;;  %6367 = vmatpush1.bf16.msra.mxu0 %v4129_v53 }
 0x968   :  { %6368 = vmatprep.subr.bf16.mxu0 %v4146_v13 }
 0x96a   :  { %6408 = vmatpush1.bf16.msra.mxu1 %v4385_v56 }
 0x96b   :  { %6409 = vmatprep.subr.bf16.mxu1 %v4402_v26  ;;  %6369 = vmatpush1.bf16.msra.mxu0 %v4145_v35  ;;  %v4035_v26 = vld [vmem:[#allocation2 + $0x150] sm:$0xff] }
 0x96c   :  { %6370 = vmatprep.subr.bf16.mxu0 %v4162_v34  ;;  %v4259_v35 = vld [vmem:[#allocation2 + $0x850] sm:$0xff]  ;;  %v4276_v34 = vld [vmem:[#allocation2 + $0x8d8] sm:$0xff] }
 0x96e   :  { %6410 = vmatpush1.bf16.msra.mxu1 %v4401_v32  ;;  %v4052_v32 = vld [vmem:[#allocation2 + $0x1d8] sm:$0xff] }
 0x96f   :  { %6411 = vmatprep.subr.bf16.mxu1 %v4418_v39  ;;  %6371 = vmatpush1.bf16.msra.mxu0 %v4161_v5  ;;  %v10216_v39 = vld [vmem:[%s10496_s20 + $0x10] ss:$0 sps:$4 sm:$0xff]  }
 0x970   :  { %6372 = vmatprep.subr.bf16.mxu0 %v4178_v40  ;;  %v4068_v40 = vld [vmem:[#allocation2 + $0x258] sm:$0xff] }
 0x972   :  { %6412 = vmatpush1.bf16.msra.mxu1 %v4417_v15 }
 0x973   :  { %6413 = vmatprep.subr.bf16.mxu1 %v4434_v47  ;;  %6373 = vmatpush1.bf16.msra.mxu0 %v4177_v52  ;;  %v4292_v47 = vld [vmem:[#allocation2 + $0x958] sm:$0xff] }
 0x974   :  { %6374 = vmatprep.subr.bf16.mxu0 %v4194_v3 }
 0x976   :  { %6414 = vmatpush1.bf16.msra.mxu1 %v4433_v30 }
 0x977   :  { %6415 = vmatprep.subr.bf16.mxu1 %v4450_v1  ;;  %6375 = vmatpush1.bf16.msra.mxu0 %v4193_v36 }
 0x978   :  { %6376 = vmatprep.subr.bf16.mxu0 %v4210_v43 }
 0x97a   :  { %6416 = vmatpush1.bf16.msra.mxu1 %v4449_v11 }
 0x97b   :  { %6417 = vmatprep.subr.bf16.mxu1 %v4466_v31  ;;  %6377 = vmatpush1.bf16.msra.mxu0 %v4209_v55 }
 0x97c   :  { %6378 = vmatprep.subr.bf16.mxu0 %v4226_v27  ;;  %v4291_v27 = vld [vmem:[#allocation2 + $0x950] sm:$0xff] }
 0x97e   :  { %6418 = vmatpush1.bf16.msra.mxu1 %v4465_v14  ;;  %v4067_v14 = vld [vmem:[#allocation2 + $0x250] sm:$0xff] }
 0x97f   :  { %6419 = vmatprep.subr.bf16.mxu1 %v4482_v21  ;;  %6379 = vmatpush1.bf16.msra.mxu0 %v4225_v62  ;;  %v4084_v62 = vld [vmem:[#allocation2 + $0x2d8] sm:$0xff] }
 0x980   :  { %6380 = vmatprep.subr.bf16.mxu0 %v4242_v38  ;;  %v4083_v38 = vld [vmem:[#allocation2 + $0x2d0] sm:$0xff] }
 0x982   :  { %6420 = vmatpush1.bf16.msra.mxu1 %v4481_v42  ;;  %v4308_v42 = vld [vmem:[#allocation2 + $0x9d8] sm:$0xff] }
 0x983   :  { %6421 = vmatprep.subr.bf16.mxu1 %v4498_v44  ;;  %6381 = vmatpush1.bf16.msra.mxu0 %v4241_v18  ;;  %v4307_v44 = vld [vmem:[#allocation2 + $0x9d0] sm:$0xff]  ;;  %v4100_v18 = vld [vmem:[#allocation2 + $0x358] sm:$0xff] }
 0x984   :  { %6432 = vmatprep.subr.bf16.mxu0 %v4514_v23  ;;  %v4099_v23 = vld [vmem:[#allocation2 + $0x350] sm:$0xff] }
 0x986   :  { %6422 = vmatpush1.bf16.msra.mxu1 %v4497_v49  ;;  %6383 = vmatmul.mubr.bf16.vlgmr.msra.gmra.mrb[92].mxu0 %v10150_v54  ;;  %v4324_v49 = vld [vmem:[#allocation2 + $0xa58] sm:$0xff] }
 0x987   :  { %6473 = vmatprep.subr.bf16.mxu1 %v4004_v19  ;;  %6433 = vmatpush1.bf16.msra.mxu0 %v4513_v0  ;;  %v4323_v19 = vld [vmem:[#allocation2 + $0xa50] sm:$0xff]  ;;  %v4116_v0 = vld [vmem:[#allocation2 + $0x3d8] sm:$0xff] }
 0x988   :  { %6434 = vmatprep.subr.bf16.mxu0 %v4530_v20  ;;  %6464 = vmatprep.mubr.bf16.mxu0 %v10497_v6  ;;  %v4115_v20 = vld [vmem:[#allocation2 + $0x3d0] sm:$0xff] }
 0x989   :  { %6424 = vmatmul.mubr.bf16.vlgmr.msra.gmra.mrb[92].mxu1 %v10154_v46 }
 0x98a   :  { %6474 = vmatpush1.bf16.msra.mxu1 %v4003_v24  ;;  %6505 = vmatprep.mubr.bf16.mxu1 %v10134_v8  ;;  %v4340_v24 = vld [vmem:[#allocation2 + $0xad8] sm:$0xff] }
 0x98b   :  { %6475 = vmatprep.subr.bf16.mxu1 %v4020_v25  ;;  %6435 = vmatpush1.bf16.msra.mxu0 %v4529_v37  ;;  %v4339_v25 = vld [vmem:[#allocation2 + $0xad0] sm:$0xff]  ;;  %v4132_v37 = vld [vmem:[#allocation2 + $0x458] sm:$0xff] }
 0x98c   :  { %v6015_v63 = vpop.f32.mrb[72].mxu1  ;;  %6514 = vmatprep.subr.bf16.mxu0 %v4260_v22  ;;  %v4148_v22 = vld [vmem:[#allocation2 + $0x4d8] sm:$0xff] }
 0x98d   :  { %v6016_v29 = vadd.f32 %v6015_v63, %v10102_v17  ;;  %v6017_v7 = vpop.f32.mrb[73].mxu1  ;;  %v4051_v17 = vld [vmem:[#allocation2 + $0x1d0] sm:$0xff] }
 0x98e   :  { %v6018_v53 = vadd.f32 %v6017_v7, %v10104_v58  ;;  %v6019_v56 = vpop.f32.mrb[74].mxu1  ;;  %6476 = vmatpush1.bf16.msra.mxu1 %v4019_v33  ;;  %7568 = vmatmul.mubr.msk.bf16.vlgmr.msra.gmra.mrb[96].mxu0 %vm5854_vm9, %v10216_v39  ;;  %v4275_v58 = vld [vmem:[#allocation2 + $0x8d0] sm:$0xff]  ;;  %v4356_v33 = vld [vmem:[#allocation2 + $0xb58] sm:$0xff] }
 0x98f   :  { %v6020_v13 = vpop.f32.mrb[75].mxu1  ;;  %6477 = vmatprep.subr.bf16.mxu1 %v4036_v28  ;;  %6515 = vmatpush1.bf16.msra.mxu0 %v4259_v35  ;;  %v4131_v63 = vld [vmem:[#allocation2 + $0x450] sm:$0xff]  ;;  %v4164_v56 = vld [vmem:[#allocation2 + $0x558] sm:$0xff] }
 0x990   :  { %6516 = vmatprep.subr.bf16.mxu0 %v4276_v34  ;;  %6546 = vmatprep.mubr.bf16.mxu0 %v10138_v16  ;;  %v4355_v28 = vld [vmem:[#allocation2 + $0xb50] sm:$0xff]  ;;  %v4388_v13 = vld [vmem:[#allocation2 + $0xc58] sm:$0xff] }
 0x991   :  { %v6056_v5 = vpop.f32.mrb[76].mxu0  ;;  %v4147_v7 = vld [vmem:[#allocation2 + $0x4d0] sm:$0xff]  ;;  %v4404_v34 = vld [vmem:[#allocation2 + $0xcd8] sm:$0xff] }
 0x992   :  { %6478 = vmatpush1.bf16.msra.mxu1 %v4035_v26  ;;  %v6057_v52 = vadd.f32 %v6056_v5, %v6016_v29  ;;  %v6058_v30 = vpop.f32.mrb[77].mxu0  ;;  %v4372_v29 = vld [vmem:[#allocation2 + $0xbd8] sm:$0xff]  ;;  %v4163_v26 = vld [vmem:[#allocation2 + $0x550] sm:$0xff] }
 0x993   :  { %6479 = vmatprep.subr.bf16.mxu1 %v4052_v32  ;;  %v6059_v1 = vadd.f32 %v6058_v30, %v6018_v53  ;;  %v6060_v36 = vpop.f32.mrb[78].mxu0  ;;  %6517 = vmatpush1.bf16.msra.mxu0 %v4275_v58  ;;  %v4371_v53 = vld [vmem:[#allocation2 + $0xbd0] sm:$0xff]  ;;  %v4180_v32 = vld [vmem:[#allocation2 + $0x5d8] sm:$0xff] }
 0x994   :  { %v6097_v15 = vpop.f32.mrb[76].mxu1  ;;  %v6061_v31 = vpop.f32.mrb[79].mxu0  ;;  %6518 = vmatprep.subr.bf16.mxu0 %v4292_v47  ;;  %v4387_v35 = vld [vmem:[#allocation2 + $0xc50] sm:$0xff]  ;;  %v4196_v5 = vld [vmem:[#allocation2 + $0x658] sm:$0xff] }
 0x995   :  { %v6099_v3 = vpop.f32.mrb[77].mxu1  ;;  %v10221_v43 = vadd.f32 %v6097_v15, %v6057_v52  ;;  %v4403_v58 = vld [vmem:[#allocation2 + $0xcd0] sm:$0xff]  ;;  %v4420_v15 = vld [vmem:[#allocation2 + $0xd58] sm:$0xff] }
 0x996   :  { %v6101_v11 = vpop.f32.mrb[78].mxu1  ;;  %6480 = vmatpush1.bf16.msra.mxu1 %v4051_v17  ;;  %v10223_v21 = vadd.f32 %v6099_v3, %v6059_v1  ;;  %v4179_v17 = vld [vmem:[#allocation2 + $0x5d0] sm:$0xff]  ;;  %v4212_v52 = vld [vmem:[#allocation2 + $0x6d8] sm:$0xff] }
 0x997   :  { %v6102_v55 = vpop.f32.mrb[79].mxu1  ;;  %6481 = vmatprep.subr.bf16.mxu1 %v4068_v40  ;;  %6519 = vmatpush1.bf16.msra.mxu0 %v4291_v27  ;;  %v4195_v40 = vld [vmem:[#allocation2 + $0x650] sm:$0xff]  ;;  %v4436_v30 = vld [vmem:[#allocation2 + $0xdd8] sm:$0xff] }
 0x998   :  { %6520 = vmatprep.subr.bf16.mxu0 %v4308_v42  ;;  %v4419_v47 = vld [vmem:[#allocation2 + $0xd50] sm:$0xff]  ;;  %v4228_v36 = vld [vmem:[#allocation2 + $0x758] sm:$0xff] }
 0x999   :  { %v4211_v3 = vld [vmem:[#allocation2 + $0x6d0] sm:$0xff]  ;;  %v4452_v11 = vld [vmem:[#allocation2 + $0xe58] sm:$0xff] }
 0x99a   :  { %6482 = vmatpush1.bf16.msra.mxu1 %v4067_v14  ;;  %v4435_v1 = vld [vmem:[#allocation2 + $0xdd0] sm:$0xff]  ;;  %v4244_v14 = vld [vmem:[#allocation2 + $0x7d8] sm:$0xff] }
 0x99b   :  { %6483 = vmatprep.subr.bf16.mxu1 %v4084_v62  ;;  %6521 = vmatpush1.bf16.msra.mxu0 %v4307_v44  ;;  %v4227_v31 = vld [vmem:[#allocation2 + $0x750] sm:$0xff]  ;;  %v4468_v27 = vld [vmem:[#allocation2 + $0xed8] sm:$0xff] }
 0x99c   :  { %6522 = vmatprep.subr.bf16.mxu0 %v4324_v49  ;;  %v4451_v55 = vld [vmem:[#allocation2 + $0xe50] sm:$0xff]  ;;  %v4516_v44 = vld [vmem:[#allocation2 + $0x1058] sm:$0xff] }
 0x99d   :  { %v4243_v62 = vld [vmem:[#allocation2 + $0x7d0] sm:$0xff] }
 0x99e   :  { %6484 = vmatpush1.bf16.msra.mxu1 %v4083_v38  ;;  %v4467_v42 = vld [vmem:[#allocation2 + $0xed0] sm:$0xff]  ;;  %v4484_v38 = vld [vmem:[#allocation2 + $0xf58] sm:$0xff] }
 0x99f   :  { %6485 = vmatprep.subr.bf16.mxu1 %v4100_v18  ;;  %6523 = vmatpush1.bf16.msra.mxu0 %v4323_v19  ;;  %v4483_v18 = vld [vmem:[#allocation2 + $0xf50] sm:$0xff]  ;;  %v4532_v19 = vld [vmem:[#allocation2 + $0x10d8] sm:$0xff] }
 0x9a0   :  { %6524 = vmatprep.subr.bf16.mxu0 %v4340_v24  ;;  %v4515_v49 = vld [vmem:[#allocation2 + $0x1050] sm:$0xff] }
 0x9a1   :  { %v4531_v24 = vld [vmem:[#allocation2 + $0x10d0] sm:$0xff] }
 0x9a2   :  { %6486 = vmatpush1.bf16.msra.mxu1 %v4099_v23  ;;  %v4500_v23 = vld [vmem:[#allocation2 + $0xfd8] sm:$0xff] }
 0x9a3   :  { %6487 = vmatprep.subr.bf16.mxu1 %v4116_v0  ;;  %6525 = vmatpush1.bf16.msra.mxu0 %v4339_v25  ;;  %v4499_v0 = vld [vmem:[#allocation2 + $0xfd0] sm:$0xff]  ;;  %v4262_v25 = vld [vmem:[#allocation2 + $0x868] sm:$0xff] }
 0x9a4   :  { %6526 = vmatprep.subr.bf16.mxu0 %v4356_v33  ;;  %v4261_v33 = vld [vmem:[#allocation2 + $0x860] sm:$0xff] }
 0x9a6   :  { %6488 = vmatpush1.bf16.msra.mxu1 %v4115_v20  ;;  %v4006_v20 = vld [vmem:[#allocation2 + $0x68] sm:$0xff] }
 0x9a7   :  { %6489 = vmatprep.subr.bf16.mxu1 %v4132_v37  ;;  %6527 = vmatpush1.bf16.msra.mxu0 %v4355_v28  ;;  %v4005_v37 = vld [vmem:[#allocation2 + $0x60] sm:$0xff]  ;;  %v4278_v28 = vld [vmem:[#allocation2 + $0x8e8] sm:$0xff] }
 0x9a8   :  { %6528 = vmatprep.subr.bf16.mxu0 %v4372_v29  ;;  %v4277_v29 = vld [vmem:[#allocation2 + $0x8e0] sm:$0xff] }
 0x9aa   :  { %6490 = vmatpush1.bf16.msra.mxu1 %v4131_v63  ;;  %v4022_v63 = vld [vmem:[#allocation2 + $0xe8] sm:$0xff] }
 0x9ab   :  { %6491 = vmatprep.subr.bf16.mxu1 %v4148_v22  ;;  %6529 = vmatpush1.bf16.msra.mxu0 %v4371_v53  ;;  %v4021_v22 = vld [vmem:[#allocation2 + $0xe0] sm:$0xff] }
 0x9ac   :  { %6530 = vmatprep.subr.bf16.mxu0 %v4388_v13  ;;  %v4294_v13 = vld [vmem:[#allocation2 + $0x968] sm:$0xff] }
 0x9ae   :  { %6492 = vmatpush1.bf16.msra.mxu1 %v4147_v7 }
 0x9af   :  { %6493 = vmatprep.subr.bf16.mxu1 %v4164_v56  ;;  %6531 = vmatpush1.bf16.msra.mxu0 %v4387_v35  ;;  %v4038_v56 = vld [vmem:[#allocation2 + $0x168] sm:$0xff] }
 0x9b0   :  { %6532 = vmatprep.subr.bf16.mxu0 %v4404_v34 }
 0x9b2   :  { %6494 = vmatpush1.bf16.msra.mxu1 %v4163_v26 }
 0x9b3   :  { %6495 = vmatprep.subr.bf16.mxu1 %v4180_v32  ;;  %6533 = vmatpush1.bf16.msra.mxu0 %v4403_v58 }
 0x9b4   :  { %6534 = vmatprep.subr.bf16.mxu0 %v4420_v15 }
 0x9b6   :  { %6496 = vmatpush1.bf16.msra.mxu1 %v4179_v17 }
 0x9b7   :  { %6497 = vmatprep.subr.bf16.mxu1 %v4196_v5  ;;  %6535 = vmatpush1.bf16.msra.mxu0 %v4419_v47  ;;  %v4037_v47 = vld [vmem:[#allocation2 + $0x160] sm:$0xff] }
 0x9b8   :  { %6536 = vmatprep.subr.bf16.mxu0 %v4436_v30 }
 0x9ba   :  { %6498 = vmatpush1.bf16.msra.mxu1 %v4195_v40 }
 0x9bb   :  { %6499 = vmatprep.subr.bf16.mxu1 %v4212_v52  ;;  %6537 = vmatpush1.bf16.msra.mxu0 %v4435_v1  ;;  %v4293_v52 = vld [vmem:[#allocation2 + $0x960] sm:$0xff]  ;;  %v4310_v1 = vld [vmem:[#allocation2 + $0x9e8] sm:$0xff] }
 0x9bc   :  { %6538 = vmatprep.subr.bf16.mxu0 %v4452_v11  ;;  %v4070_v11 = vld [vmem:[#allocation2 + $0x268] sm:$0xff] }
 0x9be   :  { %6500 = vmatpush1.bf16.msra.mxu1 %v4211_v3  ;;  %v4054_v3 = vld [vmem:[#allocation2 + $0x1e8] sm:$0xff] }
 0x9bf   :  { %6501 = vmatprep.subr.bf16.mxu1 %v4228_v36  ;;  %6539 = vmatpush1.bf16.msra.mxu0 %v4451_v55 }
 0x9c0   :  { %6540 = vmatprep.subr.bf16.mxu0 %v4468_v27 }
 0x9c2   :  { %6502 = vmatpush1.bf16.msra.mxu1 %v4227_v31  ;;  %v4326_v31 = vld [vmem:[#allocation2 + $0xa68] sm:$0xff] }
 0x9c3   :  { %6503 = vmatprep.subr.bf16.mxu1 %v4244_v14  ;;  %6541 = vmatpush1.bf16.msra.mxu0 %v4467_v42 }
 0x9c4   :  { %6542 = vmatprep.subr.bf16.mxu0 %v4484_v38  ;;  %v4069_v38 = vld [vmem:[#allocation2 + $0x260] sm:$0xff] }
 0x9c6   :  { %6504 = vmatpush1.bf16.msra.mxu1 %v4243_v62 }
 0x9c7   :  { %6555 = vmatprep.subr.bf16.mxu1 %v4516_v44  ;;  %6543 = vmatpush1.bf16.msra.mxu0 %v4483_v18  ;;  %v4325_v44 = vld [vmem:[#allocation2 + $0xa60] sm:$0xff]  ;;  %v4086_v18 = vld [vmem:[#allocation2 + $0x2e8] sm:$0xff] }
 0x9c8   :  { %6544 = vmatprep.subr.bf16.mxu0 %v4500_v23  ;;  %v4085_v23 = vld [vmem:[#allocation2 + $0x2e0] sm:$0xff] }
 0x9c9   :  { %6506 = vmatmul.mubr.bf16.vlgmr.msra.gmra.mrb[96].mxu1 %v10150_v54 }
 0x9ca   :  { %6556 = vmatpush1.bf16.msra.mxu1 %v4515_v49  ;;  %6587 = vmatprep.mubr.bf16.mxu1 %v10497_v6  ;;  %v4342_v49 = vld [vmem:[#allocation2 + $0xae8] sm:$0xff] }
 0x9cb   :  { %6557 = vmatprep.subr.bf16.mxu1 %v4532_v19  ;;  %6545 = vmatpush1.bf16.msra.mxu0 %v4499_v0  ;;  %v4341_v19 = vld [vmem:[#allocation2 + $0xae0] sm:$0xff]  ;;  %v4102_v0 = vld [vmem:[#allocation2 + $0x368] sm:$0xff] }
 0x9cc   :  { %6596 = vmatprep.subr.bf16.mxu0 %v4006_v20  ;;  %v4101_v20 = vld [vmem:[#allocation2 + $0x360] sm:$0xff] }
 0x9ce   :  { %6558 = vmatpush1.bf16.msra.mxu1 %v4531_v24  ;;  %6547 = vmatmul.mubr.bf16.vlgmr.msra.gmra.mrb[100].mxu0 %v10154_v46  ;;  %v4358_v24 = vld [vmem:[#allocation2 + $0xb68] sm:$0xff] }
 0x9cf   :  { %6637 = vmatprep.subr.bf16.mxu1 %v4262_v25  ;;  %6597 = vmatpush1.bf16.msra.mxu0 %v4005_v37  ;;  %v4357_v25 = vld [vmem:[#allocation2 + $0xb60] sm:$0xff]  ;;  %v4118_v37 = vld [vmem:[#allocation2 + $0x3e8] sm:$0xff] }
 0x9d0   :  { %6598 = vmatprep.subr.bf16.mxu0 %v4022_v63  ;;  %6628 = vmatprep.mubr.bf16.mxu0 %v10134_v8  ;;  %v4117_v63 = vld [vmem:[#allocation2 + $0x3e0] sm:$0xff] }
 0x9d1   :  { %7569 = vmatmul.mubr.msk.bf16.vlgmr.msra.gmra.mrb[100].mxu1 %vm5854_vm9, %v10216_v39  ;;  %v6138_v7 = vpop.f32.mrb[80].mxu0 }
 0x9d2   :  { %6638 = vmatpush1.bf16.msra.mxu1 %v4261_v33  ;;  %6669 = vmatprep.mubr.bf16.mxu1 %v10138_v16  ;;  %v6139_v26 = vadd.f32 %v6138_v7, %v10110_v9  ;;  %v6140_v35 = vpop.f32.mrb[81].mxu0  ;;  %v4053_v9 = vld [vmem:[#allocation2 + $0x1e0] sm:$0xff]  ;;  %v4374_v33 = vld [vmem:[#allocation2 + $0xbe8] sm:$0xff] }
 0x9d3   :  { %6639 = vmatprep.subr.bf16.mxu1 %v4278_v28  ;;  %v6141_v34 = vadd.f32 %v6140_v35, %v10112_v57  ;;  %v6142_v17 = vpop.f32.mrb[82].mxu0  ;;  %6599 = vmatpush1.bf16.msra.mxu0 %v4021_v22  ;;  %v4309_v57 = vld [vmem:[#allocation2 + $0x9e0] sm:$0xff]  ;;  %v4134_v22 = vld [vmem:[#allocation2 + $0x468] sm:$0xff] }
 0x9d4   :  { %v6179_v53 = vpop.f32.mrb[80].mxu1  ;;  %v6143_v15 = vpop.f32.mrb[83].mxu0  ;;  %6600 = vmatprep.subr.bf16.mxu0 %v4038_v56  ;;  %v4373_v28 = vld [vmem:[#allocation2 + $0xbe0] sm:$0xff]  ;;  %v4150_v56 = vld [vmem:[#allocation2 + $0x4e8] sm:$0xff] }
 0x9d5   :  { %v6181_v32 = vpop.f32.mrb[81].mxu1  ;;  %v6180_v5 = vadd.f32 %v6179_v53, %v6139_v26  ;;  %v4133_v7 = vld [vmem:[#allocation2 + $0x460] sm:$0xff]  ;;  %v4438_v15 = vld [vmem:[#allocation2 + $0xde8] sm:$0xff] }
 0x9d6   :  { %v6183_v58 = vpop.f32.mrb[82].mxu1  ;;  %6640 = vmatpush1.bf16.msra.mxu1 %v4277_v29  ;;  %v6182_v30 = vadd.f32 %v6181_v32, %v6141_v34  ;;  %v4390_v29 = vld [vmem:[#allocation2 + $0xc68] sm:$0xff]  ;;  %v4389_v53 = vld [vmem:[#allocation2 + $0xc60] sm:$0xff] }
 0x9d7   :  { %v6184_v40 = vpop.f32.mrb[83].mxu1  ;;  %6641 = vmatprep.subr.bf16.mxu1 %v4294_v13  ;;  %6601 = vmatpush1.bf16.msra.mxu0 %v4037_v47  ;;  %v4406_v13 = vld [vmem:[#allocation2 + $0xce8] sm:$0xff]  ;;  %v4149_v26 = vld [vmem:[#allocation2 + $0x4e0] sm:$0xff] }
 0x9d8   :  { %6602 = vmatprep.subr.bf16.mxu0 %v4054_v3  ;;  %v4405_v35 = vld [vmem:[#allocation2 + $0xce0] sm:$0xff]  ;;  %v4166_v32 = vld [vmem:[#allocation2 + $0x568] sm:$0xff] }
 0x9d9   :  { %v6220_v36 = vpop.f32.mrb[84].mxu0  ;;  %v4422_v34 = vld [vmem:[#allocation2 + $0xd68] sm:$0xff]  ;;  %v4165_v17 = vld [vmem:[#allocation2 + $0x560] sm:$0xff] }
 0x9da   :  { %6642 = vmatpush1.bf16.msra.mxu1 %v4293_v52  ;;  %v10234_v55 = vadd.f32 %v6220_v36, %v6180_v5  ;;  %v6222_v14 = vpop.f32.mrb[85].mxu0  ;;  %v4421_v58 = vld [vmem:[#allocation2 + $0xd60] sm:$0xff]  ;;  %v4182_v5 = vld [vmem:[#allocation2 + $0x5e8] sm:$0xff] }
 0x9db   :  { %6643 = vmatprep.subr.bf16.mxu1 %v4310_v1  ;;  %v10236_v27 = vadd.f32 %v6222_v14, %v6182_v30  ;;  %v6224_v62 = vpop.f32.mrb[86].mxu0  ;;  %6603 = vmatpush1.bf16.msra.mxu0 %v4053_v9  ;;  %v4181_v40 = vld [vmem:[#allocation2 + $0x5e0] sm:$0xff]  ;;  %v4198_v52 = vld [vmem:[#allocation2 + $0x668] sm:$0xff] }
 0x9dc   :  { %v6225_v42 = vpop.f32.mrb[87].mxu0  ;;  %6604 = vmatprep.subr.bf16.mxu0 %v4070_v11  ;;  %v4437_v47 = vld [vmem:[#allocation2 + $0xde0] sm:$0xff]  ;;  %v4454_v30 = vld [vmem:[#allocation2 + $0xe68] sm:$0xff] }
 0x9dd   :  { %v4197_v3 = vld [vmem:[#allocation2 + $0x660] sm:$0xff]  ;;  %v4214_v9 = vld [vmem:[#allocation2 + $0x6e8] sm:$0xff] }
 0x9de   :  { %6644 = vmatpush1.bf16.msra.mxu1 %v4309_v57  ;;  %v4453_v1 = vld [vmem:[#allocation2 + $0xe60] sm:$0xff]  ;;  %v4470_v57 = vld [vmem:[#allocation2 + $0xee8] sm:$0xff] }
 0x9df   :  { %6645 = vmatprep.subr.bf16.mxu1 %v4326_v31  ;;  %6605 = vmatpush1.bf16.msra.mxu0 %v4069_v38  ;;  %v4213_v36 = vld [vmem:[#allocation2 + $0x6e0] sm:$0xff]  ;;  %v4230_v31 = vld [vmem:[#allocation2 + $0x768] sm:$0xff] }
 0x9e0   :  { %6606 = vmatprep.subr.bf16.mxu0 %v4086_v18  ;;  %v4469_v11 = vld [vmem:[#allocation2 + $0xee0] sm:$0xff]  ;;  %v4486_v14 = vld [vmem:[#allocation2 + $0xf68] sm:$0xff] }
 0x9e1   :  { %v4229_v62 = vld [vmem:[#allocation2 + $0x760] sm:$0xff]  ;;  %v4246_v38 = vld [vmem:[#allocation2 + $0x7e8] sm:$0xff] }
 0x9e2   :  { %6646 = vmatpush1.bf16.msra.mxu1 %v4325_v44  ;;  %v4485_v42 = vld [vmem:[#allocation2 + $0xf60] sm:$0xff]  ;;  %v4502_v44 = vld [vmem:[#allocation2 + $0xfe8] sm:$0xff] }
 0x9e3   :  { %6647 = vmatprep.subr.bf16.mxu1 %v4342_v49  ;;  %6607 = vmatpush1.bf16.msra.mxu0 %v4085_v23  ;;  %v4245_v18 = vld [vmem:[#allocation2 + $0x7e0] sm:$0xff]  ;;  %v4518_v23 = vld [vmem:[#allocation2 + $0x1068] sm:$0xff] }
 0x9e4   :  { %6608 = vmatprep.subr.bf16.mxu0 %v4102_v0  ;;  %v4501_v49 = vld [vmem:[#allocation2 + $0xfe0] sm:$0xff] }
 0x9e5   :  { %v4517_v0 = vld [vmem:[#allocation2 + $0x1060] sm:$0xff] }
 0x9e6   :  { %6648 = vmatpush1.bf16.msra.mxu1 %v4341_v19  ;;  %v4008_v19 = vld [vmem:[#allocation2 + $0x78] sm:$0xff] }
 0x9e7   :  { %6649 = vmatprep.subr.bf16.mxu1 %v4358_v24  ;;  %6609 = vmatpush1.bf16.msra.mxu0 %v4101_v20  ;;  %v4007_v24 = vld [vmem:[#allocation2 + $0x70] sm:$0xff]  ;;  %v4534_v20 = vld [vmem:[#allocation2 + $0x10e8] sm:$0xff] }
 0x9e8   :  { %6610 = vmatprep.subr.bf16.mxu0 %v4118_v37  ;;  %v4533_v37 = vld [vmem:[#allocation2 + $0x10e0] sm:$0xff] }
 0x9ea   :  { %6650 = vmatpush1.bf16.msra.mxu1 %v4357_v25  ;;  %v4024_v25 = vld [vmem:[#allocation2 + $0xf8] sm:$0xff] }
 0x9eb   :  { %6651 = vmatprep.subr.bf16.mxu1 %v4374_v33  ;;  %6611 = vmatpush1.bf16.msra.mxu0 %v4117_v63  ;;  %v4023_v33 = vld [vmem:[#allocation2 + $0xf0] sm:$0xff] }
 0x9ec   :  { %6612 = vmatprep.subr.bf16.mxu0 %v4134_v22  ;;  %v4264_v22 = vld [vmem:[#allocation2 + $0x878] sm:$0xff] }
 0x9ee   :  { %6652 = vmatpush1.bf16.msra.mxu1 %v4373_v28  ;;  %v4040_v28 = vld [vmem:[#allocation2 + $0x178] sm:$0xff] }
 0x9ef   :  { %6653 = vmatprep.subr.bf16.mxu1 %v4390_v29  ;;  %6613 = vmatpush1.bf16.msra.mxu0 %v4133_v7 }
 0x9f0   :  { %6614 = vmatprep.subr.bf16.mxu0 %v4150_v56 }
 0x9f2   :  { %6654 = vmatpush1.bf16.msra.mxu1 %v4389_v53 }
 0x9f3   :  { %6655 = vmatprep.subr.bf16.mxu1 %v4406_v13  ;;  %6615 = vmatpush1.bf16.msra.mxu0 %v4149_v26  ;;  %v4039_v26 = vld [vmem:[#allocation2 + $0x170] sm:$0xff] }
 0x9f4   :  { %6616 = vmatprep.subr.bf16.mxu0 %v4166_v32  ;;  %v4056_v32 = vld [vmem:[#allocation2 + $0x1f8] sm:$0xff] }
 0x9f6   :  { %6656 = vmatpush1.bf16.msra.mxu1 %v4405_v35  ;;  %v4263_v35 = vld [vmem:[#allocation2 + $0x870] sm:$0xff] }
 0x9f7   :  { %6657 = vmatprep.subr.bf16.mxu1 %v4422_v34  ;;  %6617 = vmatpush1.bf16.msra.mxu0 %v4165_v17  ;;  %v4280_v34 = vld [vmem:[#allocation2 + $0x8f8] sm:$0xff] }
 0x9f8   :  { %6618 = vmatprep.subr.bf16.mxu0 %v4182_v5  ;;  %v4296_v5 = vld [vmem:[#allocation2 + $0x978] sm:$0xff] }
 0x9fa   :  { %6658 = vmatpush1.bf16.msra.mxu1 %v4421_v58  ;;  %v4072_v58 = vld [vmem:[#allocation2 + $0x278] sm:$0xff] }
 0x9fb   :  { %6659 = vmatprep.subr.bf16.mxu1 %v4438_v15  ;;  %6619 = vmatpush1.bf16.msra.mxu0 %v4181_v40 }
 0x9fc   :  { %6620 = vmatprep.subr.bf16.mxu0 %v4198_v52 }
 0x9fe   :  { %6660 = vmatpush1.bf16.msra.mxu1 %v4437_v47 }
 0x9ff   :  { %6661 = vmatprep.subr.bf16.mxu1 %v4454_v30  ;;  %6621 = vmatpush1.bf16.msra.mxu0 %v4197_v3 }
 0xa00   :  { %6622 = vmatprep.subr.bf16.mxu0 %v4214_v9 }
 0xa02   :  { %6662 = vmatpush1.bf16.msra.mxu1 %v4453_v1 }
 0xa03   :  { %6663 = vmatprep.subr.bf16.mxu1 %v4470_v57  ;;  %6623 = vmatpush1.bf16.msra.mxu0 %v4213_v36  ;;  %v4071_v36 = vld [vmem:[#allocation2 + $0x270] sm:$0xff] }
 0xa04   :  { %6624 = vmatprep.subr.bf16.mxu0 %v4230_v31 }
 0xa06   :  { %6664 = vmatpush1.bf16.msra.mxu1 %v4469_v11  ;;  %v4295_v11 = vld [vmem:[#allocation2 + $0x970] sm:$0xff] }
 0xa07   :  { %6665 = vmatprep.subr.bf16.mxu1 %v4486_v14  ;;  %6625 = vmatpush1.bf16.msra.mxu0 %v4229_v62  ;;  %v4088_v14 = vld [vmem:[#allocation2 + $0x2f8] sm:$0xff]  ;;  %v4087_v62 = vld [vmem:[#allocation2 + $0x2f0] sm:$0xff] }
 0xa08   :  { %6626 = vmatprep.subr.bf16.mxu0 %v4246_v38  ;;  %v4104_v38 = vld [vmem:[#allocation2 + $0x378] sm:$0xff] }
 0xa0a   :  { %6666 = vmatpush1.bf16.msra.mxu1 %v4485_v42  ;;  %v4311_v42 = vld [vmem:[#allocation2 + $0x9f0] sm:$0xff] }
 0xa0b   :  { %6667 = vmatprep.subr.bf16.mxu1 %v4502_v44  ;;  %6627 = vmatpush1.bf16.msra.mxu0 %v4245_v18  ;;  %v4328_v44 = vld [vmem:[#allocation2 + $0xa78] sm:$0xff]  ;;  %v4103_v18 = vld [vmem:[#allocation2 + $0x370] sm:$0xff] }
 0xa0c   :  { %6678 = vmatprep.subr.bf16.mxu0 %v4518_v23  ;;  %v4120_v23 = vld [vmem:[#allocation2 + $0x3f8] sm:$0xff] }
 0xa0e   :  { %6668 = vmatpush1.bf16.msra.mxu1 %v4501_v49  ;;  %6629 = vmatmul.mubr.bf16.vlgmr.msra.gmra.mrb[104].mxu0 %v10150_v54  ;;  %v4327_v49 = vld [vmem:[#allocation2 + $0xa70] sm:$0xff] }
 0xa0f   :  { %6719 = vmatprep.subr.bf16.mxu1 %v4008_v19  ;;  %6679 = vmatpush1.bf16.msra.mxu0 %v4517_v0  ;;  %v4344_v19 = vld [vmem:[#allocation2 + $0xaf8] sm:$0xff]  ;;  %v4119_v0 = vld [vmem:[#allocation2 + $0x3f0] sm:$0xff] }
 0xa10   :  { %6680 = vmatprep.subr.bf16.mxu0 %v4534_v20  ;;  %6710 = vmatprep.mubr.bf16.mxu0 %v10497_v6  ;;  %v4136_v20 = vld [vmem:[#allocation2 + $0x478] sm:$0xff] }
 0xa11   :  { %6670 = vmatmul.mubr.bf16.vlgmr.msra.gmra.mrb[104].mxu1 %v10154_v46 }
 0xa12   :  { %6720 = vmatpush1.bf16.msra.mxu1 %v4007_v24  ;;  %6751 = vmatprep.mubr.bf16.mxu1 %v10134_v8  ;;  %v4279_v8 = vld [vmem:[#allocation2 + $0x8f0] sm:$0xff] }
 0xa13   :  { %6721 = vmatprep.subr.bf16.mxu1 %v4024_v25  ;;  %6681 = vmatpush1.bf16.msra.mxu0 %v4533_v37  ;;  %v4343_v24 = vld [vmem:[#allocation2 + $0xaf0] sm:$0xff]  ;;  %v4360_v25 = vld [vmem:[#allocation2 + $0xb78] sm:$0xff] }
 0xa14   :  { %v6261_v63 = vpop.f32.mrb[84].mxu1  ;;  %6760 = vmatprep.subr.bf16.mxu0 %v4264_v22  ;;  %v4135_v37 = vld [vmem:[#allocation2 + $0x470] sm:$0xff] }
 0xa15   :  { %v6262_v29 = vadd.f32 %v6261_v63, %v10118_v61  ;;  %v6263_v7 = vpop.f32.mrb[85].mxu1  ;;  %v4055_v61 = vld [vmem:[#allocation2 + $0x1f0] sm:$0xff]  ;;  %v4152_v63 = vld [vmem:[#allocation2 + $0x4f8] sm:$0xff] }
 0xa16   :  { %v6264_v53 = vadd.f32 %v6263_v7, %v10120_v41  ;;  %v6265_v56 = vpop.f32.mrb[86].mxu1  ;;  %6722 = vmatpush1.bf16.msra.mxu1 %v4023_v33  ;;  %7570 = vmatmul.mubr.msk.bf16.vlgmr.msra.gmra.mrb[108].mxu0 %vm5854_vm9, %v10216_v39  ;;  %v4359_v33 = vld [vmem:[#allocation2 + $0xb70] sm:$0xff]  ;;  %v4168_v7 = vld [vmem:[#allocation2 + $0x578] sm:$0xff] }
 0xa17   :  { %v6266_v13 = vpop.f32.mrb[87].mxu1  ;;  %6723 = vmatprep.subr.bf16.mxu1 %v4040_v28  ;;  %6761 = vmatpush1.bf16.msra.mxu0 %v4263_v35  ;;  %v4376_v28 = vld [vmem:[#allocation2 + $0xbf8] sm:$0xff]  ;;  %v4151_v22 = vld [vmem:[#allocation2 + $0x4f0] sm:$0xff] }
 0xa18   :  { %6762 = vmatprep.subr.bf16.mxu0 %v4280_v34  ;;  %6792 = vmatprep.mubr.bf16.mxu0 %v10138_v16  ;;  %v4312_v16 = vld [vmem:[#allocation2 + $0x9f8] sm:$0xff]  ;;  %v4167_v56 = vld [vmem:[#allocation2 + $0x570] sm:$0xff] }
 0xa19   :  { %v6302_v41 = vpop.f32.mrb[88].mxu0  ;;  %v4391_v13 = vld [vmem:[#allocation2 + $0xc70] sm:$0xff]  ;;  %v4408_v35 = vld [vmem:[#allocation2 + $0xcf8] sm:$0xff] }
 0xa1a   :  { %6724 = vmatpush1.bf16.msra.mxu1 %v4039_v26  ;;  %v6303_v15 = vadd.f32 %v6302_v41, %v6262_v29  ;;  %v6304_v40 = vpop.f32.mrb[89].mxu0  ;;  %v4375_v29 = vld [vmem:[#allocation2 + $0xbf0] sm:$0xff]  ;;  %v4184_v26 = vld [vmem:[#allocation2 + $0x5f8] sm:$0xff] }
 0xa1b   :  { %6725 = vmatprep.subr.bf16.mxu1 %v4056_v32  ;;  %v6305_v52 = vadd.f32 %v6304_v40, %v6264_v53  ;;  %v6306_v30 = vpop.f32.mrb[90].mxu0  ;;  %6763 = vmatpush1.bf16.msra.mxu0 %v4279_v8  ;;  %v4392_v53 = vld [vmem:[#allocation2 + $0xc78] sm:$0xff]  ;;  %v4183_v32 = vld [vmem:[#allocation2 + $0x5f0] sm:$0xff] }
 0xa1c   :  { %v6343_v17 = vpop.f32.mrb[88].mxu1  ;;  %v6307_v9 = vpop.f32.mrb[91].mxu0  ;;  %6764 = vmatprep.subr.bf16.mxu0 %v4296_v5  ;;  %v4407_v34 = vld [vmem:[#allocation2 + $0xcf0] sm:$0xff]  ;;  %v4424_v8 = vld [vmem:[#allocation2 + $0xd78] sm:$0xff]  ;;  %v10251_v30 = vld [vmem:[#allocation17] sm:$0xff] }
 0xa1d   :  { %v6345_v47 = vpop.f32.mrb[89].mxu1  ;;  %v10247_v1 = vadd.f32 %v6343_v17, %v6303_v15  ;;  %v4199_v41 = vld [vmem:[#allocation2 + $0x670] sm:$0xff]  ;;  %v4440_v5 = vld [vmem:[#allocation2 + $0xdf8] sm:$0xff] }
 0xa1e   :  { %v6347_v3 = vpop.f32.mrb[90].mxu1  ;;  %6726 = vmatpush1.bf16.msra.mxu1 %v4055_v61  ;;  %v10249_v31 = vadd.f32 %v6345_v47, %v6305_v52  ;;  %v4200_v61 = vld [vmem:[#allocation2 + $0x678] sm:$0xff]  ;;  %v4423_v17 = vld [vmem:[#allocation2 + $0xd70] sm:$0xff] }
 0xa1f   :  { %v6348_v57 = vpop.f32.mrb[91].mxu1  ;;  %6727 = vmatprep.subr.bf16.mxu1 %v4072_v58  ;;  %6765 = vmatpush1.bf16.msra.mxu0 %v4295_v11  ;;  %v4216_v58 = vld [vmem:[#allocation2 + $0x6f8] sm:$0xff]  ;;  %v4215_v15 = vld [vmem:[#allocation2 + $0x6f0] sm:$0xff] }
 0xa20   :  { %6766 = vmatprep.subr.bf16.mxu0 %v4312_v16  ;;  %v4439_v40 = vld [vmem:[#allocation2 + $0xdf0] sm:$0xff]  ;;  %v4232_v47 = vld [vmem:[#allocation2 + $0x778] sm:$0xff] }
 0xa21   :  { %v4456_v52 = vld [vmem:[#allocation2 + $0xe78] sm:$0xff]  ;;  %v4231_v3 = vld [vmem:[#allocation2 + $0x770] sm:$0xff] }
 0xa22   :  { %6728 = vmatpush1.bf16.msra.mxu1 %v4071_v36  ;;  %v4455_v9 = vld [vmem:[#allocation2 + $0xe70] sm:$0xff]  ;;  %v4248_v11 = vld [vmem:[#allocation2 + $0x7f8] sm:$0xff] }
 0xa23   :  { %6729 = vmatprep.subr.bf16.mxu1 %v4088_v14  ;;  %6767 = vmatpush1.bf16.msra.mxu0 %v4311_v42  ;;  %v10498_v57 = vld [vmem:[#allocation49_spill] sm:$0xff]  ;;  %v4472_v14 = vld [vmem:[#allocation2 + $0xef8] sm:$0xff] }
 0xa24   :  { %6768 = vmatprep.subr.bf16.mxu0 %v4328_v44  ;;  %v6849_v36 = vrot.slane %v10251_v30, %v10498_v57  ;;  %v10499_v16 = vld [vmem:[#allocation51_spill] sm:$0xff]  ;;  %v10500_v42 = vld [vmem:[#allocation57_spill] sm:$0xff]  ;;  %v10501_v44 = vld [vmem:[#allocation54_spill] sm:$0xff] }
 0xa26   :  { %6730 = vmatpush1.bf16.msra.mxu1 %v4087_v62  ;;  %v6853_v62 = vrot.slane %v10251_v30, %v10499_v16 }
 0xa27   :  { %6731 = vmatprep.subr.bf16.mxu1 %v4104_v38  ;;  %6769 = vmatpush1.bf16.msra.mxu0 %v4327_v49  ;;  %v6865_v38 = vrot.slane %v10251_v30, %v10500_v42  ;;  %v4247_v49 = vld [vmem:[#allocation2 + $0x7f0] sm:$0xff] }
 0xa28   :  { %6770 = vmatprep.subr.bf16.mxu0 %v4344_v19  ;;  %v6926_v19 = vadd.f32 %v6849_v36, %v10203_v2 }
 0xa2a   :  { %6732 = vmatpush1.bf16.msra.mxu1 %v4103_v18  ;;  %v6869_v18 = vrot.slane %v10251_v30, %v10501_v44 }
 0xa2b   :  { %6733 = vmatprep.subr.bf16.mxu1 %v4120_v23  ;;  %6771 = vmatpush1.bf16.msra.mxu0 %v4343_v24  ;;  %v4471_v23 = vld [vmem:[#allocation2 + $0xef0] sm:$0xff]  ;;  %v4520_v24 = vld [vmem:[#allocation2 + $0x1078] sm:$0xff] }
 0xa2c   :  { %6772 = vmatprep.subr.bf16.mxu0 %v4360_v25  ;;  %v6930_v25 = vadd.f32 %v6865_v38, %v10234_v55  ;;  %v4503_v55 = vld [vmem:[#allocation2 + $0xff0] sm:$0xff] }
 0xa2e   :  { %6734 = vmatpush1.bf16.msra.mxu1 %v4119_v0  ;;  %v4488_v0 = vld [vmem:[#allocation2 + $0xf78] sm:$0xff]  ;;  %v7576_v2 = vmul.f32 -1.442695, %v6930_v25 }
 0xa2f   :  { %6735 = vmatprep.subr.bf16.mxu1 %v4136_v20  ;;  %6773 = vmatpush1.bf16.msra.mxu0 %v4359_v33  ;;  %v6927_v20 = vadd.f32 %v6853_v62, %v10205_v50  ;;  %v4487_v33 = vld [vmem:[#allocation2 + $0xf70] sm:$0xff] }
 0xa30   :  { %6774 = vmatprep.subr.bf16.mxu0 %v4376_v28  ;;  %v7572_v28 = vmul.f32 -1.442695, %v6926_v19 }
 0xa32   :  { %6736 = vmatpush1.bf16.msra.mxu1 %v4135_v37  ;;  %v6931_v37 = vadd.f32 %v6869_v18, %v10236_v27  ;;  %8354 = vpow2.f32 %v7572_v28 }
 0xa33   :  { %6737 = vmatprep.subr.bf16.mxu1 %v4152_v63  ;;  %6775 = vmatpush1.bf16.msra.mxu0 %v4375_v29  ;;  %v4519_v63 = vld [vmem:[#allocation2 + $0x1070] sm:$0xff]  ;;  %v4536_v29 = vld [vmem:[#allocation2 + $0x10f8] sm:$0xff] }
 0xa34   :  { %6776 = vmatprep.subr.bf16.mxu0 %v4392_v53  ;;  %v7577_v50 = vmul.f32 -1.442695, %v6931_v37  ;;  %v4535_v53 = vld [vmem:[#allocation2 + $0x10f0] sm:$0xff] }
 0xa35   :  { %v10503_v37 = vld [vmem:[#allocation46_spill] sm:$0xff] }
 0xa36   :  { %6738 = vmatpush1.bf16.msra.mxu1 %v4151_v22  ;;  %v4504_v22 = vld [vmem:[#allocation2 + $0xff8] sm:$0xff] }
 0xa37   :  { %6739 = vmatprep.subr.bf16.mxu1 %v4168_v7  ;;  %6777 = vmatpush1.bf16.msra.mxu0 %v4391_v13  ;;  %v7573_v7 = vmul.f32 -1.442695, %v6927_v20 }
 0xa38   :  { %6778 = vmatprep.subr.bf16.mxu0 %v4408_v35 }
 0xa39   :  { %8356 = vpow2.f32 %v7573_v7 }
 0xa3a   :  { %6740 = vmatpush1.bf16.msra.mxu1 %v4167_v56  ;;  %8358 = vpow2.f32 %v7576_v2  ;;  %v10505_v2 = vld [vmem:[#allocation52_spill] sm:$0xff] }
 0xa3b   :  { %6741 = vmatprep.subr.bf16.mxu1 %v4184_v26  ;;  %6779 = vmatpush1.bf16.msra.mxu0 %v4407_v34  ;;  %8360 = vpow2.f32 %v7577_v50  ;;  %v6861_v50 = vrot.slane %v10251_v30, %v10505_v2 }
 0xa3c   :  { %6780 = vmatprep.subr.bf16.mxu0 %v4424_v8  ;;  %v8355_v35 = vpop.eup %8354 }
 0xa3e   :  { %6742 = vmatpush1.bf16.msra.mxu1 %v4183_v32 }
 0xa3f   :  { %6743 = vmatprep.subr.bf16.mxu1 %v4200_v61  ;;  %6781 = vmatpush1.bf16.msra.mxu0 %v4423_v17 }
 0xa40   :  { %6782 = vmatprep.subr.bf16.mxu0 %v4440_v5  ;;  %v10272_v5 = vld [vmem:[#allocation17 + $0x8] sm:$0xff] }
 0xa42   :  { %6744 = vmatpush1.bf16.msra.mxu1 %v4199_v41 }
 0xa43   :  { %6745 = vmatprep.subr.bf16.mxu1 %v4216_v58  ;;  %6783 = vmatpush1.bf16.msra.mxu0 %v4439_v40  ;;  %v8357_v61 = vpop.eup %8356 }
 0xa44   :  { %6784 = vmatprep.subr.bf16.mxu0 %v4456_v52  ;;  %v8359_v58 = vpop.eup %8358  ;;  %v6955_v40 = vadd.f32 1.0, %v8357_v61 }
 0xa46   :  { %6746 = vmatpush1.bf16.msra.mxu1 %v4215_v15  ;;  %v6954_v15 = vadd.f32 1.0, %v8355_v35 }
 0xa47   :  { %6747 = vmatprep.subr.bf16.mxu1 %v4232_v47  ;;  %6785 = vmatpush1.bf16.msra.mxu0 %v4455_v9  ;;  %v6978_v47 = vadd.f32 1.0, %v8359_v58 }
 0xa48   :  { %6786 = vmatprep.subr.bf16.mxu0 %v4472_v14  ;;  %8362 = vrcp.f32 %v6954_v15 }
 0xa49   :  { %8364 = vrcp.f32 %v6955_v40 }
 0xa4a   :  { %6748 = vmatpush1.bf16.msra.mxu1 %v4231_v3  ;;  %8366 = vrcp.f32 %v6978_v47 }
 0xa4b   :  { %6749 = vmatprep.subr.bf16.mxu1 %v4248_v11  ;;  %6787 = vmatpush1.bf16.msra.mxu0 %v4471_v23 }
 0xa4c   :  { %6788 = vmatprep.subr.bf16.mxu0 %v4488_v0 }
 0xa4e   :  { %6750 = vmatpush1.bf16.msra.mxu1 %v4247_v49 }
 0xa4f   :  { %6801 = vmatprep.subr.bf16.mxu1 %v4520_v24  ;;  %6789 = vmatpush1.bf16.msra.mxu0 %v4487_v33 }
 0xa50   :  { %6790 = vmatprep.subr.bf16.mxu0 %v4504_v22 }
 0xa51   :  { %6752 = vmatmul.mubr.bf16.vlgmr.msra.gmra.mrb[108].mxu1 %v10150_v54 }
 0xa52   :  { %6802 = vmatpush1.bf16.msra.mxu1 %v4519_v63  ;;  %6833 = vmatprep.mubr.bf16.mxu1 %v10497_v6 }
 0xa53   :  { %6803 = vmatprep.subr.bf16.mxu1 %v4536_v29  ;;  %6791 = vmatpush1.bf16.msra.mxu0 %v4503_v55  ;;  %v10504_v29 = vld [vmem:[#allocation50_spill] sm:$0xff]  ;;  %v10506_v55 = vld [vmem:[#allocation55_spill] sm:$0xff] }
 0xa54   :  { %v6857_v7 = vrot.slane %v10251_v30, %v10504_v29 }
 0xa56   :  { %6804 = vmatpush1.bf16.msra.mxu1 %v4535_v53  ;;  %6793 = vmatmul.mubr.bf16.vlgmr.msra.gmra.mrb[112].mxu0 %v10154_v46  ;;  %v6873_v53 = vrot.slane %v10251_v30, %v10506_v55 }
 0xa59   :  { %7571 = vmatmul.mubr.msk.bf16.vlgmr.msra.gmra.mrb[112].mxu1 %vm5854_vm9, %v10216_v39  ;;  %v6384_v54 = vpop.f32.mrb[92].mxu0  ;;  %v8361_v39 = vpop.eup %8360 }
 0xa5a   :  { %v6385_v56 = vadd.f32 %v6384_v54, %v10144_v12  ;;  %v6386_v13 = vpop.f32.mrb[93].mxu0  ;;  %v6881_v12 = vrot.slane %v10272_v5, %v10498_v57  ;;  %v6979_v52 = vadd.f32 1.0, %v8361_v39  ;;  %v8363_v49 = vpop.eup %8362  ;;  %v10507_v54 = vld [vmem:[#allocation56_spill] sm:$0xff] }
 0xa5b   :  { %v6387_v32 = vadd.f32 %v6386_v13, %v10146_v4  ;;  %v6388_v6 = vpop.f32.mrb[94].mxu0  ;;  %v6885_v4 = vrot.slane %v10272_v5, %v10499_v16  ;;  %v8365_v57 = vpop.eup %8364  ;;  %v10502_v16 = vld [vmem:[#allocation45_spill] sm:$0xff]  ;;  %v6929_v13 = vadd.f32 %v6861_v50, %v10223_v21 }
 0xa5c   :  { %v6425_v27 = vpop.f32.mrb[92].mxu1  ;;  %v6389_v41 = vpop.f32.mrb[95].mxu0  ;;  %8368 = vrcp.f32 %v6979_v52 }
 0xa5d   :  { %v6427_v26 = vpop.f32.mrb[93].mxu1  ;;  %v6426_v8 = vadd.f32 %v6425_v27, %v6385_v56  ;;  %v8367_v23 = vpop.eup %8366  ;;  %v6877_v27 = vrot.slane %v10251_v30, %v10507_v54  ;;  %v6928_v56 = vadd.f32 %v6857_v7, %v10221_v43  ;;  %v7575_v6 = vmul.f32 -1.442695, %v6929_v13 }
 0xa5e   :  { %v6429_v34 = vpop.f32.mrb[94].mxu1  ;;  %v6428_v46 = vadd.f32 %v6427_v26, %v6387_v32  ;;  %v7018_v20 = vmul.f32 %v8367_v23, %v10502_v16  ;;  %v6932_v26 = vadd.f32 %v6873_v53, %v10247_v1 }
 0xa5f   :  { %v6430_v17 = vpop.f32.mrb[95].mxu1  ;;  %v6933_v35 = vadd.f32 %v6877_v27, %v10249_v31  ;;  %v7574_v32 = vmul.f32 -1.442695, %v6928_v56 }
 0xa60   :  { %v7578_v34 = vmul.f32 -1.442695, %v6932_v26 }
 0xa61   :  { %v6466_v3 = vpop.f32.mrb[96].mxu0  ;;  %v7579_v61 = vmul.f32 -1.442695, %v6933_v35 }
 0xa62   :  { %v6467_v9 = vadd.f32 %v6466_v3, %v6426_v8  ;;  %v6468_v36 = vpop.f32.mrb[97].mxu0  ;;  %v6889_v3 = vrot.slane %v10272_v5, %v10504_v29  ;;  %v10509_v29 = vld [vmem:[#allocation48_spill] sm:$0xff] }
 0xa63   :  { %v6469_v11 = vadd.f32 %v6468_v36, %v6428_v46  ;;  %v6470_v14 = vpop.f32.mrb[98].mxu0 }
 0xa64   :  { %v6934_v62 = vadd.f32 %v6881_v12, %v6467_v9  ;;  %v6471_v38 = vpop.f32.mrb[99].mxu0 }
 0xa65   :  { %v6935_v18 = vadd.f32 %v6885_v4, %v6469_v11 }
 0xa66   :  { %8370 = vtanh.f32 %v6934_v62  ;;  %v8369_v19 = vpop.eup %8368 }
 0xa67   :  { %8372 = vtanh.f32 %v6935_v18  ;;  %v7019_v33 = vmul.f32 %v8369_v19, %v10503_v37  ;;  %v10508_v37 = vld [vmem:[#allocation47_spill] sm:$0xff] }
 0xa68   :  { %8374 = vpow2.f32 %v7574_v32 }
 0xa69   :  { %8376 = vpow2.f32 %v7575_v6 }
 0xa6a   :  { %8378 = vpow2.f32 %v7578_v34 }
 0xa6b   :  { %8380 = vpow2.f32 %v7579_v61 }
 0xa70   :  { %v8371_v0 = vpop.eup %8370 }
 0xa71   :  { %v8373_v24 = vpop.eup %8372  ;;  %v7022_v25 = vmul.f32 %v8371_v0, %v8363_v49 }
 0xa72   :  { %v7023_v63 = vmul.f32 %v8373_v24, %v8365_v57  ;;  %v8375_v58 = vpop.eup %8374 }
 0xa73   :  { %v10280_v28 = vadd.f32 %v7022_v25, %v7018_v20  ;;  %v8377_v1 = vpop.eup %8376  ;;  %v6956_v39 = vadd.f32 1.0, %v8375_v58 }
 0xa74   :  { %v10282_v22 = vadd.f32 %v7023_v63, %v7019_v33  ;;  %v8379_v46 = vpop.eup %8378  ;;  %v6957_v15 = vadd.f32 1.0, %v8377_v1 }
 0xa75   :  { %v8381_v31 = vpop.eup %8380  ;;  %v6980_v12 = vadd.f32 1.0, %v8379_v46  ;;  %8382 = vrcp.f32 %v6956_v39 }
 0xa76   :  { %v6981_v9 = vadd.f32 1.0, %v8381_v31  ;;  %8384 = vrcp.f32 %v6957_v15 }
 0xa77   :  { %8386 = vrcp.f32 %v6980_v12 }
 0xa78   :  { %8388 = vrcp.f32 %v6981_v9 }
 0xa7f   :  { %v8383_v19 = vpop.eup %8382 }
 0xa80   :  { %v8385_v0 = vpop.eup %8384 }
 0xa81   :  { %v8387_v24 = vpop.eup %8386 }
 0xa82   :  { %v8389_v16 = vpop.eup %8388  ;;  %v7020_v33 = vmul.f32 %v8387_v24, %v10508_v37 }
 0xa83   :  { %v7021_v7 = vmul.f32 %v8389_v16, %v10509_v29 }
 0xa9c   :  { %v6507_v8 = vpop.f32.mrb[96].mxu1 }
 0xa9d   :  { %v6508_v41 = vadd.f32 %v6507_v8, %v10168_v48  ;;  %v6509_v30 = vpop.f32.mrb[97].mxu1 }
 0xa9e   :  { %v6510_v43 = vadd.f32 %v6509_v30, %v10170_v59  ;;  %v6511_v17 = vpop.f32.mrb[98].mxu1  ;;  %v6893_v59 = vrot.slane %v10272_v5, %v10505_v2 }
 0xa9f   :  { %v6512_v21 = vpop.f32.mrb[99].mxu1 }
 0xaa0   :  { %v6901_v21 = vrot.slane %v10272_v5, %v10501_v44 }
 0xaa1   :  { %v6548_v40 = vpop.f32.mrb[100].mxu0 }
 0xaa2   :  { %v6549_v52 = vadd.f32 %v6548_v40, %v6508_v41  ;;  %v6550_v4 = vpop.f32.mrb[101].mxu0 }
 0xaa3   :  { %v6551_v36 = vadd.f32 %v6550_v4, %v6510_v43  ;;  %v6552_v11 = vpop.f32.mrb[102].mxu0  ;;  %v6897_v43 = vrot.slane %v10272_v5, %v10500_v42 }
 0xaa4   :  { %v6589_v47 = vpop.f32.mrb[100].mxu1  ;;  %v6553_v38 = vpop.f32.mrb[103].mxu0 }
 0xaa5   :  { %v6591_v48 = vpop.f32.mrb[101].mxu1  ;;  %v6590_v62 = vadd.f32 %v6589_v47, %v6549_v52 }
 0xaa6   :  { %v6593_v14 = vpop.f32.mrb[102].mxu1  ;;  %v6592_v49 = vadd.f32 %v6591_v48, %v6551_v36 }
 0xaa7   :  { %v6594_v18 = vpop.f32.mrb[103].mxu1  ;;  %v6936_v57 = vadd.f32 %v6889_v3, %v6590_v62 }
 0xaa8   :  { %v6937_v23 = vadd.f32 %v6893_v59, %v6592_v49 }
 0xaa9   :  { %8390 = vtanh.f32 %v6936_v57 }
 0xaaa   :  { %8392 = vtanh.f32 %v6937_v23 }
 0xab3   :  { %v8391_v20 = vpop.eup %8390 }
 0xab4   :  { %v8393_v25 = vpop.eup %8392  ;;  %v7024_v63 = vmul.f32 %v8391_v20, %v8383_v19  ;;  %v6905_v19 = vrot.slane %v10272_v5, %v10506_v55  ;;  %v6909_v20 = vrot.slane %v10272_v5, %v10507_v54 }
 0xab5   :  { %v7025_v2 = vmul.f32 %v8393_v25, %v8385_v0 }
 0xab6   :  { %v10304_v50 = vadd.f32 %v7024_v63, %v7020_v33 }
 0xab7   :  { %v10306_v53 = vadd.f32 %v7025_v2, %v7021_v7 }
 0xae1   :  { %v6630_v27 = vpop.f32.mrb[104].mxu0 }
 0xae2   :  { %v6631_v13 = vadd.f32 %v6630_v27, %v10179_v45  ;;  %v6632_v26 = vpop.f32.mrb[105].mxu0 }
 0xae3   :  { %v6633_v32 = vadd.f32 %v6632_v26, %v10181_v10  ;;  %v6634_v6 = vpop.f32.mrb[106].mxu0 }
 0xae4   :  { %v6671_v56 = vpop.f32.mrb[104].mxu1  ;;  %v6635_v8 = vpop.f32.mrb[107].mxu0 }
 0xae5   :  { %v6673_v35 = vpop.f32.mrb[105].mxu1  ;;  %v6672_v61 = vadd.f32 %v6671_v56, %v6631_v13 }
 0xae6   :  { %v6675_v34 = vpop.f32.mrb[106].mxu1  ;;  %v6674_v30 = vadd.f32 %v6673_v35, %v6633_v32 }
 0xae7   :  { %v6676_v41 = vpop.f32.mrb[107].mxu1 }
 0xae9   :  { %v6712_v17 = vpop.f32.mrb[108].mxu0 }
 0xaea   :  { %v6713_v58 = vadd.f32 %v6712_v17, %v6672_v61  ;;  %v6714_v1 = vpop.f32.mrb[109].mxu0 }
 0xaeb   :  { %v6715_v45 = vadd.f32 %v6714_v1, %v6674_v30  ;;  %v6716_v46 = vpop.f32.mrb[110].mxu0 }
 0xaec   :  { %v6938_v31 = vadd.f32 %v6897_v43, %v6713_v58  ;;  %v6717_v39 = vpop.f32.mrb[111].mxu0 }
 0xaed   :  { %v6939_v10 = vadd.f32 %v6901_v21, %v6715_v45 }
 0xaee   :  { %v7580_v15 = vmul.f32 -1.442695, %v6938_v31 }
 0xaef   :  { %v7581_v40 = vmul.f32 -1.442695, %v6939_v10 }
 0xaf0   :  { %8394 = vpow2.f32 %v7580_v15 }
 0xaf1   :  { %8396 = vpow2.f32 %v7581_v40 }
 0xaf2   :  { %8398 = vtanh.f32 %v10280_v28 }
 0xaf3   :  { %8400 = vtanh.f32 %v10282_v22 }
 0xafa   :  { %v8395_v47 = vpop.eup %8394 }
 0xafb   :  { %v8397_v12 = vpop.eup %8396  ;;  %v7006_v42 = vadd.f32 1.0, %v8395_v47 }
 0xafc   :  { %v7007_v52 = vadd.f32 1.0, %v8397_v12  ;;  %v8399_v44 = vpop.eup %8398 }
 0xafd   :  { %8402 = vrcp.f32 %v7006_v42  ;;  %v8401_v3 = vpop.eup %8400 }
 0xafe   :  { %8404 = vrcp.f32 %v7007_v52 }
 0xb07   :  { %v8403_v4 = vpop.eup %8402 }
 0xb08   :  { %v8405_v48 = vpop.eup %8404  ;;  %v10316_v9 = vmul.f32 %v8403_v4, %v8399_v44 }
 0xb09   :  { %v7035_v36 = vmul.f32 %v8405_v48, %v8401_v3 }
 0xb24   :  { %v6753_v59 = vpop.f32.mrb[108].mxu1 }
 0xb25   :  { %v6754_v11 = vadd.f32 %v6753_v59, %v10190_v51  ;;  %v6755_v14 = vpop.f32.mrb[109].mxu1 }
 0xb26   :  { %v6756_v62 = vadd.f32 %v6755_v14, %v10192_v60  ;;  %v6757_v38 = vpop.f32.mrb[110].mxu1 }
 0xb27   :  { %v6758_v18 = vpop.f32.mrb[111].mxu1 }
 0xb29   :  { %v6794_v49 = vpop.f32.mrb[112].mxu0 }
 0xb2a   :  { %v6795_v23 = vadd.f32 %v6794_v49, %v6754_v11  ;;  %v6796_v0 = vpop.f32.mrb[113].mxu0 }
 0xb2b   :  { %v6797_v16 = vadd.f32 %v6796_v0, %v6756_v62  ;;  %v6798_v25 = vpop.f32.mrb[114].mxu0 }
 0xb2c   :  { %v6835_v57 = vpop.f32.mrb[112].mxu1  ;;  %v6799_v33 = vpop.f32.mrb[115].mxu0 }
 0xb2d   :  { %v6837_v24 = vpop.f32.mrb[113].mxu1  ;;  %v6836_v51 = vadd.f32 %v6835_v57, %v6795_v23 }
 0xb2e   :  { %v6839_v37 = vpop.f32.mrb[114].mxu1  ;;  %v6838_v60 = vadd.f32 %v6837_v24, %v6797_v16 }
 0xb2f   :  { %v6840_v63 = vpop.f32.mrb[115].mxu1  ;;  %v6940_v29 = vadd.f32 %v6905_v19, %v6836_v51 }
 0xb30   :  { %v6941_v7 = vadd.f32 %v6909_v20, %v6838_v60 }
 0xb31   :  { %v7582_v2 = vmul.f32 -1.442695, %v6940_v29 }
 0xb32   :  { %v7583_v27 = vmul.f32 -1.442695, %v6941_v7 }
 0xb33   :  { %8406 = vpow2.f32 %v7582_v2 }
 0xb34   :  { %8408 = vpow2.f32 %v7583_v27 }
 0xb35   :  { %8410 = vtanh.f32 %v10304_v50 }
 0xb36   :  { %8412 = vtanh.f32 %v10306_v53 }
 0xb3d   :  { %v8407_v56 = vpop.eup %8406 }
 0xb3e   :  { %v8409_v55 = vpop.eup %8408  ;;  %v7008_v13 = vadd.f32 1.0, %v8407_v56 }
 0xb3f   :  { %v7009_v5 = vadd.f32 1.0, %v8409_v55  ;;  %v8411_v54 = vpop.eup %8410 }
 0xb40   :  { %8414 = vrcp.f32 %v7008_v13  ;;  %v8413_v26 = vpop.eup %8412 }
 0xb41   :  { %8416 = vrcp.f32 %v7009_v5 }
 0xb4a   :  { %v8415_v35 = vpop.eup %8414 }
 0xb4b   :  { %v8417_v32 = vpop.eup %8416  ;;  %v10326_v6 = vmul.f32 %v8415_v35, %v8411_v54 }
 0xb4c   :  { %v7037_v34 = vmul.f32 %v8417_v32, %v8413_v26 }
 0xb4d   :  { %8723 = dma.done.wait [#allocation5 + $0x2], 4096 }
 0xb4e   :  { %8724 = vsyncadd [#allocation5 + $0x2], 4294963200  ;;  %v7042_v61 = vpack.c.bf16 %v7035_v36, %v7035_v36  ;;  %v7044_v8 = vpack.c.bf16 %v7037_v34, %v7037_v34  ;;  %7178 = vst [vmem:[#allocation21] sm:$0xff] %v10316_v9  ;;  %v7053_v41 = vld [vmem:[#allocation4 + $0x40] sm:$0xff]  ;;  %v7054_v21 = vld [vmem:[#allocation4 + $0x48] sm:$0xff]  ;;  %v7041_v18 = vpack.c.bf16 %v10316_v9, %v10316_v9  ;;  %v7043_v49 = vpack.c.bf16 %v10326_v6, %v10326_v6  ;;  %s8756_s25 = smov [#allocation21]  }
 0xb4f   :  { %7179 = vst [vmem:[#allocation21 + $0x8] sm:$0xff] %v7035_v36  ;;  %7180 = vst [vmem:[#allocation21 + $0x10] sm:$0xff] %v10326_v6  ;;  %v7069_v30 = vld [vmem:[#allocation4 + $0xc0] sm:$0xff]  ;;  %7588 = vmatprep.subr.bf16.mxu0 %v7053_v41  ;;  %v7070_v58 = vld [vmem:[#allocation4 + $0xc8] sm:$0xff]  ;;  %s7203_s29 = sshll.u32 %s8756_s25, 4  ;;  %s7204_s29 = int_to_ptr.vmem [resolvable:$true] %s7203_s29 }
 0xb50   :  { %7181 = vst [vmem:[#allocation21 + $0x18] sm:$0xff] %v7037_v34  ;;  %7182 = vst [vmem:[#allocation23] sm:$0xff] %v10280_v28  ;;  %7116 = vmatprep.mubr.bf16.mxu0 %v7042_v61  ;;  %7156 = vmatprep.mubr.bf16.mxu1 %v7044_v8  ;;  %v7045_v43 = vld [vmem:[#allocation4] sm:$0xff]  ;;  %v7046_v28 = vld [vmem:[#allocation4 + $0x8] sm:$0xff]  ;;  %s8621_s2 = scalar_lea.vmem %s7204_s29, 512  ;;  %p8626_p3 = scmp.lt.s32.totalorder %s7204_s29, %s7204_s29 }
 0xb51   :  { %7183 = vst [vmem:[#allocation23 + $0x8] sm:$0xff] %v10282_v22  ;;  %7184 = vst [vmem:[#allocation23 + $0x10] sm:$0xff] %v10304_v50  ;;  %7610 = vmatprep.subr.bf16.mxu1 %v7069_v30  ;;  %v7061_v17 = vld [vmem:[#allocation4 + $0x80] sm:$0xff]  ;;  %7589 = vmatpush3.bf16.msra.mxu0 %v7045_v43  ;;  %v7062_v22 = vld [vmem:[#allocation4 + $0x88] sm:$0xff]  ;;  %p8622_p2 = scmp.ne.s32.totalorder %s7204_s29, %s8621_s2  ;;  %p8627_p4 = scmp.lt.s32.totalorder %s8621_s2, %s8621_s2 }
 0xb52   :  { %7185 = vst [vmem:[#allocation23 + $0x18] sm:$0xff] %v10306_v53  ;;  %7611 = vmatpush3.bf16.msra.mxu1 %v7061_v17  ;;  %7590 = vmatprep.subr.bf16.mxu0 %v7054_v21  ;;  %v7055_v1 = vld [vmem:[#allocation4 + $0x50] sm:$0xff]  ;;  %v7056_v46 = vld [vmem:[#allocation4 + $0x58] sm:$0xff]  ;;  %v7057_v15 = vld [vmem:[#allocation4 + $0x60] sm:$0xff] }
 0xb53   :  { %7612 = vmatprep.subr.bf16.mxu1 %v7070_v58  ;;  %v7071_v50 = vld [vmem:[#allocation4 + $0xd0] sm:$0xff]  ;;  %v7072_v31 = vld [vmem:[#allocation4 + $0xd8] sm:$0xff]  ;;  %v7073_v40 = vld [vmem:[#allocation4 + $0xe0] sm:$0xff]  ;;  %p8628_p5 = por %p8627_p4, %p8626_p3 }
 0xb54   :  { %v7047_v53 = vld [vmem:[#allocation4 + $0x10] sm:$0xff]  ;;  %v7048_v39 = vld [vmem:[#allocation4 + $0x18] sm:$0xff]  ;;  %v7049_v47 = vld [vmem:[#allocation4 + $0x20] sm:$0xff] }
 0xb55   :  { %7591 = vmatpush3.bf16.msra.mxu0 %v7046_v28  ;;  %v7063_v45 = vld [vmem:[#allocation4 + $0x90] sm:$0xff]  ;;  %v7064_v10 = vld [vmem:[#allocation4 + $0x98] sm:$0xff]  ;;  %v7065_v12 = vld [vmem:[#allocation4 + $0xa0] sm:$0xff]  ;;  %p8629_p6 = pnand %p8628_p5, %p8622_p2 }
 0xb56   :  { %7613 = vmatpush3.bf16.msra.mxu1 %v7062_v22  ;;  %7592 = vmatprep.subr.bf16.mxu0 %v7055_v1  ;;  %v7058_v42 = vld [vmem:[#allocation4 + $0x68] sm:$0xff]  ;;  %v7059_v4 = vld [vmem:[#allocation4 + $0x70] sm:$0xff]  ;;  %v7060_v11 = vld [vmem:[#allocation4 + $0x78] sm:$0xff] }
 0xb57   :  { %7614 = vmatprep.subr.bf16.mxu1 %v7071_v50  ;;  %v7074_v52 = vld [vmem:[#allocation4 + $0xe8] sm:$0xff]  ;;  %v7075_v48 = vld [vmem:[#allocation4 + $0xf0] sm:$0xff]  ;;  %v7076_v14 = vld [vmem:[#allocation4 + $0xf8] sm:$0xff] }
 0xb58   :  { %v7050_v44 = vld [vmem:[#allocation4 + $0x28] sm:$0xff]  ;;  %v7051_v36 = vld [vmem:[#allocation4 + $0x30] sm:$0xff]  ;;  %v7052_v62 = vld [vmem:[#allocation4 + $0x38] sm:$0xff] }
 0xb59   :  { %7593 = vmatpush3.bf16.msra.mxu0 %v7047_v53  ;;  %v7066_v3 = vld [vmem:[#allocation4 + $0xa8] sm:$0xff]  ;;  %v7067_v59 = vld [vmem:[#allocation4 + $0xb0] sm:$0xff]  ;;  %v7068_v38 = vld [vmem:[#allocation4 + $0xb8] sm:$0xff] }
 0xb5a   :  { %7615 = vmatpush3.bf16.msra.mxu1 %v7063_v45  ;;  %7594 = vmatprep.subr.bf16.mxu0 %v7056_v46  ;;  %v7584_v19 = vld [vmem:[#allocation18] ss:$0 sm:$0xff]  ;;  %v10510_v9 = vld [vmem:[#allocation53_spill] sm:$0xff] }
 0xb5b   :  { %7616 = vmatprep.subr.bf16.mxu1 %v7072_v31  ;;  %vm7164_vm10 = vcmp.lt.s32.totalorder %v10510_v9, 64 }
 0xb5d   :  { %7595 = vmatpush3.bf16.msra.mxu0 %v7048_v39 }
 0xb5e   :  { %7617 = vmatpush3.bf16.msra.mxu1 %v7064_v10  ;;  %7596 = vmatprep.subr.bf16.mxu0 %v7057_v15 }
 0xb5f   :  { %7618 = vmatprep.subr.bf16.mxu1 %v7073_v40 }
 0xb61   :  { %7597 = vmatpush3.bf16.msra.mxu0 %v7049_v47 }
 0xb62   :  { %7619 = vmatpush3.bf16.msra.mxu1 %v7065_v12  ;;  %7598 = vmatprep.subr.bf16.mxu0 %v7058_v42 }
 0xb63   :  { %7620 = vmatprep.subr.bf16.mxu1 %v7074_v52 }
 0xb65   :  { %7599 = vmatpush3.bf16.msra.mxu0 %v7050_v44 }
 0xb66   :  { %7621 = vmatpush3.bf16.msra.mxu1 %v7066_v3  ;;  %7600 = vmatprep.subr.bf16.mxu0 %v7059_v4 }
 0xb67   :  { %7622 = vmatprep.subr.bf16.mxu1 %v7075_v48 }
 0xb69   :  { %7601 = vmatpush3.bf16.msra.mxu0 %v7051_v36 }
 0xb6a   :  { %7623 = vmatpush3.bf16.msra.mxu1 %v7067_v59  ;;  %7602 = vmatprep.subr.bf16.mxu0 %v7060_v11 }
 0xb6b   :  { %7624 = vmatprep.subr.bf16.mxu1 %v7076_v14 }
 0xb6d   :  { %7603 = vmatpush3.bf16.msra.mxu0 %v7052_v62 }
 0xb6e   :  { %7625 = vmatpush3.bf16.msra.mxu1 %v7068_v38 }
 0xb70   :  { %7117 = vmatmul.mubr.bf16.vlgmr.msra.gmra.mrb[116].mxu0 %v7041_v18 }
 0xb71   :  { %7157 = vmatmul.mubr.bf16.vlgmr.msra.gmra.mrb[116].mxu1 %v7043_v49 }
 0xc43   :  { %v7604_v57 = vpop.f32.mrb[116].mxu0 }
 0xc44   :  { %v7626_v23 = vpop.f32.mrb[116].mxu1  ;;  %v7605_v0 = vpop.f32.mrb[117].mxu0 }
 0xc45   :  { %v7627_v24 = vpop.f32.mrb[117].mxu1  ;;  %v7606_v16 = vadd.f32 %v7605_v0, %v7604_v57  ;;  %v7607_v25 = vpop.f32.mrb[118].mxu0 }
 0xc46   :  { %v7628_v20 = vadd.f32 %v7627_v24, %v7626_v23  ;;  %v7629_v37 = vpop.f32.mrb[118].mxu1  ;;  %v7608_v51 = vpop.f32.mrb[119].mxu0 }
 0xc47   :  { %v7630_v33 = vpop.f32.mrb[119].mxu1  ;;  %v7119_v63 = vadd.f32 %v7606_v16, %v7584_v19 }
 0xc49   :  { %v7159_v60 = vadd.f32 %v7628_v20, %v7119_v63 }
 0xc4b   :  { %v7167_v29 = vsel %vm7164_vm10, %v7159_v60, -1e+30  ;;  %7186 = vst [vmem:[#allocation24] sm:$0xff] %v7159_v60 }
 0xc4c   :  { %7168 = vmax.xlane.f32.xlu0 %v7167_v29 }
 0xcd9   :  { %v7169_v7 = vpop.xlane.xlu0 %7168 }
 0xcda   :  { %v7170_v2 = vsub.f32 %v7167_v29, %v7169_v7 }
 0xcdc   :  { %v7171_v27 = vmul.f32 1.442695, %v7170_v2 }
 0xcde   :  { %8419 = vpow2.f32 %v7171_v27 }
 0xce8   :  { %v8420_v56 = vpop.eup %8419 }
 0xce9   :  { %7173 = vadd.xlane.f32.xlu0 %v8420_v56 }
 0xcea   :  { %8632 = shalt.err (!%p8629_p6)
}
 0xceb   :  { %s8633_s10 = scalar_lea.hbm %s10401_s14, 512 }
 0xcec   :  { %p8634_p7 = scmp.ne.s32.totalorder %s10401_s14, %s8633_s10  ;;  %p8637_p8 = scmp.lt.u32.totalorder %s8633_s10, %s10401_s14 }
 0xcee   :  { %p8639_p9 = pnand %p8637_p8, %p8634_p7 }
 0xcf0   :  { %8642 = shalt.err (!%p8639_p9)
}
 0xcf1   :  { %7206 = dma.vmem_to_hbm [thread:$0]  %s7204_s29, 512, %s10401_s14, [#allocation22]  }
 0xcf2   :  { %s8757_s19 = smov [#allocation23]  }
 0xcf3   :  { %s7213_s21 = sshll.u32 %s8757_s19, 4  ;;  %s7214_s21 = int_to_ptr.vmem [resolvable:$true] %s7213_s21 }
 0xcf4   :  { %s8643_s9 = scalar_lea.vmem %s7214_s21, 512  ;;  %p8648_p11 = scmp.lt.s32.totalorder %s7214_s21, %s7214_s21 }
 0xcf5   :  { %p8644_p10 = scmp.ne.s32.totalorder %s7214_s21, %s8643_s9  ;;  %p8649_p12 = scmp.lt.s32.totalorder %s8643_s9, %s8643_s9 }
 0xcf7   :  { %p8650_p13 = por %p8649_p12, %p8648_p11 }
 0xcf9   :  { %p8651_p0 = pnand %p8650_p13, %p8644_p10 }
 0xcfb   :  { %8654 = shalt.err (!%p8651_p0)
}
 0xcfc   :  { %s8655_s6 = scalar_lea.hbm %s10402_s15, 512 }
 0xcfd   :  { %p8656_p1 = scmp.ne.s32.totalorder %s10402_s15, %s8655_s6  ;;  %p8659_p2 = scmp.lt.u32.totalorder %s8655_s6, %s10402_s15 }
 0xcff   :  { %p8661_p3 = pnand %p8659_p2, %p8656_p1 }
 0xd01   :  { %8664 = shalt.err (!%p8661_p3)
}
 0xd02   :  { %7216 = dma.vmem_to_hbm [thread:$0]  %s7214_s21, 512, %s10402_s15, [#allocation22]  }
 0xd03   :  { %s8758_s5 = smov [#allocation24]  }
 0xd04   :  { %s7223_s24 = sshll.u32 %s8758_s5, 4  ;;  %s7224_s24 = int_to_ptr.vmem [resolvable:$true] %s7223_s24 }
 0xd05   :  { %s8665_s28 = scalar_lea.vmem %s7224_s24, 128  ;;  %p8670_p5 = scmp.lt.s32.totalorder %s7224_s24, %s7224_s24 }
 0xd06   :  { %p8666_p4 = scmp.ne.s32.totalorder %s7224_s24, %s8665_s28  ;;  %p8671_p6 = scmp.lt.s32.totalorder %s8665_s28, %s8665_s28 }
 0xd08   :  { %p8672_p7 = por %p8671_p6, %p8670_p5 }
 0xd0a   :  { %p8673_p8 = pnand %p8672_p7, %p8666_p4 }
 0xd0c   :  { %8676 = shalt.err (!%p8673_p8)
}
 0xd0d   :  { %s8677_s29 = scalar_lea.hbm %s10403_s16, 128 }
 0xd0e   :  { %p8678_p9 = scmp.ne.s32.totalorder %s10403_s16, %s8677_s29  ;;  %p8681_p10 = scmp.lt.u32.totalorder %s8677_s29, %s10403_s16 }
 0xd10   :  { %p8683_p11 = pnand %p8681_p10, %p8678_p9 }
 0xd12   :  { %8686 = shalt.err (!%p8683_p11)
}
 0xd13   :  { %7226 = dma.vmem_to_hbm [thread:$0]  %s7224_s24, 128, %s10403_s16, [#allocation25]  }
 0xd14   :  { %s8759_s18 = smov [#allocation20]  }
 0xd15   :  { %s7193_s22 = sshll.u32 %s8759_s18, 4  ;;  %s7194_s22 = int_to_ptr.vmem [resolvable:$true] %s7193_s22 }
 0xd16   :  { %s8687_s30 = scalar_lea.vmem %s7194_s22, 128  ;;  %p8692_p13 = scmp.lt.s32.totalorder %s7194_s22, %s7194_s22 }
 0xd17   :  { %p8688_p12 = scmp.ne.s32.totalorder %s7194_s22, %s8687_s30  ;;  %p8693_p0 = scmp.lt.s32.totalorder %s8687_s30, %s8687_s30 }
 0xd19   :  { %p8694_p1 = por %p8693_p0, %p8692_p13 }
 0xd1b   :  { %p8695_p2 = pnand %p8694_p1, %p8688_p12 }
 0xd76   :  { %v7174_v55 = vpop.xlane.xlu0 %7173 }
 0xd77   :  { %8421 = vrcp.f32 %v7174_v55 }
 0xd81   :  { %v8422_v13 = vpop.eup %8421 }
 0xd82   :  { %v7176_v5 = vmul.f32 %v8422_v13, %v8420_v56 }
 0xd84   :  { %7177 = vst [vmem:[#allocation20] sm:$0xff] %v7176_v5 }
 0xd85   :  { %8698 = shalt.err (!%p8695_p2)
}
 0xd86   :  { %s8699_s19 = scalar_lea.hbm %s10400_s13, 128 }
 0xd87   :  { %p8700_p3 = scmp.ne.s32.totalorder %s10400_s13, %s8699_s19  ;;  %p8703_p4 = scmp.lt.u32.totalorder %s8699_s19, %s10400_s13 }
 0xd89   :  { %p8705_p5 = pnand %p8703_p4, %p8700_p3 }
 0xd8b   :  { %8708 = shalt.err (!%p8705_p5)
}
 0xd8c   :  { %7196 = dma.vmem_to_hbm [thread:$0]  %s7194_s22, 128, %s10400_s13, [#allocation8]  }
 0xd8d   :  { %8725 = dma.done.wait [#allocation8], 128  }
 0xd8e   :  { %8726 = vsyncadd [#allocation8], 4294967168 }
 0xd8f   :  { %8727 = dma.done.wait [#allocation22], 1024  }
 0xd90   :  { %8728 = vsyncadd [#allocation22], 4294966272 }
 0xd91   :  { %8729 = dma.done.wait [#allocation25], 128  }
 0xd92   :  { %8730 = vsyncadd [#allocation25], 4294967168 }
 0xd93   :  { %7239 = vsyncpa [#allocation7], 1 }
 0xd94   :  { %7240 = vsyncpa [#allocation10], 1 }
 0xd95   :  { %7241 = vsyncpa [#allocation13], 1 }
 0xd96   :  { %7242 = vsyncpa [#allocation16], 1 }
 0xd97   :  { %7243 = vsyncpa [#allocation19], 1 }
 0xd98   :  { %7244 = vsyncpa [#allocation8], 1 }
 0xd99   :  { %7245 = vsyncpa [#allocation22], 1 }
 0xd9a   :  { %7246 = vsyncpa [#allocation25], 1 }
 0xd9b   :  { %7247 = vsyncmov [#allocation5] }
 0xd9e   :  { %s7248_s3 = vpop.sfrf %7247 }
 0xd9f   :  { %p7585_p6 = scmp.ne.s32.totalorder %s7248_s3, 0 }
 0xda1   :  { %7252 = shalt.err (%p7585_p6)  }
 0xda2   :  { %7254 = vsyncmov [#allocation5 + $0x1] }
 0xda5   :  { %s7255_s13 = vpop.sfrf %7254 }
 0xda6   :  { %p7586_p7 = scmp.ne.s32.totalorder %s7255_s13, 0 }
 0xda8   :  { %7259 = shalt.err (%p7586_p7)  }
 0xda9   :  { %7261 = vsyncmov [#allocation5 + $0x2] }
 0xdac   :  { %s7262_s1 = vpop.sfrf %7261 }
 0xdad   :  { %p7587_p8 = scmp.ne.s32.totalorder %s7262_s1, 0 }
 0xdaf   :  { %7266 = shalt.err (%p7587_p8)  }

</bundles_post_ra>
